<compile_context>
chip_gen: v6e
topology: v6e:2x2x1
jax: 0.10.0
libtpu: 0.0.40
codegen_flags: <defaults>
</compile_context>

<pallas_src>
import functools

import jax
import jax.numpy as jnp
import numpy as np
from jax.experimental import pallas as pl
from jax.experimental.pallas import tpu as pltpu

_LPAD = 8  # left halo width of the VMEM activation scratch (one f32 sublane tile)


def _fused_head_kernel(x_ref, w1_ref, b1_ref, w2_ref, b2_ref, w3_ref, b3_ref,
                       o_ref, a1_ref, a2_ref, *, H, W):
    """Fused conv3x3+relu -> conv3x3+relu -> conv3x3 for one NHWC image.

    x_ref  : (H+2, W+2, Cin)            spatially padded input image
    wK_ref : (9, CinK, CoutK)           3x3 taps flattened on the leading axis
    bK_ref : (1, CoutK)                 f32 bias
    o_ref  : (H*W, Cout)                flattened output (anchor-major channels)
    a1_ref, a2_ref : (H+2, W+_LPAD+1, F) f32 VMEM scratch with zero halo
    """

    def conv3x3(src_ref, col0, w_ref, b_ref, relu):
        cin = w_ref.shape[1]
        cout = w_ref.shape[2]
        acc = jnp.zeros((H * W, cout), jnp.float32)
        # 9 shifted slabs, each an MXU matmul accumulated in f32.
        for t in range(9):
            dy, dx = divmod(t, 3)
            slab = src_ref[dy:dy + H, col0 + dx:col0 + dx + W, :]
            xs = slab.reshape(H * W, cin).astype(w_ref.dtype)
            acc = acc + jnp.dot(xs, w_ref[t], preferred_element_type=jnp.float32)
        acc = acc + b_ref[0]
        if relu:
            acc = jnp.maximum(acc, 0.0)
        return acc

    # Zero the scratch every grid step: with a "parallel" batch axis each
    # TensorCore owns private, uninitialized scratch, so a program_id==0 guard
    # would be unsafe.  Interior is overwritten below; only the halo must be 0.
    a1_ref[...] = jnp.zeros_like(a1_ref)
    a2_ref[...] = jnp.zeros_like(a2_ref)

    feat = a1_ref.shape[-1]

    # Layer 1: input is padded symmetrically by 1 (wrapper), so col0 = 0.
    y1 = conv3x3(x_ref, 0, w1_ref, b1_ref, relu=True)               # (H*W, F)
    a1_ref[1:H + 1, _LPAD:_LPAD + W, :] = y1.reshape(H, W, feat)    # aligned store

    # Layer 2: scratch interior starts at column _LPAD, so taps start at _LPAD-1.
    y2 = conv3x3(a1_ref, _LPAD - 1, w2_ref, b2_ref, relu=True)      # (H*W, F)
    a2_ref[1:H + 1, _LPAD:_LPAD + W, :] = y2.reshape(H, W, feat)

    # Layer 3: no ReLU, no Sigmoid (matches the reference forward()).
    y3 = conv3x3(a2_ref, _LPAD - 1, w3_ref, b3_ref, relu=False)     # (H*W, Cout)
    o_ref[...] = y3.astype(o_ref.dtype)


def classification_model_forward(x_nhwc, params, num_anchor_points, num_classes,
                                 *, compute_dtype=jnp.float32):
    """conv3x3+relu -> conv3x3+relu -> conv3x3 -> (N, H*W*A, C), one pallas_call."""
    N, H, W, Cin = x_nhwc.shape
    F = params["w1"].shape[-1]
    Cout = num_anchor_points * num_classes
    assert params["w3"].shape[-1] == Cout

    # Single spatial pad of the (tiny) raw input; no per-layer HBM re-padding.
    x_pad = jnp.pad(x_nhwc, ((0, 0), (1, 1), (1, 1), (0, 0)))

    def prep_w(w):  # (3,3,Ci,Co) HWIO -> (9, Ci, Co); cast for the MXU operands
        return w.reshape(9, w.shape[2], w.shape[3]).astype(compute_dtype)

    def prep_b(b):
        return b.reshape(1, -1).astype(jnp.float32)

    kernel = functools.partial(_fused_head_kernel, H=H, W=W)

    def wspec(ci, co):
        return pl.BlockSpec((9, ci, co), lambda n: (0, 0, 0))

    def bspec(co):
        return pl.BlockSpec((1, co), lambda n: (0, 0))

    out = pl.pallas_call(
        kernel,
        out_shape=jax.ShapeDtypeStruct((N, H * W, Cout), x_nhwc.dtype),
        grid=(N,),
        in_specs=[
            pl.BlockSpec((pl.Squeezed(), H + 2, W + 2, Cin), lambda n: (n, 0, 0, 0)),
            wspec(Cin, F), bspec(F),
            wspec(F, F), bspec(F),
            wspec(F, Cout), bspec(Cout),
        ],
        out_specs=pl.BlockSpec((pl.Squeezed(), H * W, Cout), lambda n: (n, 0, 0)),
        scratch_shapes=[
            pltpu.VMEM((H + 2, W + _LPAD + 1, F), jnp.float32),
            pltpu.VMEM((H + 2, W + _LPAD + 1, F), jnp.float32),
        ],
        compiler_params=pltpu.CompilerParams(dimension_semantics=("parallel",)),
    )(x_pad,
      prep_w(params["w1"]), prep_b(params["b1"]),
      prep_w(params["w2"]), prep_b(params["b2"]),
      prep_w(params["w3"]), prep_b(params["b3"]))

    # (N, H*W, A*C) -> (N, H*W*A, C): pure view; matches PyTorch's
    # permute(0,2,3,1).view(batch, W, H, A, C).view(batch, -1, C) ordering.
    return out.reshape(N, H * W * num_anchor_points, num_classes)


def init_params(key, num_features_in, feature_size, num_anchor_points, num_classes):
    """Deterministic synthetic parameters (HWIO conv weights)."""
    ks = jax.random.split(key, 6)
    out_ch = num_anchor_points * num_classes

    def conv_w(k, cin, cout):
        fan_in = 3 * 3 * cin
        return (jax.random.normal(k, (3, 3, cin, cout), jnp.float32)
                / np.sqrt(fan_in)).astype(jnp.float32)

    return {
        "w1": conv_w(ks[0], num_features_in, feature_size),
        "b1": 0.01 * jax.random.normal(ks[1], (feature_size,), jnp.float32),
        "w2": conv_w(ks[2], feature_size, feature_size),
        "b2": 0.01 * jax.random.normal(ks[3], (feature_size,), jnp.float32),
        "w3": conv_w(ks[4], feature_size, out_ch),
        "b3": 0.01 * jax.random.normal(ks[5], (out_ch,), jnp.float32),
    }


def _reference_forward(x_nhwc, params, num_anchor_points, num_classes):
    """Pure-JAX reference (lax.conv) for correctness checking."""
    dn = ("NHWC", "HWIO", "NHWC")

    def conv(x, w, b):
        y = jax.lax.conv_general_dilated(x, w, (1, 1), "SAME", dimension_numbers=dn)
        return y + b

    out = jax.nn.relu(conv(x_nhwc, params["w1"], params["b1"]))
    out = jax.nn.relu(conv(out, params["w2"], params["b2"]))
    out = conv(out, params["w3"], params["b3"])
    N, H, W, _ = out.shape
    return out.reshape(N, H * W * num_anchor_points, num_classes)


if __name__ == "__main__":
    # Small shapes consistent with the module defaults (scaled down).
    N, Cin, H, W = 2, 4, 16, 16
    feature_size = 32
    num_anchor_points = 4
    num_classes = 8

    key = jax.random.PRNGKey(0)
    k_x, k_p = jax.random.split(key)

    # PyTorch input would be NCHW (2, 4, 16, 16); transpose to NHWC for the kernel.
    x_nchw = jax.random.normal(k_x, (N, Cin, H, W), jnp.float32)
    x_nhwc = jnp.transpose(x_nchw, (0, 2, 3, 1))

    params = init_params(k_p, Cin, feature_size, num_anchor_points, num_classes)

    # f32 path (default): exact check against the lax.conv reference.
    out = classification_model_forward(x_nhwc, params, num_anchor_points, num_classes)
    out = jax.block_until_ready(out)
    expected_shape = (N, H * W * num_anchor_points, num_classes)
    assert out.shape == expected_shape, (out.shape, expected_shape)

    ref = _reference_forward(x_nhwc, params, num_anchor_points, num_classes)
    np.testing.assert_allclose(np.asarray(out), np.asarray(ref), atol=1e-4, rtol=1e-4)

    # bf16 MXU-operand path (v6e/v7x fast path): loose check, f32 accumulation.
    out_bf16 = classification_model_forward(
        x_nhwc, params, num_anchor_points, num_classes, compute_dtype=jnp.bfloat16)
    out_bf16 = jax.block_until_ready(out_bf16)
    np.testing.assert_allclose(np.asarray(out_bf16), np.asarray(ref), atol=5e-2, rtol=5e-2)

    print("KERNEL_OK")
</pallas_src>

<mosaic_0001>
module attributes {stable_mosaic.version = 11 : i64} {
  func.func @_fused_head_kernel(%arg0: i32, %arg1: memref<1x18x18x4xf32, #tpu.memory_space<vmem>>, %arg2: memref<9x4x32xf32, #tpu.memory_space<vmem>>, %arg3: memref<1x32xf32, #tpu.memory_space<vmem>>, %arg4: memref<9x32x32xf32, #tpu.memory_space<vmem>>, %arg5: memref<1x32xf32, #tpu.memory_space<vmem>>, %arg6: memref<9x32x32xf32, #tpu.memory_space<vmem>>, %arg7: memref<1x32xf32, #tpu.memory_space<vmem>>, %arg8: memref<1x256x32xf32, #tpu.memory_space<vmem>>, %arg9: memref<18x25x32xf32, #tpu.memory_space<vmem>>, %arg10: memref<18x25x32xf32, #tpu.memory_space<vmem>>) attributes {dimension_semantics = [#tpu.dimension_semantics<parallel>], iteration_bounds = array<i64: 2>, scalar_prefetch = 0 : i64, scratch_operands = 2 : i64, tpu.core_type = #tpu.core_type<tc>, window_params = [{transform_indices = @transform_0, window_bounds = array<i64: 1, 18, 18, 4>}, {pipeline_mode = #tpu.pipeline_mode<synchronous>, transform_indices = @transform_1, window_bounds = array<i64: 9, 4, 32>}, {pipeline_mode = #tpu.pipeline_mode<synchronous>, transform_indices = @transform_2, window_bounds = array<i64: 1, 32>}, {pipeline_mode = #tpu.pipeline_mode<synchronous>, transform_indices = @transform_3, window_bounds = array<i64: 9, 32, 32>}, {pipeline_mode = #tpu.pipeline_mode<synchronous>, transform_indices = @transform_4, window_bounds = array<i64: 1, 32>}, {pipeline_mode = #tpu.pipeline_mode<synchronous>, transform_indices = @transform_5, window_bounds = array<i64: 9, 32, 32>}, {pipeline_mode = #tpu.pipeline_mode<synchronous>, transform_indices = @transform_6, window_bounds = array<i64: 1, 32>}, {transform_indices = @transform_7, window_bounds = array<i64: 1, 256, 32>}]} {
    %cst = arith.constant 0.000000e+00 : f32
    %0 = vector.broadcast %cst : f32 to vector<18x25x32xf32>
    %c0 = arith.constant 0 : index
    %c0_0 = arith.constant 0 : index
    %c0_1 = arith.constant 0 : index
    %1 = vector.load %arg9[%c0, %c0_0, %c0_1] : memref<18x25x32xf32, #tpu.memory_space<vmem>>, vector<18x25x32xf32>
    tpu.vector_store %arg9[%c0, %c0_0, %c0_1], %0 {strides = array<i32>} : memref<18x25x32xf32, #tpu.memory_space<vmem>>, vector<18x25x32xf32>,
    %cst_2 = arith.constant 0.000000e+00 : f32
    %2 = vector.broadcast %cst_2 : f32 to vector<18x25x32xf32>
    %c0_3 = arith.constant 0 : index
    %c0_4 = arith.constant 0 : index
    %c0_5 = arith.constant 0 : index
    %3 = vector.load %arg10[%c0_3, %c0_4, %c0_5] : memref<18x25x32xf32, #tpu.memory_space<vmem>>, vector<18x25x32xf32>
    tpu.vector_store %arg10[%c0_3, %c0_4, %c0_5], %2 {strides = array<i32>} : memref<18x25x32xf32, #tpu.memory_space<vmem>>, vector<18x25x32xf32>,
    %cst_6 = arith.constant 0.000000e+00 : f32
    %4 = vector.broadcast %cst_6 : f32 to vector<256x32xf32>
    %c0_7 = arith.constant 0 : index
    %c0_8 = arith.constant 0 : index
    %c0_9 = arith.constant 0 : index
    %c0_10 = arith.constant 0 : index
    %5 = vector.load %arg1[%c0_7, %c0_8, %c0_9, %c0_10] : memref<1x18x18x4xf32, #tpu.memory_space<vmem>>, vector<1x16x16x4xf32>
    %6 = vector.shape_cast %5 : vector<1x16x16x4xf32> to vector<16x16x4xf32>
    %7 = vector.shape_cast %6 : vector<16x16x4xf32> to vector<256x4xf32>
    %c0_11 = arith.constant 0 : index
    %c0_12 = arith.constant 0 : index
    %c0_13 = arith.constant 0 : index
    %8 = vector.load %arg2[%c0_11, %c0_12, %c0_13] : memref<9x4x32xf32, #tpu.memory_space<vmem>>, vector<1x4x32xf32>
    %9 = vector.shape_cast %8 : vector<1x4x32xf32> to vector<4x32xf32>
    %cst_14 = arith.constant dense<0.000000e+00> : vector<256x32xf32>
    %10 = tpu.matmul %7, %9, %cst_14 {dimension_numbers = #tpu.dot_dimension_numbers<[1], [0], [0], [1], [0, 0, 1, 1], [], []>} : vector<256x4xf32>, vector<4x32xf32>, vector<256x32xf32> -> vector<256x32xf32>
    %11 = arith.addf %4, %10 : vector<256x32xf32>
    %c0_15 = arith.constant 0 : index
    %c0_16 = arith.constant 0 : index
    %c1 = arith.constant 1 : index
    %c0_17 = arith.constant 0 : index
    %12 = vector.load %arg1[%c0_15, %c0_16, %c1, %c0_17] : memref<1x18x18x4xf32, #tpu.memory_space<vmem>>, vector<1x16x16x4xf32>
    %13 = vector.shape_cast %12 : vector<1x16x16x4xf32> to vector<16x16x4xf32>
    %14 = vector.shape_cast %13 : vector<16x16x4xf32> to vector<256x4xf32>
    %c1_18 = arith.constant 1 : index
    %c0_19 = arith.constant 0 : index
    %c0_20 = arith.constant 0 : index
    %15 = vector.load %arg2[%c1_18, %c0_19, %c0_20] : memref<9x4x32xf32, #tpu.memory_space<vmem>>, vector<1x4x32xf32>
    %16 = vector.shape_cast %15 : vector<1x4x32xf32> to vector<4x32xf32>
    %cst_21 = arith.constant dense<0.000000e+00> : vector<256x32xf32>
    %17 = tpu.matmul %14, %16, %cst_21 {dimension_numbers = #tpu.dot_dimension_numbers<[1], [0], [0], [1], [0, 0, 1, 1], [], []>} : vector<256x4xf32>, vector<4x32xf32>, vector<256x32xf32> -> vector<256x32xf32>
    %18 = arith.addf %11, %17 : vector<256x32xf32>
    %c0_22 = arith.constant 0 : index
    %c0_23 = arith.constant 0 : index
    %c2 = arith.constant 2 : index
    %c0_24 = arith.constant 0 : index
    %19 = vector.load %arg1[%c0_22, %c0_23, %c2, %c0_24] : memref<1x18x18x4xf32, #tpu.memory_space<vmem>>, vector<1x16x16x4xf32>
    %20 = vector.shape_cast %19 : vector<1x16x16x4xf32> to vector<16x16x4xf32>
    %21 = vector.shape_cast %20 : vector<16x16x4xf32> to vector<256x4xf32>
    %c2_25 = arith.constant 2 : index
    %c0_26 = arith.constant 0 : index
    %c0_27 = arith.constant 0 : index
    %22 = vector.load %arg2[%c2_25, %c0_26, %c0_27] : memref<9x4x32xf32, #tpu.memory_space<vmem>>, vector<1x4x32xf32>
    %23 = vector.shape_cast %22 : vector<1x4x32xf32> to vector<4x32xf32>
    %cst_28 = arith.constant dense<0.000000e+00> : vector<256x32xf32>
    %24 = tpu.matmul %21, %23, %cst_28 {dimension_numbers = #tpu.dot_dimension_numbers<[1], [0], [0], [1], [0, 0, 1, 1], [], []>} : vector<256x4xf32>, vector<4x32xf32>, vector<256x32xf32> -> vector<256x32xf32>
    %25 = arith.addf %18, %24 : vector<256x32xf32>
    %c0_29 = arith.constant 0 : index
    %c1_30 = arith.constant 1 : index
    %c0_31 = arith.constant 0 : index
    %c0_32 = arith.constant 0 : index
    %26 = vector.load %arg1[%c0_29, %c1_30, %c0_31, %c0_32] : memref<1x18x18x4xf32, #tpu.memory_space<vmem>>, vector<1x16x16x4xf32>
    %27 = vector.shape_cast %26 : vector<1x16x16x4xf32> to vector<16x16x4xf32>
    %28 = vector.shape_cast %27 : vector<16x16x4xf32> to vector<256x4xf32>
    %c3 = arith.constant 3 : index
    %c0_33 = arith.constant 0 : index
    %c0_34 = arith.constant 0 : index
    %29 = vector.load %arg2[%c3, %c0_33, %c0_34] : memref<9x4x32xf32, #tpu.memory_space<vmem>>, vector<1x4x32xf32>
    %30 = vector.shape_cast %29 : vector<1x4x32xf32> to vector<4x32xf32>
    %cst_35 = arith.constant dense<0.000000e+00> : vector<256x32xf32>
    %31 = tpu.matmul %28, %30, %cst_35 {dimension_numbers = #tpu.dot_dimension_numbers<[1], [0], [0], [1], [0, 0, 1, 1], [], []>} : vector<256x4xf32>, vector<4x32xf32>, vector<256x32xf32> -> vector<256x32xf32>
    %32 = arith.addf %25, %31 : vector<256x32xf32>
    %c0_36 = arith.constant 0 : index
    %c1_37 = arith.constant 1 : index
    %c1_38 = arith.constant 1 : index
    %c0_39 = arith.constant 0 : index
    %33 = vector.load %arg1[%c0_36, %c1_37, %c1_38, %c0_39] : memref<1x18x18x4xf32, #tpu.memory_space<vmem>>, vector<1x16x16x4xf32>
    %34 = vector.shape_cast %33 : vector<1x16x16x4xf32> to vector<16x16x4xf32>
    %35 = vector.shape_cast %34 : vector<16x16x4xf32> to vector<256x4xf32>
    %c4 = arith.constant 4 : index
    %c0_40 = arith.constant 0 : index
    %c0_41 = arith.constant 0 : index
    %36 = vector.load %arg2[%c4, %c0_40, %c0_41] : memref<9x4x32xf32, #tpu.memory_space<vmem>>, vector<1x4x32xf32>
    %37 = vector.shape_cast %36 : vector<1x4x32xf32> to vector<4x32xf32>
    %cst_42 = arith.constant dense<0.000000e+00> : vector<256x32xf32>
    %38 = tpu.matmul %35, %37, %cst_42 {dimension_numbers = #tpu.dot_dimension_numbers<[1], [0], [0], [1], [0, 0, 1, 1], [], []>} : vector<256x4xf32>, vector<4x32xf32>, vector<256x32xf32> -> vector<256x32xf32>
    %39 = arith.addf %32, %38 : vector<256x32xf32>
    %c0_43 = arith.constant 0 : index
    %c1_44 = arith.constant 1 : index
    %c2_45 = arith.constant 2 : index
    %c0_46 = arith.constant 0 : index
    %40 = vector.load %arg1[%c0_43, %c1_44, %c2_45, %c0_46] : memref<1x18x18x4xf32, #tpu.memory_space<vmem>>, vector<1x16x16x4xf32>
    %41 = vector.shape_cast %40 : vector<1x16x16x4xf32> to vector<16x16x4xf32>
    %42 = vector.shape_cast %41 : vector<16x16x4xf32> to vector<256x4xf32>
    %c5 = arith.constant 5 : index
    %c0_47 = arith.constant 0 : index
    %c0_48 = arith.constant 0 : index
    %43 = vector.load %arg2[%c5, %c0_47, %c0_48] : memref<9x4x32xf32, #tpu.memory_space<vmem>>, vector<1x4x32xf32>
    %44 = vector.shape_cast %43 : vector<1x4x32xf32> to vector<4x32xf32>
    %cst_49 = arith.constant dense<0.000000e+00> : vector<256x32xf32>
    %45 = tpu.matmul %42, %44, %cst_49 {dimension_numbers = #tpu.dot_dimension_numbers<[1], [0], [0], [1], [0, 0, 1, 1], [], []>} : vector<256x4xf32>, vector<4x32xf32>, vector<256x32xf32> -> vector<256x32xf32>
    %46 = arith.addf %39, %45 : vector<256x32xf32>
    %c0_50 = arith.constant 0 : index
    %c2_51 = arith.constant 2 : index
    %c0_52 = arith.constant 0 : index
    %c0_53 = arith.constant 0 : index
    %47 = vector.load %arg1[%c0_50, %c2_51, %c0_52, %c0_53] : memref<1x18x18x4xf32, #tpu.memory_space<vmem>>, vector<1x16x16x4xf32>
    %48 = vector.shape_cast %47 : vector<1x16x16x4xf32> to vector<16x16x4xf32>
    %49 = vector.shape_cast %48 : vector<16x16x4xf32> to vector<256x4xf32>
    %c6 = arith.constant 6 : index
    %c0_54 = arith.constant 0 : index
    %c0_55 = arith.constant 0 : index
    %50 = vector.load %arg2[%c6, %c0_54, %c0_55] : memref<9x4x32xf32, #tpu.memory_space<vmem>>, vector<1x4x32xf32>
    %51 = vector.shape_cast %50 : vector<1x4x32xf32> to vector<4x32xf32>
    %cst_56 = arith.constant dense<0.000000e+00> : vector<256x32xf32>
    %52 = tpu.matmul %49, %51, %cst_56 {dimension_numbers = #tpu.dot_dimension_numbers<[1], [0], [0], [1], [0, 0, 1, 1], [], []>} : vector<256x4xf32>, vector<4x32xf32>, vector<256x32xf32> -> vector<256x32xf32>
    %53 = arith.addf %46, %52 : vector<256x32xf32>
    %c0_57 = arith.constant 0 : index
    %c2_58 = arith.constant 2 : index
    %c1_59 = arith.constant 1 : index
    %c0_60 = arith.constant 0 : index
    %54 = vector.load %arg1[%c0_57, %c2_58, %c1_59, %c0_60] : memref<1x18x18x4xf32, #tpu.memory_space<vmem>>, vector<1x16x16x4xf32>
    %55 = vector.shape_cast %54 : vector<1x16x16x4xf32> to vector<16x16x4xf32>
    %56 = vector.shape_cast %55 : vector<16x16x4xf32> to vector<256x4xf32>
    %c7 = arith.constant 7 : index
    %c0_61 = arith.constant 0 : index
    %c0_62 = arith.constant 0 : index
    %57 = vector.load %arg2[%c7, %c0_61, %c0_62] : memref<9x4x32xf32, #tpu.memory_space<vmem>>, vector<1x4x32xf32>
    %58 = vector.shape_cast %57 : vector<1x4x32xf32> to vector<4x32xf32>
    %cst_63 = arith.constant dense<0.000000e+00> : vector<256x32xf32>
    %59 = tpu.matmul %56, %58, %cst_63 {dimension_numbers = #tpu.dot_dimension_numbers<[1], [0], [0], [1], [0, 0, 1, 1], [], []>} : vector<256x4xf32>, vector<4x32xf32>, vector<256x32xf32> -> vector<256x32xf32>
    %60 = arith.addf %53, %59 : vector<256x32xf32>
    %c0_64 = arith.constant 0 : index
    %c2_65 = arith.constant 2 : index
    %c2_66 = arith.constant 2 : index
    %c0_67 = arith.constant 0 : index
    %61 = vector.load %arg1[%c0_64, %c2_65, %c2_66, %c0_67] : memref<1x18x18x4xf32, #tpu.memory_space<vmem>>, vector<1x16x16x4xf32>
    %62 = vector.shape_cast %61 : vector<1x16x16x4xf32> to vector<16x16x4xf32>
    %63 = vector.shape_cast %62 : vector<16x16x4xf32> to vector<256x4xf32>
    %c8 = arith.constant 8 : index
    %c0_68 = arith.constant 0 : index
    %c0_69 = arith.constant 0 : index
    %64 = vector.load %arg2[%c8, %c0_68, %c0_69] : memref<9x4x32xf32, #tpu.memory_space<vmem>>, vector<1x4x32xf32>
    %65 = vector.shape_cast %64 : vector<1x4x32xf32> to vector<4x32xf32>
    %cst_70 = arith.constant dense<0.000000e+00> : vector<256x32xf32>
    %66 = tpu.matmul %63, %65, %cst_70 {dimension_numbers = #tpu.dot_dimension_numbers<[1], [0], [0], [1], [0, 0, 1, 1], [], []>} : vector<256x4xf32>, vector<4x32xf32>, vector<256x32xf32> -> vector<256x32xf32>
    %67 = arith.addf %60, %66 : vector<256x32xf32>
    %c0_71 = arith.constant 0 : index
    %c0_72 = arith.constant 0 : index
    %68 = vector.load %arg3[%c0_71, %c0_72] : memref<1x32xf32, #tpu.memory_space<vmem>>, vector<1x32xf32>
    %69 = vector.shape_cast %68 : vector<1x32xf32> to vector<32xf32>
    %70 = vector.shape_cast %69 : vector<32xf32> to vector<1x32xf32>
    %71 = vector.broadcast %70 : vector<1x32xf32> to vector<256x32xf32>
    %72 = arith.addf %67, %71 : vector<256x32xf32>
    %cst_73 = arith.constant 0.000000e+00 : f32
    %73 = vector.broadcast %cst_73 : f32 to vector<256x32xf32>
    %74 = arith.maximumf %72, %73 : vector<256x32xf32>
    %75 = vector.shape_cast %74 : vector<256x32xf32> to vector<16x16x32xf32>
    %c1_74 = arith.constant 1 : index
    %c8_75 = arith.constant 8 : index
    %c0_76 = arith.constant 0 : index
    %76 = vector.load %arg9[%c1_74, %c8_75, %c0_76] : memref<18x25x32xf32, #tpu.memory_space<vmem>>, vector<16x16x32xf32>
    tpu.vector_store %arg9[%c1_74, %c8_75, %c0_76], %75 {strides = array<i32>} : memref<18x25x32xf32, #tpu.memory_space<vmem>>, vector<16x16x32xf32>,
    %cst_77 = arith.constant 0.000000e+00 : f32
    %77 = vector.broadcast %cst_77 : f32 to vector<256x32xf32>
    %c0_78 = arith.constant 0 : index
    %c7_79 = arith.constant 7 : index
    %c0_80 = arith.constant 0 : index
    %78 = vector.load %arg9[%c0_78, %c7_79, %c0_80] : memref<18x25x32xf32, #tpu.memory_space<vmem>>, vector<16x16x32xf32>
    %79 = vector.shape_cast %78 : vector<16x16x32xf32> to vector<256x32xf32>
    %c0_81 = arith.constant 0 : index
    %c0_82 = arith.constant 0 : index
    %c0_83 = arith.constant 0 : index
    %80 = vector.load %arg4[%c0_81, %c0_82, %c0_83] : memref<9x32x32xf32, #tpu.memory_space<vmem>>, vector<1x32x32xf32>
    %81 = vector.shape_cast %80 : vector<1x32x32xf32> to vector<32x32xf32>
    %cst_84 = arith.constant dense<0.000000e+00> : vector<256x32xf32>
    %82 = tpu.matmul %79, %81, %cst_84 {dimension_numbers = #tpu.dot_dimension_numbers<[1], [0], [0], [1], [0, 0, 1, 1], [], []>} : vector<256x32xf32>, vector<32x32xf32>, vector<256x32xf32> -> vector<256x32xf32>
    %83 = arith.addf %77, %82 : vector<256x32xf32>
    %c0_85 = arith.constant 0 : index
    %c8_86 = arith.constant 8 : index
    %c0_87 = arith.constant 0 : index
    %84 = vector.load %arg9[%c0_85, %c8_86, %c0_87] : memref<18x25x32xf32, #tpu.memory_space<vmem>>, vector<16x16x32xf32>
    %85 = vector.shape_cast %84 : vector<16x16x32xf32> to vector<256x32xf32>
    %c1_88 = arith.constant 1 : index
    %c0_89 = arith.constant 0 : index
    %c0_90 = arith.constant 0 : index
    %86 = vector.load %arg4[%c1_88, %c0_89, %c0_90] : memref<9x32x32xf32, #tpu.memory_space<vmem>>, vector<1x32x32xf32>
    %87 = vector.shape_cast %86 : vector<1x32x32xf32> to vector<32x32xf32>
    %cst_91 = arith.constant dense<0.000000e+00> : vector<256x32xf32>
    %88 = tpu.matmul %85, %87, %cst_91 {dimension_numbers = #tpu.dot_dimension_numbers<[1], [0], [0], [1], [0, 0, 1, 1], [], []>} : vector<256x32xf32>, vector<32x32xf32>, vector<256x32xf32> -> vector<256x32xf32>
    %89 = arith.addf %83, %88 : vector<256x32xf32>
    %c0_92 = arith.constant 0 : index
    %c9 = arith.constant 9 : index
    %c0_93 = arith.constant 0 : index
    %90 = vector.load %arg9[%c0_92, %c9, %c0_93] : memref<18x25x32xf32, #tpu.memory_space<vmem>>, vector<16x16x32xf32>
    %91 = vector.shape_cast %90 : vector<16x16x32xf32> to vector<256x32xf32>
    %c2_94 = arith.constant 2 : index
    %c0_95 = arith.constant 0 : index
    %c0_96 = arith.constant 0 : index
    %92 = vector.load %arg4[%c2_94, %c0_95, %c0_96] : memref<9x32x32xf32, #tpu.memory_space<vmem>>, vector<1x32x32xf32>
    %93 = vector.shape_cast %92 : vector<1x32x32xf32> to vector<32x32xf32>
    %cst_97 = arith.constant dense<0.000000e+00> : vector<256x32xf32>
    %94 = tpu.matmul %91, %93, %cst_97 {dimension_numbers = #tpu.dot_dimension_numbers<[1], [0], [0], [1], [0, 0, 1, 1], [], []>} : vector<256x32xf32>, vector<32x32xf32>, vector<256x32xf32> -> vector<256x32xf32>
    %95 = arith.addf %89, %94 : vector<256x32xf32>
    %c1_98 = arith.constant 1 : index
    %c7_99 = arith.constant 7 : index
    %c0_100 = arith.constant 0 : index
    %96 = vector.load %arg9[%c1_98, %c7_99, %c0_100] : memref<18x25x32xf32, #tpu.memory_space<vmem>>, vector<16x16x32xf32>
    %97 = vector.shape_cast %96 : vector<16x16x32xf32> to vector<256x32xf32>
    %c3_101 = arith.constant 3 : index
    %c0_102 = arith.constant 0 : index
    %c0_103 = arith.constant 0 : index
    %98 = vector.load %arg4[%c3_101, %c0_102, %c0_103] : memref<9x32x32xf32, #tpu.memory_space<vmem>>, vector<1x32x32xf32>
    %99 = vector.shape_cast %98 : vector<1x32x32xf32> to vector<32x32xf32>
    %cst_104 = arith.constant dense<0.000000e+00> : vector<256x32xf32>
    %100 = tpu.matmul %97, %99, %cst_104 {dimension_numbers = #tpu.dot_dimension_numbers<[1], [0], [0], [1], [0, 0, 1, 1], [], []>} : vector<256x32xf32>, vector<32x32xf32>, vector<256x32xf32> -> vector<256x32xf32>
    %101 = arith.addf %95, %100 : vector<256x32xf32>
    %c1_105 = arith.constant 1 : index
    %c8_106 = arith.constant 8 : index
    %c0_107 = arith.constant 0 : index
    %102 = vector.load %arg9[%c1_105, %c8_106, %c0_107] : memref<18x25x32xf32, #tpu.memory_space<vmem>>, vector<16x16x32xf32>
    %103 = vector.shape_cast %102 : vector<16x16x32xf32> to vector<256x32xf32>
    %c4_108 = arith.constant 4 : index
    %c0_109 = arith.constant 0 : index
    %c0_110 = arith.constant 0 : index
    %104 = vector.load %arg4[%c4_108, %c0_109, %c0_110] : memref<9x32x32xf32, #tpu.memory_space<vmem>>, vector<1x32x32xf32>
    %105 = vector.shape_cast %104 : vector<1x32x32xf32> to vector<32x32xf32>
    %cst_111 = arith.constant dense<0.000000e+00> : vector<256x32xf32>
    %106 = tpu.matmul %103, %105, %cst_111 {dimension_numbers = #tpu.dot_dimension_numbers<[1], [0], [0], [1], [0, 0, 1, 1], [], []>} : vector<256x32xf32>, vector<32x32xf32>, vector<256x32xf32> -> vector<256x32xf32>
    %107 = arith.addf %101, %106 : vector<256x32xf32>
    %c1_112 = arith.constant 1 : index
    %c9_113 = arith.constant 9 : index
    %c0_114 = arith.constant 0 : index
    %108 = vector.load %arg9[%c1_112, %c9_113, %c0_114] : memref<18x25x32xf32, #tpu.memory_space<vmem>>, vector<16x16x32xf32>
    %109 = vector.shape_cast %108 : vector<16x16x32xf32> to vector<256x32xf32>
    %c5_115 = arith.constant 5 : index
    %c0_116 = arith.constant 0 : index
    %c0_117 = arith.constant 0 : index
    %110 = vector.load %arg4[%c5_115, %c0_116, %c0_117] : memref<9x32x32xf32, #tpu.memory_space<vmem>>, vector<1x32x32xf32>
    %111 = vector.shape_cast %110 : vector<1x32x32xf32> to vector<32x32xf32>
    %cst_118 = arith.constant dense<0.000000e+00> : vector<256x32xf32>
    %112 = tpu.matmul %109, %111, %cst_118 {dimension_numbers = #tpu.dot_dimension_numbers<[1], [0], [0], [1], [0, 0, 1, 1], [], []>} : vector<256x32xf32>, vector<32x32xf32>, vector<256x32xf32> -> vector<256x32xf32>
    %113 = arith.addf %107, %112 : vector<256x32xf32>
    %c2_119 = arith.constant 2 : index
    %c7_120 = arith.constant 7 : index
    %c0_121 = arith.constant 0 : index
    %114 = vector.load %arg9[%c2_119, %c7_120, %c0_121] : memref<18x25x32xf32, #tpu.memory_space<vmem>>, vector<16x16x32xf32>
    %115 = vector.shape_cast %114 : vector<16x16x32xf32> to vector<256x32xf32>
    %c6_122 = arith.constant 6 : index
    %c0_123 = arith.constant 0 : index
    %c0_124 = arith.constant 0 : index
    %116 = vector.load %arg4[%c6_122, %c0_123, %c0_124] : memref<9x32x32xf32, #tpu.memory_space<vmem>>, vector<1x32x32xf32>
    %117 = vector.shape_cast %116 : vector<1x32x32xf32> to vector<32x32xf32>
    %cst_125 = arith.constant dense<0.000000e+00> : vector<256x32xf32>
    %118 = tpu.matmul %115, %117, %cst_125 {dimension_numbers = #tpu.dot_dimension_numbers<[1], [0], [0], [1], [0, 0, 1, 1], [], []>} : vector<256x32xf32>, vector<32x32xf32>, vector<256x32xf32> -> vector<256x32xf32>
    %119 = arith.addf %113, %118 : vector<256x32xf32>
    %c2_126 = arith.constant 2 : index
    %c8_127 = arith.constant 8 : index
    %c0_128 = arith.constant 0 : index
    %120 = vector.load %arg9[%c2_126, %c8_127, %c0_128] : memref<18x25x32xf32, #tpu.memory_space<vmem>>, vector<16x16x32xf32>
    %121 = vector.shape_cast %120 : vector<16x16x32xf32> to vector<256x32xf32>
    %c7_129 = arith.constant 7 : index
    %c0_130 = arith.constant 0 : index
    %c0_131 = arith.constant 0 : index
    %122 = vector.load %arg4[%c7_129, %c0_130, %c0_131] : memref<9x32x32xf32, #tpu.memory_space<vmem>>, vector<1x32x32xf32>
    %123 = vector.shape_cast %122 : vector<1x32x32xf32> to vector<32x32xf32>
    %cst_132 = arith.constant dense<0.000000e+00> : vector<256x32xf32>
    %124 = tpu.matmul %121, %123, %cst_132 {dimension_numbers = #tpu.dot_dimension_numbers<[1], [0], [0], [1], [0, 0, 1, 1], [], []>} : vector<256x32xf32>, vector<32x32xf32>, vector<256x32xf32> -> vector<256x32xf32>
    %125 = arith.addf %119, %124 : vector<256x32xf32>
    %c2_133 = arith.constant 2 : index
    %c9_134 = arith.constant 9 : index
    %c0_135 = arith.constant 0 : index
    %126 = vector.load %arg9[%c2_133, %c9_134, %c0_135] : memref<18x25x32xf32, #tpu.memory_space<vmem>>, vector<16x16x32xf32>
    %127 = vector.shape_cast %126 : vector<16x16x32xf32> to vector<256x32xf32>
    %c8_136 = arith.constant 8 : index
    %c0_137 = arith.constant 0 : index
    %c0_138 = arith.constant 0 : index
    %128 = vector.load %arg4[%c8_136, %c0_137, %c0_138] : memref<9x32x32xf32, #tpu.memory_space<vmem>>, vector<1x32x32xf32>
    %129 = vector.shape_cast %128 : vector<1x32x32xf32> to vector<32x32xf32>
    %cst_139 = arith.constant dense<0.000000e+00> : vector<256x32xf32>
    %130 = tpu.matmul %127, %129, %cst_139 {dimension_numbers = #tpu.dot_dimension_numbers<[1], [0], [0], [1], [0, 0, 1, 1], [], []>} : vector<256x32xf32>, vector<32x32xf32>, vector<256x32xf32> -> vector<256x32xf32>
    %131 = arith.addf %125, %130 : vector<256x32xf32>
    %c0_140 = arith.constant 0 : index
    %c0_141 = arith.constant 0 : index
    %132 = vector.load %arg5[%c0_140, %c0_141] : memref<1x32xf32, #tpu.memory_space<vmem>>, vector<1x32xf32>
    %133 = vector.shape_cast %132 : vector<1x32xf32> to vector<32xf32>
    %134 = vector.shape_cast %133 : vector<32xf32> to vector<1x32xf32>
    %135 = vector.broadcast %134 : vector<1x32xf32> to vector<256x32xf32>
    %136 = arith.addf %131, %135 : vector<256x32xf32>
    %cst_142 = arith.constant 0.000000e+00 : f32
    %137 = vector.broadcast %cst_142 : f32 to vector<256x32xf32>
    %138 = arith.maximumf %136, %137 : vector<256x32xf32>
    %139 = vector.shape_cast %138 : vector<256x32xf32> to vector<16x16x32xf32>
    %c1_143 = arith.constant 1 : index
    %c8_144 = arith.constant 8 : index
    %c0_145 = arith.constant 0 : index
    %140 = vector.load %arg10[%c1_143, %c8_144, %c0_145] : memref<18x25x32xf32, #tpu.memory_space<vmem>>, vector<16x16x32xf32>
    tpu.vector_store %arg10[%c1_143, %c8_144, %c0_145], %139 {strides = array<i32>} : memref<18x25x32xf32, #tpu.memory_space<vmem>>, vector<16x16x32xf32>,
    %cst_146 = arith.constant 0.000000e+00 : f32
    %141 = vector.broadcast %cst_146 : f32 to vector<256x32xf32>
    %c0_147 = arith.constant 0 : index
    %c7_148 = arith.constant 7 : index
    %c0_149 = arith.constant 0 : index
    %142 = vector.load %arg10[%c0_147, %c7_148, %c0_149] : memref<18x25x32xf32, #tpu.memory_space<vmem>>, vector<16x16x32xf32>
    %143 = vector.shape_cast %142 : vector<16x16x32xf32> to vector<256x32xf32>
    %c0_150 = arith.constant 0 : index
    %c0_151 = arith.constant 0 : index
    %c0_152 = arith.constant 0 : index
    %144 = vector.load %arg6[%c0_150, %c0_151, %c0_152] : memref<9x32x32xf32, #tpu.memory_space<vmem>>, vector<1x32x32xf32>
    %145 = vector.shape_cast %144 : vector<1x32x32xf32> to vector<32x32xf32>
    %cst_153 = arith.constant dense<0.000000e+00> : vector<256x32xf32>
    %146 = tpu.matmul %143, %145, %cst_153 {dimension_numbers = #tpu.dot_dimension_numbers<[1], [0], [0], [1], [0, 0, 1, 1], [], []>} : vector<256x32xf32>, vector<32x32xf32>, vector<256x32xf32> -> vector<256x32xf32>
    %147 = arith.addf %141, %146 : vector<256x32xf32>
    %c0_154 = arith.constant 0 : index
    %c8_155 = arith.constant 8 : index
    %c0_156 = arith.constant 0 : index
    %148 = vector.load %arg10[%c0_154, %c8_155, %c0_156] : memref<18x25x32xf32, #tpu.memory_space<vmem>>, vector<16x16x32xf32>
    %149 = vector.shape_cast %148 : vector<16x16x32xf32> to vector<256x32xf32>
    %c1_157 = arith.constant 1 : index
    %c0_158 = arith.constant 0 : index
    %c0_159 = arith.constant 0 : index
    %150 = vector.load %arg6[%c1_157, %c0_158, %c0_159] : memref<9x32x32xf32, #tpu.memory_space<vmem>>, vector<1x32x32xf32>
    %151 = vector.shape_cast %150 : vector<1x32x32xf32> to vector<32x32xf32>
    %cst_160 = arith.constant dense<0.000000e+00> : vector<256x32xf32>
    %152 = tpu.matmul %149, %151, %cst_160 {dimension_numbers = #tpu.dot_dimension_numbers<[1], [0], [0], [1], [0, 0, 1, 1], [], []>} : vector<256x32xf32>, vector<32x32xf32>, vector<256x32xf32> -> vector<256x32xf32>
    %153 = arith.addf %147, %152 : vector<256x32xf32>
    %c0_161 = arith.constant 0 : index
    %c9_162 = arith.constant 9 : index
    %c0_163 = arith.constant 0 : index
    %154 = vector.load %arg10[%c0_161, %c9_162, %c0_163] : memref<18x25x32xf32, #tpu.memory_space<vmem>>, vector<16x16x32xf32>
    %155 = vector.shape_cast %154 : vector<16x16x32xf32> to vector<256x32xf32>
    %c2_164 = arith.constant 2 : index
    %c0_165 = arith.constant 0 : index
    %c0_166 = arith.constant 0 : index
    %156 = vector.load %arg6[%c2_164, %c0_165, %c0_166] : memref<9x32x32xf32, #tpu.memory_space<vmem>>, vector<1x32x32xf32>
    %157 = vector.shape_cast %156 : vector<1x32x32xf32> to vector<32x32xf32>
    %cst_167 = arith.constant dense<0.000000e+00> : vector<256x32xf32>
    %158 = tpu.matmul %155, %157, %cst_167 {dimension_numbers = #tpu.dot_dimension_numbers<[1], [0], [0], [1], [0, 0, 1, 1], [], []>} : vector<256x32xf32>, vector<32x32xf32>, vector<256x32xf32> -> vector<256x32xf32>
    %159 = arith.addf %153, %158 : vector<256x32xf32>
    %c1_168 = arith.constant 1 : index
    %c7_169 = arith.constant 7 : index
    %c0_170 = arith.constant 0 : index
    %160 = vector.load %arg10[%c1_168, %c7_169, %c0_170] : memref<18x25x32xf32, #tpu.memory_space<vmem>>, vector<16x16x32xf32>
    %161 = vector.shape_cast %160 : vector<16x16x32xf32> to vector<256x32xf32>
    %c3_171 = arith.constant 3 : index
    %c0_172 = arith.constant 0 : index
    %c0_173 = arith.constant 0 : index
    %162 = vector.load %arg6[%c3_171, %c0_172, %c0_173] : memref<9x32x32xf32, #tpu.memory_space<vmem>>, vector<1x32x32xf32>
    %163 = vector.shape_cast %162 : vector<1x32x32xf32> to vector<32x32xf32>
    %cst_174 = arith.constant dense<0.000000e+00> : vector<256x32xf32>
    %164 = tpu.matmul %161, %163, %cst_174 {dimension_numbers = #tpu.dot_dimension_numbers<[1], [0], [0], [1], [0, 0, 1, 1], [], []>} : vector<256x32xf32>, vector<32x32xf32>, vector<256x32xf32> -> vector<256x32xf32>
    %165 = arith.addf %159, %164 : vector<256x32xf32>
    %c1_175 = arith.constant 1 : index
    %c8_176 = arith.constant 8 : index
    %c0_177 = arith.constant 0 : index
    %166 = vector.load %arg10[%c1_175, %c8_176, %c0_177] : memref<18x25x32xf32, #tpu.memory_space<vmem>>, vector<16x16x32xf32>
    %167 = vector.shape_cast %166 : vector<16x16x32xf32> to vector<256x32xf32>
    %c4_178 = arith.constant 4 : index
    %c0_179 = arith.constant 0 : index
    %c0_180 = arith.constant 0 : index
    %168 = vector.load %arg6[%c4_178, %c0_179, %c0_180] : memref<9x32x32xf32, #tpu.memory_space<vmem>>, vector<1x32x32xf32>
    %169 = vector.shape_cast %168 : vector<1x32x32xf32> to vector<32x32xf32>
    %cst_181 = arith.constant dense<0.000000e+00> : vector<256x32xf32>
    %170 = tpu.matmul %167, %169, %cst_181 {dimension_numbers = #tpu.dot_dimension_numbers<[1], [0], [0], [1], [0, 0, 1, 1], [], []>} : vector<256x32xf32>, vector<32x32xf32>, vector<256x32xf32> -> vector<256x32xf32>
    %171 = arith.addf %165, %170 : vector<256x32xf32>
    %c1_182 = arith.constant 1 : index
    %c9_183 = arith.constant 9 : index
    %c0_184 = arith.constant 0 : index
    %172 = vector.load %arg10[%c1_182, %c9_183, %c0_184] : memref<18x25x32xf32, #tpu.memory_space<vmem>>, vector<16x16x32xf32>
    %173 = vector.shape_cast %172 : vector<16x16x32xf32> to vector<256x32xf32>
    %c5_185 = arith.constant 5 : index
    %c0_186 = arith.constant 0 : index
    %c0_187 = arith.constant 0 : index
    %174 = vector.load %arg6[%c5_185, %c0_186, %c0_187] : memref<9x32x32xf32, #tpu.memory_space<vmem>>, vector<1x32x32xf32>
    %175 = vector.shape_cast %174 : vector<1x32x32xf32> to vector<32x32xf32>
    %cst_188 = arith.constant dense<0.000000e+00> : vector<256x32xf32>
    %176 = tpu.matmul %173, %175, %cst_188 {dimension_numbers = #tpu.dot_dimension_numbers<[1], [0], [0], [1], [0, 0, 1, 1], [], []>} : vector<256x32xf32>, vector<32x32xf32>, vector<256x32xf32> -> vector<256x32xf32>
    %177 = arith.addf %171, %176 : vector<256x32xf32>
    %c2_189 = arith.constant 2 : index
    %c7_190 = arith.constant 7 : index
    %c0_191 = arith.constant 0 : index
    %178 = vector.load %arg10[%c2_189, %c7_190, %c0_191] : memref<18x25x32xf32, #tpu.memory_space<vmem>>, vector<16x16x32xf32>
    %179 = vector.shape_cast %178 : vector<16x16x32xf32> to vector<256x32xf32>
    %c6_192 = arith.constant 6 : index
    %c0_193 = arith.constant 0 : index
    %c0_194 = arith.constant 0 : index
    %180 = vector.load %arg6[%c6_192, %c0_193, %c0_194] : memref<9x32x32xf32, #tpu.memory_space<vmem>>, vector<1x32x32xf32>
    %181 = vector.shape_cast %180 : vector<1x32x32xf32> to vector<32x32xf32>
    %cst_195 = arith.constant dense<0.000000e+00> : vector<256x32xf32>
    %182 = tpu.matmul %179, %181, %cst_195 {dimension_numbers = #tpu.dot_dimension_numbers<[1], [0], [0], [1], [0, 0, 1, 1], [], []>} : vector<256x32xf32>, vector<32x32xf32>, vector<256x32xf32> -> vector<256x32xf32>
    %183 = arith.addf %177, %182 : vector<256x32xf32>
    %c2_196 = arith.constant 2 : index
    %c8_197 = arith.constant 8 : index
    %c0_198 = arith.constant 0 : index
    %184 = vector.load %arg10[%c2_196, %c8_197, %c0_198] : memref<18x25x32xf32, #tpu.memory_space<vmem>>, vector<16x16x32xf32>
    %185 = vector.shape_cast %184 : vector<16x16x32xf32> to vector<256x32xf32>
    %c7_199 = arith.constant 7 : index
    %c0_200 = arith.constant 0 : index
    %c0_201 = arith.constant 0 : index
    %186 = vector.load %arg6[%c7_199, %c0_200, %c0_201] : memref<9x32x32xf32, #tpu.memory_space<vmem>>, vector<1x32x32xf32>
    %187 = vector.shape_cast %186 : vector<1x32x32xf32> to vector<32x32xf32>
    %cst_202 = arith.constant dense<0.000000e+00> : vector<256x32xf32>
    %188 = tpu.matmul %185, %187, %cst_202 {dimension_numbers = #tpu.dot_dimension_numbers<[1], [0], [0], [1], [0, 0, 1, 1], [], []>} : vector<256x32xf32>, vector<32x32xf32>, vector<256x32xf32> -> vector<256x32xf32>
    %189 = arith.addf %183, %188 : vector<256x32xf32>
    %c2_203 = arith.constant 2 : index
    %c9_204 = arith.constant 9 : index
    %c0_205 = arith.constant 0 : index
    %190 = vector.load %arg10[%c2_203, %c9_204, %c0_205] : memref<18x25x32xf32, #tpu.memory_space<vmem>>, vector<16x16x32xf32>
    %191 = vector.shape_cast %190 : vector<16x16x32xf32> to vector<256x32xf32>
    %c8_206 = arith.constant 8 : index
    %c0_207 = arith.constant 0 : index
    %c0_208 = arith.constant 0 : index
    %192 = vector.load %arg6[%c8_206, %c0_207, %c0_208] : memref<9x32x32xf32, #tpu.memory_space<vmem>>, vector<1x32x32xf32>
    %193 = vector.shape_cast %192 : vector<1x32x32xf32> to vector<32x32xf32>
    %cst_209 = arith.constant dense<0.000000e+00> : vector<256x32xf32>
    %194 = tpu.matmul %191, %193, %cst_209 {dimension_numbers = #tpu.dot_dimension_numbers<[1], [0], [0], [1], [0, 0, 1, 1], [], []>} : vector<256x32xf32>, vector<32x32xf32>, vector<256x32xf32> -> vector<256x32xf32>
    %195 = arith.addf %189, %194 : vector<256x32xf32>
    %c0_210 = arith.constant 0 : index
    %c0_211 = arith.constant 0 : index
    %196 = vector.load %arg7[%c0_210, %c0_211] : memref<1x32xf32, #tpu.memory_space<vmem>>, vector<1x32xf32>
    %197 = vector.shape_cast %196 : vector<1x32xf32> to vector<32xf32>
    %198 = vector.shape_cast %197 : vector<32xf32> to vector<1x32xf32>
    %199 = vector.broadcast %198 : vector<1x32xf32> to vector<256x32xf32>
    %200 = arith.addf %195, %199 : vector<256x32xf32>
    %c0_212 = arith.constant 0 : index
    %c0_213 = arith.constant 0 : index
    %c0_214 = arith.constant 0 : index
    %201 = vector.load %arg8[%c0_212, %c0_213, %c0_214] : memref<1x256x32xf32, #tpu.memory_space<vmem>>, vector<1x256x32xf32>
    %202 = vector.shape_cast %201 : vector<1x256x32xf32> to vector<256x32xf32>
    %203 = vector.shape_cast %200 : vector<256x32xf32> to vector<1x256x32xf32>
    tpu.vector_store %arg8[%c0_212, %c0_213, %c0_214], %203 {strides = array<i32>} : memref<1x256x32xf32, #tpu.memory_space<vmem>>, vector<1x256x32xf32>,
    return
  }
  func.func @transform_0(%arg0: i32) -> (i32, i32, i32, i32) {
    %c0_i32 = arith.constant 0 : i32
    %c0_i32_0 = arith.constant 0 : i32
    %c0_i32_1 = arith.constant 0 : i32
    %c0_i32_2 = arith.constant 0 : i32
    return %arg0, %c0_i32, %c0_i32_0, %c0_i32_1 : i32, i32, i32, i32
  }
  func.func @transform_1(%arg0: i32) -> (i32, i32, i32) {
    %c0_i32 = arith.constant 0 : i32
    %c0_i32_0 = arith.constant 0 : i32
    %c0_i32_1 = arith.constant 0 : i32
    %c0_i32_2 = arith.constant 0 : i32
    return %c0_i32, %c0_i32_0, %c0_i32_1 : i32, i32, i32
  }
  func.func @transform_2(%arg0: i32) -> (i32, i32) {
    %c0_i32 = arith.constant 0 : i32
    %c0_i32_0 = arith.constant 0 : i32
    %c0_i32_1 = arith.constant 0 : i32
    return %c0_i32, %c0_i32_0 : i32, i32
  }
  func.func @transform_3(%arg0: i32) -> (i32, i32, i32) {
    %c0_i32 = arith.constant 0 : i32
    %c0_i32_0 = arith.constant 0 : i32
    %c0_i32_1 = arith.constant 0 : i32
    %c0_i32_2 = arith.constant 0 : i32
    return %c0_i32, %c0_i32_0, %c0_i32_1 : i32, i32, i32
  }
  func.func @transform_4(%arg0: i32) -> (i32, i32) {
    %c0_i32 = arith.constant 0 : i32
    %c0_i32_0 = arith.constant 0 : i32
    %c0_i32_1 = arith.constant 0 : i32
    return %c0_i32, %c0_i32_0 : i32, i32
  }
  func.func @transform_5(%arg0: i32) -> (i32, i32, i32) {
    %c0_i32 = arith.constant 0 : i32
    %c0_i32_0 = arith.constant 0 : i32
    %c0_i32_1 = arith.constant 0 : i32
    %c0_i32_2 = arith.constant 0 : i32
    return %c0_i32, %c0_i32_0, %c0_i32_1 : i32, i32, i32
  }
  func.func @transform_6(%arg0: i32) -> (i32, i32) {
    %c0_i32 = arith.constant 0 : i32
    %c0_i32_0 = arith.constant 0 : i32
    %c0_i32_1 = arith.constant 0 : i32
    return %c0_i32, %c0_i32_0 : i32, i32
  }
  func.func @transform_7(%arg0: i32) -> (i32, i32, i32) {
    %c0_i32 = arith.constant 0 : i32
    %c0_i32_0 = arith.constant 0 : i32
    %c0_i32_1 = arith.constant 0 : i32
    return %arg0, %c0_i32, %c0_i32_0 : i32, i32, i32
  }
}

</mosaic_0001>

<bundles_post_ra>
// kernel: tpu_custom_call.1
= control target key start
LH: loop header
LB: loop body
LE: loop exit
PB: predicated region body
PF: predicated region fallthrough
CT: control target
= control target key end

     0   :  { %s14716_s24 = smov 0   ;;  %s19584_s0 = inlined_call_operand.vmem [shape: f32[2,18,18,4], index: 0, kind: input, shape index: {}]   ;;  %s19585_s1 = inlined_call_operand.vmem [shape: f32[9,4,32], index: 1, kind: input, shape index: {}]   ;;  %s19586_s2 = inlined_call_operand.vmem [shape: f32[1,32], index: 2, kind: input, shape index: {}]   ;;  %s19587_s3 = inlined_call_operand.vmem [shape: f32[9,32,32], index: 3, kind: input, shape index: {}]   ;;  %s19588_s4 = inlined_call_operand.vmem [shape: f32[1,32], index: 4, kind: input, shape index: {}]   ;;  %s19589_s5 = inlined_call_operand.vmem [shape: f32[9,32,32], index: 5, kind: input, shape index: {}]   ;;  %s19590_s6 = inlined_call_operand.vmem [shape: f32[1,32], index: 6, kind: input, shape index: {}]   ;;  %s19591_s7 = inlined_call_operand.vmem [shape: f32[2,256,32], index: 7, kind: output, shape index: {}]  }
   0x1 LB: > { %s11100_s25 = sadd.s32 4294967295, %s14673_s24   ;;  %p11104_p0 = scmp.ge.s32.totalorder %s14673_s24, 1  ;;  %s14673_s24 = sphi %s14716_s24, %s17_s24  }
   0x2   : > { %p237_p1 = scmp.lt.s32.totalorder %s14673_s24, 3 }
   0x4   : > { %p238_p2 = pnand %p11104_p0, %p237_p1 }
   0x6   : > { %241 = sbr.rel (%p238_p2) target bundleno = 1484 (0x5cc), region = 48 }
   0xb   : > { %v11108_v0 = vld [vmem:[%s19585_s1 + $0x4] sm:$0xf]  ;;  %vm589_vm0 = vcmask 1043456   ;;  %p269_p3 = scmp.lt.s32.totalorder %s11100_s25, 1  ;;  %v457_v1 = vld [vmem:[%s19585_s1] sm:$0xf] }
   0xc   : > { %14654 = vmatprep.subr.msk.mxu1 %vm589_vm0, %v11108_v0  ;;  %13196 = vmatprep.subr.msk.mxu0 %vm589_vm0, %v11108_v0  ;;  %v11175_v2 = vld [vmem:[%s19585_s1 + $0x8] sm:$0xf]  ;;  %vm492_vm1 = vcmask 31744   ;;  %v14770_v9 = vld [vmem:[%s19585_s1 + $0xc] sm:$0xf]  ;;  %vm279_vm2 = vcmask 261120  }
   0xd   : > { %14655 = vmatpush3.msk.msra.mxu1 %vm589_vm0, %v11108_v0  ;;  %13197 = vmatpush3.msk.msra.mxu0 %vm589_vm0, %v11108_v0  ;;  %s20254_s25 = smov (!%p269_p3, %s11100_s25), 1  ;;  %v14775_v10 = vld [vmem:[%s19585_s1 + $0x10] sm:$0xf]  ;;  %v14934_v43 = vld [vmem:[%s19585_s1 + $0x14] sm:$0xf]  ;;  %vm283_vm3 = vcmask 253952  }
   0xe   : > { %13246 = vmatprep.subr.msk.mxu1 %vm589_vm0, %v457_v1  ;;  %13296 = vmatprep.subr.msk.mxu0 %vm589_vm0, %v11175_v2  ;;  %s14656_s9 = smul.u32 432, %s20254_s25  ;;  %v14939_v44 = vld [vmem:[%s19585_s1 + $0x18] sm:$0xf]  ;;  %s12250_s30 = sshll.u32 %s20254_s25, 8 }
   0xf   : > { %s19372_s25 = scalar_lea.vmem %s19591_s7, %s12250_s30 }
  0x10   : > { %s14745_s12 = scalar_lea.vmem %s19584_s0, %s14656_s9 }
  0x11   : > { %v458_v3 = vld [vmem:[%s14745_s12 + $0x1] sm:$0xff]  ;;  %v459_v5 = vld [vmem:[%s14745_s12 + $0x9] sm:$0xff]  ;;  %v14759_v7 = vld [vmem:[%s14745_s12 + $0x19] sm:$0xff] }
  0x12   : > { %v14749_v4 = vld [vmem:[%s14745_s12 + $0xc1] sm:$0xff]  ;;  %13198 = vmatprep.mubr.msk.f32.mxu0 %vm492_vm1, %v458_v3  ;;  %v14756_v6 = vld [vmem:[%s14745_s12 + $0xc9] sm:$0xff]  ;;  %v14762_v8 = vld [vmem:[%s14745_s12 + $0xd9] sm:$0xff] }
  0x13   : > { %13222 = vmatprep.mubr.msk.f32.mxu1 %vm492_vm1, %v14749_v4  ;;  %13199 = vmatmul.mubr.msk.f32.vlgmr.msra.gmra.mxu0 %vm492_vm1, %v459_v5  ;;  %v14780_v11 = vld [vmem:[%s14745_s12 + $0x21] sm:$0xff]  ;;  %v14790_v13 = vld [vmem:[%s14745_s12 + $0x31] sm:$0xff]  ;;  %v14808_v15 = vld [vmem:[%s14745_s12 + $0x39] sm:$0xff] }
  0x14   : > { %13223 = vmatmul.mubr.msk.f32.vlgmr.msra.gmra.mxu1 %vm492_vm1, %v14756_v6  ;;  %13297 = vmatpush3.msk.msra.mxu0 %vm589_vm0, %v11175_v2  ;;  %v14783_v12 = vld [vmem:[%s14745_s12 + $0xe1] sm:$0xff]  ;;  %v14793_v14 = vld [vmem:[%s14745_s12 + $0xf1] sm:$0xff]  ;;  %v14811_v16 = vld [vmem:[%s14745_s12 + $0xf9] sm:$0xff] }
  0x15   : > { %13247 = vmatpush3.msk.msra.mxu1 %vm589_vm0, %v457_v1  ;;  %13201 = vmatprep.mubr.msk.f32.mxu0 %vm492_vm1, %v14759_v7  ;;  %v14814_v17 = vld [vmem:[%s14745_s12 + $0x49] sm:$0xff]  ;;  %v14828_v19 = vld [vmem:[%s14745_s12 + $0x51] sm:$0xff]  ;;  %v14834_v21 = vld [vmem:[%s14745_s12 + $0x61] sm:$0xff] }
  0x16   : > { %13225 = vmatprep.mubr.msk.f32.mxu1 %vm492_vm1, %v14762_v8  ;;  %13346 = vmatprep.subr.msk.mxu1 %vm589_vm0, %v14770_v9  ;;  %v14817_v18 = vld [vmem:[%s14745_s12 + $0x109] sm:$0xff]  ;;  %v14831_v20 = vld [vmem:[%s14745_s12 + $0x111] sm:$0xff]  ;;  %v14837_v22 = vld [vmem:[%s14745_s12 + $0x121] sm:$0xff] }
  0x17   : > { %13396 = vmatprep.subr.msk.mxu0 %vm589_vm0, %v14775_v10  ;;  %13202 = vmatmul.mubr.msk.f32.gmra.mxu0 %vm492_vm1, %v14780_v11  ;;  %v14848_v23 = vld [vmem:[%s14745_s12 + $0x69] sm:$0xff]  ;;  %v14854_v25 = vld [vmem:[%s14745_s12 + $0x79] sm:$0xff]  ;;  %v14868_v27 = vld [vmem:[%s14745_s12 + $0x81] sm:$0xff] }
  0x18   : > { %13226 = vmatmul.mubr.msk.f32.gmra.mxu1 %vm492_vm1, %v14783_v12  ;;  %13204 = vmatprep.mubr.msk.f32.mxu0 %vm492_vm1, %v14790_v13  ;;  %v14851_v24 = vld [vmem:[%s14745_s12 + $0x129] sm:$0xff]  ;;  %v14857_v26 = vld [vmem:[%s14745_s12 + $0x139] sm:$0xff]  ;;  %v14871_v28 = vld [vmem:[%s14745_s12 + $0x141] sm:$0xff] }
  0x19   : > { %13228 = vmatprep.mubr.msk.f32.mxu1 %vm492_vm1, %v14793_v14  ;;  %v14874_v29 = vld [vmem:[%s14745_s12 + $0x91] sm:$0xff]  ;;  %v14888_v31 = vld [vmem:[%s14745_s12 + $0x99] sm:$0xff]  ;;  %v14894_v33 = vld [vmem:[%s14745_s12 + $0xa9] sm:$0xff] }
  0x1a   : > { %v14877_v30 = vld [vmem:[%s14745_s12 + $0x151] sm:$0xff]  ;;  %v14891_v32 = vld [vmem:[%s14745_s12 + $0x159] sm:$0xff]  ;;  %v14897_v34 = vld [vmem:[%s14745_s12 + $0x169] sm:$0xff] }
  0x1b   : > { %13205 = vmatmul.mubr.msk.f32.gmra.mxu0 %vm492_vm1, %v14808_v15  ;;  %v14908_v35 = vld [vmem:[%s14745_s12 + $0xb1] sm:$0xff]  ;;  %v425_v37 = vld [vmem:[%s14745_s12] sm:$0xff]  ;;  %v426_v39 = vld [vmem:[%s14745_s12 + $0x8] sm:$0xff] }
  0x1c   : > { %13229 = vmatmul.mubr.msk.f32.gmra.mxu1 %vm492_vm1, %v14811_v16  ;;  %13207 = vmatprep.mubr.msk.f32.mxu0 %vm492_vm1, %v14814_v17  ;;  %v14911_v36 = vld [vmem:[%s14745_s12 + $0x171] sm:$0xff]  ;;  %v1142_v38 = vld [vmem:[%s14745_s12 + $0x2] sm:$0xff]  ;;  %v14927_v42 = vld [vmem:[%s14745_s12 + $0x1a] sm:$0xff] }
  0x1d   : > { %13231 = vmatprep.mubr.msk.f32.mxu1 %vm492_vm1, %v14817_v18  ;;  %19671 = vst [vmem:[#allocation4_spill] sm:$0xff] %v14911_v36  ;;  %v1143_v40 = vld [vmem:[%s14745_s12 + $0xa] sm:$0xff]  ;;  %v14924_v41 = vld [vmem:[%s14745_s12 + $0x18] sm:$0xff]  ;;  %19672 = vst [vmem:[#allocation5_spill] sm:$0xff] %v14927_v42 }
  0x1e   : > { %v14946_v45 = vld [vmem:[%s14745_s12 + $0x20] sm:$0xff]  ;;  %v14956_v47 = vld [vmem:[%s14745_s12 + $0x30] sm:$0xff]  ;;  %v14974_v49 = vld [vmem:[%s14745_s12 + $0x38] sm:$0xff] }
  0x1f   : > { %13208 = vmatmul.mubr.msk.f32.gmra.mxu0 %vm492_vm1, %v14828_v19  ;;  %v14949_v46 = vld [vmem:[%s14745_s12 + $0x22] sm:$0xff]  ;;  %v14959_v48 = vld [vmem:[%s14745_s12 + $0x32] sm:$0xff]  ;;  %v14977_v50 = vld [vmem:[%s14745_s12 + $0x3a] sm:$0xff] }
  0x20   : > { %13232 = vmatmul.mubr.msk.f32.gmra.mxu1 %vm492_vm1, %v14831_v20  ;;  %13210 = vmatprep.mubr.msk.f32.mxu0 %vm492_vm1, %v14834_v21  ;;  %19673 = vst [vmem:[#allocation6_spill] sm:$0xff] %v14949_v46  ;;  %19674 = vst [vmem:[#allocation7_spill] sm:$0xff] %v14959_v48  ;;  %v14980_v51 = vld [vmem:[%s14745_s12 + $0x48] sm:$0xff]  ;;  %v14994_v53 = vld [vmem:[%s14745_s12 + $0x50] sm:$0xff] }
  0x21   : > { %13234 = vmatprep.mubr.msk.f32.mxu1 %vm492_vm1, %v14837_v22  ;;  %19675 = vst [vmem:[#allocation8_spill] sm:$0xff] %v14977_v50  ;;  %v14983_v52 = vld [vmem:[%s14745_s12 + $0x4a] sm:$0xff]  ;;  %v14997_v54 = vld [vmem:[%s14745_s12 + $0x52] sm:$0xff]  ;;  %v15000_v55 = vld [vmem:[%s14745_s12 + $0x60] sm:$0xff] }
  0x22   : > { %19676 = vst [vmem:[#allocation9_spill] sm:$0xff] %v14983_v52  ;;  %19677 = vst [vmem:[#allocation10_spill] sm:$0xff] %v14997_v54  ;;  %v15003_v56 = vld [vmem:[%s14745_s12 + $0x62] sm:$0xff]  ;;  %v15017_v58 = vld [vmem:[%s14745_s12 + $0x6a] sm:$0xff] }
  0x23   : > { %13211 = vmatmul.mubr.msk.f32.gmra.mxu0 %vm492_vm1, %v14848_v23  ;;  %19678 = vst [vmem:[#allocation11_spill] sm:$0xff] %v15003_v56  ;;  %v15014_v57 = vld [vmem:[%s14745_s12 + $0x68] sm:$0xff]  ;;  %19679 = vst [vmem:[#allocation12_spill] sm:$0xff] %v15017_v58  ;;  %v15020_v59 = vld [vmem:[%s14745_s12 + $0x78] sm:$0xff] }
  0x24   : > { %13235 = vmatmul.mubr.msk.f32.gmra.mxu1 %vm492_vm1, %v14851_v24  ;;  %13213 = vmatprep.mubr.msk.f32.mxu0 %vm492_vm1, %v14854_v25  ;;  %v15023_v60 = vld [vmem:[%s14745_s12 + $0x7a] sm:$0xff]  ;;  %v15037_v62 = vld [vmem:[%s14745_s12 + $0x82] sm:$0xff]  ;;  %v15040_v63 = vld [vmem:[%s14745_s12 + $0x90] sm:$0xff] }
  0x25   : > { %13237 = vmatprep.mubr.msk.f32.mxu1 %vm492_vm1, %v14857_v26  ;;  %19680 = vst [vmem:[#allocation13_spill] sm:$0xff] %v15023_v60  ;;  %v15034_v61 = vld [vmem:[%s14745_s12 + $0x80] sm:$0xff]  ;;  %19681 = vst [vmem:[#allocation14_spill] sm:$0xff] %v15037_v62  ;;  %v15043_v0 = vld [vmem:[%s14745_s12 + $0x92] sm:$0xff] }
  0x26   : > { %19682 = vst [vmem:[#allocation15_spill] sm:$0xff] %v15043_v0  ;;  %v15054_v1 = vld [vmem:[%s14745_s12 + $0x98] sm:$0xff]  ;;  %v15060_v3 = vld [vmem:[%s14745_s12 + $0xa8] sm:$0xff] }
  0x27   : > { %13214 = vmatmul.mubr.msk.f32.gmra.mxu0 %vm492_vm1, %v14868_v27  ;;  %v15057_v2 = vld [vmem:[%s14745_s12 + $0x9a] sm:$0xff]  ;;  %v15063_v5 = vld [vmem:[%s14745_s12 + $0xaa] sm:$0xff] }
  0x28   : > { %13238 = vmatmul.mubr.msk.f32.gmra.mxu1 %vm492_vm1, %v14871_v28  ;;  %13216 = vmatprep.mubr.msk.f32.mxu0 %vm492_vm1, %v14874_v29  ;;  %19683 = vst [vmem:[#allocation16_spill] sm:$0xff] %v15057_v2  ;;  %19684 = vst [vmem:[#allocation17_spill] sm:$0xff] %v15063_v5 }
  0x29   : > { %13240 = vmatprep.mubr.msk.f32.mxu1 %vm492_vm1, %v14877_v30 }
  0x2b   : > { %13217 = vmatmul.mubr.msk.f32.gmra.mxu0 %vm492_vm1, %v14888_v31 }
  0x2c   : > { %13241 = vmatmul.mubr.msk.f32.gmra.mxu1 %vm492_vm1, %v14891_v32  ;;  %13219 = vmatprep.mubr.msk.f32.mxu0 %vm492_vm1, %v14894_v33 }
  0x2d   : > { %13243 = vmatprep.mubr.msk.f32.mxu1 %vm492_vm1, %v14897_v34 }
  0x2f   : > { %13220 = vmatmul.mubr.msk.f32.gmra.mxu0 %vm492_vm1, %v14908_v35 }
  0x30   : > { %13244 = vmatmul.mubr.msk.f32.gmra.mxu1 %vm492_vm1, %v14911_v36  ;;  %13298 = vmatprep.mubr.msk.f32.mxu0 %vm492_vm1, %v1142_v38  ;;  %v15083_v38 = vld [vmem:[%s14745_s12 + $0xc2] sm:$0xff]  ;;  %v15223_v36 = vld [vmem:[%s14745_s12 + $0x16a] sm:$0xff] }
  0x31   : > { %13248 = vmatprep.mubr.msk.f32.mxu1 %vm492_vm1, %v425_v37  ;;  %v15080_v37 = vld [vmem:[%s14745_s12 + $0xc0] sm:$0xff]  ;;  %19686 = vst [vmem:[#allocation19_spill] sm:$0xff] %v15083_v38  ;;  %19699 = vst [vmem:[#allocation32_spill] sm:$0xff] %v15223_v36 }
  0x33   : > { %13299 = vmatmul.mubr.msk.f32.vlgmr.msra.gmra.mxu0 %vm492_vm1, %v1143_v40  ;;  %v15097_v40 = vld [vmem:[%s14745_s12 + $0xca] sm:$0xff] }
  0x34   : > { %13249 = vmatmul.mubr.msk.f32.vlgmr.msra.gmra.mxu1 %vm492_vm1, %v426_v39  ;;  %13397 = vmatpush3.msk.msra.mxu0 %vm589_vm0, %v14775_v10  ;;  %v15077_v10 = vld [vmem:[%s14745_s12 + $0xb2] sm:$0xff]  ;;  %v15094_v39 = vld [vmem:[%s14745_s12 + $0xc8] sm:$0xff]  ;;  %19687 = vst [vmem:[#allocation20_spill] sm:$0xff] %v15097_v40 }
  0x35   : > { %13347 = vmatpush3.msk.msra.mxu1 %vm589_vm0, %v14770_v9  ;;  %13251 = vmatprep.mubr.msk.f32.mxu1 %vm492_vm1, %v14924_v41  ;;  %v15074_v9 = vld [vmem:[%s14745_s12 + $0xb0] sm:$0xff]  ;;  %19685 = vst [vmem:[#allocation18_spill] sm:$0xff] %v15077_v10 }
  0x36   : > { %13301 = vmatprep.mubr.msk.f32.mxu0 %vm492_vm1, %v14927_v42  ;;  %13446 = vmatprep.subr.msk.mxu1 %vm589_vm0, %v14934_v43  ;;  %v15220_v42 = vld [vmem:[%s14745_s12 + $0x168] sm:$0xff] }
  0x37   : > { %13496 = vmatprep.subr.msk.mxu0 %vm589_vm0, %v14939_v44  ;;  %13302 = vmatmul.mubr.msk.f32.gmra.mxu0 %vm492_vm1, %v14949_v46  ;;  %v15203_v46 = vld [vmem:[%s14745_s12 + $0x152] sm:$0xff] }
  0x38   : > { %13252 = vmatmul.mubr.msk.f32.gmra.mxu1 %vm492_vm1, %v14946_v45  ;;  %13304 = vmatprep.mubr.msk.f32.mxu0 %vm492_vm1, %v14959_v48  ;;  %v15200_v48 = vld [vmem:[%s14745_s12 + $0x150] sm:$0xff]  ;;  %19698 = vst [vmem:[#allocation31_spill] sm:$0xff] %v15203_v46 }
  0x39   : > { %13254 = vmatprep.mubr.msk.f32.mxu1 %vm492_vm1, %v14956_v47 }
  0x3b   : > { %13305 = vmatmul.mubr.msk.f32.gmra.mxu0 %vm492_vm1, %v14977_v50  ;;  %v15183_v50 = vld [vmem:[%s14745_s12 + $0x13a] sm:$0xff] }
  0x3c   : > { %13255 = vmatmul.mubr.msk.f32.gmra.mxu1 %vm492_vm1, %v14974_v49  ;;  %13307 = vmatprep.mubr.msk.f32.mxu0 %vm492_vm1, %v14983_v52  ;;  %v15180_v52 = vld [vmem:[%s14745_s12 + $0x138] sm:$0xff]  ;;  %19696 = vst [vmem:[#allocation29_spill] sm:$0xff] %v15183_v50 }
  0x3d   : > { %13257 = vmatprep.mubr.msk.f32.mxu1 %vm492_vm1, %v14980_v51 }
  0x3f   : > { %13308 = vmatmul.mubr.msk.f32.gmra.mxu0 %vm492_vm1, %v14997_v54  ;;  %v15163_v54 = vld [vmem:[%s14745_s12 + $0x122] sm:$0xff] }
  0x40   : > { %13258 = vmatmul.mubr.msk.f32.gmra.mxu1 %vm492_vm1, %v14994_v53  ;;  %13310 = vmatprep.mubr.msk.f32.mxu0 %vm492_vm1, %v15003_v56  ;;  %v15160_v56 = vld [vmem:[%s14745_s12 + $0x120] sm:$0xff]  ;;  %19694 = vst [vmem:[#allocation27_spill] sm:$0xff] %v15163_v54 }
  0x41   : > { %13260 = vmatprep.mubr.msk.f32.mxu1 %vm492_vm1, %v15000_v55 }
  0x43   : > { %13311 = vmatmul.mubr.msk.f32.gmra.mxu0 %vm492_vm1, %v15017_v58  ;;  %v15143_v58 = vld [vmem:[%s14745_s12 + $0x10a] sm:$0xff] }
  0x44   : > { %13261 = vmatmul.mubr.msk.f32.gmra.mxu1 %vm492_vm1, %v15014_v57  ;;  %13313 = vmatprep.mubr.msk.f32.mxu0 %vm492_vm1, %v15023_v60  ;;  %v15140_v60 = vld [vmem:[%s14745_s12 + $0x108] sm:$0xff]  ;;  %19692 = vst [vmem:[#allocation25_spill] sm:$0xff] %v15143_v58 }
  0x45   : > { %13263 = vmatprep.mubr.msk.f32.mxu1 %vm492_vm1, %v15020_v59 }
  0x47   : > { %13314 = vmatmul.mubr.msk.f32.gmra.mxu0 %vm492_vm1, %v15037_v62  ;;  %v15123_v62 = vld [vmem:[%s14745_s12 + $0xf2] sm:$0xff] }
  0x48   : > { %13264 = vmatmul.mubr.msk.f32.gmra.mxu1 %vm492_vm1, %v15034_v61  ;;  %13316 = vmatprep.mubr.msk.f32.mxu0 %vm492_vm1, %v15043_v0  ;;  %v15120_v0 = vld [vmem:[%s14745_s12 + $0xf0] sm:$0xff]  ;;  %19690 = vst [vmem:[#allocation23_spill] sm:$0xff] %v15123_v62 }
  0x49   : > { %13266 = vmatprep.mubr.msk.f32.mxu1 %vm492_vm1, %v15040_v63 }
  0x4b   : > { %13317 = vmatmul.mubr.msk.f32.gmra.mxu0 %vm492_vm1, %v15057_v2  ;;  %v15103_v2 = vld [vmem:[%s14745_s12 + $0xda] sm:$0xff] }
  0x4c   : > { %13267 = vmatmul.mubr.msk.f32.gmra.mxu1 %vm492_vm1, %v15054_v1  ;;  %13319 = vmatprep.mubr.msk.f32.mxu0 %vm492_vm1, %v15063_v5  ;;  %v15100_v5 = vld [vmem:[%s14745_s12 + $0xd8] sm:$0xff]  ;;  %19688 = vst [vmem:[#allocation21_spill] sm:$0xff] %v15103_v2 }
  0x4d   : > { %13269 = vmatprep.mubr.msk.f32.mxu1 %vm492_vm1, %v15060_v3 }
  0x4f   : > { %13320 = vmatmul.mubr.msk.f32.gmra.mxu0 %vm492_vm1, %v15077_v10  ;;  %v15117_v10 = vld [vmem:[%s14745_s12 + $0xe2] sm:$0xff] }
  0x50   : > { %13270 = vmatmul.mubr.msk.f32.gmra.mxu1 %vm492_vm1, %v15074_v9  ;;  %13322 = vmatprep.mubr.msk.f32.mxu0 %vm492_vm1, %v15083_v38  ;;  %v15114_v38 = vld [vmem:[%s14745_s12 + $0xe0] sm:$0xff]  ;;  %19689 = vst [vmem:[#allocation22_spill] sm:$0xff] %v15117_v10 }
  0x51   : > { %13272 = vmatprep.mubr.msk.f32.mxu1 %vm492_vm1, %v15080_v37 }
  0x53   : > { %13323 = vmatmul.mubr.msk.f32.gmra.mxu0 %vm492_vm1, %v15097_v40  ;;  %v15137_v40 = vld [vmem:[%s14745_s12 + $0xfa] sm:$0xff] }
  0x54   : > { %13273 = vmatmul.mubr.msk.f32.gmra.mxu1 %vm492_vm1, %v15094_v39  ;;  %13325 = vmatprep.mubr.msk.f32.mxu0 %vm492_vm1, %v15103_v2  ;;  %v15134_v2 = vld [vmem:[%s14745_s12 + $0xf8] sm:$0xff]  ;;  %19691 = vst [vmem:[#allocation24_spill] sm:$0xff] %v15137_v40 }
  0x55   : > { %13275 = vmatprep.mubr.msk.f32.mxu1 %vm492_vm1, %v15100_v5 }
  0x57   : > { %13326 = vmatmul.mubr.msk.f32.gmra.mxu0 %vm492_vm1, %v15117_v10  ;;  %v15157_v10 = vld [vmem:[%s14745_s12 + $0x112] sm:$0xff] }
  0x58   : > { %13276 = vmatmul.mubr.msk.f32.gmra.mxu1 %vm492_vm1, %v15114_v38  ;;  %13328 = vmatprep.mubr.msk.f32.mxu0 %vm492_vm1, %v15123_v62  ;;  %v15154_v62 = vld [vmem:[%s14745_s12 + $0x110] sm:$0xff]  ;;  %19693 = vst [vmem:[#allocation26_spill] sm:$0xff] %v15157_v10 }
  0x59   : > { %13278 = vmatprep.mubr.msk.f32.mxu1 %vm492_vm1, %v15120_v0 }
  0x5b   : > { %13329 = vmatmul.mubr.msk.f32.gmra.mxu0 %vm492_vm1, %v15137_v40  ;;  %v15177_v40 = vld [vmem:[%s14745_s12 + $0x12a] sm:$0xff] }
  0x5c   : > { %13279 = vmatmul.mubr.msk.f32.gmra.mxu1 %vm492_vm1, %v15134_v2  ;;  %13331 = vmatprep.mubr.msk.f32.mxu0 %vm492_vm1, %v15143_v58  ;;  %v15174_v58 = vld [vmem:[%s14745_s12 + $0x128] sm:$0xff]  ;;  %19695 = vst [vmem:[#allocation28_spill] sm:$0xff] %v15177_v40 }
  0x5d   : > { %13281 = vmatprep.mubr.msk.f32.mxu1 %vm492_vm1, %v15140_v60 }
  0x5f   : > { %13332 = vmatmul.mubr.msk.f32.gmra.mxu0 %vm492_vm1, %v15157_v10  ;;  %v15197_v10 = vld [vmem:[%s14745_s12 + $0x142] sm:$0xff] }
  0x60   : > { %13282 = vmatmul.mubr.msk.f32.gmra.mxu1 %vm492_vm1, %v15154_v62  ;;  %13334 = vmatprep.mubr.msk.f32.mxu0 %vm492_vm1, %v15163_v54  ;;  %v15194_v54 = vld [vmem:[%s14745_s12 + $0x140] sm:$0xff]  ;;  %19697 = vst [vmem:[#allocation30_spill] sm:$0xff] %v15197_v10 }
  0x61   : > { %13284 = vmatprep.mubr.msk.f32.mxu1 %vm492_vm1, %v15160_v56 }
  0x63   : > { %13335 = vmatmul.mubr.msk.f32.gmra.mxu0 %vm492_vm1, %v15177_v40  ;;  %v15217_v40 = vld [vmem:[%s14745_s12 + $0x15a] sm:$0xff] }
  0x64   : > { %13285 = vmatmul.mubr.msk.f32.gmra.mxu1 %vm492_vm1, %v15174_v58  ;;  %13337 = vmatprep.mubr.msk.f32.mxu0 %vm492_vm1, %v15183_v50  ;;  %v15214_v50 = vld [vmem:[%s14745_s12 + $0x158] sm:$0xff] }
  0x65   : > { %13287 = vmatprep.mubr.msk.f32.mxu1 %vm492_vm1, %v15180_v52 }
  0x67   : > { %13338 = vmatmul.mubr.msk.f32.gmra.mxu0 %vm492_vm1, %v15197_v10  ;;  %v15237_v10 = vld [vmem:[%s14745_s12 + $0x172] sm:$0xff] }
  0x68   : > { %13288 = vmatmul.mubr.msk.f32.gmra.mxu1 %vm492_vm1, %v15194_v54  ;;  %13340 = vmatprep.mubr.msk.f32.mxu0 %vm492_vm1, %v15203_v46  ;;  %v15234_v46 = vld [vmem:[%s14745_s12 + $0x170] sm:$0xff]  ;;  %19700 = vst [vmem:[#allocation33_spill] sm:$0xff] %v15237_v10 }
  0x69   : > { %13290 = vmatprep.mubr.msk.f32.mxu1 %vm492_vm1, %v15200_v48 }
  0x6b   : > { %13341 = vmatmul.mubr.msk.f32.gmra.mxu0 %vm492_vm1, %v15217_v40 }
  0x6c   : > { %13291 = vmatmul.mubr.msk.f32.gmra.mxu1 %vm492_vm1, %v15214_v50  ;;  %13343 = vmatprep.mubr.msk.f32.mxu0 %vm492_vm1, %v15223_v36  ;;  %v15254_v36 = vld [vmem:[%s19585_s1 + $0x1c] sm:$0xf] }
  0x6d   : > { %13293 = vmatprep.mubr.msk.f32.mxu1 %vm492_vm1, %v15220_v42 }
  0x6f   : > { %13344 = vmatmul.mubr.msk.f32.gmra.mxu0 %vm492_vm1, %v15237_v10  ;;  %v15259_v10 = vld [vmem:[%s19585_s1 + $0x20] sm:$0xf] }
  0x70   : > { %13294 = vmatmul.mubr.msk.f32.gmra.mxu1 %vm492_vm1, %v15234_v46  ;;  %13398 = vmatprep.mubr.msk.f32.mxu0 %vm492_vm1, %v14759_v7  ;;  %v19702_v7 = vld [vmem:[#allocation4_spill] sm:$0xff] }
  0x71   : > { %13348 = vmatprep.mubr.msk.f32.mxu1 %vm492_vm1, %v14924_v41 }
  0x73   : > { %13399 = vmatmul.mubr.msk.f32.vlgmr.msra.gmra.mxu0 %vm492_vm1, %v14780_v11  ;;  %v15395_v11 = vld [vmem:[%s14745_s12 + $0x189] sm:$0xff] }
  0x74   : > { %13349 = vmatmul.mubr.msk.f32.vlgmr.msra.gmra.mxu1 %vm492_vm1, %v14946_v45  ;;  %13497 = vmatpush3.msk.msra.mxu0 %vm589_vm0, %v14939_v44  ;;  %19703 = vst [vmem:[#allocation4_spill] sm:$0xff] %v15395_v11  ;;  %v19721_v44 = vld [vmem:[#allocation22_spill] sm:$0xff]  ;;  %v19722_v45 = vld [vmem:[#allocation23_spill] sm:$0xff] }
  0x75   : > { %13447 = vmatpush3.msk.msra.mxu1 %vm589_vm0, %v14934_v43  ;;  %13351 = vmatprep.mubr.msk.f32.mxu1 %vm492_vm1, %v14956_v47 }
  0x76   : > { %13401 = vmatprep.mubr.msk.f32.mxu0 %vm492_vm1, %v14790_v13  ;;  %13546 = vmatprep.subr.msk.mxu1 %vm589_vm0, %v15254_v36 }
  0x77   : > { %13596 = vmatprep.subr.msk.mxu0 %vm589_vm0, %v15259_v10  ;;  %13402 = vmatmul.mubr.msk.f32.gmra.mxu0 %vm492_vm1, %v14808_v15 }
  0x78   : > { %13352 = vmatmul.mubr.msk.f32.gmra.mxu1 %vm492_vm1, %v14974_v49  ;;  %13404 = vmatprep.mubr.msk.f32.mxu0 %vm492_vm1, %v14814_v17 }
  0x79   : > { %13354 = vmatprep.mubr.msk.f32.mxu1 %vm492_vm1, %v14980_v51 }
  0x7b   : > { %13405 = vmatmul.mubr.msk.f32.gmra.mxu0 %vm492_vm1, %v14828_v19 }
  0x7c   : > { %13355 = vmatmul.mubr.msk.f32.gmra.mxu1 %vm492_vm1, %v14994_v53  ;;  %13407 = vmatprep.mubr.msk.f32.mxu0 %vm492_vm1, %v14834_v21 }
  0x7d   : > { %13357 = vmatprep.mubr.msk.f32.mxu1 %vm492_vm1, %v15000_v55 }
  0x7f   : > { %13408 = vmatmul.mubr.msk.f32.gmra.mxu0 %vm492_vm1, %v14848_v23 }
  0x80   : > { %13358 = vmatmul.mubr.msk.f32.gmra.mxu1 %vm492_vm1, %v15014_v57  ;;  %13410 = vmatprep.mubr.msk.f32.mxu0 %vm492_vm1, %v14854_v25 }
  0x81   : > { %13360 = vmatprep.mubr.msk.f32.mxu1 %vm492_vm1, %v15020_v59 }
  0x83   : > { %13411 = vmatmul.mubr.msk.f32.gmra.mxu0 %vm492_vm1, %v14868_v27 }
  0x84   : > { %13361 = vmatmul.mubr.msk.f32.gmra.mxu1 %vm492_vm1, %v15034_v61  ;;  %13413 = vmatprep.mubr.msk.f32.mxu0 %vm492_vm1, %v14874_v29  ;;  %v19713_v29 = vld [vmem:[#allocation14_spill] sm:$0xff] }
  0x85   : > { %13363 = vmatprep.mubr.msk.f32.mxu1 %vm492_vm1, %v15040_v63 }
  0x87   : > { %13414 = vmatmul.mubr.msk.f32.gmra.mxu0 %vm492_vm1, %v14888_v31  ;;  %v19715_v31 = vld [vmem:[#allocation16_spill] sm:$0xff] }
  0x88   : > { %13364 = vmatmul.mubr.msk.f32.gmra.mxu1 %vm492_vm1, %v15054_v1  ;;  %13416 = vmatprep.mubr.msk.f32.mxu0 %vm492_vm1, %v14894_v33  ;;  %v19717_v33 = vld [vmem:[#allocation18_spill] sm:$0xff] }
  0x89   : > { %13366 = vmatprep.mubr.msk.f32.mxu1 %vm492_vm1, %v15060_v3 }
  0x8b   : > { %13417 = vmatmul.mubr.msk.f32.gmra.mxu0 %vm492_vm1, %v14908_v35  ;;  %v19719_v35 = vld [vmem:[#allocation20_spill] sm:$0xff] }
  0x8c   : > { %13367 = vmatmul.mubr.msk.f32.gmra.mxu1 %vm492_vm1, %v15074_v9  ;;  %13419 = vmatprep.mubr.msk.f32.mxu0 %vm492_vm1, %v14749_v4  ;;  %v15378_v4 = vld [vmem:[%s14745_s12 + $0x180] sm:$0xff] }
  0x8d   : > { %13369 = vmatprep.mubr.msk.f32.mxu1 %vm492_vm1, %v15080_v37 }
  0x8f   : > { %13420 = vmatmul.mubr.msk.f32.gmra.mxu0 %vm492_vm1, %v14756_v6  ;;  %v15381_v6 = vld [vmem:[%s14745_s12 + $0x181] sm:$0xff] }
  0x90   : > { %13370 = vmatmul.mubr.msk.f32.gmra.mxu1 %vm492_vm1, %v15094_v39  ;;  %13422 = vmatprep.mubr.msk.f32.mxu0 %vm492_vm1, %v14762_v8  ;;  %19701 = vst [vmem:[#allocation34_spill] sm:$0xff] %v15381_v6  ;;  %v15392_v8 = vld [vmem:[%s14745_s12 + $0x188] sm:$0xff] }
  0x91   : > { %13372 = vmatprep.mubr.msk.f32.mxu1 %vm492_vm1, %v15100_v5 }
  0x93   : > { %13423 = vmatmul.mubr.msk.f32.gmra.mxu0 %vm492_vm1, %v14783_v12  ;;  %v19704_v12 = vld [vmem:[#allocation5_spill] sm:$0xff] }
  0x94   : > { %13373 = vmatmul.mubr.msk.f32.gmra.mxu1 %vm492_vm1, %v15114_v38  ;;  %13425 = vmatprep.mubr.msk.f32.mxu0 %vm492_vm1, %v14793_v14  ;;  %v19705_v14 = vld [vmem:[#allocation6_spill] sm:$0xff] }
  0x95   : > { %13375 = vmatprep.mubr.msk.f32.mxu1 %vm492_vm1, %v15120_v0 }
  0x97   : > { %13426 = vmatmul.mubr.msk.f32.gmra.mxu0 %vm492_vm1, %v14811_v16  ;;  %v19706_v16 = vld [vmem:[#allocation7_spill] sm:$0xff] }
  0x98   : > { %13376 = vmatmul.mubr.msk.f32.gmra.mxu1 %vm492_vm1, %v15134_v2  ;;  %13428 = vmatprep.mubr.msk.f32.mxu0 %vm492_vm1, %v14817_v18  ;;  %v19707_v18 = vld [vmem:[#allocation8_spill] sm:$0xff] }
  0x99   : > { %13378 = vmatprep.mubr.msk.f32.mxu1 %vm492_vm1, %v15140_v60 }
  0x9b   : > { %13429 = vmatmul.mubr.msk.f32.gmra.mxu0 %vm492_vm1, %v14831_v20  ;;  %v19708_v20 = vld [vmem:[#allocation9_spill] sm:$0xff] }
  0x9c   : > { %13379 = vmatmul.mubr.msk.f32.gmra.mxu1 %vm492_vm1, %v15154_v62  ;;  %13431 = vmatprep.mubr.msk.f32.mxu0 %vm492_vm1, %v14837_v22  ;;  %v19709_v22 = vld [vmem:[#allocation10_spill] sm:$0xff] }
  0x9d   : > { %13381 = vmatprep.mubr.msk.f32.mxu1 %vm492_vm1, %v15160_v56 }
  0x9f   : > { %13432 = vmatmul.mubr.msk.f32.gmra.mxu0 %vm492_vm1, %v14851_v24  ;;  %v19710_v24 = vld [vmem:[#allocation11_spill] sm:$0xff] }
  0xa0   : > { %13382 = vmatmul.mubr.msk.f32.gmra.mxu1 %vm492_vm1, %v15174_v58  ;;  %13434 = vmatprep.mubr.msk.f32.mxu0 %vm492_vm1, %v14857_v26  ;;  %v19711_v26 = vld [vmem:[#allocation12_spill] sm:$0xff] }
  0xa1   : > { %13384 = vmatprep.mubr.msk.f32.mxu1 %vm492_vm1, %v15180_v52 }
  0xa3   : > { %13435 = vmatmul.mubr.msk.f32.gmra.mxu0 %vm492_vm1, %v14871_v28  ;;  %v19712_v28 = vld [vmem:[#allocation13_spill] sm:$0xff] }
  0xa4   : > { %13385 = vmatmul.mubr.msk.f32.gmra.mxu1 %vm492_vm1, %v15194_v54  ;;  %13437 = vmatprep.mubr.msk.f32.mxu0 %vm492_vm1, %v14877_v30  ;;  %v19714_v30 = vld [vmem:[#allocation15_spill] sm:$0xff] }
  0xa5   : > { %13387 = vmatprep.mubr.msk.f32.mxu1 %vm492_vm1, %v15200_v48 }
  0xa7   : > { %13438 = vmatmul.mubr.msk.f32.gmra.mxu0 %vm492_vm1, %v14891_v32  ;;  %v19716_v32 = vld [vmem:[#allocation17_spill] sm:$0xff] }
  0xa8   : > { %13388 = vmatmul.mubr.msk.f32.gmra.mxu1 %vm492_vm1, %v15214_v50  ;;  %13440 = vmatprep.mubr.msk.f32.mxu0 %vm492_vm1, %v14897_v34  ;;  %v19718_v34 = vld [vmem:[#allocation19_spill] sm:$0xff] }
  0xa9   : > { %13390 = vmatprep.mubr.msk.f32.mxu1 %vm492_vm1, %v15220_v42 }
  0xab   : > { %13441 = vmatmul.mubr.msk.f32.gmra.mxu0 %vm492_vm1, %v19702_v7 }
  0xac   : > { %13391 = vmatmul.mubr.msk.f32.gmra.mxu1 %vm492_vm1, %v15234_v46  ;;  %13443 = vmatprep.mubr.msk.f32.mxu0 %vm492_vm1, %v15381_v6 }
  0xad   : > { %13393 = vmatprep.mubr.msk.f32.mxu1 %vm492_vm1, %v15378_v4 }
  0xaf   : > { %13444 = vmatmul.mubr.msk.f32.gmra.mxu0 %vm492_vm1, %v15395_v11  ;;  %v19739_v11 = vld [vmem:[#allocation33_spill] sm:$0xff] }
  0xb0   : > { %13394 = vmatmul.mubr.msk.f32.gmra.mxu1 %vm492_vm1, %v15392_v8  ;;  %13498 = vmatprep.mubr.msk.f32.mxu0 %vm492_vm1, %v14956_v47 }
  0xb1   : > { %13448 = vmatprep.mubr.msk.f32.mxu1 %vm492_vm1, %v19704_v12 }
  0xb3   : > { %13499 = vmatmul.mubr.msk.f32.vlgmr.msra.gmra.mxu0 %vm492_vm1, %v14974_v49 }
  0xb4   : > { %13449 = vmatmul.mubr.msk.f32.vlgmr.msra.gmra.mxu1 %vm492_vm1, %v19705_v14  ;;  %13597 = vmatpush3.msk.msra.mxu0 %vm589_vm0, %v15259_v10 }
  0xb5   : > { %13547 = vmatpush3.msk.msra.mxu1 %vm589_vm0, %v15254_v36  ;;  %13451 = vmatprep.mubr.msk.f32.mxu1 %vm492_vm1, %v19706_v16  ;;  %v19720_v36 = vld [vmem:[#allocation21_spill] sm:$0xff] }
  0xb6   : > { %13501 = vmatprep.mubr.msk.f32.mxu0 %vm492_vm1, %v14980_v51 }
  0xb7   : > { %13502 = vmatmul.mubr.msk.f32.gmra.mxu0 %vm492_vm1, %v14994_v53 }
  0xb8   : > { %13452 = vmatmul.mubr.msk.f32.gmra.mxu1 %vm492_vm1, %v19707_v18  ;;  %13504 = vmatprep.mubr.msk.f32.mxu0 %vm492_vm1, %v15000_v55  ;;  %v19723_v55 = vld [vmem:[#allocation24_spill] sm:$0xff] }
  0xb9   : > { %13454 = vmatprep.mubr.msk.f32.mxu1 %vm492_vm1, %v19708_v20 }
  0xbb   : > { %13505 = vmatmul.mubr.msk.f32.gmra.mxu0 %vm492_vm1, %v15014_v57  ;;  %v19724_v57 = vld [vmem:[#allocation25_spill] sm:$0xff] }
  0xbc   : > { %13455 = vmatmul.mubr.msk.f32.gmra.mxu1 %vm492_vm1, %v19709_v22  ;;  %13507 = vmatprep.mubr.msk.f32.mxu0 %vm492_vm1, %v15020_v59 }
  0xbd   : > { %13457 = vmatprep.mubr.msk.f32.mxu1 %vm492_vm1, %v19710_v24 }
  0xbf   : > { %13508 = vmatmul.mubr.msk.f32.gmra.mxu0 %vm492_vm1, %v15034_v61 }
  0xc0   : > { %13458 = vmatmul.mubr.msk.f32.gmra.mxu1 %vm492_vm1, %v19711_v26  ;;  %13510 = vmatprep.mubr.msk.f32.mxu0 %vm492_vm1, %v15040_v63 }
  0xc1   : > { %13460 = vmatprep.mubr.msk.f32.mxu1 %vm492_vm1, %v19712_v28 }
  0xc3   : > { %13511 = vmatmul.mubr.msk.f32.gmra.mxu0 %vm492_vm1, %v15054_v1 }
  0xc4   : > { %13461 = vmatmul.mubr.msk.f32.gmra.mxu1 %vm492_vm1, %v19713_v29  ;;  %13513 = vmatprep.mubr.msk.f32.mxu0 %vm492_vm1, %v15060_v3 }
  0xc5   : > { %13463 = vmatprep.mubr.msk.f32.mxu1 %vm492_vm1, %v19714_v30 }
  0xc7   : > { %13514 = vmatmul.mubr.msk.f32.gmra.mxu0 %vm492_vm1, %v15074_v9 }
  0xc8   : > { %13464 = vmatmul.mubr.msk.f32.gmra.mxu1 %vm492_vm1, %v19715_v31  ;;  %13516 = vmatprep.mubr.msk.f32.mxu0 %vm492_vm1, %v15080_v37 }
  0xc9   : > { %13466 = vmatprep.mubr.msk.f32.mxu1 %vm492_vm1, %v19716_v32 }
  0xcb   : > { %13517 = vmatmul.mubr.msk.f32.gmra.mxu0 %vm492_vm1, %v15094_v39 }
  0xcc   : > { %13467 = vmatmul.mubr.msk.f32.gmra.mxu1 %vm492_vm1, %v19717_v33  ;;  %13519 = vmatprep.mubr.msk.f32.mxu0 %vm492_vm1, %v15100_v5  ;;  %v19729_v5 = vld [vmem:[#allocation28_spill] sm:$0xff] }
  0xcd   : > { %13469 = vmatprep.mubr.msk.f32.mxu1 %vm492_vm1, %v19718_v34 }
  0xcf   : > { %13520 = vmatmul.mubr.msk.f32.gmra.mxu0 %vm492_vm1, %v15114_v38  ;;  %v19732_v38 = vld [vmem:[#allocation30_spill] sm:$0xff] }
  0xd0   : > { %13470 = vmatmul.mubr.msk.f32.gmra.mxu1 %vm492_vm1, %v19719_v35  ;;  %13522 = vmatprep.mubr.msk.f32.mxu0 %vm492_vm1, %v15120_v0  ;;  %v19726_v0 = vld [vmem:[#allocation26_spill] sm:$0xff] }
  0xd1   : > { %13472 = vmatprep.mubr.msk.f32.mxu1 %vm492_vm1, %v19720_v36 }
  0xd3   : > { %v15473_v41 = vpop.f32.mrf.mxu0  ;;  %13523 = vmatmul.mubr.msk.f32.gmra.mxu0 %vm492_vm1, %v15134_v2 }
  0xd4   : > { %v15475_v43 = vpop.f32.mrf.mxu1  ;;  %13473 = vmatmul.mubr.msk.f32.gmra.mxu1 %vm492_vm1, %v19721_v44  ;;  %13525 = vmatprep.mubr.msk.f32.mxu0 %vm492_vm1, %v15140_v60 }
  0xd5   : > { %13475 = vmatprep.mubr.msk.f32.mxu1 %vm492_vm1, %v19722_v45  ;;  %v15485_v47 = vpop.f32.mrf.mxu0 }
  0xd6   : > { %v15487_v49 = vpop.f32.mrf.mxu1 }
  0xd7   : > { %v15489_v51 = vpop.f32.mrf.mxu0  ;;  %13526 = vmatmul.mubr.msk.f32.gmra.mxu0 %vm492_vm1, %v15154_v62  ;;  %v19727_v62 = vld [vmem:[#allocation27_spill] sm:$0xff] }
  0xd8   : > { %v15491_v53 = vpop.f32.mrf.mxu1  ;;  %13476 = vmatmul.mubr.msk.f32.gmra.mxu1 %vm492_vm1, %v19723_v55  ;;  %13528 = vmatprep.mubr.msk.f32.mxu0 %vm492_vm1, %v15160_v56 }
  0xd9   : > { %13478 = vmatprep.mubr.msk.f32.mxu1 %vm492_vm1, %v19724_v57  ;;  %v15501_v59 = vpop.f32.mrf.mxu0 }
  0xda   : > { %v15503_v60 = vpop.f32.mrf.mxu1 }
  0xdb   : > { %19725 = vst [vmem:[#allocation5_spill] sm:$0xff] %v15503_v60  ;;  %v15505_v61 = vpop.f32.mrf.mxu0  ;;  %13529 = vmatmul.mubr.msk.f32.gmra.mxu0 %vm492_vm1, %v15174_v58  ;;  %v19730_v58 = vld [vmem:[#allocation29_spill] sm:$0xff] }
  0xdc   : > { %v15507_v63 = vpop.f32.mrf.mxu1  ;;  %13479 = vmatmul.mubr.msk.f32.gmra.mxu1 %vm492_vm1, %v19726_v0  ;;  %13531 = vmatprep.mubr.msk.f32.mxu0 %vm492_vm1, %v15180_v52 }
  0xdd   : > { %13481 = vmatprep.mubr.msk.f32.mxu1 %vm492_vm1, %v19727_v62  ;;  %v15517_v56 = vpop.f32.mrf.mxu0 }
  0xde   : > { %v15519_v1 = vpop.f32.mrf.mxu1 }
  0xdf   : > { %19728 = vst [vmem:[#allocation6_spill] sm:$0xff] %v15519_v1  ;;  %v15521_v2 = vpop.f32.mrf.mxu0  ;;  %13532 = vmatmul.mubr.msk.f32.gmra.mxu0 %vm492_vm1, %v15194_v54  ;;  %v19733_v54 = vld [vmem:[#allocation31_spill] sm:$0xff] }
  0xe0   : > { %v15523_v3 = vpop.f32.mrf.mxu1  ;;  %13482 = vmatmul.mubr.msk.f32.gmra.mxu1 %vm492_vm1, %v19729_v5  ;;  %13534 = vmatprep.mubr.msk.f32.mxu0 %vm492_vm1, %v15200_v48 }
  0xe1   : > { %13484 = vmatprep.mubr.msk.f32.mxu1 %vm492_vm1, %v19730_v58  ;;  %v15533_v52 = vpop.f32.mrf.mxu0 }
  0xe2   : > { %v15535_v9 = vpop.f32.mrf.mxu1 }
  0xe3   : > { %19731 = vst [vmem:[#allocation7_spill] sm:$0xff] %v15535_v9  ;;  %v15537_v10 = vpop.f32.mrf.mxu0  ;;  %13535 = vmatmul.mubr.msk.f32.gmra.mxu0 %vm492_vm1, %v15214_v50  ;;  %v19735_v50 = vld [vmem:[#allocation32_spill] sm:$0xff]  ;;  %v11437_v9 = vld [vmem:[%s14745_s12 + $0x198] sm:$0xff] }
  0xe4   : > { %v15539_v37 = vpop.f32.mrf.mxu1  ;;  %13485 = vmatmul.mubr.msk.f32.gmra.mxu1 %vm492_vm1, %v19732_v38  ;;  %13537 = vmatprep.mubr.msk.f32.mxu0 %vm492_vm1, %v15220_v42 }
  0xe5   : > { %13487 = vmatprep.mubr.msk.f32.mxu1 %vm492_vm1, %v19733_v54  ;;  %v15549_v48 = vpop.f32.mrf.mxu0 }
  0xe6   : > { %v15551_v39 = vpop.f32.mrf.mxu1 }
  0xe7   : > { %19734 = vst [vmem:[#allocation8_spill] sm:$0xff] %v15551_v39  ;;  %v15553_v7 = vpop.f32.mrf.mxu0  ;;  %13538 = vmatmul.mubr.msk.f32.gmra.mxu0 %vm492_vm1, %v15234_v46  ;;  %v15570_v39 = vld [vmem:[%s14745_s12 + $0x182] sm:$0xff]  ;;  %v15585_v46 = vld [vmem:[%s14745_s12 + $0x18a] sm:$0xff] }
  0xe8   : > { %v15555_v12 = vpop.f32.mrf.mxu1  ;;  %13488 = vmatmul.mubr.msk.f32.gmra.mxu1 %vm492_vm1, %v15217_v40  ;;  %13540 = vmatprep.mubr.msk.f32.mxu0 %vm492_vm1, %v15378_v4  ;;  %19737 = vst [vmem:[#allocation10_spill] sm:$0xff] %v15570_v39  ;;  %19740 = vst [vmem:[#allocation12_spill] sm:$0xff] %v15585_v46  ;;  %v11438_v4 = vld [vmem:[%s14745_s12 + $0x1a0] sm:$0xff] }
  0xe9   : > { %13490 = vmatprep.mubr.msk.f32.mxu1 %vm492_vm1, %v19735_v50  ;;  %v15565_v42 = vpop.f32.mrf.mxu0 }
  0xea   : > { %v15567_v14 = vpop.f32.mrf.mxu1 }
  0xeb   : > { %19736 = vst [vmem:[#allocation9_spill] sm:$0xff] %v15567_v14  ;;  %v15573_v1 = vpop.f32.mrf.mxu0  ;;  %13541 = vmatmul.mubr.msk.f32.gmra.mxu0 %vm492_vm1, %v15392_v8 }
  0xec   : > { %v15575_v60 = vpop.f32.mrf.mxu1  ;;  %13491 = vmatmul.mubr.msk.f32.gmra.mxu1 %vm492_vm1, %v19739_v11  ;;  %13543 = vmatprep.mubr.msk.f32.mxu0 %vm492_vm1, %v11437_v9 }
  0xed   : > { %19738 = vst [vmem:[#allocation11_spill] sm:$0xff] %v15575_v60  ;;  %13493 = vmatprep.mubr.msk.f32.mxu1 %vm492_vm1, %v15570_v39  ;;  %v15588_v50 = vpop.f32.mrf.mxu0 }
  0xee   : > { %v15590_v14 = vpop.f32.mrf.mxu1 }
  0xef   : > { %19741 = vst [vmem:[#allocation13_spill] sm:$0xff] %v15590_v14  ;;  %v15592_v6 = vpop.f32.mrf.mxu0  ;;  %13544 = vmatmul.mubr.msk.f32.gmra.mxu0 %vm492_vm1, %v11438_v4 }
  0xf0   : > { %v15594_v60 = vpop.f32.mrf.mxu1  ;;  %13494 = vmatmul.mubr.msk.f32.gmra.mxu1 %vm492_vm1, %v15585_v46  ;;  %13598 = vmatprep.mubr.msk.f32.mxu0 %vm492_vm1, %v19706_v16 }
  0xf1   : > { %19742 = vst [vmem:[#allocation14_spill] sm:$0xff] %v15594_v60  ;;  %13548 = vmatprep.mubr.msk.f32.mxu1 %vm492_vm1, %v14790_v13  ;;  %v15603_v8 = vpop.f32.mrf.mxu0 }
  0xf2   : > { %v15605_v11 = vpop.f32.mrf.mxu1 }
  0xf3   : > { %19743 = vst [vmem:[#allocation15_spill] sm:$0xff] %v15605_v11  ;;  %v13300_v14 = vpop.f32.mrf.mxu0  ;;  %13599 = vmatmul.mubr.msk.f32.vlgmr.msra.gmra.mxu0 %vm492_vm1, %v19707_v18 }
  0xf4   : > { %v13250_v9 = vpop.f32.mrf.mxu1  ;;  %13549 = vmatmul.mubr.msk.f32.vlgmr.msra.gmra.mxu1 %vm492_vm1, %v14808_v15  ;;  %13601 = vmatprep.mubr.msk.f32.mxu0 %vm492_vm1, %v19708_v20 }
  0xf5   : > { %v989_v4 = vadd.f32 %v13250_v9, %v15473_v41  ;;  %13551 = vmatprep.mubr.msk.f32.mxu1 %vm492_vm1, %v14814_v17  ;;  %v1341_v16 = vpop.f32.mrf.mxu0  ;;  %v11483_v9 = vld [vmem:[%s14745_s12 + $0xa9] sm:$0xff] }
  0xf6   : > { %v983_v13 = vpop.f32.mrf.mxu1 }
  0xf7   : > { %v15616_v60 = vadd.f32 %v13300_v14, %v989_v4  ;;  %v984_v11 = vadd.f32 %v983_v13, %v15485_v47  ;;  %v13303_v39 = vpop.f32.mrf.mxu0  ;;  %13602 = vmatmul.mubr.msk.f32.gmra.mxu0 %vm492_vm1, %v19709_v22 }
  0xf8   : > { %v13253_v46 = vpop.f32.mrf.mxu1  ;;  %13552 = vmatmul.mubr.msk.f32.gmra.mxu1 %vm492_vm1, %v14828_v19  ;;  %13604 = vmatprep.mubr.msk.f32.mxu0 %vm492_vm1, %v19710_v24 }
  0xf9   : > { %v15623_v15 = vadd.f32 %v1341_v16, %v984_v11  ;;  %v999_v17 = vadd.f32 %v13253_v46, %v15489_v51  ;;  %13554 = vmatprep.mubr.msk.f32.mxu1 %vm492_vm1, %v14834_v21  ;;  %v1351_v20 = vpop.f32.mrf.mxu0  ;;  %v11484_v16 = vld [vmem:[%s14745_s12 + $0xb1] sm:$0xff] }
  0xfa   : > { %v993_v18 = vpop.f32.mrf.mxu1 }
  0xfb   : > { %v15630_v41 = vadd.f32 %v13303_v39, %v999_v17  ;;  %v994_v19 = vadd.f32 %v993_v18, %v15501_v59  ;;  %v13306_v14 = vpop.f32.mrf.mxu0  ;;  %13605 = vmatmul.mubr.msk.f32.gmra.mxu0 %vm492_vm1, %v19711_v26  ;;  %v11481_v59 = vld [vmem:[%s14745_s12 + $0x91] sm:$0xff] }
  0xfc   : > { %v13256_v47 = vpop.f32.mrf.mxu1  ;;  %13555 = vmatmul.mubr.msk.f32.gmra.mxu1 %vm492_vm1, %v14848_v23  ;;  %13607 = vmatprep.mubr.msk.f32.mxu0 %vm492_vm1, %v19712_v28 }
  0xfd   : > { %v15637_v22 = vadd.f32 %v1351_v20, %v994_v19  ;;  %v1009_v21 = vadd.f32 %v13256_v47, %v15505_v61  ;;  %13557 = vmatprep.mubr.msk.f32.mxu1 %vm492_vm1, %v14854_v25  ;;  %v1361_v51 = vpop.f32.mrf.mxu0  ;;  %v11482_v61 = vld [vmem:[%s14745_s12 + $0x99] sm:$0xff]  ;;  %v11485_v20 = vld [vmem:[%s14745_s12 + $0xc1] sm:$0xff] }
  0xfe   : > { %v1003_v24 = vpop.f32.mrf.mxu1 }
  0xff   : > { %v15645_v39 = vadd.f32 %v13306_v14, %v1009_v21  ;;  %v1004_v23 = vadd.f32 %v1003_v24, %v15517_v56  ;;  %v13309_v46 = vpop.f32.mrf.mxu0  ;;  %13608 = vmatmul.mubr.msk.f32.gmra.mxu0 %vm492_vm1, %v19713_v29  ;;  %v11486_v21 = vld [vmem:[%s14745_s12 + $0xc9] sm:$0xff] }
 0x100   : > { %v13259_v26 = vpop.f32.mrf.mxu1  ;;  %13558 = vmatmul.mubr.msk.f32.gmra.mxu1 %vm492_vm1, %v14868_v27  ;;  %13610 = vmatprep.mubr.msk.f32.mxu0 %vm492_vm1, %v19714_v30 }
 0x101   : > { %v15652_v25 = vadd.f32 %v1361_v51, %v1004_v23  ;;  %v1019_v28 = vadd.f32 %v13259_v26, %v15521_v2  ;;  %13560 = vmatprep.mubr.msk.f32.mxu1 %vm492_vm1, %v11481_v59  ;;  %v1371_v11 = vpop.f32.mrf.mxu0  ;;  %v11487_v51 = vld [vmem:[%s14745_s12 + $0xd9] sm:$0xff] }
 0x102   : > { %v1013_v56 = vpop.f32.mrf.mxu1 }
 0x103   : > { %v15660_v4 = vadd.f32 %v13309_v46, %v1019_v28  ;;  %v1014_v27 = vadd.f32 %v1013_v56, %v15533_v52  ;;  %v13312_v13 = vpop.f32.mrf.mxu0  ;;  %13611 = vmatmul.mubr.msk.f32.gmra.mxu0 %vm492_vm1, %v19715_v31  ;;  %v11609_v52 = vld [vmem:[%s19587_s3 + $0x38] sm:$0xff]  ;;  %v11488_v46 = vld [vmem:[%s14745_s12 + $0xe1] sm:$0xff] }
 0x104   : > { %v13262_v29 = vpop.f32.mrf.mxu1  ;;  %13561 = vmatmul.mubr.msk.f32.gmra.mxu1 %vm492_vm1, %v11482_v61  ;;  %13613 = vmatprep.mubr.msk.f32.mxu0 %vm492_vm1, %v19716_v32  ;;  %v11489_v61 = vld [vmem:[%s14745_s12 + $0xf1] sm:$0xff] }
 0x105   : > { %v15666_v2 = vadd.f32 %v1371_v11, %v1014_v27  ;;  %v1029_v30 = vadd.f32 %v13262_v29, %v15537_v10  ;;  %13563 = vmatprep.mubr.msk.f32.mxu1 %vm492_vm1, %v11483_v9  ;;  %v1381_v18 = vpop.f32.mrf.mxu0  ;;  %13646 = vmatprep.subr.mxu1 %v11609_v52  ;;  %v11490_v27 = vld [vmem:[%s14745_s12 + $0xf9] sm:$0xff] }
 0x106   : > { %v1023_v17 = vpop.f32.mrf.mxu1  ;;  %13647 = vmatpush3.msra.mxu1 %v11609_v52 }
 0x107   : > { %v15677_v31 = vadd.f32 %v13312_v13, %v1029_v30  ;;  %v1024_v10 = vadd.f32 %v1023_v17, %v15549_v48  ;;  %v13315_v47 = vpop.f32.mrf.mxu0  ;;  %13614 = vmatmul.mubr.msk.f32.gmra.mxu0 %vm492_vm1, %v19717_v33  ;;  %v11491_v13 = vld [vmem:[%s14745_s12 + $0x109] sm:$0xff]  ;;  %v11492_v17 = vld [vmem:[%s14745_s12 + $0x111] sm:$0xff] }
 0x108   : > { %v13265_v19 = vpop.f32.mrf.mxu1  ;;  %13564 = vmatmul.mubr.msk.f32.gmra.mxu1 %vm492_vm1, %v11484_v16  ;;  %13616 = vmatprep.mubr.msk.f32.mxu0 %vm492_vm1, %v19718_v34 }
 0x109   : > { %v15683_v32 = vadd.f32 %v1381_v18, %v1024_v10  ;;  %v1039_v14 = vadd.f32 %v13265_v19, %v15553_v7  ;;  %13566 = vmatprep.mubr.msk.f32.mxu1 %vm492_vm1, %v11485_v20  ;;  %v1391_v24 = vpop.f32.mrf.mxu0  ;;  %v11493_v10 = vld [vmem:[%s14745_s12 + $0x121] sm:$0xff] }
 0x10a   : > { %v1033_v48 = vpop.f32.mrf.mxu1 }
 0x10b   : > { %v15691_v59 = vadd.f32 %v13315_v47, %v1039_v14  ;;  %v1034_v23 = vadd.f32 %v1033_v48, %v15565_v42  ;;  %v13318_v26 = vpop.f32.mrf.mxu0  ;;  %13617 = vmatmul.mubr.msk.f32.gmra.mxu0 %vm492_vm1, %v19719_v35 }
 0x10c   : > { %v13268_v33 = vpop.f32.mrf.mxu1  ;;  %13567 = vmatmul.mubr.msk.f32.gmra.mxu1 %vm492_vm1, %v11486_v21  ;;  %13619 = vmatprep.mubr.msk.f32.mxu0 %vm492_vm1, %v19720_v36 }
 0x10d   : > { %v15697_v7 = vadd.f32 %v1391_v24, %v1034_v23  ;;  %v1049_v34 = vadd.f32 %v13268_v33, %v15573_v1  ;;  %13569 = vmatprep.mubr.msk.f32.mxu1 %vm492_vm1, %v11487_v51  ;;  %v1401_v42 = vpop.f32.mrf.mxu0  ;;  %v11495_v24 = vld [vmem:[%s14745_s12 + $0x139] sm:$0xff] }
 0x10e   : > { %v1043_v28 = vpop.f32.mrf.mxu1 }
 0x10f   : > { %v15705_v56 = vadd.f32 %v13318_v26, %v1049_v34  ;;  %v1044_v11 = vadd.f32 %v1043_v28, %v15588_v50  ;;  %v13321_v9 = vpop.f32.mrf.mxu0  ;;  %13620 = vmatmul.mubr.msk.f32.gmra.mxu0 %vm492_vm1, %v19721_v44  ;;  %v11497_v34 = vld [vmem:[%s14745_s12 + $0x151] sm:$0xff] }
 0x110   : > { %v13271_v35 = vpop.f32.mrf.mxu1  ;;  %13570 = vmatmul.mubr.msk.f32.gmra.mxu1 %vm492_vm1, %v11488_v46  ;;  %13622 = vmatprep.mubr.msk.f32.mxu0 %vm492_vm1, %v19722_v45 }
 0x111   : > { %v15711_v1 = vadd.f32 %v1401_v42, %v1044_v11  ;;  %v1059_v36 = vadd.f32 %v13271_v35, %v15592_v6  ;;  %13572 = vmatprep.mubr.msk.f32.mxu1 %vm492_vm1, %v11489_v61  ;;  %v1411_v50 = vpop.f32.mrf.mxu0  ;;  %v11499_v11 = vld [vmem:[%s14745_s12 + $0x169] sm:$0xff] }
 0x112   : > { %v1053_v29 = vpop.f32.mrf.mxu1  ;;  %v11565_v35 = vld [vmem:[%s14745_s12 + $0x16a] sm:$0xff] }
 0x113   : > { %v15719_v30 = vadd.f32 %v13321_v9, %v1059_v36  ;;  %v1054_v16 = vadd.f32 %v1053_v29, %v15603_v8  ;;  %v13324_v52 = vpop.f32.mrf.mxu0  ;;  %13623 = vmatmul.mubr.msk.f32.gmra.mxu0 %vm492_vm1, %v19723_v55  ;;  %v11608_v8 = vld [vmem:[%s19587_s3 + $0x30] sm:$0xff]  ;;  %v11607_v29 = vld [vmem:[%s19587_s3 + $0x28] sm:$0xff] }
 0x114   : > { %v13274_v44 = vpop.f32.mrf.mxu1  ;;  %13573 = vmatmul.mubr.msk.f32.gmra.mxu1 %vm492_vm1, %v11490_v27  ;;  %13625 = vmatprep.mubr.msk.f32.mxu0 %vm492_vm1, %v19724_v57  ;;  %v11566_v27 = vld [vmem:[%s14745_s12 + $0x172] sm:$0xff] }
 0x115   : > { %v15725_v6 = vadd.f32 %v1411_v50, %v1054_v16  ;;  %v1069_v45 = vadd.f32 %v13274_v44, %v15475_v43  ;;  %13575 = vmatprep.mubr.msk.f32.mxu1 %vm492_vm1, %v11491_v13  ;;  %v1421_v20 = vpop.f32.mrf.mxu0  ;;  %13648 = vmatprep.subr.mxu1 %v11608_v8 }
 0x116   : > { %v1063_v18 = vpop.f32.mrf.mxu1  ;;  %13649 = vmatpush3.msra.mxu1 %v11608_v8 }
 0x117   : > { %19744 = vst [vmem:[#allocation16_spill] sm:$0xff] %v15725_v6  ;;  %v15736_v55 = vadd.f32 %v13324_v52, %v1069_v45  ;;  %v1064_v43 = vadd.f32 %v1063_v18, %v15487_v49  ;;  %v13327_v47 = vpop.f32.mrf.mxu0  ;;  %13626 = vmatmul.mubr.msk.f32.gmra.mxu0 %vm492_vm1, %v19726_v0  ;;  %v11494_v49 = vld [vmem:[%s14745_s12 + $0x129] sm:$0xff]  ;;  %13650 = vmatprep.subr.mxu1 %v11607_v29  ;;  %v11503_v18 = vld [vmem:[%s14745_s12 + $0x199] sm:$0xff] }
 0x118   : > { %v13277_v19 = vpop.f32.mrf.mxu1  ;;  %13576 = vmatmul.mubr.msk.f32.gmra.mxu1 %vm492_vm1, %v11492_v17  ;;  %13628 = vmatprep.mubr.msk.f32.mxu0 %vm492_vm1, %v19727_v62  ;;  %v11496_v62 = vld [vmem:[%s14745_s12 + $0x141] sm:$0xff]  ;;  %v19748_v52 = vld [vmem:[#allocation34_spill] sm:$0xff] }
 0x119   : > { %v15742_v57 = vadd.f32 %v1421_v20, %v1064_v43  ;;  %v1079_v14 = vadd.f32 %v13277_v19, %v15491_v53  ;;  %13578 = vmatprep.mubr.msk.f32.mxu1 %vm492_vm1, %v11493_v10  ;;  %v15751_v48 = vpop.f32.mrf.mxu0  ;;  %13651 = vmatpush3.msra.mxu1 %v11607_v29  ;;  %v19749_v45 = vld [vmem:[#allocation10_spill] sm:$0xff]  ;;  %v11569_v20 = vld [vmem:[%s14745_s12 + $0x19a] sm:$0xff] }
 0x11a   : > { %v15749_v21 = vpop.f32.mrf.mxu1 }
 0x11b   : > { %19745 = vst [vmem:[#allocation17_spill] sm:$0xff] %v15742_v57  ;;  %v15754_v51 = vadd.f32 %v13327_v47, %v1079_v14  ;;  %v13330_v23 = vpop.f32.mrf.mxu0  ;;  %13629 = vmatmul.mubr.msk.f32.gmra.mxu0 %vm492_vm1, %v19729_v5  ;;  %v19752_v47 = vld [vmem:[#allocation4_spill] sm:$0xff]  ;;  %v19754_v14 = vld [vmem:[#allocation11_spill] sm:$0xff] }
 0x11c   : > { %v13280_v0 = vpop.f32.mrf.mxu1  ;;  %13579 = vmatmul.mubr.msk.f32.gmra.mxu1 %vm492_vm1, %v11494_v49  ;;  %13631 = vmatprep.mubr.msk.f32.mxu0 %vm492_vm1, %v19730_v58  ;;  %v11498_v58 = vld [vmem:[%s14745_s12 + $0x159] sm:$0xff] }
 0x11d   : > { %v1089_v53 = vadd.f32 %v13280_v0, %v15507_v63  ;;  %13581 = vmatprep.mubr.msk.f32.mxu1 %vm492_vm1, %v11495_v24  ;;  %v15766_v26 = vpop.f32.mrf.mxu0  ;;  %v11504_v24 = vld [vmem:[%s14745_s12 + $0x1a1] sm:$0xff] }
 0x11e   : > { %v15764_v33 = vpop.f32.mrf.mxu1  ;;  %v11570_v0 = vld [vmem:[%s14745_s12 + $0x1a2] sm:$0xff] }
 0x11f   : > { %v15769_v46 = vadd.f32 %v13330_v23, %v1089_v53  ;;  %v13333_v5 = vpop.f32.mrf.mxu0  ;;  %13632 = vmatmul.mubr.msk.f32.gmra.mxu0 %vm492_vm1, %v19732_v38 }
 0x120   : > { %v13283_v28 = vpop.f32.mrf.mxu1  ;;  %13582 = vmatmul.mubr.msk.f32.gmra.mxu1 %vm492_vm1, %v11496_v62  ;;  %13634 = vmatprep.mubr.msk.f32.mxu0 %vm492_vm1, %v19733_v54  ;;  %v11500_v54 = vld [vmem:[%s14745_s12 + $0x171] sm:$0xff] }
 0x121   : > { %v1099_v63 = vadd.f32 %v13283_v28, %v15523_v3  ;;  %13584 = vmatprep.mubr.msk.f32.mxu1 %vm492_vm1, %v11497_v34  ;;  %v15781_v61 = vpop.f32.mrf.mxu0 }
 0x122   : > { %v15779_v42 = vpop.f32.mrf.mxu1 }
 0x123   : > { %v15785_v9 = vadd.f32 %v13333_v5, %v1099_v63  ;;  %v13336_v38 = vpop.f32.mrf.mxu0  ;;  %13635 = vmatmul.mubr.msk.f32.gmra.mxu0 %vm492_vm1, %v15217_v40  ;;  %v19757_v5 = vld [vmem:[#allocation14_spill] sm:$0xff] }
 0x124   : > { %v13286_v36 = vpop.f32.mrf.mxu1  ;;  %13585 = vmatmul.mubr.msk.f32.gmra.mxu1 %vm492_vm1, %v11498_v58  ;;  %13637 = vmatprep.mubr.msk.f32.mxu0 %vm492_vm1, %v11565_v35 }
 0x125   : > { %v1109_v3 = vadd.f32 %v13286_v36, %v15539_v37  ;;  %13587 = vmatprep.mubr.msk.f32.mxu1 %vm492_vm1, %v11499_v11  ;;  %v15800_v13 = vpop.f32.mrf.mxu0 }
 0x126   : > { %v15798_v50 = vpop.f32.mrf.mxu1  ;;  %19747 = vst [vmem:[#allocation19_spill] sm:$0xff] %v15800_v13 }
 0x127   : > { %19746 = vst [vmem:[#allocation18_spill] sm:$0xff] %v15798_v50  ;;  %v15802_v40 = vadd.f32 %v13336_v38, %v1109_v3  ;;  %v13339_v16 = vpop.f32.mrf.mxu0  ;;  %13638 = vmatmul.mubr.msk.f32.gmra.mxu0 %vm492_vm1, %v11566_v27 }
 0x128   : > { %v13289_v37 = vpop.f32.mrf.mxu1  ;;  %13588 = vmatmul.mubr.msk.f32.gmra.mxu1 %vm492_vm1, %v11500_v54  ;;  %13640 = vmatprep.mubr.msk.f32.mxu0 %vm492_vm1, %v19749_v45  ;;  %v15851_v54 = vld [vmem:[%s19587_s3 + $0x20] sm:$0xff]  ;;  %v4013_v45 = vld [vmem:[%s19587_s3 + $0x18] sm:$0xff] }
 0x129   : > { %v1119_v44 = vadd.f32 %v13289_v37, %v15555_v12  ;;  %13590 = vmatprep.mubr.msk.f32.mxu1 %vm492_vm1, %v19748_v52  ;;  %v15813_v8 = vpop.f32.mrf.mxu0  ;;  %v19753_v12 = vld [vmem:[#allocation12_spill] sm:$0xff]  ;;  %13652 = vmatprep.subr.mxu1 %v15851_v54  ;;  %v14675_v37 = vmov 0.0  }
 0x12a   : > { %v15811_v17 = vpop.f32.mrf.mxu1  ;;  %19751 = vst [vmem:[#allocation21_spill] sm:$0xff] %v15813_v8  ;;  %287 = vst.msk [vmem:[#allocation2 + $0x30] sm:$0xff] %vm279_vm2, %v14675_v37  ;;  %13653 = vmatpush3.msra.mxu1 %v15851_v54  ;;  %13702 = vmatprep.subr.mxu0 %v4013_v45 }
 0x12b   : > { %19750 = vst [vmem:[#allocation20_spill] sm:$0xff] %v15811_v17  ;;  %v15817_v10 = vadd.f32 %v13339_v16, %v1119_v44  ;;  %v13342_v19 = vpop.f32.mrf.mxu0  ;;  %13641 = vmatmul.mubr.msk.f32.gmra.mxu0 %vm492_vm1, %v19753_v12  ;;  %280 = vst.msk [vmem:[#allocation2] sm:$0xff] %vm279_vm2, %v14675_v37 }
 0x12c   : > { %v13292_v43 = vpop.f32.mrf.mxu1  ;;  %13591 = vmatmul.mubr.msk.f32.gmra.mxu1 %vm492_vm1, %v19752_v47  ;;  %13643 = vmatprep.mubr.msk.f32.mxu0 %vm492_vm1, %v11569_v20  ;;  %281 = vst.msk [vmem:[#allocation2 + $0x8] sm:$0xff] %vm279_vm2, %v14675_v37  ;;  %282 = vst.msk [vmem:[#allocation2 + $0x10] sm:$0xff] %vm279_vm2, %v14675_v37 }
 0x12d   : > { %v1129_v49 = vadd.f32 %v13292_v43, %v19754_v14  ;;  %13593 = vmatprep.mubr.msk.f32.mxu1 %vm492_vm1, %v11503_v18  ;;  %v15830_v53 = vpop.f32.mrf.mxu0  ;;  %285 = vst.msk [vmem:[#allocation2 + $0x20] sm:$0xff] %vm279_vm2, %v14675_v37  ;;  %286 = vst.msk [vmem:[#allocation2 + $0x28] sm:$0xff] %vm279_vm2, %v14675_v37  ;;  %13703 = vmatpush3.msra.mxu0 %v4013_v45  ;;  %v4011_v14 = vld [vmem:[%s19587_s3 + $0x8] sm:$0xff] }
 0x12e   : > { %v15828_v23 = vpop.f32.mrf.mxu1  ;;  %19756 = vst [vmem:[#allocation23_spill] sm:$0xff] %v15830_v53  ;;  %289 = vst.msk [vmem:[#allocation2 + $0x40] sm:$0xff] %vm279_vm2, %v14675_v37 }
 0x12f   : > { %19755 = vst [vmem:[#allocation22_spill] sm:$0xff] %v15828_v23  ;;  %v15832_v62 = vadd.f32 %v13342_v19, %v1129_v49  ;;  %v13345_v28 = vpop.f32.mrf.mxu0  ;;  %13644 = vmatmul.mubr.msk.f32.gmra.mxu0 %vm492_vm1, %v11570_v0  ;;  %290 = vst.msk [vmem:[#allocation2 + $0x48] sm:$0xff] %vm279_vm2, %v14675_v37  ;;  %v4012_v19 = vld [vmem:[%s19587_s3 + $0x10] sm:$0xff]  ;;  %v4010_v0 = vld [vmem:[%s19587_s3] sm:$0xff] }
 0x130   : > { %v13295_v34 = vpop.f32.mrf.mxu1  ;;  %13594 = vmatmul.mubr.msk.f32.gmra.mxu1 %vm492_vm1, %v11504_v24  ;;  %291 = vst.msk [vmem:[#allocation2 + $0x50] sm:$0xff] %vm279_vm2, %v14675_v37  ;;  %293 = vst.msk [vmem:[#allocation2 + $0x60] sm:$0xff] %vm279_vm2, %v14675_v37  ;;  %13704 = vmatprep.subr.mxu0 %v4012_v19 }
 0x131   : > { %v1139_v63 = vadd.f32 %v13295_v34, %v19757_v5  ;;  %v15839_v11 = vpop.f32.mrf.mxu0  ;;  %294 = vst.msk [vmem:[#allocation2 + $0x68] sm:$0xff] %vm279_vm2, %v14675_v37  ;;  %295 = vst.msk [vmem:[#allocation2 + $0x70] sm:$0xff] %vm279_vm2, %v14675_v37  ;;  %13705 = vmatpush3.msra.mxu0 %v4012_v19 }
 0x132   : > { %v15837_v58 = vpop.f32.mrf.mxu1  ;;  %19759 = vst [vmem:[#allocation25_spill] sm:$0xff] %v15839_v11  ;;  %297 = vst.msk [vmem:[#allocation2 + $0x80] sm:$0xff] %vm279_vm2, %v14675_v37  ;;  %13706 = vmatprep.subr.mxu0 %v4011_v14 }
 0x133   : > { %19758 = vst [vmem:[#allocation24_spill] sm:$0xff] %v15837_v58  ;;  %v15841_v35 = vadd.f32 %v13345_v28, %v1139_v63  ;;  %v15843_v38 = vpop.f32.mrf.mxu0  ;;  %298 = vst.msk [vmem:[#allocation2 + $0x88] sm:$0xff] %vm279_vm2, %v14675_v37  ;;  %13707 = vmatpush3.msra.mxu0 %v4011_v14  ;;  %v4014_v5 = vld [vmem:[#allocation2 + $0x8] sm:$0xff] }
 0x134   : > { %v13350_v36 = vpop.f32.mrf.mxu1  ;;  %299 = vst.msk [vmem:[#allocation2 + $0x90] sm:$0xff] %vm279_vm2, %v14675_v37  ;;  %301 = vst.msk [vmem:[#allocation2 + $0xa0] sm:$0xff] %vm279_vm2, %v14675_v37  ;;  %13708 = vmatprep.subr.mxu0 %v4010_v0  ;;  %v3978_v63 = vld [vmem:[#allocation2 + $0x7] sm:$0xff]  ;;  %13654 = vmatprep.mubr.msk.f32.mxu1 %vm279_vm2, %v4014_v5 }
 0x135   : > { %v15846_v3 = vadd.f32 %v13350_v36, %v15616_v60  ;;  %v15855_v29 = vpop.f32.mrf.mxu0  ;;  %302 = vst.msk [vmem:[#allocation2 + $0xa8] sm:$0xff] %vm279_vm2, %v14675_v37  ;;  %303 = vst.msk [vmem:[#allocation2 + $0xb0] sm:$0xff] %vm279_vm2, %v14675_v37  ;;  %13709 = vmatpush3.msra.mxu0 %v4010_v0  ;;  %13710 = vmatprep.mubr.msk.f32.mxu0 %vm279_vm2, %v3978_v63 }
 0x136   : > { %v15853_v27 = vpop.f32.mrf.mxu1  ;;  %305 = vst.msk [vmem:[#allocation2 + $0xc0] sm:$0xff] %vm279_vm2, %v14675_v37  ;;  %306 = vst.msk [vmem:[#allocation2 + $0xc8] sm:$0xff] %vm279_vm2, %v14675_v37 }
 0x137   : > { %307 = vst.msk [vmem:[#allocation2 + $0xd0] sm:$0xff] %vm279_vm2, %v14675_v37  ;;  %309 = vst.msk [vmem:[#allocation2 + $0xe0] sm:$0xff] %vm279_vm2, %v14675_v37  ;;  %v16076_v60 = vadd.f32 %v15843_v38, %v15846_v3  ;;  %v13403_v44 = vpop.f32.mrf.mxu0  ;;  %v4015_v38 = vld [vmem:[#allocation2 + $0x10] sm:$0xff] }
 0x138   : > { %310 = vst.msk [vmem:[#allocation2 + $0xe8] sm:$0xff] %vm279_vm2, %v14675_v37  ;;  %311 = vst.msk [vmem:[#allocation2 + $0xf0] sm:$0xff] %vm279_vm2, %v14675_v37  ;;  %v13353_v16 = vpop.f32.mrf.mxu1  ;;  %v3979_v3 = vld [vmem:[#allocation2 + $0xf] sm:$0xff]  ;;  %13655 = vmatmul.mubr.msk.f32.vlgmr.msra.gmra.mxu1 %vm279_vm2, %v4015_v38 }
 0x139   : > { %313 = vst.msk [vmem:[#allocation2 + $0x100] sm:$0xff] %vm279_vm2, %v14675_v37  ;;  %314 = vst.msk [vmem:[#allocation2 + $0x108] sm:$0xff] %vm279_vm2, %v14675_v37  ;;  %v1894_v52 = vadd.f32 %v13353_v16, %v15630_v41  ;;  %v16085_v20 = vpop.f32.mrf.mxu0  ;;  %13711 = vmatmul.mubr.msk.f32.vlgmr.msra.gmra.mxu0 %vm279_vm2, %v3979_v3 }
 0x13a   : > { %315 = vst.msk [vmem:[#allocation2 + $0x110] sm:$0xff] %vm279_vm2, %v14675_v37  ;;  %317 = vst.msk [vmem:[#allocation2 + $0x120] sm:$0xff] %vm279_vm2, %v14675_v37  ;;  %v16083_v18 = vpop.f32.mrf.mxu1 }
 0x13b   : > { %318 = vst.msk [vmem:[#allocation2 + $0x128] sm:$0xff] %vm279_vm2, %v14675_v37  ;;  %319 = vst.msk [vmem:[#allocation2 + $0x130] sm:$0xff] %vm279_vm2, %v14675_v37  ;;  %v16087_v43 = vadd.f32 %v13403_v44, %v1894_v52  ;;  %v13406_v12 = vpop.f32.mrf.mxu0 }
 0x13c   : > { %321 = vst.msk [vmem:[#allocation2 + $0x140] sm:$0xff] %vm279_vm2, %v14675_v37  ;;  %322 = vst.msk [vmem:[#allocation2 + $0x148] sm:$0xff] %vm279_vm2, %v14675_v37  ;;  %v13356_v47 = vpop.f32.mrf.mxu1 }
 0x13d   : > { %323 = vst.msk [vmem:[#allocation2 + $0x150] sm:$0xff] %vm279_vm2, %v14675_v37  ;;  %325 = vst.msk [vmem:[#allocation2 + $0x160] sm:$0xff] %vm279_vm2, %v14675_v37  ;;  %v1896_v41 = vadd.f32 %v13356_v47, %v15645_v39  ;;  %v16170_v49 = vpop.f32.mrf.mxu0 }
 0x13e   : > { %326 = vst.msk [vmem:[#allocation2 + $0x168] sm:$0xff] %vm279_vm2, %v14675_v37  ;;  %327 = vst.msk [vmem:[#allocation2 + $0x170] sm:$0xff] %vm279_vm2, %v14675_v37  ;;  %v16168_v39 = vpop.f32.mrf.mxu1 }
 0x13f   : > { %329 = vst.msk [vmem:[#allocation2 + $0x180] sm:$0xff] %vm279_vm2, %v14675_v37  ;;  %330 = vst.msk [vmem:[#allocation2 + $0x188] sm:$0xff] %vm279_vm2, %v14675_v37  ;;  %v16172_v24 = vadd.f32 %v13406_v12, %v1896_v41  ;;  %v13409_v28 = vpop.f32.mrf.mxu0 }
 0x140   : > { %331 = vst.msk [vmem:[#allocation2 + $0x190] sm:$0xff] %vm279_vm2, %v14675_v37  ;;  %333 = vst.msk [vmem:[#allocation2 + $0x1a0] sm:$0xff] %vm279_vm2, %v14675_v37  ;;  %v13359_v34 = vpop.f32.mrf.mxu1 }
 0x141   : > { %334 = vst.msk [vmem:[#allocation2 + $0x1a8] sm:$0xff] %vm279_vm2, %v14675_v37  ;;  %335 = vst.msk [vmem:[#allocation2 + $0x1b0] sm:$0xff] %vm279_vm2, %v14675_v37  ;;  %v1898_v36 = vadd.f32 %v13359_v34, %v15660_v4 }
 0x142   : > { %337 = vst.msk [vmem:[#allocation2 + $0x1c0] sm:$0xff] %vm279_vm2, %v14675_v37  ;;  %338 = vst.msk [vmem:[#allocation2 + $0x1c8] sm:$0xff] %vm279_vm2, %v14675_v37  ;;  %v16179_v54 = vpop.f32.mrf.mxu1 }
 0x143   : > { %339 = vst.msk [vmem:[#allocation2 + $0x1d0] sm:$0xff] %vm279_vm2, %v14675_v37  ;;  %341 = vst.msk [vmem:[#allocation2 + $0x1e0] sm:$0xff] %vm279_vm2, %v14675_v37  ;;  %v16185_v16 = vadd.f32 %v13409_v28, %v1898_v36 }
 0x144   : > { %342 = vst.msk [vmem:[#allocation2 + $0x1e8] sm:$0xff] %vm279_vm2, %v14675_v37  ;;  %343 = vst.msk [vmem:[#allocation2 + $0x1f0] sm:$0xff] %vm279_vm2, %v14675_v37  ;;  %v13362_v44 = vpop.f32.mrf.mxu1 }
 0x145   : > { %345 = vst.msk [vmem:[#allocation2 + $0x200] sm:$0xff] %vm279_vm2, %v14675_v37  ;;  %346 = vst.msk [vmem:[#allocation2 + $0x208] sm:$0xff] %vm279_vm2, %v14675_v37  ;;  %v1900_v4 = vadd.f32 %v13362_v44, %v15677_v31  ;;  %v11677_v31 = vld [vmem:[%s19587_s3 + $0x58] sm:$0xff] }
 0x146   : > { %347 = vst.msk [vmem:[#allocation2 + $0x210] sm:$0xff] %vm279_vm2, %v14675_v37  ;;  %349 = vst.msk [vmem:[#allocation2 + $0x220] sm:$0xff] %vm279_vm2, %v14675_v37  ;;  %v16189_v45 = vpop.f32.mrf.mxu1  ;;  %13758 = vmatprep.subr.mxu1 %v11677_v31 }
 0x147   : > { %350 = vst.msk [vmem:[#allocation2 + $0x228] sm:$0xff] %vm279_vm2, %v14675_v37  ;;  %351 = vst.msk [vmem:[#allocation2 + $0x230] sm:$0xff] %vm279_vm2, %v14675_v37  ;;  %13759 = vmatpush3.msra.mxu1 %v11677_v31 }
 0x148   : > { %353 = vst.msk [vmem:[#allocation3] sm:$0xff] %vm279_vm2, %v14675_v37  ;;  %354 = vst.msk [vmem:[#allocation3 + $0x8] sm:$0xff] %vm279_vm2, %v14675_v37  ;;  %v13365_v12 = vpop.f32.mrf.mxu1 }
 0x149   : > { %355 = vst.msk [vmem:[#allocation3 + $0x10] sm:$0xff] %vm279_vm2, %v14675_v37  ;;  %357 = vst.msk [vmem:[#allocation3 + $0x20] sm:$0xff] %vm279_vm2, %v14675_v37  ;;  %v1902_v14 = vadd.f32 %v13365_v12, %v15691_v59 }
 0x14a   : > { %358 = vst.msk [vmem:[#allocation3 + $0x28] sm:$0xff] %vm279_vm2, %v14675_v37  ;;  %359 = vst.msk [vmem:[#allocation3 + $0x30] sm:$0xff] %vm279_vm2, %v14675_v37  ;;  %v16196_v0 = vpop.f32.mrf.mxu1 }
 0x14b   : > { %361 = vst.msk [vmem:[#allocation3 + $0x40] sm:$0xff] %vm279_vm2, %v14675_v37  ;;  %362 = vst.msk [vmem:[#allocation3 + $0x48] sm:$0xff] %vm279_vm2, %v14675_v37 }
 0x14c   : > { %363 = vst.msk [vmem:[#allocation3 + $0x50] sm:$0xff] %vm279_vm2, %v14675_v37  ;;  %365 = vst.msk [vmem:[#allocation3 + $0x60] sm:$0xff] %vm279_vm2, %v14675_v37  ;;  %v13368_v5 = vpop.f32.mrf.mxu1 }
 0x14d   : > { %366 = vst.msk [vmem:[#allocation3 + $0x68] sm:$0xff] %vm279_vm2, %v14675_v37  ;;  %367 = vst.msk [vmem:[#allocation3 + $0x70] sm:$0xff] %vm279_vm2, %v14675_v37  ;;  %v1904_v36 = vadd.f32 %v13368_v5, %v15705_v56 }
 0x14e   : > { %369 = vst.msk [vmem:[#allocation3 + $0x80] sm:$0xff] %vm279_vm2, %v14675_v37  ;;  %370 = vst.msk [vmem:[#allocation3 + $0x88] sm:$0xff] %vm279_vm2, %v14675_v37  ;;  %v16206_v38 = vpop.f32.mrf.mxu1 }
 0x14f   : > { %371 = vst.msk [vmem:[#allocation3 + $0x90] sm:$0xff] %vm279_vm2, %v14675_v37  ;;  %373 = vst.msk [vmem:[#allocation3 + $0xa0] sm:$0xff] %vm279_vm2, %v14675_v37 }
 0x150   : > { %374 = vst.msk [vmem:[#allocation3 + $0xa8] sm:$0xff] %vm279_vm2, %v14675_v37  ;;  %375 = vst.msk [vmem:[#allocation3 + $0xb0] sm:$0xff] %vm279_vm2, %v14675_v37  ;;  %v13371_v44 = vpop.f32.mrf.mxu1 }
 0x151   : > { %377 = vst.msk [vmem:[#allocation3 + $0xc0] sm:$0xff] %vm279_vm2, %v14675_v37  ;;  %378 = vst.msk [vmem:[#allocation3 + $0xc8] sm:$0xff] %vm279_vm2, %v14675_v37 }
 0x152   : > { %379 = vst.msk [vmem:[#allocation3 + $0xd0] sm:$0xff] %vm279_vm2, %v14675_v37  ;;  %381 = vst.msk [vmem:[#allocation3 + $0xe0] sm:$0xff] %vm279_vm2, %v14675_v37  ;;  %v16213_v12 = vpop.f32.mrf.mxu1 }
 0x153   : > { %382 = vst.msk [vmem:[#allocation3 + $0xe8] sm:$0xff] %vm279_vm2, %v14675_v37  ;;  %383 = vst.msk [vmem:[#allocation3 + $0xf0] sm:$0xff] %vm279_vm2, %v14675_v37 }
 0x154   : > { %385 = vst.msk [vmem:[#allocation3 + $0x100] sm:$0xff] %vm279_vm2, %v14675_v37  ;;  %386 = vst.msk [vmem:[#allocation3 + $0x108] sm:$0xff] %vm279_vm2, %v14675_v37  ;;  %v13374_v11 = vpop.f32.mrf.mxu1 }
 0x155   : > { %387 = vst.msk [vmem:[#allocation3 + $0x110] sm:$0xff] %vm279_vm2, %v14675_v37  ;;  %389 = vst.msk [vmem:[#allocation3 + $0x120] sm:$0xff] %vm279_vm2, %v14675_v37  ;;  %v1908_v56 = vadd.f32 %v13374_v11, %v15736_v55  ;;  %v11676_v55 = vld [vmem:[%s19587_s3 + $0x50] sm:$0xff] }
 0x156   : > { %390 = vst.msk [vmem:[#allocation3 + $0x128] sm:$0xff] %vm279_vm2, %v14675_v37  ;;  %391 = vst.msk [vmem:[#allocation3 + $0x130] sm:$0xff] %vm279_vm2, %v14675_v37  ;;  %v16220_v31 = vpop.f32.mrf.mxu1  ;;  %13760 = vmatprep.subr.mxu1 %v11676_v55 }
 0x157   : > { %393 = vst.msk [vmem:[#allocation3 + $0x140] sm:$0xff] %vm279_vm2, %v14675_v37  ;;  %394 = vst.msk [vmem:[#allocation3 + $0x148] sm:$0xff] %vm279_vm2, %v14675_v37  ;;  %13761 = vmatpush3.msra.mxu1 %v11676_v55 }
 0x158   : > { %395 = vst.msk [vmem:[#allocation3 + $0x150] sm:$0xff] %vm279_vm2, %v14675_v37  ;;  %397 = vst.msk [vmem:[#allocation3 + $0x160] sm:$0xff] %vm279_vm2, %v14675_v37 }
 0x159   : > { %398 = vst.msk [vmem:[#allocation3 + $0x168] sm:$0xff] %vm279_vm2, %v14675_v37  ;;  %399 = vst.msk [vmem:[#allocation3 + $0x170] sm:$0xff] %vm279_vm2, %v14675_v37 }
 0x15a   : > { %401 = vst.msk [vmem:[#allocation3 + $0x180] sm:$0xff] %vm279_vm2, %v14675_v37  ;;  %402 = vst.msk [vmem:[#allocation3 + $0x188] sm:$0xff] %vm279_vm2, %v14675_v37 }
 0x15b   : > { %403 = vst.msk [vmem:[#allocation3 + $0x190] sm:$0xff] %vm279_vm2, %v14675_v37  ;;  %405 = vst.msk [vmem:[#allocation3 + $0x1a0] sm:$0xff] %vm279_vm2, %v14675_v37 }
 0x15c   : > { %406 = vst.msk [vmem:[#allocation3 + $0x1a8] sm:$0xff] %vm279_vm2, %v14675_v37  ;;  %407 = vst.msk [vmem:[#allocation3 + $0x1b0] sm:$0xff] %vm279_vm2, %v14675_v37 }
 0x15d   : > { %409 = vst.msk [vmem:[#allocation3 + $0x1c0] sm:$0xff] %vm279_vm2, %v14675_v37  ;;  %410 = vst.msk [vmem:[#allocation3 + $0x1c8] sm:$0xff] %vm279_vm2, %v14675_v37 }
 0x15e   : > { %411 = vst.msk [vmem:[#allocation3 + $0x1d0] sm:$0xff] %vm279_vm2, %v14675_v37  ;;  %413 = vst.msk [vmem:[#allocation3 + $0x1e0] sm:$0xff] %vm279_vm2, %v14675_v37 }
 0x15f   : > { %414 = vst.msk [vmem:[#allocation3 + $0x1e8] sm:$0xff] %vm279_vm2, %v14675_v37  ;;  %415 = vst.msk [vmem:[#allocation3 + $0x1f0] sm:$0xff] %vm279_vm2, %v14675_v37 }
 0x160   : > { %417 = vst.msk [vmem:[#allocation3 + $0x200] sm:$0xff] %vm279_vm2, %v14675_v37  ;;  %418 = vst.msk [vmem:[#allocation3 + $0x208] sm:$0xff] %vm279_vm2, %v14675_v37 }
 0x161   : > { %419 = vst.msk [vmem:[#allocation3 + $0x210] sm:$0xff] %vm279_vm2, %v14675_v37  ;;  %421 = vst.msk [vmem:[#allocation3 + $0x220] sm:$0xff] %vm279_vm2, %v14675_v37 }
 0x162   : > { %422 = vst.msk [vmem:[#allocation3 + $0x228] sm:$0xff] %vm279_vm2, %v14675_v37  ;;  %423 = vst.msk [vmem:[#allocation3 + $0x230] sm:$0xff] %vm279_vm2, %v14675_v37 }
 0x163   : > { %284 = vst.msk [vmem:[#allocation2 + $0x18] sm:$0x1] %vm283_vm3, %v14675_v37  ;;  %288 = vst.msk [vmem:[#allocation2 + $0x38] sm:$0x1] %vm283_vm3, %v14675_v37 }
 0x164   : > { %292 = vst.msk [vmem:[#allocation2 + $0x58] sm:$0x1] %vm283_vm3, %v14675_v37  ;;  %296 = vst.msk [vmem:[#allocation2 + $0x78] sm:$0x1] %vm283_vm3, %v14675_v37 }
 0x165   : > { %300 = vst.msk [vmem:[#allocation2 + $0x98] sm:$0x1] %vm283_vm3, %v14675_v37  ;;  %304 = vst.msk [vmem:[#allocation2 + $0xb8] sm:$0x1] %vm283_vm3, %v14675_v37 }
 0x166   : > { %308 = vst.msk [vmem:[#allocation2 + $0xd8] sm:$0x1] %vm283_vm3, %v14675_v37  ;;  %312 = vst.msk [vmem:[#allocation2 + $0xf8] sm:$0x1] %vm283_vm3, %v14675_v37 }
 0x167   : > { %316 = vst.msk [vmem:[#allocation2 + $0x118] sm:$0x1] %vm283_vm3, %v14675_v37  ;;  %320 = vst.msk [vmem:[#allocation2 + $0x138] sm:$0x1] %vm283_vm3, %v14675_v37 }
 0x168   : > { %324 = vst.msk [vmem:[#allocation2 + $0x158] sm:$0x1] %vm283_vm3, %v14675_v37  ;;  %328 = vst.msk [vmem:[#allocation2 + $0x178] sm:$0x1] %vm283_vm3, %v14675_v37 }
 0x169   : > { %332 = vst.msk [vmem:[#allocation2 + $0x198] sm:$0x1] %vm283_vm3, %v14675_v37  ;;  %336 = vst.msk [vmem:[#allocation2 + $0x1b8] sm:$0x1] %vm283_vm3, %v14675_v37 }
 0x16a   : > { %340 = vst.msk [vmem:[#allocation2 + $0x1d8] sm:$0x1] %vm283_vm3, %v14675_v37  ;;  %344 = vst.msk [vmem:[#allocation2 + $0x1f8] sm:$0x1] %vm283_vm3, %v14675_v37 }
 0x16b   : > { %348 = vst.msk [vmem:[#allocation2 + $0x218] sm:$0x1] %vm283_vm3, %v14675_v37  ;;  %352 = vst.msk [vmem:[#allocation2 + $0x238] sm:$0x1] %vm283_vm3, %v14675_v37 }
 0x16c   : > { %356 = vst.msk [vmem:[#allocation3 + $0x18] sm:$0x1] %vm283_vm3, %v14675_v37  ;;  %360 = vst.msk [vmem:[#allocation3 + $0x38] sm:$0x1] %vm283_vm3, %v14675_v37 }
 0x16d   : > { %364 = vst.msk [vmem:[#allocation3 + $0x58] sm:$0x1] %vm283_vm3, %v14675_v37  ;;  %368 = vst.msk [vmem:[#allocation3 + $0x78] sm:$0x1] %vm283_vm3, %v14675_v37 }
 0x16e   : > { %372 = vst.msk [vmem:[#allocation3 + $0x98] sm:$0x1] %vm283_vm3, %v14675_v37  ;;  %376 = vst.msk [vmem:[#allocation3 + $0xb8] sm:$0x1] %vm283_vm3, %v14675_v37 }
 0x16f   : > { %380 = vst.msk [vmem:[#allocation3 + $0xd8] sm:$0x1] %vm283_vm3, %v14675_v37  ;;  %384 = vst.msk [vmem:[#allocation3 + $0xf8] sm:$0x1] %vm283_vm3, %v14675_v37 }
 0x170   : > { %388 = vst.msk [vmem:[#allocation3 + $0x118] sm:$0x1] %vm283_vm3, %v14675_v37  ;;  %392 = vst.msk [vmem:[#allocation3 + $0x138] sm:$0x1] %vm283_vm3, %v14675_v37 }
 0x171   : > { %396 = vst.msk [vmem:[#allocation3 + $0x158] sm:$0x1] %vm283_vm3, %v14675_v37  ;;  %400 = vst.msk [vmem:[#allocation3 + $0x178] sm:$0x1] %vm283_vm3, %v14675_v37 }
 0x172   : > { %404 = vst.msk [vmem:[#allocation3 + $0x198] sm:$0x1] %vm283_vm3, %v14675_v37  ;;  %408 = vst.msk [vmem:[#allocation3 + $0x1b8] sm:$0x1] %vm283_vm3, %v14675_v37 }
 0x173   : > { %412 = vst.msk [vmem:[#allocation3 + $0x1d8] sm:$0x1] %vm283_vm3, %v14675_v37  ;;  %416 = vst.msk [vmem:[#allocation3 + $0x1f8] sm:$0x1] %vm283_vm3, %v14675_v37 }
 0x174   : > { %420 = vst.msk [vmem:[#allocation3 + $0x218] sm:$0x1] %vm283_vm3, %v14675_v37  ;;  %424 = vst.msk [vmem:[#allocation3 + $0x238] sm:$0x1] %vm283_vm3, %v14675_v37  ;;  %v16181_v37 = vpop.f32.mrf.mxu0 }
 0x175   : > { %19762 = vst [vmem:[#allocation28_spill] sm:$0xff] %v16213_v12  ;;  %19765 = vst [vmem:[#allocation31_spill] sm:$0xff] %v16220_v31 }
 0x176   : > { %v13412_v52 = vpop.f32.mrf.mxu0 }
 0x177   : > { %v16193_v47 = vadd.f32 %v13412_v52, %v1900_v4  ;;  %v1906_v4 = vadd.f32 %v13371_v44, %v15719_v30 }
 0x178   : > { %v16191_v19 = vpop.f32.mrf.mxu0 }
 0x17a   : > { %v13415_v41 = vpop.f32.mrf.mxu0 }
 0x17b   : > { %v16200_v28 = vadd.f32 %v13415_v41, %v1902_v14 }
 0x17c   : > { %v16198_v34 = vpop.f32.mrf.mxu0 }
 0x17e   : > { %v13418_v63 = vpop.f32.mrf.mxu0 }
 0x17f   : > { %v16210_v59 = vadd.f32 %v13418_v63, %v1904_v36  ;;  %v13377_v36 = vpop.f32.mrf.mxu1 }
 0x180   : > { %v16208_v3 = vpop.f32.mrf.mxu0  ;;  %v1910_v30 = vadd.f32 %v13377_v36, %v15754_v51 }
 0x181   : > { %19760 = vst [vmem:[#allocation26_spill] sm:$0xff] %v16208_v3  ;;  %19761 = vst [vmem:[#allocation27_spill] sm:$0xff] %v16210_v59  ;;  %v16227_v44 = vpop.f32.mrf.mxu1 }
 0x182   : > { %v13421_v52 = vpop.f32.mrf.mxu0  ;;  %19768 = vst [vmem:[#allocation34_spill] sm:$0xff] %v16227_v44 }
 0x183   : > { %v16217_v14 = vadd.f32 %v13421_v52, %v1906_v4  ;;  %v13380_v11 = vpop.f32.mrf.mxu1 }
 0x184   : > { %v16215_v41 = vpop.f32.mrf.mxu0 }
 0x185   : > { %19763 = vst [vmem:[#allocation29_spill] sm:$0xff] %v16215_v41  ;;  %19764 = vst [vmem:[#allocation30_spill] sm:$0xff] %v16217_v14 }
 0x186   : > { %v13424_v58 = vpop.f32.mrf.mxu0 }
 0x187   : > { %v16224_v63 = vadd.f32 %v13424_v58, %v1908_v56  ;;  %v1912_v58 = vadd.f32 %v13380_v11, %v15769_v46  ;;  %v16237_v56 = vpop.f32.mrf.mxu1 }
 0x188   : > { %v16222_v5 = vpop.f32.mrf.mxu0  ;;  %19771 = vst [vmem:[#allocation12_spill] sm:$0xff] %v16237_v56 }
 0x189   : > { %19766 = vst [vmem:[#allocation32_spill] sm:$0xff] %v16222_v5  ;;  %19767 = vst [vmem:[#allocation33_spill] sm:$0xff] %v16224_v63  ;;  %v13383_v36 = vpop.f32.mrf.mxu1 }
 0x18a   : > { %v13427_v53 = vpop.f32.mrf.mxu0 }
 0x18b   : > { %v16231_v52 = vadd.f32 %v13427_v53, %v1910_v30  ;;  %v1914_v53 = vadd.f32 %v13383_v36, %v15785_v9  ;;  %v16244_v30 = vpop.f32.mrf.mxu1 }
 0x18c   : > { %v16229_v23 = vpop.f32.mrf.mxu0  ;;  %19774 = vst [vmem:[#allocation35_spill] sm:$0xff] %v16244_v30 }
 0x18d   : > { %19769 = vst [vmem:[#allocation10_spill] sm:$0xff] %v16229_v23  ;;  %19770 = vst [vmem:[#allocation4_spill] sm:$0xff] %v16231_v52  ;;  %v13386_v63 = vpop.f32.mrf.mxu1 }
 0x18e   : > { %v13430_v4 = vpop.f32.mrf.mxu0  ;;  %v1916_v46 = vadd.f32 %v13386_v63, %v15802_v40  ;;  %v11675_v40 = vld [vmem:[%s19587_s3 + $0x48] sm:$0xff] }
 0x18f   : > { %v16241_v51 = vadd.f32 %v13430_v4, %v1912_v58  ;;  %v16251_v55 = vpop.f32.mrf.mxu1  ;;  %13762 = vmatprep.subr.mxu1 %v11675_v40 }
 0x190   : > { %v16239_v8 = vpop.f32.mrf.mxu0  ;;  %19777 = vst [vmem:[#allocation38_spill] sm:$0xff] %v16251_v55  ;;  %13763 = vmatpush3.msra.mxu1 %v11675_v40  ;;  %v11749_v55 = vld [vmem:[%s19587_s3 + $0x98] sm:$0xff] }
 0x191   : > { %19772 = vst [vmem:[#allocation11_spill] sm:$0xff] %v16239_v8  ;;  %19773 = vst [vmem:[#allocation14_spill] sm:$0xff] %v16241_v51  ;;  %v13389_v58 = vpop.f32.mrf.mxu1 }
 0x192   : > { %v13433_v23 = vpop.f32.mrf.mxu0  ;;  %v1918_v9 = vadd.f32 %v13389_v58, %v15817_v10 }
 0x193   : > { %v16248_v17 = vadd.f32 %v13433_v23, %v1914_v53  ;;  %v16258_v36 = vpop.f32.mrf.mxu1 }
 0x194   : > { %v16246_v52 = vpop.f32.mrf.mxu0  ;;  %19780 = vst [vmem:[#allocation41_spill] sm:$0xff] %v16258_v36 }
 0x195   : > { %19775 = vst [vmem:[#allocation36_spill] sm:$0xff] %v16246_v52  ;;  %19776 = vst [vmem:[#allocation37_spill] sm:$0xff] %v16248_v17  ;;  %v13392_v63 = vpop.f32.mrf.mxu1 }
 0x196   : > { %v13436_v44 = vpop.f32.mrf.mxu0 }
 0x197   : > { %v16255_v4 = vadd.f32 %v13436_v44, %v1916_v46  ;;  %v1920_v44 = vadd.f32 %v13392_v63, %v15832_v62  ;;  %v16268_v46 = vpop.f32.mrf.mxu1 }
 0x198   : > { %v16253_v11 = vpop.f32.mrf.mxu0  ;;  %19783 = vst [vmem:[#allocation44_spill] sm:$0xff] %v16268_v46 }
 0x199   : > { %19778 = vst [vmem:[#allocation39_spill] sm:$0xff] %v16253_v11  ;;  %19779 = vst [vmem:[#allocation40_spill] sm:$0xff] %v16255_v4  ;;  %v13395_v58 = vpop.f32.mrf.mxu1 }
 0x19a   : > { %v13439_v51 = vpop.f32.mrf.mxu0 }
 0x19b   : > { %v16262_v23 = vadd.f32 %v13439_v51, %v1918_v9  ;;  %v1922_v51 = vadd.f32 %v13395_v58, %v15841_v35  ;;  %v16275_v9 = vpop.f32.mrf.mxu1  ;;  %v11674_v35 = vld [vmem:[%s19587_s3 + $0x40] sm:$0xff] }
 0x19c   : > { %v16260_v30 = vpop.f32.mrf.mxu0  ;;  %19786 = vst [vmem:[#allocation47_spill] sm:$0xff] %v16275_v9  ;;  %13764 = vmatprep.subr.mxu1 %v11674_v35 }
 0x19d   : > { %19781 = vst [vmem:[#allocation42_spill] sm:$0xff] %v16260_v30  ;;  %19782 = vst [vmem:[#allocation43_spill] sm:$0xff] %v16262_v23  ;;  %v16281_v11 = vpop.f32.mrf.mxu1  ;;  %13765 = vmatpush3.msra.mxu1 %v11674_v35  ;;  %v11711_v35 = vld [vmem:[%s19587_s3 + $0x68] sm:$0xff] }
 0x19e   : > { %v13442_v53 = vpop.f32.mrf.mxu0  ;;  %13870 = vmatprep.subr.mxu1 %v11749_v55 }
 0x19f   : > { %v16272_v10 = vadd.f32 %v13442_v53, %v1920_v44  ;;  %v16285_v40 = vpop.f32.mrf.mxu1 }
 0x1a0   : > { %v16270_v4 = vpop.f32.mrf.mxu0 }
 0x1a1   : > { %19784 = vst [vmem:[#allocation45_spill] sm:$0xff] %v16270_v4  ;;  %19785 = vst [vmem:[#allocation46_spill] sm:$0xff] %v16272_v10  ;;  %v16289_v53 = vpop.f32.mrf.mxu1  ;;  %v11712_v10 = vld [vmem:[%s19587_s3 + $0x70] sm:$0xff] }
 0x1a2   : > { %v13445_v30 = vpop.f32.mrf.mxu0 }
 0x1a3   : > { %v16279_v36 = vadd.f32 %v13445_v30, %v1922_v51  ;;  %v16296_v58 = vpop.f32.mrf.mxu1  ;;  %v11713_v51 = vld [vmem:[%s19587_s3 + $0x78] sm:$0xff] }
 0x1a4   : > { %v16277_v23 = vpop.f32.mrf.mxu0  ;;  %13814 = vmatprep.subr.mxu0 %v11713_v51 }
 0x1a5   : > { %19787 = vst [vmem:[#allocation48_spill] sm:$0xff] %v16277_v23  ;;  %19788 = vst [vmem:[#allocation49_spill] sm:$0xff] %v16279_v36  ;;  %v16303_v36 = vpop.f32.mrf.mxu1  ;;  %13815 = vmatpush3.msra.mxu0 %v11713_v51  ;;  %v11710_v51 = vld [vmem:[%s19587_s3 + $0x60] sm:$0xff] }
 0x1a6   : > { %v16283_v62 = vpop.f32.mrf.mxu0  ;;  %13816 = vmatprep.subr.mxu0 %v11712_v10 }
 0x1a7   : > { %v16310_v9 = vpop.f32.mrf.mxu1  ;;  %13817 = vmatpush3.msra.mxu0 %v11712_v10 }
 0x1a8   : > { %v16287_v63 = vpop.f32.mrf.mxu0  ;;  %13818 = vmatprep.subr.mxu0 %v11711_v35 }
 0x1a9   : > { %v16317_v46 = vpop.f32.mrf.mxu1  ;;  %13819 = vmatpush3.msra.mxu0 %v11711_v35 }
 0x1aa   : > { %v16291_v44 = vpop.f32.mrf.mxu0  ;;  %13820 = vmatprep.subr.mxu0 %v11710_v51 }
 0x1ab   : > { %v16327_v52 = vpop.f32.mrf.mxu1  ;;  %13821 = vmatpush3.msra.mxu0 %v11710_v51 }
 0x1ac   : > { %v16298_v30 = vpop.f32.mrf.mxu0 }
 0x1ad   : > { %v16331_v8 = vpop.f32.mrf.mxu1 }
 0x1ae   : > { %v16305_v23 = vpop.f32.mrf.mxu0 }
 0x1af   : > { %v16335_v35 = vpop.f32.mrf.mxu1 }
 0x1b0   : > { %v16312_v4 = vpop.f32.mrf.mxu0 }
 0x1b1   : > { %v16339_v13 = vpop.f32.mrf.mxu1 }
 0x1b2   : > { %v16319_v17 = vpop.f32.mrf.mxu0 }
 0x1b3   : > { %v16343_v31 = vpop.f32.mrf.mxu1 }
 0x1b4   : > { %v16329_v10 = vpop.f32.mrf.mxu0  ;;  %19790 = vst [vmem:[#allocation51_spill] sm:$0xff] %v16343_v31 }
 0x1b5   : > { %v16347_v41 = vpop.f32.mrf.mxu1 }
 0x1b6   : > { %v16333_v56 = vpop.f32.mrf.mxu0  ;;  %19792 = vst [vmem:[#allocation53_spill] sm:$0xff] %v16347_v41 }
 0x1b7   : > { %v16351_v51 = vpop.f32.mrf.mxu1 }
 0x1b8   : > { %v16337_v5 = vpop.f32.mrf.mxu0  ;;  %19794 = vst [vmem:[#allocation55_spill] sm:$0xff] %v16351_v51 }
 0x1b9   : > { %v16355_v59 = vpop.f32.mrf.mxu1 }
 0x1ba   : > { %v16341_v14 = vpop.f32.mrf.mxu0  ;;  %19796 = vst [vmem:[#allocation57_spill] sm:$0xff] %v16355_v59 }
 0x1bb   : > { %19789 = vst [vmem:[#allocation50_spill] sm:$0xff] %v16341_v14  ;;  %v16359_v6 = vpop.f32.mrf.mxu1 }
 0x1bc   : > { %v16345_v57 = vpop.f32.mrf.mxu0  ;;  %19798 = vst [vmem:[#allocation59_spill] sm:$0xff] %v16359_v6 }
 0x1bd   : > { %19791 = vst [vmem:[#allocation52_spill] sm:$0xff] %v16345_v57  ;;  %v16363_v14 = vpop.f32.mrf.mxu1 }
 0x1be   : > { %v16349_v55 = vpop.f32.mrf.mxu0  ;;  %19800 = vst [vmem:[#allocation61_spill] sm:$0xff] %v16363_v14 }
 0x1bf   : > { %19793 = vst [vmem:[#allocation54_spill] sm:$0xff] %v16349_v55  ;;  %v16367_v57 = vpop.f32.mrf.mxu1 }
 0x1c0   : > { %v16353_v50 = vpop.f32.mrf.mxu0  ;;  %19802 = vst [vmem:[#allocation63_spill] sm:$0xff] %v16367_v57 }
 0x1c1   : > { %19795 = vst [vmem:[#allocation56_spill] sm:$0xff] %v16353_v50  ;;  %v16371_v55 = vpop.f32.mrf.mxu1 }
 0x1c2   : > { %v16357_v12 = vpop.f32.mrf.mxu0  ;;  %19804 = vst [vmem:[#allocation65_spill] sm:$0xff] %v16371_v55 }
 0x1c3   : > { %19797 = vst [vmem:[#allocation58_spill] sm:$0xff] %v16357_v12  ;;  %v16375_v50 = vpop.f32.mrf.mxu1 }
 0x1c4   : > { %v16361_v3 = vpop.f32.mrf.mxu0  ;;  %19806 = vst [vmem:[#allocation67_spill] sm:$0xff] %v16375_v50 }
 0x1c5   : > { %19799 = vst [vmem:[#allocation60_spill] sm:$0xff] %v16361_v3  ;;  %v16379_v12 = vpop.f32.mrf.mxu1 }
 0x1c6   : > { %v16365_v31 = vpop.f32.mrf.mxu0  ;;  %19808 = vst [vmem:[#allocation69_spill] sm:$0xff] %v16379_v12 }
 0x1c7   : > { %19801 = vst [vmem:[#allocation62_spill] sm:$0xff] %v16365_v31  ;;  %v16383_v3 = vpop.f32.mrf.mxu1 }
 0x1c8   : > { %v16369_v41 = vpop.f32.mrf.mxu0  ;;  %19810 = vst [vmem:[#allocation71_spill] sm:$0xff] %v16383_v3 }
 0x1c9   : > { %19803 = vst [vmem:[#allocation64_spill] sm:$0xff] %v16369_v41  ;;  %v16387_v31 = vpop.f32.mrf.mxu1 }
 0x1ca   : > { %v16373_v51 = vpop.f32.mrf.mxu0  ;;  %19812 = vst [vmem:[#allocation73_spill] sm:$0xff] %v16387_v31 }
 0x1cb   : > { %19805 = vst [vmem:[#allocation66_spill] sm:$0xff] %v16373_v51  ;;  %v16391_v41 = vpop.f32.mrf.mxu1 }
 0x1cc   : > { %v16377_v59 = vpop.f32.mrf.mxu0 }
 0x1cd   : > { %19807 = vst [vmem:[#allocation68_spill] sm:$0xff] %v16377_v59  ;;  %v16395_v51 = vpop.f32.mrf.mxu1 }
 0x1ce   : > { %v16381_v6 = vpop.f32.mrf.mxu0  ;;  %19815 = vst [vmem:[#allocation76_spill] sm:$0xff] %v16395_v51 }
 0x1cf   : > { %19809 = vst [vmem:[#allocation70_spill] sm:$0xff] %v16381_v6  ;;  %v16399_v59 = vpop.f32.mrf.mxu1 }
 0x1d0   : > { %v16385_v14 = vpop.f32.mrf.mxu0  ;;  %19817 = vst [vmem:[#allocation78_spill] sm:$0xff] %v16399_v59 }
 0x1d1   : > { %19811 = vst [vmem:[#allocation72_spill] sm:$0xff] %v16385_v14  ;;  %v16403_v6 = vpop.f32.mrf.mxu1 }
 0x1d2   : > { %v16389_v57 = vpop.f32.mrf.mxu0  ;;  %19819 = vst [vmem:[#allocation80_spill] sm:$0xff] %v16403_v6 }
 0x1d3   : > { %19813 = vst [vmem:[#allocation74_spill] sm:$0xff] %v16389_v57  ;;  %v16407_v14 = vpop.f32.mrf.mxu1  ;;  %v1891_v57 = vadd.f32 %v15853_v27, %v15623_v15  ;;  %v1895_v27 = vadd.f32 %v16168_v39, %v15652_v25  ;;  %v1897_v39 = vadd.f32 %v16179_v54, %v15666_v2 }
 0x1d4   : > { %v16393_v55 = vpop.f32.mrf.mxu0  ;;  %19821 = vst [vmem:[#allocation82_spill] sm:$0xff] %v16407_v14  ;;  %v2672_v14 = vadd.f32 %v16281_v11, %v16076_v60 }
 0x1d5   : > { %19814 = vst [vmem:[#allocation75_spill] sm:$0xff] %v16393_v55  ;;  %v16413_v55 = vpop.f32.mrf.mxu1  ;;  %v2285_v25 = vadd.f32 %v16170_v49, %v1895_v27 }
 0x1d6   : > { %v16397_v50 = vpop.f32.mrf.mxu0 }
 0x1d7   : > { %19816 = vst [vmem:[#allocation77_spill] sm:$0xff] %v16397_v50  ;;  %v16417_v50 = vpop.f32.mrf.mxu1 }
 0x1d8   : > { %v16401_v12 = vpop.f32.mrf.mxu0 }
 0x1d9   : > { %19818 = vst [vmem:[#allocation79_spill] sm:$0xff] %v16401_v12  ;;  %v2281_v12 = vadd.f32 %v15855_v29, %v1891_v57  ;;  %v2674_v29 = vadd.f32 %v16289_v53, %v16087_v43 }
 0x1da   : > { %v16405_v3 = vpop.f32.mrf.mxu0 }
 0x1db   : > { %19820 = vst [vmem:[#allocation81_spill] sm:$0xff] %v16405_v3  ;;  %v1893_v3 = vadd.f32 %v16083_v18, %v15637_v22  ;;  %v2671_v15 = vadd.f32 %v16285_v40, %v2281_v12  ;;  %v3063_v22 = vadd.f32 %v16283_v62, %v2672_v14  ;;  %v3065_v62 = vadd.f32 %v16291_v44, %v2674_v29 }
 0x1dc   : > { %v16409_v31 = vpop.f32.mrf.mxu0  ;;  %v1899_v44 = vadd.f32 %v16189_v45, %v15683_v32 }
 0x1dd   : > { %19822 = vst [vmem:[#allocation83_spill] sm:$0xff] %v16409_v31  ;;  %v16426_v31 = vpop.f32.mrf.mxu1  ;;  %v2283_v57 = vadd.f32 %v16085_v20, %v1893_v3  ;;  %v3062_v11 = vadd.f32 %v16287_v63, %v2671_v15  ;;  %v2676_v20 = vadd.f32 %v16303_v36, %v16172_v24  ;;  %v16451_v3 = vld [vmem:[%s19586_s2] ss:$0 sm:$0xff]  ;;  %v2675_v15 = vadd.f32 %v16310_v9, %v2285_v25 }
 0x1de   : > { %v16415_v51 = vpop.f32.mrf.mxu0 }
 0x1df   : > { %19823 = vst [vmem:[#allocation84_spill] sm:$0xff] %v16415_v51  ;;  %v16433_v51 = vpop.f32.mrf.mxu1  ;;  %v2673_v12 = vadd.f32 %v16296_v58, %v2283_v57  ;;  %v19825_v58 = vld [vmem:[#allocation5_spill] sm:$0xff]  ;;  %v3067_v29 = vadd.f32 %v16305_v23, %v2676_v20 }
 0x1e0   : > { %v16419_v59 = vpop.f32.mrf.mxu0  ;;  %v1074_v49 = vadd.f32 %v15749_v21, %v19825_v58  ;;  %v2678_v21 = vadd.f32 %v16317_v46, %v16185_v16  ;;  %v16474_v16 = vld [vmem:[%s19587_s3 + $0xb8] sm:$0xff] }
 0x1e1   : > { %19824 = vst [vmem:[#allocation85_spill] sm:$0xff] %v16419_v59  ;;  %v13550_v60 = vpop.f32.mrf.mxu1  ;;  %v3064_v24 = vadd.f32 %v16298_v30, %v2673_v12  ;;  %13926 = vmatprep.subr.mxu0 %v16474_v16 }
 0x1e2   : > { %v16428_v6 = vpop.f32.mrf.mxu0  ;;  %v3453_v40 = vadd.f32 %v13550_v60, %v3063_v22  ;;  %v2287_v22 = vadd.f32 %v16181_v37, %v1897_v39  ;;  %v3066_v37 = vadd.f32 %v16312_v4, %v2675_v15  ;;  %v3069_v4 = vadd.f32 %v16319_v17, %v2678_v21  ;;  %v19826_v15 = vld [vmem:[#allocation6_spill] sm:$0xff] }
 0x1e3   : > { %v3293_v43 = vpop.f32.mrf.mxu1 }
 0x1e4   : > { %v16435_v59 = vpop.f32.mrf.mxu0  ;;  %v3452_v53 = vadd.f32 %v3293_v43, %v3062_v11  ;;  %v2677_v25 = vadd.f32 %v16327_v52, %v2287_v22  ;;  %v1901_v52 = vadd.f32 %v16196_v0, %v15697_v7  ;;  %v2680_v43 = vadd.f32 %v16331_v8, %v16193_v47 }
 0x1e5   : > { %v13553_v2 = vpop.f32.mrf.mxu1 }
 0x1e6   : > { %v13600_v18 = vpop.f32.mrf.mxu0  ;;  %v3455_v57 = vadd.f32 %v13553_v2, %v3065_v62  ;;  %v19827_v2 = vld [vmem:[#allocation7_spill] sm:$0xff]  ;;  %v3068_v17 = vadd.f32 %v16329_v10, %v2677_v25  ;;  %v2682_v10 = vadd.f32 %v16339_v13, %v16200_v28 }
 0x1e7   : > { %v3843_v63 = vadd.f32 %v13600_v18, %v3453_v40  ;;  %v3303_v60 = vpop.f32.mrf.mxu1  ;;  %v16467_v40 = vadd.f32 %v15751_v48, %v1074_v49  ;;  %v2289_v48 = vadd.f32 %v16191_v19, %v1899_v44  ;;  %v1084_v19 = vadd.f32 %v15764_v33, %v19826_v15  ;;  %v19836_v15 = vld [vmem:[#allocation18_spill] sm:$0xff] }
 0x1e8   : > { %v3683_v14 = vpop.f32.mrf.mxu0  ;;  %v3454_v12 = vadd.f32 %v3303_v60, %v3064_v24  ;;  %v1094_v7 = vadd.f32 %v15779_v42, %v19827_v2  ;;  %v1903_v33 = vadd.f32 %v16206_v38, %v15711_v1  ;;  %v3071_v42 = vadd.f32 %v16333_v56, %v2680_v43  ;;  %v19828_v38 = vld [vmem:[#allocation51_spill] sm:$0xff]  ;;  %v19837_v2 = vld [vmem:[#allocation52_spill] sm:$0xff] }
 0x1e9   : > { %v3882_v36 = vadd.f32 %v16451_v3, %v3843_v63  ;;  %v3842_v27 = vadd.f32 %v3683_v14, %v3452_v53  ;;  %v13556_v32 = vpop.f32.mrf.mxu1  ;;  %v2679_v0 = vadd.f32 %v16335_v35, %v2289_v48 }
 0x1ea   : > { %v13603_v54 = vpop.f32.mrf.mxu0  ;;  %v3457_v20 = vadd.f32 %v13556_v32, %v3067_v29  ;;  %v19831_v32 = vld [vmem:[#allocation28_spill] sm:$0xff] }
 0x1eb   : > { %v3914_v18 = vmax.f32 %v3882_v36, 0.0  ;;  %v3881_v11 = vadd.f32 %v16451_v3, %v3842_v27  ;;  %v3845_v30 = vadd.f32 %v13603_v54, %v3455_v57  ;;  %v3313_v14 = vpop.f32.mrf.mxu1  ;;  %v2291_v57 = vadd.f32 %v16198_v34, %v1901_v52 }
 0x1ec   : > { %v3693_v9 = vpop.f32.mrf.mxu0  ;;  %v3456_v49 = vadd.f32 %v3313_v14, %v3066_v37  ;;  %v16507_v34 = vadd.f32 %v15781_v61, %v1094_v7  ;;  %v3070_v1 = vadd.f32 %v16337_v5, %v2679_v0  ;;  %v19829_v37 = vld [vmem:[#allocation26_spill] sm:$0xff]  ;;  %v19834_v5 = vld [vmem:[#allocation53_spill] sm:$0xff] }
 0x1ed   : > { %3947 = vst.msk [vmem:[#allocation2 + $0x30] sm:$0xff] %vm279_vm2, %v3914_v18  ;;  %v3913_v23 = vmax.f32 %v3881_v11, 0.0  ;;  %v3884_v46 = vadd.f32 %v16451_v3, %v3845_v30  ;;  %v3844_v39 = vadd.f32 %v3693_v9, %v3454_v12  ;;  %v13559_v8 = vpop.f32.mrf.mxu1  ;;  %v16504_v9 = vadd.f32 %v15766_v26, %v1084_v19  ;;  %v19830_v26 = vld [vmem:[#allocation16_spill] sm:$0xff]  ;;  %v19832_v61 = vld [vmem:[#allocation50_spill] sm:$0xff] }
 0x1ee   : > { %v13606_v45 = vpop.f32.mrf.mxu0  ;;  %v3459_v27 = vadd.f32 %v13559_v8, %v3069_v4  ;;  %v2681_v56 = vadd.f32 %v19828_v38, %v2291_v57  ;;  %v2293_v25 = vadd.f32 %v19829_v37, %v1903_v33  ;;  %v19839_v57 = vld [vmem:[#allocation29_spill] sm:$0xff] }
 0x1ef   : > { %3946 = vst.msk [vmem:[#allocation2 + $0x28] sm:$0xff] %vm279_vm2, %v3913_v23  ;;  %v3916_v63 = vmax.f32 %v3884_v46, 0.0  ;;  %v3883_v53 = vadd.f32 %v16451_v3, %v3844_v39  ;;  %v3847_v58 = vadd.f32 %v13606_v45, %v3457_v20  ;;  %v3323_v35 = vpop.f32.mrf.mxu1  ;;  %v1905_v45 = vadd.f32 %v19831_v32, %v19830_v26  ;;  %v19833_v46 = vld [vmem:[#allocation27_spill] sm:$0xff]  ;;  %v19846_v32 = vld [vmem:[#allocation56_spill] sm:$0xff] }
 0x1f0   : > { %v3703_v62 = vpop.f32.mrf.mxu0  ;;  %v3458_v60 = vadd.f32 %v3323_v35, %v3068_v17  ;;  %v3073_v23 = vadd.f32 %v19832_v61, %v2682_v10  ;;  %v2684_v39 = vadd.f32 %v19834_v5, %v19833_v46  ;;  %v3072_v7 = vadd.f32 %v19837_v2, %v2681_v56  ;;  %v19838_v17 = vld [vmem:[#allocation55_spill] sm:$0xff]  ;;  %v19851_v2 = vld [vmem:[#allocation33_spill] sm:$0xff] }
 0x1f1   : > { %3949 = vst.msk [vmem:[#allocation2 + $0x50] sm:$0xff] %vm279_vm2, %v3916_v63  ;;  %v3915_v54 = vmax.f32 %v3883_v53, 0.0  ;;  %v3886_v24 = vadd.f32 %v16451_v3, %v3847_v58  ;;  %v3846_v36 = vadd.f32 %v3703_v62, %v3456_v49  ;;  %v13562_v13 = vpop.f32.mrf.mxu1  ;;  %v19835_v49 = vld [vmem:[#allocation8_spill] sm:$0xff]  ;;  %v2683_v0 = vadd.f32 %v19838_v17, %v2293_v25  ;;  %v19841_v10 = vld [vmem:[#allocation31_spill] sm:$0xff] }
 0x1f2   : > { %v13609_v47 = vpop.f32.mrf.mxu0  ;;  %v3461_v12 = vadd.f32 %v13562_v13, %v3071_v42  ;;  %v1104_v19 = vadd.f32 %v19836_v15, %v19835_v49  ;;  %v2295_v33 = vadd.f32 %v19839_v57, %v1905_v45  ;;  %v19840_v42 = vld [vmem:[#allocation17_spill] sm:$0xff]  ;;  %v19845_v25 = vld [vmem:[#allocation19_spill] sm:$0xff]  ;;  %v19850_v15 = vld [vmem:[#allocation58_spill] sm:$0xff] }
 0x1f3   : > { %3948 = vst.msk [vmem:[#allocation2 + $0x48] sm:$0xff] %vm279_vm2, %v3915_v54  ;;  %v3918_v44 = vmax.f32 %v3886_v24, 0.0  ;;  %v3885_v29 = vadd.f32 %v16451_v3, %v3846_v36  ;;  %v3849_v21 = vadd.f32 %v13609_v47, %v3459_v27  ;;  %v3333_v20 = vpop.f32.mrf.mxu1  ;;  %v1907_v35 = vadd.f32 %v19841_v10, %v19840_v42  ;;  %v19847_v61 = vld [vmem:[#allocation59_spill] sm:$0xff]  ;;  %v19853_v42 = vld [vmem:[#allocation9_spill] sm:$0xff]  ;;  %v19854_v10 = vld [vmem:[#allocation20_spill] sm:$0xff] }
 0x1f4   : > { %v3713_v22 = vpop.f32.mrf.mxu0  ;;  %v3460_v53 = vadd.f32 %v3333_v20, %v3070_v1  ;;  %v16531_v58 = vld [vmem:[#allocation2 + $0x30] sm:$0xff]  ;;  %v16564_v26 = vadd.f32 %v19845_v25, %v1104_v19  ;;  %v3074_v45 = vadd.f32 %v19846_v32, %v2683_v0  ;;  %v19858_v32 = vld [vmem:[#allocation12_spill] sm:$0xff] }
 0x1f5   : > { %3951 = vst.msk [vmem:[#allocation2 + $0x70] sm:$0xff] %vm279_vm2, %v3918_v44  ;;  %v3917_v18 = vmax.f32 %v3885_v29, 0.0  ;;  %v3888_v11 = vadd.f32 %v16451_v3, %v3849_v21  ;;  %v3848_v30 = vadd.f32 %v3713_v22, %v3458_v60  ;;  %v13565_v8 = vpop.f32.mrf.mxu1  ;;  %v19842_v22 = vld [vmem:[#allocation54_spill] sm:$0xff]  ;;  %v19844_v21 = vld [vmem:[#allocation57_spill] sm:$0xff] }
 0x1f6   : > { %v13612_v28 = vpop.f32.mrf.mxu0  ;;  %v16519_v52 = vld [vmem:[#allocation2 + $0x28] sm:$0xff]  ;;  %v3463_v27 = vadd.f32 %v13565_v8, %v3073_v23  ;;  %v3075_v44 = vadd.f32 %v19842_v22, %v2684_v39  ;;  %v19843_v29 = vld [vmem:[#allocation30_spill] sm:$0xff]  ;;  %v2685_v23 = vadd.f32 %v19847_v61, %v2295_v33  ;;  %v19855_v22 = vld [vmem:[#allocation60_spill] sm:$0xff] }
 0x1f7   : > { %v16521_v4 = vld [vmem:[#allocation2 + $0x27] sm:$0xff]  ;;  %v16523_v43 = vld [vmem:[#allocation2 + $0x2f] sm:$0xff]  ;;  %3950 = vst.msk [vmem:[#allocation2 + $0x68] sm:$0xff] %vm279_vm2, %v3917_v18  ;;  %v3920_v14 = vmax.f32 %v3888_v11, 0.0  ;;  %v3887_v62 = vadd.f32 %v16451_v3, %v3848_v30  ;;  %v3851_v63 = vadd.f32 %v13612_v28, %v3461_v12  ;;  %13657 = vmatprep.mubr.msk.f32.mxu1 %vm279_vm2, %v16519_v52  ;;  %v2686_v60 = vadd.f32 %v19844_v21, %v19843_v29  ;;  %v3343_v1 = vpop.f32.mrf.mxu1  ;;  %v19856_v29 = vld [vmem:[#allocation63_spill] sm:$0xff] }
 0x1f8   : > { %v3723_v48 = vpop.f32.mrf.mxu0  ;;  %13713 = vmatprep.mubr.msk.f32.mxu0 %vm279_vm2, %v16521_v4  ;;  %13658 = vmatmul.mubr.msk.f32.gmra.mxu1 %vm279_vm2, %v16531_v58  ;;  %v3462_v12 = vadd.f32 %v3343_v1, %v3072_v7  ;;  %v16561_v37 = vld [vmem:[#allocation2 + $0x50] sm:$0xff]  ;;  %v19852_v7 = vld [vmem:[#allocation61_spill] sm:$0xff] }
 0x1f9   : > { %13714 = vmatmul.mubr.msk.f32.gmra.mxu0 %vm279_vm2, %v16523_v43  ;;  %3953 = vst.msk [vmem:[#allocation2 + $0x90] sm:$0xff] %vm279_vm2, %v3920_v14  ;;  %v3919_v54 = vmax.f32 %v3887_v62, 0.0  ;;  %v3890_v24 = vadd.f32 %v16451_v3, %v3851_v63  ;;  %v3850_v36 = vadd.f32 %v3723_v48, %v3460_v53  ;;  %v13568_v46 = vpop.f32.mrf.mxu1  ;;  %v19848_v62 = vld [vmem:[#allocation32_spill] sm:$0xff]  ;;  %v19849_v53 = vld [vmem:[#allocation34_spill] sm:$0xff]  ;;  %v3077_v19 = vadd.f32 %v19850_v15, %v2686_v60 }
 0x1fa   : > { %v13615_v47 = vpop.f32.mrf.mxu0  ;;  %v16549_v56 = vld [vmem:[#allocation2 + $0x48] sm:$0xff]  ;;  %v3465_v14 = vadd.f32 %v13568_v46, %v3075_v44  ;;  %v2297_v63 = vadd.f32 %v19848_v62, %v1907_v35  ;;  %v1909_v49 = vadd.f32 %v19849_v53, %v16467_v40  ;;  %v2688_v17 = vadd.f32 %v19852_v7, %v19851_v2  ;;  %v19859_v61 = vld [vmem:[#allocation62_spill] sm:$0xff]  ;;  %v19860_v46 = vld [vmem:[#allocation4_spill] sm:$0xff] }
 0x1fb   : > { %v16551_v13 = vld [vmem:[#allocation2 + $0x47] sm:$0xff]  ;;  %v16553_v28 = vld [vmem:[#allocation2 + $0x4f] sm:$0xff]  ;;  %3952 = vst.msk [vmem:[#allocation2 + $0x88] sm:$0xff] %vm279_vm2, %v3919_v54  ;;  %v3922_v18 = vmax.f32 %v3890_v24, 0.0  ;;  %v3889_v11 = vadd.f32 %v16451_v3, %v3850_v36  ;;  %v3853_v30 = vadd.f32 %v13615_v47, %v3463_v27  ;;  %13660 = vmatprep.mubr.msk.f32.mxu1 %vm279_vm2, %v16549_v56  ;;  %v3353_v0 = vpop.f32.mrf.mxu1  ;;  %v1114_v35 = vadd.f32 %v19854_v10, %v19853_v42 }
 0x1fc   : > { %v3733_v38 = vpop.f32.mrf.mxu0  ;;  %13716 = vmatprep.mubr.msk.f32.mxu0 %vm279_vm2, %v16551_v13  ;;  %13661 = vmatmul.mubr.msk.f32.gmra.mxu1 %vm279_vm2, %v16561_v37  ;;  %v3464_v40 = vadd.f32 %v3353_v0, %v3074_v45  ;;  %v16592_v33 = vld [vmem:[#allocation2 + $0x70] sm:$0xff]  ;;  %v3076_v44 = vadd.f32 %v19855_v22, %v2685_v23  ;;  %v2687_v21 = vadd.f32 %v19856_v29, %v2297_v63  ;;  %v19862_v2 = vld [vmem:[#allocation21_spill] sm:$0xff]  ;;  %v19865_v22 = vld [vmem:[#allocation11_spill] sm:$0xff] }
 0x1fd   : > { %13717 = vmatmul.mubr.msk.f32.gmra.mxu0 %vm279_vm2, %v16553_v28  ;;  %3955 = vst.msk [vmem:[#allocation2 + $0xb0] sm:$0xff] %vm279_vm2, %v3922_v18  ;;  %v3921_v39 = vmax.f32 %v3889_v11, 0.0  ;;  %v3892_v20 = vadd.f32 %v16451_v3, %v3853_v30  ;;  %v3852_v48 = vadd.f32 %v3733_v38, %v3462_v12  ;;  %v13571_v60 = vpop.f32.mrf.mxu1  ;;  %v19857_v12 = vld [vmem:[#allocation10_spill] sm:$0xff]  ;;  %v1911_v45 = vadd.f32 %v19858_v32, %v16504_v9  ;;  %v19866_v29 = vld [vmem:[#allocation35_spill] sm:$0xff] }
 0x1fe   : > { %v13618_v5 = vpop.f32.mrf.mxu0  ;;  %v16580_v47 = vld [vmem:[#allocation2 + $0x68] sm:$0xff]  ;;  %v3467_v30 = vadd.f32 %v13571_v60, %v3077_v19  ;;  %v2299_v25 = vadd.f32 %v19857_v12, %v1909_v49  ;;  %v3079_v23 = vadd.f32 %v19859_v61, %v2688_v17  ;;  %v16625_v7 = vadd.f32 %v19862_v2, %v1114_v35  ;;  %v19863_v17 = vld [vmem:[#allocation64_spill] sm:$0xff]  ;;  %v19867_v60 = vld [vmem:[#allocation66_spill] sm:$0xff] }
 0x1ff   : > { %v16582_v54 = vld [vmem:[#allocation2 + $0x67] sm:$0xff]  ;;  %v16584_v24 = vld [vmem:[#allocation2 + $0x6f] sm:$0xff]  ;;  %3954 = vst.msk [vmem:[#allocation2 + $0xa8] sm:$0xff] %vm279_vm2, %v3921_v39  ;;  %v3924_v36 = vmax.f32 %v3892_v20, 0.0  ;;  %v3891_v27 = vadd.f32 %v16451_v3, %v3852_v48  ;;  %v3855_v57 = vadd.f32 %v13618_v5, %v3465_v14  ;;  %13663 = vmatprep.mubr.msk.f32.mxu1 %vm279_vm2, %v16580_v47  ;;  %v3363_v20 = vpop.f32.mrf.mxu1  ;;  %v3078_v0 = vadd.f32 %v19863_v17, %v2687_v21 }
 0x200   : > { %v3743_v8 = vpop.f32.mrf.mxu0  ;;  %13719 = vmatprep.mubr.msk.f32.mxu0 %vm279_vm2, %v16582_v54  ;;  %13664 = vmatmul.mubr.msk.f32.gmra.mxu1 %vm279_vm2, %v16592_v33  ;;  %v19861_v5 = vld [vmem:[#allocation65_spill] sm:$0xff]  ;;  %v3466_v9 = vadd.f32 %v3363_v20, %v3076_v44  ;;  %v16622_v19 = vld [vmem:[#allocation2 + $0x90] sm:$0xff]  ;;  %v2301_v44 = vadd.f32 %v19865_v22, %v1911_v45  ;;  %v1913_v21 = vadd.f32 %v19866_v29, %v16507_v34 }
 0x201   : > { %13720 = vmatmul.mubr.msk.f32.gmra.mxu0 %vm279_vm2, %v16584_v24  ;;  %3957 = vst.msk [vmem:[#allocation2 + $0xd0] sm:$0xff] %vm279_vm2, %v3924_v36  ;;  %v3923_v38 = vmax.f32 %v3891_v27, 0.0  ;;  %v3894_v18 = vadd.f32 %v16451_v3, %v3855_v57  ;;  %v3854_v11 = vadd.f32 %v3743_v8, %v3464_v40  ;;  %v2690_v39 = vadd.f32 %v19861_v5, %v19860_v46  ;;  %v19864_v8 = vld [vmem:[#allocation67_spill] sm:$0xff]  ;;  %v13574_v27 = vpop.f32.mrf.mxu1  ;;  %v19871_v20 = vld [vmem:[#allocation22_spill] sm:$0xff]  ;;  %v19878_v29 = vld [vmem:[#allocation73_spill] sm:$0xff] }
 0x202   : > { %v13621_v1 = vpop.f32.mrf.mxu0  ;;  %v16610_v14 = vld [vmem:[#allocation2 + $0x88] sm:$0xff]  ;;  %v2689_v36 = vadd.f32 %v19864_v8, %v2299_v25  ;;  %v3469_v35 = vadd.f32 %v13574_v27, %v3079_v23 }
 0x203   : > { %v16612_v62 = vld [vmem:[#allocation2 + $0x87] sm:$0xff]  ;;  %v16614_v63 = vld [vmem:[#allocation2 + $0x8f] sm:$0xff]  ;;  %3956 = vst.msk [vmem:[#allocation2 + $0xc8] sm:$0xff] %vm279_vm2, %v3923_v38  ;;  %v3926_v53 = vmax.f32 %v3894_v18, 0.0  ;;  %v3893_v49 = vadd.f32 %v16451_v3, %v3854_v11  ;;  %v3857_v15 = vadd.f32 %v13621_v1, %v3467_v30  ;;  %13666 = vmatprep.mubr.msk.f32.mxu1 %vm279_vm2, %v16610_v14  ;;  %v3081_v1 = vadd.f32 %v19867_v60, %v2690_v39  ;;  %v3373_v30 = vpop.f32.mrf.mxu1 }
 0x204   : > { %v3753_v48 = vpop.f32.mrf.mxu0  ;;  %13722 = vmatprep.mubr.msk.f32.mxu0 %vm279_vm2, %v16612_v62  ;;  %13667 = vmatmul.mubr.msk.f32.gmra.mxu1 %vm279_vm2, %v16622_v19  ;;  %v19868_v38 = vld [vmem:[#allocation14_spill] sm:$0xff]  ;;  %v19869_v18 = vld [vmem:[#allocation69_spill] sm:$0xff]  ;;  %v3468_v34 = vadd.f32 %v3373_v30, %v3078_v0 }
 0x205   : > { %13723 = vmatmul.mubr.msk.f32.gmra.mxu0 %vm279_vm2, %v16614_v63  ;;  %3959 = vst.msk [vmem:[#allocation2 + $0xf0] sm:$0xff] %vm279_vm2, %v3926_v53  ;;  %v3925_v40 = vmax.f32 %v3893_v49, 0.0  ;;  %v3896_v42 = vadd.f32 %v16451_v3, %v3857_v15  ;;  %v3856_v10 = vadd.f32 %v3753_v48, %v3466_v9  ;;  %v2692_v11 = vadd.f32 %v19869_v18, %v19868_v38  ;;  %v16653_v5 = vld [vmem:[#allocation2 + $0xb0] sm:$0xff]  ;;  %v19870_v39 = vld [vmem:[#allocation13_spill] sm:$0xff]  ;;  %v19872_v53 = vld [vmem:[#allocation68_spill] sm:$0xff]  ;;  %v13577_v2 = vpop.f32.mrf.mxu1 }
 0x206   : > { %v13624_v57 = vpop.f32.mrf.mxu0  ;;  %v16641_v25 = vld [vmem:[#allocation2 + $0xa8] sm:$0xff]  ;;  %v1124_v48 = vadd.f32 %v19871_v20, %v19870_v39  ;;  %v3080_v49 = vadd.f32 %v19872_v53, %v2689_v36  ;;  %v19873_v15 = vld [vmem:[#allocation71_spill] sm:$0xff]  ;;  %v19875_v36 = vld [vmem:[#allocation38_spill] sm:$0xff] }
 0x207   : > { %v16643_v32 = vld [vmem:[#allocation2 + $0xa7] sm:$0xff]  ;;  %v16645_v61 = vld [vmem:[#allocation2 + $0xaf] sm:$0xff]  ;;  %3958 = vst.msk [vmem:[#allocation2 + $0xe8] sm:$0xff] %vm279_vm2, %v3925_v40  ;;  %v3928_v23 = vmax.f32 %v3896_v42, 0.0  ;;  %v3895_v45 = vadd.f32 %v16451_v3, %v3856_v10  ;;  %v3859_v46 = vadd.f32 %v13624_v57, %v3469_v35  ;;  %13669 = vmatprep.mubr.msk.f32.mxu1 %vm279_vm2, %v16641_v25  ;;  %v2691_v9 = vadd.f32 %v19873_v15, %v2301_v44  ;;  %v3383_v38 = vpop.f32.mrf.mxu1 }
 0x208   : > { %v3763_v12 = vpop.f32.mrf.mxu0  ;;  %13725 = vmatprep.mubr.msk.f32.mxu0 %vm279_vm2, %v16643_v32  ;;  %13670 = vmatmul.mubr.msk.f32.gmra.mxu1 %vm279_vm2, %v16653_v5  ;;  %v3471_v57 = vadd.f32 %v13577_v2, %v3081_v1  ;;  %v19874_v40 = vld [vmem:[#allocation36_spill] sm:$0xff]  ;;  %v1915_v10 = vadd.f32 %v19875_v36, %v16564_v26  ;;  %v19876_v35 = vld [vmem:[#allocation70_spill] sm:$0xff]  ;;  %v19877_v44 = vld [vmem:[#allocation37_spill] sm:$0xff]  ;;  %v3470_v26 = vadd.f32 %v3383_v38, %v3080_v49 }
 0x209   : > { %13726 = vmatmul.mubr.msk.f32.gmra.mxu0 %vm279_vm2, %v16645_v61  ;;  %3961 = vst.msk [vmem:[#allocation2 + $0x110] sm:$0xff] %vm279_vm2, %v3928_v23  ;;  %v3927_v0 = vmax.f32 %v3895_v45, 0.0  ;;  %v3898_v8 = vadd.f32 %v16451_v3, %v3859_v46  ;;  %v3858_v27 = vadd.f32 %v3763_v12, %v3468_v34  ;;  %v2303_v42 = vadd.f32 %v19874_v40, %v1913_v21  ;;  %v19880_v46 = vld [vmem:[#allocation23_spill] sm:$0xff]  ;;  %v19881_v39 = vld [vmem:[#allocation72_spill] sm:$0xff]  ;;  %v13580_v15 = vpop.f32.mrf.mxu1 }
 0x20a   : > { %v13627_v17 = vpop.f32.mrf.mxu0  ;;  %v3083_v22 = vadd.f32 %v19876_v35, %v2692_v11  ;;  %v2694_v60 = vadd.f32 %v19878_v29, %v19877_v44  ;;  %v16671_v30 = vld [vmem:[#allocation2 + $0xc8] sm:$0xff]  ;;  %v16683_v11 = vld [vmem:[#allocation2 + $0xd0] sm:$0xff]  ;;  %v1528_v34 = vadd.f32 %v19880_v46, %v1124_v48  ;;  %v3082_v20 = vadd.f32 %v19881_v39, %v2691_v9  ;;  %v19882_v48 = vld [vmem:[#allocation39_spill] sm:$0xff] }
 0x20b   : > { %v16673_v23 = vld [vmem:[#allocation2 + $0xc7] sm:$0xff]  ;;  %v16675_v45 = vld [vmem:[#allocation2 + $0xcf] sm:$0xff]  ;;  %3960 = vst.msk [vmem:[#allocation2 + $0x108] sm:$0xff] %vm279_vm2, %v3927_v0  ;;  %v3930_v1 = vmax.f32 %v3898_v8, 0.0  ;;  %v3897_v21 = vadd.f32 %v16451_v3, %v3858_v27  ;;  %v3861_v12 = vadd.f32 %v13627_v17, %v3471_v57  ;;  %13672 = vmatprep.mubr.msk.f32.mxu1 %vm279_vm2, %v16671_v30  ;;  %19879 = vst [vmem:[#allocation5_spill] sm:$0xff] %v16683_v11  ;;  %v3393_v44 = vpop.f32.mrf.mxu1 }
 0x20c   : > { %v3773_v18 = vpop.f32.mrf.mxu0  ;;  %13728 = vmatprep.mubr.msk.f32.mxu0 %vm279_vm2, %v16673_v23  ;;  %v2693_v53 = vadd.f32 %v16391_v41, %v2303_v42  ;;  %13673 = vmatmul.mubr.msk.f32.gmra.mxu1 %vm279_vm2, %v16683_v11  ;;  %v3473_v8 = vadd.f32 %v13580_v15, %v3083_v22  ;;  %v2305_v27 = vadd.f32 %v19882_v48, %v1915_v10  ;;  %v19883_v9 = vld [vmem:[#allocation41_spill] sm:$0xff]  ;;  %v19884_v57 = vld [vmem:[#allocation74_spill] sm:$0xff]  ;;  %v19885_v42 = vld [vmem:[#allocation40_spill] sm:$0xff] }
 0x20d   : > { %13729 = vmatmul.mubr.msk.f32.gmra.mxu0 %vm279_vm2, %v16675_v45  ;;  %3963 = vst.msk [vmem:[#allocation2 + $0x130] sm:$0xff] %vm279_vm2, %v3930_v1  ;;  %v3929_v49 = vmax.f32 %v3897_v21, 0.0  ;;  %v3900_v17 = vadd.f32 %v16451_v3, %v3861_v12  ;;  %v3860_v0 = vadd.f32 %v3773_v18, %v3470_v26  ;;  %v1917_v41 = vadd.f32 %v19883_v9, %v16625_v7  ;;  %v19886_v36 = vld [vmem:[#allocation76_spill] sm:$0xff]  ;;  %v19889_v12 = vld [vmem:[#allocation15_spill] sm:$0xff]  ;;  %v19892_v48 = vld [vmem:[#allocation78_spill] sm:$0xff] }
 0x20e   : > { %v13630_v2 = vpop.f32.mrf.mxu0  ;;  %v3085_v40 = vadd.f32 %v19884_v57, %v2694_v60  ;;  %v2696_v35 = vadd.f32 %v19886_v36, %v19885_v42  ;;  %v16700_v38 = vld [vmem:[#allocation2 + $0xe8] sm:$0xff]  ;;  %v3472_v7 = vadd.f32 %v3393_v44, %v3082_v20  ;;  %v16712_v60 = vld [vmem:[#allocation2 + $0xf0] sm:$0xff]  ;;  %v19890_v26 = vld [vmem:[#allocation24_spill] sm:$0xff] }
 0x20f   : > { %19887 = vst [vmem:[#allocation6_spill] sm:$0xff] %v16700_v38  ;;  %v16702_v1 = vld [vmem:[#allocation2 + $0xe7] sm:$0xff]  ;;  %v16704_v21 = vld [vmem:[#allocation2 + $0xef] sm:$0xff]  ;;  %3962 = vst.msk [vmem:[#allocation2 + $0x128] sm:$0xff] %vm279_vm2, %v3929_v49  ;;  %v3932_v22 = vmax.f32 %v3900_v17, 0.0  ;;  %v3899_v10 = vadd.f32 %v16451_v3, %v3860_v0  ;;  %v3863_v18 = vadd.f32 %v13630_v2, %v3473_v8  ;;  %13675 = vmatprep.mubr.msk.f32.mxu1 %vm279_vm2, %v16700_v38  ;;  %v13583_v17 = vpop.f32.mrf.mxu1 }
 0x210   : > { %v3783_v29 = vpop.f32.mrf.mxu0  ;;  %13731 = vmatprep.mubr.msk.f32.mxu0 %vm279_vm2, %v16702_v1  ;;  %19888 = vst [vmem:[#allocation7_spill] sm:$0xff] %v16712_v60  ;;  %v1134_v46 = vadd.f32 %v19890_v26, %v19889_v12  ;;  %v19891_v39 = vld [vmem:[#allocation75_spill] sm:$0xff]  ;;  %v2695_v49 = vadd.f32 %v19892_v48, %v2305_v27  ;;  %13676 = vmatmul.mubr.msk.f32.gmra.mxu1 %vm279_vm2, %v16712_v60  ;;  %v19893_v57 = vld [vmem:[#allocation42_spill] sm:$0xff]  ;;  %v19895_v27 = vld [vmem:[#allocation77_spill] sm:$0xff] }
 0x211   : > { %v3084_v15 = vadd.f32 %v19891_v39, %v2693_v53  ;;  %13732 = vmatmul.mubr.msk.f32.gmra.mxu0 %vm279_vm2, %v16704_v21  ;;  %3965 = vst.msk [vmem:[#allocation2 + $0x150] sm:$0xff] %vm279_vm2, %v3932_v22  ;;  %v3931_v20 = vmax.f32 %v3899_v10, 0.0  ;;  %v3902_v2 = vadd.f32 %v16451_v3, %v3863_v18  ;;  %v3862_v0 = vadd.f32 %v3783_v29, %v3472_v7  ;;  %v19894_v53 = vld [vmem:[#allocation44_spill] sm:$0xff]  ;;  %v19896_v12 = vld [vmem:[#allocation43_spill] sm:$0xff]  ;;  %v3403_v48 = vpop.f32.mrf.mxu1  ;;  %v19900_v10 = vld [vmem:[#allocation25_spill] sm:$0xff] }
 0x212   : > { %v13633_v9 = vpop.f32.mrf.mxu0  ;;  %v3475_v8 = vadd.f32 %v13583_v17, %v3085_v40  ;;  %v2307_v42 = vadd.f32 %v19893_v57, %v1917_v41  ;;  %v1919_v36 = vadd.f32 %v19894_v53, %v1528_v34  ;;  %v3087_v44 = vadd.f32 %v19895_v27, %v2696_v35  ;;  %v19897_v26 = vld [vmem:[#allocation80_spill] sm:$0xff]  ;;  %v16729_v38 = vld [vmem:[#allocation2 + $0x108] sm:$0xff]  ;;  %v16741_v35 = vld [vmem:[#allocation2 + $0x110] sm:$0xff] }
 0x213   : > { %v2698_v39 = vadd.f32 %v19897_v26, %v19896_v12  ;;  %19898 = vst [vmem:[#allocation51_spill] sm:$0xff] %v16729_v38  ;;  %v16731_v11 = vld [vmem:[#allocation2 + $0x107] sm:$0xff]  ;;  %v16733_v22 = vld [vmem:[#allocation2 + $0x10f] sm:$0xff]  ;;  %3964 = vst.msk [vmem:[#allocation2 + $0x148] sm:$0xff] %vm279_vm2, %v3931_v20  ;;  %v3934_v40 = vmax.f32 %v3902_v2, 0.0  ;;  %v3901_v41 = vadd.f32 %v16451_v3, %v3862_v0  ;;  %v3474_v34 = vadd.f32 %v3403_v48, %v3084_v15  ;;  %v13586_v20 = vpop.f32.mrf.mxu1 }
 0x214   : > { %v3793_v60 = vpop.f32.mrf.mxu0  ;;  %v3865_v29 = vadd.f32 %v13633_v9, %v3475_v8  ;;  %13678 = vmatprep.mubr.msk.f32.mxu1 %vm279_vm2, %v16729_v38  ;;  %13734 = vmatprep.mubr.msk.f32.mxu0 %vm279_vm2, %v16731_v11  ;;  %19899 = vst [vmem:[#allocation26_spill] sm:$0xff] %v16741_v35  ;;  %v1530_v18 = vadd.f32 %v19900_v10, %v1134_v46  ;;  %v19901_v7 = vld [vmem:[#allocation79_spill] sm:$0xff]  ;;  %v19902_v57 = vld [vmem:[#allocation82_spill] sm:$0xff]  ;;  %v19903_v46 = vld [vmem:[#allocation45_spill] sm:$0xff] }
 0x215   : > { %v3086_v17 = vadd.f32 %v19901_v7, %v2695_v49  ;;  %v2697_v53 = vadd.f32 %v19902_v57, %v2307_v42  ;;  %13679 = vmatmul.mubr.msk.f32.gmra.mxu1 %vm279_vm2, %v16741_v35  ;;  %13735 = vmatmul.mubr.msk.f32.gmra.mxu0 %vm279_vm2, %v16733_v22  ;;  %3967 = vst.msk [vmem:[#allocation2 + $0x170] sm:$0xff] %vm279_vm2, %v3934_v40  ;;  %v3933_v15 = vmax.f32 %v3901_v41, 0.0  ;;  %v19904_v49 = vld [vmem:[#allocation47_spill] sm:$0xff]  ;;  %v19905_v42 = vld [vmem:[#allocation81_spill] sm:$0xff]  ;;  %v19906_v48 = vld [vmem:[#allocation46_spill] sm:$0xff]  ;;  %v3413_v7 = vpop.f32.mrf.mxu1 }
 0x216   : > { %v13636_v2 = vpop.f32.mrf.mxu0  ;;  %v3904_v9 = vadd.f32 %v16451_v3, %v3865_v29  ;;  %v3864_v0 = vadd.f32 %v3793_v60, %v3474_v34  ;;  %v3477_v8 = vadd.f32 %v13586_v20, %v3087_v44  ;;  %v2309_v27 = vadd.f32 %v19903_v46, %v1919_v36  ;;  %v16757_v35 = vld [vmem:[#allocation2 + $0x128] sm:$0xff] }
 0x217   : > { %v1921_v12 = vadd.f32 %v19904_v49, %v1530_v18  ;;  %v3089_v26 = vadd.f32 %v19905_v42, %v2698_v39  ;;  %v2700_v10 = vadd.f32 %v16413_v55, %v19906_v48  ;;  %v16759_v38 = vld [vmem:[#allocation2 + $0x127] sm:$0xff]  ;;  %v16761_v40 = vld [vmem:[#allocation2 + $0x12f] sm:$0xff]  ;;  %3966 = vst.msk [vmem:[#allocation2 + $0x168] sm:$0xff] %vm279_vm2, %v3933_v15  ;;  %v3476_v41 = vadd.f32 %v3413_v7, %v3086_v17  ;;  %v19907_v39 = vld [vmem:[#allocation83_spill] sm:$0xff]  ;;  %v13589_v18 = vpop.f32.mrf.mxu1 }
 0x218   : > { %v3803_v57 = vpop.f32.mrf.mxu0  ;;  %v3936_v60 = vmax.f32 %v3904_v9, 0.0  ;;  %v3903_v36 = vadd.f32 %v16451_v3, %v3864_v0  ;;  %v3867_v44 = vadd.f32 %v13636_v2, %v3477_v8  ;;  %13681 = vmatprep.mubr.msk.f32.mxu1 %vm279_vm2, %v16757_v35  ;;  %13737 = vmatprep.mubr.msk.f32.mxu0 %vm279_vm2, %v16759_v38  ;;  %v16769_v55 = vld [vmem:[#allocation2 + $0x130] sm:$0xff]  ;;  %v3088_v29 = vadd.f32 %v19907_v39, %v2697_v53  ;;  %v19908_v0 = vld [vmem:[#allocation48_spill] sm:$0xff] }
 0x219   : > { %v2699_v34 = vadd.f32 %v16417_v50, %v2309_v27  ;;  %13682 = vmatmul.mubr.msk.f32.gmra.mxu1 %vm279_vm2, %v16769_v55  ;;  %13738 = vmatmul.mubr.msk.f32.gmra.mxu0 %vm279_vm2, %v16761_v40  ;;  %v3866_v15 = vadd.f32 %v3803_v57, %v3476_v41  ;;  %v3479_v9 = vadd.f32 %v13589_v18, %v3089_v26  ;;  %v19909_v53 = vld [vmem:[#allocation84_spill] sm:$0xff]  ;;  %v19910_v50 = vld [vmem:[#allocation49_spill] sm:$0xff]  ;;  %v3423_v49 = vpop.f32.mrf.mxu1 }
 0x21a   : > { %v13639_v20 = vpop.f32.mrf.mxu0  ;;  %3969 = vst.msk [vmem:[#allocation2 + $0x190] sm:$0xff] %vm279_vm2, %v3936_v60  ;;  %v3935_v17 = vmax.f32 %v3903_v36, 0.0  ;;  %v3906_v2 = vadd.f32 %v16451_v3, %v3867_v44  ;;  %v2311_v8 = vadd.f32 %v19908_v0, %v1921_v12  ;;  %v3091_v46 = vadd.f32 %v19909_v53, %v2700_v10  ;;  %v16783_v48 = vld [vmem:[#allocation2 + $0x148] sm:$0xff] }
 0x21b   : > { %v2702_v27 = vadd.f32 %v16426_v31, %v19910_v50  ;;  %v16785_v7 = vld [vmem:[#allocation2 + $0x147] sm:$0xff]  ;;  %v16787_v39 = vld [vmem:[#allocation2 + $0x14f] sm:$0xff]  ;;  %v3905_v26 = vadd.f32 %v16451_v3, %v3866_v15  ;;  %v3869_v57 = vadd.f32 %v13639_v20, %v3479_v9  ;;  %v3478_v12 = vadd.f32 %v3423_v49, %v3088_v29  ;;  %13684 = vmatprep.mubr.msk.f32.mxu1 %vm279_vm2, %v16783_v48  ;;  %v13592_v41 = vpop.f32.mrf.mxu1 }
 0x21c   : > { %v3813_v42 = vpop.f32.mrf.mxu0  ;;  %3968 = vst.msk [vmem:[#allocation2 + $0x188] sm:$0xff] %vm279_vm2, %v3935_v17  ;;  %v3938_v60 = vmax.f32 %v3906_v2, 0.0  ;;  %13740 = vmatprep.mubr.msk.f32.mxu0 %vm279_vm2, %v16785_v7  ;;  %v16795_v31 = vld [vmem:[#allocation2 + $0x150] sm:$0xff]  ;;  %v19911_v10 = vld [vmem:[#allocation85_spill] sm:$0xff]  ;;  %v2701_v44 = vadd.f32 %v16433_v51, %v2311_v8  ;;  %v3481_v2 = vadd.f32 %v13592_v41, %v3091_v46 }
 0x21d   : > { %v3090_v36 = vadd.f32 %v19911_v10, %v2699_v34  ;;  %13685 = vmatmul.mubr.msk.f32.gmra.mxu1 %vm279_vm2, %v16795_v31  ;;  %13741 = vmatmul.mubr.msk.f32.gmra.mxu0 %vm279_vm2, %v16787_v39  ;;  %v3937_v29 = vmax.f32 %v3905_v26, 0.0  ;;  %v3908_v20 = vadd.f32 %v16451_v3, %v3869_v57  ;;  %v3868_v17 = vadd.f32 %v3813_v42, %v3478_v12  ;;  %v3433_v34 = vpop.f32.mrf.mxu1 }
 0x21e   : > { %v13642_v18 = vpop.f32.mrf.mxu0  ;;  %3971 = vst.msk [vmem:[#allocation2 + $0x1b0] sm:$0xff] %vm279_vm2, %v3938_v60  ;;  %v3093_v15 = vadd.f32 %v16428_v6, %v2702_v27  ;;  %v16806_v51 = vld [vmem:[#allocation2 + $0x168] sm:$0xff]  ;;  %v16818_v6 = vld [vmem:[#allocation2 + $0x170] sm:$0xff]  ;;  %v3092_v46 = vadd.f32 %v16435_v59, %v2701_v44 }
 0x21f   : > { %v16808_v0 = vld [vmem:[#allocation2 + $0x167] sm:$0xff]  ;;  %v16810_v8 = vld [vmem:[#allocation2 + $0x16f] sm:$0xff]  ;;  %3970 = vst.msk [vmem:[#allocation2 + $0x1a8] sm:$0xff] %vm279_vm2, %v3937_v29  ;;  %v3940_v53 = vmax.f32 %v3908_v20, 0.0  ;;  %v3907_v50 = vadd.f32 %v16451_v3, %v3868_v17  ;;  %v3871_v49 = vadd.f32 %v13642_v18, %v3481_v2  ;;  %v3480_v60 = vadd.f32 %v3433_v34, %v3090_v36  ;;  %13687 = vmatprep.mubr.msk.f32.mxu1 %vm279_vm2, %v16806_v51  ;;  %v13595_v27 = vpop.f32.mrf.mxu1 }
 0x220   : > { %v3823_v9 = vpop.f32.mrf.mxu0  ;;  %13743 = vmatprep.mubr.msk.f32.mxu0 %vm279_vm2, %v16808_v0  ;;  %v3483_v10 = vadd.f32 %v13595_v27, %v3093_v15 }
 0x221   : > { %13688 = vmatmul.mubr.msk.f32.gmra.mxu1 %vm279_vm2, %v16818_v6  ;;  %13744 = vmatmul.mubr.msk.f32.gmra.mxu0 %vm279_vm2, %v16810_v8  ;;  %3973 = vst.msk [vmem:[#allocation2 + $0x1d0] sm:$0xff] %vm279_vm2, %v3940_v53  ;;  %v3939_v26 = vmax.f32 %v3907_v50, 0.0  ;;  %v3910_v57 = vadd.f32 %v16451_v3, %v3871_v49  ;;  %v3870_v12 = vadd.f32 %v3823_v9, %v3480_v60  ;;  %v3443_v36 = vpop.f32.mrf.mxu1  ;;  %v16839_v15 = vld [vmem:[#allocation2 + $0x190] sm:$0xff] }
 0x222   : > { %v13645_v42 = vpop.f32.mrf.mxu0  ;;  %v3482_v17 = vadd.f32 %v3443_v36, %v3092_v46  ;;  %v4693_v36 = vld [vmem:[#allocation2 + $0x9] sm:$0xff] }
 0x223   : > { %v16827_v41 = vld [vmem:[#allocation2 + $0x188] sm:$0xff]  ;;  %3972 = vst.msk [vmem:[#allocation2 + $0x1c8] sm:$0xff] %vm279_vm2, %v3939_v26  ;;  %v3942_v29 = vmax.f32 %v3910_v57, 0.0  ;;  %v3909_v20 = vadd.f32 %v16451_v3, %v3870_v12  ;;  %v3873_v2 = vadd.f32 %v13645_v42, %v3483_v10 }
 0x224   : > { %v16829_v18 = vld [vmem:[#allocation2 + $0x187] sm:$0xff]  ;;  %v3833_v59 = vpop.f32.mrf.mxu0  ;;  %v16831_v44 = vld [vmem:[#allocation2 + $0x18f] sm:$0xff]  ;;  %13690 = vmatprep.mubr.msk.f32.mxu1 %vm279_vm2, %v16827_v41 }
 0x225   : > { %13746 = vmatprep.mubr.msk.f32.mxu0 %vm279_vm2, %v16829_v18  ;;  %13691 = vmatmul.mubr.msk.f32.gmra.mxu1 %vm279_vm2, %v16839_v15  ;;  %3975 = vst.msk [vmem:[#allocation2 + $0x1f0] sm:$0xff] %vm279_vm2, %v3942_v29  ;;  %v3941_v34 = vmax.f32 %v3909_v20, 0.0  ;;  %v3912_v9 = vadd.f32 %v16451_v3, %v3873_v2  ;;  %v3872_v53 = vadd.f32 %v3833_v59, %v3482_v17  ;;  %v16859_v42 = vld [vmem:[#allocation2 + $0x1b0] sm:$0xff] }
 0x226   : > { %13747 = vmatmul.mubr.msk.f32.gmra.mxu0 %vm279_vm2, %v16831_v44  ;;  %v16847_v50 = vld [vmem:[#allocation2 + $0x1a8] sm:$0xff]  ;;  %v4694_v2 = vld [vmem:[#allocation2 + $0x11] sm:$0xff] }
 0x227   : > { %v16849_v49 = vld [vmem:[#allocation2 + $0x1a7] sm:$0xff]  ;;  %v16851_v60 = vld [vmem:[#allocation2 + $0x1af] sm:$0xff]  ;;  %3974 = vst.msk [vmem:[#allocation2 + $0x1e8] sm:$0xff] %vm279_vm2, %v3941_v34  ;;  %v3944_v46 = vmax.f32 %v3912_v9, 0.0  ;;  %v3911_v27 = vadd.f32 %v16451_v3, %v3872_v53  ;;  %13693 = vmatprep.mubr.msk.f32.mxu1 %vm279_vm2, %v16847_v50  ;;  %v13656_v9 = vpop.f32.mrf.mxu1  ;;  %v13712_v53 = vpop.f32.mrf.mxu0 }
 0x228   : > { %13749 = vmatprep.mubr.msk.f32.mxu0 %vm279_vm2, %v16849_v49  ;;  %v16877_v10 = vld [vmem:[#allocation2 + $0x1d0] sm:$0xff] }
 0x229   : > { %13694 = vmatmul.mubr.msk.f32.gmra.mxu1 %vm279_vm2, %v16859_v42  ;;  %3977 = vst.msk [vmem:[#allocation2 + $0x210] sm:$0xff] %vm279_vm2, %v3944_v46  ;;  %v3943_v26 = vmax.f32 %v3911_v27, 0.0  ;;  %v11748_v34 = vld [vmem:[%s19587_s3 + $0x90] sm:$0xff]  ;;  %v16910_v27 = vadd.f32 %v13712_v53, %v13656_v9  ;;  %v11782_v9 = vld [vmem:[%s19587_s3 + $0xa0] sm:$0xff] }
 0x22a   : > { %13750 = vmatmul.mubr.msk.f32.gmra.mxu0 %vm279_vm2, %v16851_v60  ;;  %v16866_v57 = vld [vmem:[#allocation2 + $0x1c8] sm:$0xff]  ;;  %v16977_v53 = vld [vmem:[#allocation2 + $0x91] sm:$0xff] }
 0x22b   : > { %v16868_v3 = vld [vmem:[#allocation2 + $0x1c7] sm:$0xff]  ;;  %v16870_v12 = vld [vmem:[#allocation2 + $0x1cf] sm:$0xff]  ;;  %3976 = vst.msk [vmem:[#allocation2 + $0x208] sm:$0xff] %vm279_vm2, %v3943_v26  ;;  %13696 = vmatprep.mubr.msk.f32.mxu1 %vm279_vm2, %v16866_v57 }
 0x22c   : > { %13752 = vmatprep.mubr.msk.f32.mxu0 %vm279_vm2, %v16868_v3  ;;  %v16893_v17 = vld [vmem:[#allocation2 + $0x1f0] sm:$0xff] }
 0x22d   : > { %13697 = vmatmul.mubr.msk.f32.gmra.mxu1 %vm279_vm2, %v16877_v10  ;;  %v16908_v46 = vld [vmem:[#allocation2 + $0x29] sm:$0xff]  ;;  %v16919_v26 = vld [vmem:[#allocation2 + $0x31] sm:$0xff] }
 0x22e   : > { %13753 = vmatmul.mubr.msk.f32.gmra.mxu0 %vm279_vm2, %v16870_v12  ;;  %v16883_v59 = vld [vmem:[#allocation2 + $0x1e8] sm:$0xff] }
 0x22f   : > { %v16885_v29 = vld [vmem:[#allocation2 + $0x1e7] sm:$0xff]  ;;  %v16887_v20 = vld [vmem:[#allocation2 + $0x1ef] sm:$0xff]  ;;  %13699 = vmatprep.mubr.msk.f32.mxu1 %vm279_vm2, %v16883_v59 }
 0x230   : > { %13755 = vmatprep.mubr.msk.f32.mxu0 %vm279_vm2, %v16885_v29 }
 0x231   : > { %13700 = vmatmul.mubr.msk.f32.gmra.mxu1 %vm279_vm2, %v16893_v17 }
 0x232   : > { %13756 = vmatmul.mubr.msk.f32.gmra.mxu0 %vm279_vm2, %v16887_v20  ;;  %13766 = vmatprep.mubr.msk.f32.mxu1 %vm279_vm2, %v4693_v36  ;;  %v11784_v36 = vld [vmem:[%s19587_s3 + $0xb0] sm:$0xff] }
 0x233   : > { %13822 = vmatprep.mubr.msk.f32.mxu0 %vm279_vm2, %v16521_v4  ;;  %v14666_v4 = vld [vmem:[%s19587_s3 + $0x98] sm:$0xff] }
 0x235   : > { %13767 = vmatmul.mubr.msk.f32.vlgmr.msra.gmra.mxu1 %vm279_vm2, %v4694_v2  ;;  %v11746_v2 = vld [vmem:[%s19587_s3 + $0x80] sm:$0xff] }
 0x236   : > { %13823 = vmatmul.mubr.msk.f32.vlgmr.msra.gmra.mxu0 %vm279_vm2, %v16523_v43  ;;  %13871 = vmatpush3.msra.mxu1 %v14666_v4  ;;  %v11747_v43 = vld [vmem:[%s19587_s3 + $0x88] sm:$0xff]  ;;  %v16982_v4 = vld [vmem:[%s19587_s3 + $0xf8] sm:$0xff] }
 0x237   : > { %13769 = vmatprep.mubr.msk.f32.mxu1 %vm279_vm2, %v16908_v46  ;;  %13825 = vmatprep.mubr.msk.f32.mxu0 %vm279_vm2, %v16551_v13  ;;  %v16932_v13 = vld [vmem:[#allocation2 + $0x49] sm:$0xff] }
 0x238   : > { %13872 = vmatprep.subr.mxu1 %v11748_v34  ;;  %13927 = vmatpush3.msra.mxu0 %v16474_v16  ;;  %v16938_v16 = vld [vmem:[#allocation2 + $0x51] sm:$0xff] }
 0x239   : > { %13873 = vmatpush3.msra.mxu1 %v11748_v34  ;;  %13928 = vmatprep.subr.mxu0 %v11784_v36  ;;  %v16956_v34 = vld [vmem:[#allocation2 + $0x71] sm:$0xff] }
 0x23a   : > { %13770 = vmatmul.mubr.msk.f32.gmra.mxu1 %vm279_vm2, %v16919_v26  ;;  %13826 = vmatmul.mubr.msk.f32.gmra.mxu0 %vm279_vm2, %v16553_v28  ;;  %v11783_v28 = vld [vmem:[%s19587_s3 + $0xa8] sm:$0xff] }
 0x23b   : > { %13772 = vmatprep.mubr.msk.f32.mxu1 %vm279_vm2, %v16932_v13  ;;  %13828 = vmatprep.mubr.msk.f32.mxu0 %vm279_vm2, %v16582_v54  ;;  %v16950_v54 = vld [vmem:[#allocation2 + $0x69] sm:$0xff] }
 0x23c   : > { %13874 = vmatprep.subr.mxu1 %v11747_v43  ;;  %13929 = vmatpush3.msra.mxu0 %v11784_v36  ;;  %v17111_v36 = vld [vmem:[#allocation2 + $0x207] sm:$0xff] }
 0x23d   : > { %13875 = vmatpush3.msra.mxu1 %v11747_v43  ;;  %13930 = vmatprep.subr.mxu0 %v11783_v28  ;;  %v17001_v43 = vld [vmem:[#allocation2 + $0xc9] sm:$0xff] }
 0x23e   : > { %13773 = vmatmul.mubr.msk.f32.gmra.mxu1 %vm279_vm2, %v16938_v16  ;;  %13829 = vmatmul.mubr.msk.f32.gmra.mxu0 %vm279_vm2, %v16584_v24  ;;  %v16964_v24 = vld [vmem:[%s19587_s3 + $0xd8] sm:$0xff] }
 0x23f   : > { %13775 = vmatprep.mubr.msk.f32.mxu1 %vm279_vm2, %v16950_v54  ;;  %13831 = vmatprep.mubr.msk.f32.mxu0 %vm279_vm2, %v16612_v62  ;;  %v16970_v62 = vld [vmem:[#allocation2 + $0x89] sm:$0xff] }
 0x240   : > { %13876 = vmatprep.subr.mxu1 %v11746_v2  ;;  %13931 = vmatpush3.msra.mxu0 %v11783_v28  ;;  %v6648_v28 = vld [vmem:[#allocation2 + $0x88] sm:$0xff] }
 0x241   : > { %13877 = vmatpush3.msra.mxu1 %v11746_v2  ;;  %13932 = vmatprep.subr.mxu0 %v11782_v9  ;;  %v6258_v2 = vld [vmem:[#allocation2 + $0x87] sm:$0xff] }
 0x242   : > { %13776 = vmatmul.mubr.msk.f32.gmra.mxu1 %vm279_vm2, %v16956_v34  ;;  %13832 = vmatmul.mubr.msk.f32.gmra.mxu0 %vm279_vm2, %v16614_v63  ;;  %v16988_v63 = vld [vmem:[#allocation2 + $0xa9] sm:$0xff] }
 0x243   : > { %13778 = vmatprep.mubr.msk.f32.mxu1 %vm279_vm2, %v16970_v62  ;;  %13834 = vmatprep.mubr.msk.f32.mxu0 %vm279_vm2, %v16643_v32  ;;  %v16995_v32 = vld [vmem:[#allocation2 + $0xb1] sm:$0xff] }
 0x244   : > { %13982 = vmatprep.subr.mxu1 %v16964_v24  ;;  %13933 = vmatpush3.msra.mxu0 %v11782_v9 }
 0x245   : > { %14038 = vmatprep.subr.mxu0 %v16982_v4 }
 0x246   : > { %13779 = vmatmul.mubr.msk.f32.gmra.mxu1 %vm279_vm2, %v16977_v53  ;;  %13835 = vmatmul.mubr.msk.f32.gmra.mxu0 %vm279_vm2, %v16645_v61  ;;  %v17007_v61 = vld [vmem:[#allocation2 + $0xd1] sm:$0xff] }
 0x247   : > { %13781 = vmatprep.mubr.msk.f32.mxu1 %vm279_vm2, %v16988_v63  ;;  %13837 = vmatprep.mubr.msk.f32.mxu0 %vm279_vm2, %v16673_v23  ;;  %v17013_v23 = vld [vmem:[#allocation2 + $0xe9] sm:$0xff] }
 0x24a   : > { %13782 = vmatmul.mubr.msk.f32.gmra.mxu1 %vm279_vm2, %v16995_v32  ;;  %13838 = vmatmul.mubr.msk.f32.gmra.mxu0 %vm279_vm2, %v16675_v45  ;;  %v17019_v45 = vld [vmem:[#allocation2 + $0xf1] sm:$0xff] }
 0x24b   : > { %13784 = vmatprep.mubr.msk.f32.mxu1 %vm279_vm2, %v17001_v43  ;;  %13840 = vmatprep.mubr.msk.f32.mxu0 %vm279_vm2, %v16702_v1  ;;  %v17025_v1 = vld [vmem:[#allocation2 + $0x109] sm:$0xff] }
 0x24e   : > { %13785 = vmatmul.mubr.msk.f32.gmra.mxu1 %vm279_vm2, %v17007_v61  ;;  %13841 = vmatmul.mubr.msk.f32.gmra.mxu0 %vm279_vm2, %v16704_v21  ;;  %v17031_v21 = vld [vmem:[#allocation2 + $0x111] sm:$0xff] }
 0x24f   : > { %13787 = vmatprep.mubr.msk.f32.mxu1 %vm279_vm2, %v17013_v23  ;;  %13843 = vmatprep.mubr.msk.f32.mxu0 %vm279_vm2, %v16731_v11  ;;  %v17037_v11 = vld [vmem:[#allocation2 + $0x129] sm:$0xff] }
 0x252   : > { %13788 = vmatmul.mubr.msk.f32.gmra.mxu1 %vm279_vm2, %v17019_v45  ;;  %13844 = vmatmul.mubr.msk.f32.gmra.mxu0 %vm279_vm2, %v16733_v22  ;;  %v17043_v22 = vld [vmem:[#allocation2 + $0x131] sm:$0xff] }
 0x253   : > { %13790 = vmatprep.mubr.msk.f32.mxu1 %vm279_vm2, %v17025_v1  ;;  %13846 = vmatprep.mubr.msk.f32.mxu0 %vm279_vm2, %v16759_v38  ;;  %v17049_v38 = vld [vmem:[#allocation2 + $0x149] sm:$0xff] }
 0x256   : > { %13791 = vmatmul.mubr.msk.f32.gmra.mxu1 %vm279_vm2, %v17031_v21  ;;  %13847 = vmatmul.mubr.msk.f32.gmra.mxu0 %vm279_vm2, %v16761_v40  ;;  %v17055_v40 = vld [vmem:[#allocation2 + $0x151] sm:$0xff] }
 0x257   : > { %13793 = vmatprep.mubr.msk.f32.mxu1 %vm279_vm2, %v17037_v11  ;;  %13849 = vmatprep.mubr.msk.f32.mxu0 %vm279_vm2, %v16785_v7  ;;  %v17061_v7 = vld [vmem:[#allocation2 + $0x169] sm:$0xff] }
 0x25a   : > { %13794 = vmatmul.mubr.msk.f32.gmra.mxu1 %vm279_vm2, %v17043_v22  ;;  %13850 = vmatmul.mubr.msk.f32.gmra.mxu0 %vm279_vm2, %v16787_v39  ;;  %v17067_v39 = vld [vmem:[#allocation2 + $0x171] sm:$0xff] }
 0x25b   : > { %13796 = vmatprep.mubr.msk.f32.mxu1 %vm279_vm2, %v17049_v38  ;;  %13852 = vmatprep.mubr.msk.f32.mxu0 %vm279_vm2, %v16808_v0  ;;  %v17073_v0 = vld [vmem:[#allocation2 + $0x189] sm:$0xff] }
 0x25e   : > { %13797 = vmatmul.mubr.msk.f32.gmra.mxu1 %vm279_vm2, %v17055_v40  ;;  %13853 = vmatmul.mubr.msk.f32.gmra.mxu0 %vm279_vm2, %v16810_v8  ;;  %v17079_v8 = vld [vmem:[#allocation2 + $0x191] sm:$0xff] }
 0x25f   : > { %13799 = vmatprep.mubr.msk.f32.mxu1 %vm279_vm2, %v17061_v7  ;;  %13855 = vmatprep.mubr.msk.f32.mxu0 %vm279_vm2, %v16829_v18  ;;  %v17085_v18 = vld [vmem:[#allocation2 + $0x1a9] sm:$0xff] }
 0x262   : > { %13800 = vmatmul.mubr.msk.f32.gmra.mxu1 %vm279_vm2, %v17067_v39  ;;  %13856 = vmatmul.mubr.msk.f32.gmra.mxu0 %vm279_vm2, %v16831_v44  ;;  %v17091_v44 = vld [vmem:[#allocation2 + $0x1b1] sm:$0xff] }
 0x263   : > { %13802 = vmatprep.mubr.msk.f32.mxu1 %vm279_vm2, %v17073_v0  ;;  %13858 = vmatprep.mubr.msk.f32.mxu0 %vm279_vm2, %v16849_v49  ;;  %v17097_v49 = vld [vmem:[#allocation2 + $0x1c9] sm:$0xff] }
 0x266   : > { %13803 = vmatmul.mubr.msk.f32.gmra.mxu1 %vm279_vm2, %v17079_v8  ;;  %13859 = vmatmul.mubr.msk.f32.gmra.mxu0 %vm279_vm2, %v16851_v60  ;;  %v17103_v60 = vld [vmem:[#allocation2 + $0x1d1] sm:$0xff] }
 0x267   : > { %13805 = vmatprep.mubr.msk.f32.mxu1 %vm279_vm2, %v17085_v18  ;;  %13861 = vmatprep.mubr.msk.f32.mxu0 %vm279_vm2, %v16868_v3  ;;  %v17109_v3 = vld [vmem:[#allocation2 + $0x1e9] sm:$0xff] }
 0x26a   : > { %13806 = vmatmul.mubr.msk.f32.gmra.mxu1 %vm279_vm2, %v17091_v44  ;;  %13862 = vmatmul.mubr.msk.f32.gmra.mxu0 %vm279_vm2, %v16870_v12  ;;  %v17117_v12 = vld [vmem:[#allocation2 + $0x1f1] sm:$0xff] }
 0x26b   : > { %13808 = vmatprep.mubr.msk.f32.mxu1 %vm279_vm2, %v17097_v49  ;;  %13864 = vmatprep.mubr.msk.f32.mxu0 %vm279_vm2, %v16885_v29  ;;  %v17119_v29 = vld [vmem:[#allocation2 + $0x20f] sm:$0xff] }
 0x26e   : > { %13809 = vmatmul.mubr.msk.f32.gmra.mxu1 %vm279_vm2, %v17103_v60  ;;  %13865 = vmatmul.mubr.msk.f32.gmra.mxu0 %vm279_vm2, %v16887_v20  ;;  %v11820_v20 = vld [vmem:[%s19587_s3 + $0xd0] sm:$0xff] }
 0x26f   : > { %13811 = vmatprep.mubr.msk.f32.mxu1 %vm279_vm2, %v17109_v3  ;;  %13867 = vmatprep.mubr.msk.f32.mxu0 %vm279_vm2, %v17111_v36 }
 0x272   : > { %13812 = vmatmul.mubr.msk.f32.gmra.mxu1 %vm279_vm2, %v17117_v12  ;;  %13868 = vmatmul.mubr.msk.f32.gmra.mxu0 %vm279_vm2, %v17119_v29 }
 0x273   : > { %13878 = vmatprep.mubr.msk.f32.mxu1 %vm279_vm2, %v16519_v52  ;;  %13934 = vmatprep.mubr.msk.f32.mxu0 %vm279_vm2, %v16908_v46  ;;  %v11819_v52 = vld [vmem:[%s19587_s3 + $0xc8] sm:$0xff]  ;;  %v6647_v46 = vld [vmem:[#allocation2 + $0x70] sm:$0xff] }
 0x276   : > { %13879 = vmatmul.mubr.msk.f32.vlgmr.msra.gmra.mxu1 %vm279_vm2, %v16531_v58  ;;  %13935 = vmatmul.mubr.msk.f32.vlgmr.msra.gmra.mxu0 %vm279_vm2, %v16919_v26  ;;  %v11856_v58 = vld [vmem:[%s19587_s3 + $0xf0] sm:$0xff]  ;;  %v11891_v26 = vld [vmem:[%s19587_s3 + $0x108] sm:$0xff] }
 0x277   : > { %13983 = vmatpush3.msra.mxu1 %v16964_v24  ;;  %13881 = vmatprep.mubr.msk.f32.mxu1 %vm279_vm2, %v16549_v56  ;;  %v11818_v56 = vld [vmem:[%s19587_s3 + $0xc0] sm:$0xff] }
 0x278   : > { %13937 = vmatprep.mubr.msk.f32.mxu0 %vm279_vm2, %v16932_v13  ;;  %13984 = vmatprep.subr.mxu1 %v11820_v20 }
 0x279   : > { %13985 = vmatpush3.msra.mxu1 %v11820_v20  ;;  %14039 = vmatpush3.msra.mxu0 %v16982_v4  ;;  %v11890_v4 = vld [vmem:[%s19587_s3 + $0x100] sm:$0xff] }
 0x27a   : > { %13882 = vmatmul.mubr.msk.f32.gmra.mxu1 %vm279_vm2, %v16561_v37  ;;  %13938 = vmatmul.mubr.msk.f32.gmra.mxu0 %vm279_vm2, %v16938_v16  ;;  %v11855_v37 = vld [vmem:[%s19587_s3 + $0xe8] sm:$0xff] }
 0x27b   : > { %13884 = vmatprep.mubr.msk.f32.mxu1 %vm279_vm2, %v16580_v47  ;;  %13940 = vmatprep.mubr.msk.f32.mxu0 %vm279_vm2, %v16950_v54  ;;  %v11854_v47 = vld [vmem:[%s19587_s3 + $0xe0] sm:$0xff] }
 0x27c   : > { %13986 = vmatprep.subr.mxu1 %v11819_v52  ;;  %14040 = vmatprep.subr.mxu0 %v11856_v58  ;;  %v6264_v20 = vld [vmem:[#allocation2 + $0xe7] sm:$0xff] }
 0x27d   : > { %13987 = vmatpush3.msra.mxu1 %v11819_v52  ;;  %14041 = vmatpush3.msra.mxu0 %v11856_v58  ;;  %v6654_v52 = vld [vmem:[#allocation2 + $0xe8] sm:$0xff] }
 0x27e   : > { %13885 = vmatmul.mubr.msk.f32.gmra.mxu1 %vm279_vm2, %v16592_v33  ;;  %13941 = vmatmul.mubr.msk.f32.gmra.mxu0 %vm279_vm2, %v16956_v34  ;;  %v17176_v33 = vld [vmem:[%s19587_s3 + $0x118] sm:$0xff] }
 0x27f   : > { %13887 = vmatprep.mubr.msk.f32.mxu1 %vm279_vm2, %v16610_v14  ;;  %13943 = vmatprep.mubr.msk.f32.mxu0 %vm279_vm2, %v16970_v62  ;;  %v19912_v14 = vld [vmem:[#allocation5_spill] sm:$0xff] }
 0x280   : > { %13988 = vmatprep.subr.mxu1 %v11818_v56  ;;  %14042 = vmatprep.subr.mxu0 %v11855_v37  ;;  %v6259_v62 = vld [vmem:[#allocation2 + $0x8f] sm:$0xff] }
 0x281   : > { %13989 = vmatpush3.msra.mxu1 %v11818_v56  ;;  %14043 = vmatpush3.msra.mxu0 %v11855_v37 }
 0x282   : > { %13888 = vmatmul.mubr.msk.f32.gmra.mxu1 %vm279_vm2, %v16622_v19  ;;  %13944 = vmatmul.mubr.msk.f32.gmra.mxu0 %vm279_vm2, %v16977_v53  ;;  %v19913_v19 = vld [vmem:[#allocation6_spill] sm:$0xff] }
 0x283   : > { %13890 = vmatprep.mubr.msk.f32.mxu1 %vm279_vm2, %v16641_v25  ;;  %13946 = vmatprep.mubr.msk.f32.mxu0 %vm279_vm2, %v16988_v63  ;;  %v19914_v25 = vld [vmem:[#allocation7_spill] sm:$0xff]  ;;  %v6649_v53 = vld [vmem:[#allocation2 + $0x90] sm:$0xff] }
 0x284   : > { %14044 = vmatprep.subr.mxu0 %v11854_v47  ;;  %14094 = vmatprep.subr.mxu1 %v17176_v33 }
 0x285   : > { %14045 = vmatpush3.msra.mxu0 %v11854_v47 }
 0x286   : > { %13891 = vmatmul.mubr.msk.f32.gmra.mxu1 %vm279_vm2, %v16653_v5  ;;  %13947 = vmatmul.mubr.msk.f32.gmra.mxu0 %vm279_vm2, %v16995_v32  ;;  %v19915_v5 = vld [vmem:[#allocation51_spill] sm:$0xff] }
 0x287   : > { %13893 = vmatprep.mubr.msk.f32.mxu1 %vm279_vm2, %v16671_v30  ;;  %13949 = vmatprep.mubr.msk.f32.mxu0 %vm279_vm2, %v17001_v43  ;;  %v19916_v30 = vld [vmem:[#allocation26_spill] sm:$0xff]  ;;  %v6260_v43 = vld [vmem:[#allocation2 + $0xa7] sm:$0xff] }
 0x28a   : > { %13894 = vmatmul.mubr.msk.f32.gmra.mxu1 %vm279_vm2, %v19912_v14  ;;  %13950 = vmatmul.mubr.msk.f32.gmra.mxu0 %vm279_vm2, %v17007_v61  ;;  %v6650_v61 = vld [vmem:[#allocation2 + $0xa8] sm:$0xff]  ;;  %v6655_v14 = vld [vmem:[#allocation2 + $0xf0] sm:$0xff] }
 0x28b   : > { %13896 = vmatprep.mubr.msk.f32.mxu1 %vm279_vm2, %v19913_v19  ;;  %13952 = vmatprep.mubr.msk.f32.mxu0 %vm279_vm2, %v17013_v23 }
 0x28e   : > { %13897 = vmatmul.mubr.msk.f32.gmra.mxu1 %vm279_vm2, %v19914_v25  ;;  %13953 = vmatmul.mubr.msk.f32.gmra.mxu0 %vm279_vm2, %v17019_v45 }
 0x28f   : > { %13899 = vmatprep.mubr.msk.f32.mxu1 %vm279_vm2, %v19915_v5  ;;  %13955 = vmatprep.mubr.msk.f32.mxu0 %vm279_vm2, %v17025_v1  ;;  %v6266_v5 = vld [vmem:[#allocation2 + $0x107] sm:$0xff] }
 0x292   : > { %13900 = vmatmul.mubr.msk.f32.gmra.mxu1 %vm279_vm2, %v19916_v30  ;;  %13956 = vmatmul.mubr.msk.f32.gmra.mxu0 %vm279_vm2, %v17031_v21  ;;  %v6656_v30 = vld [vmem:[#allocation2 + $0x108] sm:$0xff] }
 0x293   : > { %13902 = vmatprep.mubr.msk.f32.mxu1 %vm279_vm2, %v16757_v35  ;;  %13958 = vmatprep.mubr.msk.f32.mxu0 %vm279_vm2, %v17037_v11  ;;  %v17271_v35 = vld [vmem:[#allocation2 + $0x208] sm:$0xff] }
 0x294   : > { %v6261_v11 = vld [vmem:[#allocation2 + $0xaf] sm:$0xff] }
 0x296   : > { %13903 = vmatmul.mubr.msk.f32.gmra.mxu1 %vm279_vm2, %v16769_v55  ;;  %13959 = vmatmul.mubr.msk.f32.gmra.mxu0 %vm279_vm2, %v17043_v22  ;;  %v17273_v55 = vld [vmem:[#allocation2 + $0x209] sm:$0xff] }
 0x297   : > { %13905 = vmatprep.mubr.msk.f32.mxu1 %vm279_vm2, %v16783_v48  ;;  %13961 = vmatprep.mubr.msk.f32.mxu0 %vm279_vm2, %v17049_v38  ;;  %v17279_v48 = vld [vmem:[#allocation2 + $0x210] sm:$0xff] }
 0x298   : > { %v6651_v22 = vld [vmem:[#allocation2 + $0xb0] sm:$0xff] }
 0x29a   : > { %13906 = vmatmul.mubr.msk.f32.gmra.mxu1 %vm279_vm2, %v16795_v31  ;;  %13962 = vmatmul.mubr.msk.f32.gmra.mxu0 %vm279_vm2, %v17055_v40  ;;  %v17281_v31 = vld [vmem:[#allocation2 + $0x211] sm:$0xff] }
 0x29b   : > { %13908 = vmatprep.mubr.msk.f32.mxu1 %vm279_vm2, %v16806_v51  ;;  %13964 = vmatprep.mubr.msk.f32.mxu0 %vm279_vm2, %v17061_v7  ;;  %v6254_v51 = vld [vmem:[#allocation2 + $0x47] sm:$0xff] }
 0x29c   : > { %v6262_v7 = vld [vmem:[#allocation2 + $0xc7] sm:$0xff] }
 0x29e   : > { %13909 = vmatmul.mubr.msk.f32.gmra.mxu1 %vm279_vm2, %v16818_v6  ;;  %13965 = vmatmul.mubr.msk.f32.gmra.mxu0 %vm279_vm2, %v17067_v39  ;;  %v6644_v6 = vld [vmem:[#allocation2 + $0x48] sm:$0xff] }
 0x29f   : > { %13911 = vmatprep.mubr.msk.f32.mxu1 %vm279_vm2, %v16827_v41  ;;  %13967 = vmatprep.mubr.msk.f32.mxu0 %vm279_vm2, %v17073_v0  ;;  %v6255_v41 = vld [vmem:[#allocation2 + $0x4f] sm:$0xff] }
 0x2a0   : > { %v6652_v39 = vld [vmem:[#allocation2 + $0xc8] sm:$0xff] }
 0x2a2   : > { %13912 = vmatmul.mubr.msk.f32.gmra.mxu1 %vm279_vm2, %v16839_v15  ;;  %13968 = vmatmul.mubr.msk.f32.gmra.mxu0 %vm279_vm2, %v17079_v8  ;;  %v6645_v15 = vld [vmem:[#allocation2 + $0x50] sm:$0xff] }
 0x2a3   : > { %13914 = vmatprep.mubr.msk.f32.mxu1 %vm279_vm2, %v16847_v50  ;;  %13970 = vmatprep.mubr.msk.f32.mxu0 %vm279_vm2, %v17085_v18  ;;  %v11892_v50 = vld [vmem:[%s19587_s3 + $0x110] sm:$0xff] }
 0x2a6   : > { %13915 = vmatmul.mubr.msk.f32.gmra.mxu1 %vm279_vm2, %v16859_v42  ;;  %13971 = vmatmul.mubr.msk.f32.gmra.mxu0 %vm279_vm2, %v17091_v44  ;;  %v6256_v42 = vld [vmem:[#allocation2 + $0x67] sm:$0xff] }
 0x2a7   : > { %13917 = vmatprep.mubr.msk.f32.mxu1 %vm279_vm2, %v16866_v57  ;;  %13973 = vmatprep.mubr.msk.f32.mxu0 %vm279_vm2, %v17097_v49  ;;  %v6646_v57 = vld [vmem:[#allocation2 + $0x68] sm:$0xff] }
 0x2a8   : > { %v6263_v49 = vld [vmem:[#allocation2 + $0xcf] sm:$0xff] }
 0x2aa   : > { %13918 = vmatmul.mubr.msk.f32.gmra.mxu1 %vm279_vm2, %v16877_v10  ;;  %13974 = vmatmul.mubr.msk.f32.gmra.mxu0 %vm279_vm2, %v17103_v60  ;;  %v17296_v10 = vpop.f32.mrf.mxu1  ;;  %v6653_v60 = vld [vmem:[#allocation2 + $0xd0] sm:$0xff] }
 0x2ab   : > { %13920 = vmatprep.mubr.msk.f32.mxu1 %vm279_vm2, %v16883_v59  ;;  %13976 = vmatprep.mubr.msk.f32.mxu0 %vm279_vm2, %v17109_v3  ;;  %v17298_v59 = vpop.f32.mrf.mxu0 }
 0x2ae   : > { %13921 = vmatmul.mubr.msk.f32.gmra.mxu1 %vm279_vm2, %v16893_v17  ;;  %13977 = vmatmul.mubr.msk.f32.gmra.mxu0 %vm279_vm2, %v17117_v12  ;;  %v6257_v17 = vld [vmem:[#allocation2 + $0x6f] sm:$0xff] }
 0x2af   : > { %13923 = vmatprep.mubr.msk.f32.mxu1 %vm279_vm2, %v17271_v35  ;;  %13979 = vmatprep.mubr.msk.f32.mxu0 %vm279_vm2, %v17273_v55 }
 0x2b2   : > { %13924 = vmatmul.mubr.msk.f32.gmra.mxu1 %vm279_vm2, %v17279_v48  ;;  %13980 = vmatmul.mubr.msk.f32.gmra.mxu0 %vm279_vm2, %v17281_v31 }
 0x2b3   : > { %13990 = vmatprep.mubr.msk.f32.mxu1 %vm279_vm2, %v6254_v51  ;;  %14046 = vmatprep.mubr.msk.f32.mxu0 %vm279_vm2, %v6644_v6 }
 0x2b6   : > { %13991 = vmatmul.mubr.msk.f32.vlgmr.msra.gmra.mxu1 %vm279_vm2, %v6255_v41  ;;  %14047 = vmatmul.mubr.msk.f32.vlgmr.msra.gmra.mxu0 %vm279_vm2, %v6645_v15 }
 0x2b7   : > { %14095 = vmatpush3.msra.mxu1 %v17176_v33  ;;  %13993 = vmatprep.mubr.msk.f32.mxu1 %vm279_vm2, %v6256_v42  ;;  %v6265_v33 = vld [vmem:[#allocation2 + $0xef] sm:$0xff] }
 0x2b8   : > { %14049 = vmatprep.mubr.msk.f32.mxu0 %vm279_vm2, %v6646_v57  ;;  %14096 = vmatprep.subr.mxu1 %v11892_v50  ;;  %v13659_v13 = vpop.f32.mrf.mxu1  ;;  %v6657_v42 = vld [vmem:[#allocation2 + $0x110] sm:$0xff] }
 0x2b9   : > { %14097 = vmatpush3.msra.mxu1 %v11892_v50  ;;  %v13715_v16 = vpop.f32.mrf.mxu0  ;;  %v6267_v50 = vld [vmem:[#allocation2 + $0x10f] sm:$0xff] }
 0x2ba   : > { %13994 = vmatmul.mubr.msk.f32.gmra.mxu1 %vm279_vm2, %v6257_v17  ;;  %14050 = vmatmul.mubr.msk.f32.gmra.mxu0 %vm279_vm2, %v6647_v46  ;;  %v17306_v54 = vadd.f32 %v13715_v16, %v13659_v13  ;;  %v4223_v34 = vpop.f32.mrf.mxu1  ;;  %v6268_v46 = vld [vmem:[#allocation2 + $0x127] sm:$0xff] }
 0x2bb   : > { %13996 = vmatprep.mubr.msk.f32.mxu1 %vm279_vm2, %v6258_v2  ;;  %14052 = vmatprep.mubr.msk.f32.mxu0 %vm279_vm2, %v6648_v28  ;;  %v4544_v9 = vpop.f32.mrf.mxu0 }
 0x2bc   : > { %14098 = vmatprep.subr.mxu1 %v11891_v26  ;;  %v17310_v24 = vadd.f32 %v4544_v9, %v4223_v34  ;;  %v13662_v63 = vpop.f32.mrf.mxu1  ;;  %v6269_v34 = vld [vmem:[#allocation2 + $0x12f] sm:$0xff] }
 0x2bd   : > { %14099 = vmatpush3.msra.mxu1 %v11891_v26  ;;  %v13718_v32 = vpop.f32.mrf.mxu0  ;;  %v6658_v26 = vld [vmem:[#allocation2 + $0x128] sm:$0xff]  ;;  %v6659_v9 = vld [vmem:[#allocation2 + $0x130] sm:$0xff] }
 0x2be   : > { %13997 = vmatmul.mubr.msk.f32.gmra.mxu1 %vm279_vm2, %v6259_v62  ;;  %14053 = vmatmul.mubr.msk.f32.gmra.mxu0 %vm279_vm2, %v6649_v53  ;;  %v17317_v23 = vadd.f32 %v13718_v32, %v13662_v63  ;;  %v4233_v45 = vpop.f32.mrf.mxu1  ;;  %v6660_v63 = vld [vmem:[#allocation2 + $0x148] sm:$0xff] }
 0x2bf   : > { %13999 = vmatprep.mubr.msk.f32.mxu1 %vm279_vm2, %v6260_v43  ;;  %14055 = vmatprep.mubr.msk.f32.mxu0 %vm279_vm2, %v6650_v61  ;;  %v4554_v1 = vpop.f32.mrf.mxu0 }
 0x2c0   : > { %14100 = vmatprep.subr.mxu1 %v11890_v4  ;;  %v17321_v21 = vadd.f32 %v4554_v1, %v4233_v45  ;;  %v13665_v38 = vpop.f32.mrf.mxu1  ;;  %v6271_v1 = vld [vmem:[#allocation2 + $0x14f] sm:$0xff] }
 0x2c1   : > { %14101 = vmatpush3.msra.mxu1 %v11890_v4  ;;  %v13721_v40 = vpop.f32.mrf.mxu0  ;;  %v6270_v4 = vld [vmem:[#allocation2 + $0x147] sm:$0xff] }
 0x2c2   : > { %14000 = vmatmul.mubr.msk.f32.gmra.mxu1 %vm279_vm2, %v6261_v11  ;;  %14056 = vmatmul.mubr.msk.f32.gmra.mxu0 %vm279_vm2, %v6651_v22  ;;  %v17325_v0 = vadd.f32 %v13721_v40, %v13665_v38  ;;  %v4243_v8 = vpop.f32.mrf.mxu1  ;;  %v6661_v11 = vld [vmem:[#allocation2 + $0x150] sm:$0xff]  ;;  %v6272_v40 = vld [vmem:[#allocation2 + $0x167] sm:$0xff] }
 0x2c3   : > { %14002 = vmatprep.mubr.msk.f32.mxu1 %vm279_vm2, %v6262_v7  ;;  %14058 = vmatprep.mubr.msk.f32.mxu0 %vm279_vm2, %v6652_v39  ;;  %v4564_v18 = vpop.f32.mrf.mxu0  ;;  %v6662_v7 = vld [vmem:[#allocation2 + $0x168] sm:$0xff] }
 0x2c4   : > { %v17329_v44 = vadd.f32 %v4564_v18, %v4243_v8  ;;  %v13668_v3 = vpop.f32.mrf.mxu1 }
 0x2c5   : > { %v13724_v12 = vpop.f32.mrf.mxu0 }
 0x2c6   : > { %14003 = vmatmul.mubr.msk.f32.gmra.mxu1 %vm279_vm2, %v6263_v49  ;;  %14059 = vmatmul.mubr.msk.f32.gmra.mxu0 %vm279_vm2, %v6653_v60  ;;  %v17333_v58 = vadd.f32 %v13724_v12, %v13668_v3  ;;  %v4253_v56 = vpop.f32.mrf.mxu1  ;;  %v6273_v49 = vld [vmem:[#allocation2 + $0x16f] sm:$0xff] }
 0x2c7   : > { %14005 = vmatprep.mubr.msk.f32.mxu1 %vm279_vm2, %v6264_v20  ;;  %14061 = vmatprep.mubr.msk.f32.mxu0 %vm279_vm2, %v6654_v52  ;;  %v4574_v37 = vpop.f32.mrf.mxu0  ;;  %v6663_v60 = vld [vmem:[#allocation2 + $0x170] sm:$0xff]  ;;  %v6274_v20 = vld [vmem:[#allocation2 + $0x187] sm:$0xff] }
 0x2c8   : > { %v17337_v47 = vadd.f32 %v4574_v37, %v4253_v56  ;;  %v13671_v19 = vpop.f32.mrf.mxu1  ;;  %v6664_v52 = vld [vmem:[#allocation2 + $0x188] sm:$0xff] }
 0x2c9   : > { %v13727_v25 = vpop.f32.mrf.mxu0 }
 0x2ca   : > { %14006 = vmatmul.mubr.msk.f32.gmra.mxu1 %vm279_vm2, %v6265_v33  ;;  %14062 = vmatmul.mubr.msk.f32.gmra.mxu0 %vm279_vm2, %v6655_v14  ;;  %v17341_v51 = vadd.f32 %v13727_v25, %v13671_v19  ;;  %v4263_v6 = vpop.f32.mrf.mxu1  ;;  %v6275_v14 = vld [vmem:[#allocation2 + $0x18f] sm:$0xff] }
 0x2cb   : > { %14008 = vmatprep.mubr.msk.f32.mxu1 %vm279_vm2, %v6266_v5  ;;  %14064 = vmatprep.mubr.msk.f32.mxu0 %vm279_vm2, %v6656_v30  ;;  %v4584_v41 = vpop.f32.mrf.mxu0  ;;  %v6665_v19 = vld [vmem:[#allocation2 + $0x190] sm:$0xff]  ;;  %v6276_v30 = vld [vmem:[#allocation2 + $0x1a7] sm:$0xff] }
 0x2cc   : > { %v17345_v15 = vadd.f32 %v4584_v41, %v4263_v6  ;;  %v13674_v57 = vpop.f32.mrf.mxu1  ;;  %v6666_v6 = vld [vmem:[#allocation2 + $0x1a8] sm:$0xff] }
 0x2cd   : > { %v13730_v17 = vpop.f32.mrf.mxu0 }
 0x2ce   : > { %14009 = vmatmul.mubr.msk.f32.gmra.mxu1 %vm279_vm2, %v6267_v50  ;;  %14065 = vmatmul.mubr.msk.f32.gmra.mxu0 %vm279_vm2, %v6657_v42  ;;  %v17349_v13 = vadd.f32 %v13730_v17, %v13674_v57  ;;  %v4273_v16 = vpop.f32.mrf.mxu1  ;;  %v6277_v57 = vld [vmem:[#allocation2 + $0x1af] sm:$0xff] }
 0x2cf   : > { %14011 = vmatprep.mubr.msk.f32.mxu1 %vm279_vm2, %v6268_v46  ;;  %14067 = vmatprep.mubr.msk.f32.mxu0 %vm279_vm2, %v6658_v26  ;;  %v4594_v2 = vpop.f32.mrf.mxu0  ;;  %v6667_v17 = vld [vmem:[#allocation2 + $0x1b0] sm:$0xff] }
 0x2d0   : > { %v17353_v28 = vadd.f32 %v4594_v2, %v4273_v16  ;;  %v13677_v62 = vpop.f32.mrf.mxu1  ;;  %v6278_v16 = vld [vmem:[#allocation2 + $0x1c7] sm:$0xff] }
 0x2d1   : > { %v13733_v53 = vpop.f32.mrf.mxu0  ;;  %v6668_v2 = vld [vmem:[#allocation2 + $0x1c8] sm:$0xff] }
 0x2d2   : > { %14012 = vmatmul.mubr.msk.f32.gmra.mxu1 %vm279_vm2, %v6269_v34  ;;  %14068 = vmatmul.mubr.msk.f32.gmra.mxu0 %vm279_vm2, %v6659_v9  ;;  %v17357_v32 = vadd.f32 %v13733_v53, %v13677_v62  ;;  %v4283_v43 = vpop.f32.mrf.mxu1  ;;  %v6279_v53 = vld [vmem:[#allocation2 + $0x1cf] sm:$0xff] }
 0x2d3   : > { %14014 = vmatprep.mubr.msk.f32.mxu1 %vm279_vm2, %v6270_v4  ;;  %14070 = vmatprep.mubr.msk.f32.mxu0 %vm279_vm2, %v6660_v63  ;;  %v4604_v61 = vpop.f32.mrf.mxu0  ;;  %v6669_v4 = vld [vmem:[#allocation2 + $0x1d0] sm:$0xff] }
 0x2d4   : > { %v17361_v45 = vadd.f32 %v4604_v61, %v4283_v43  ;;  %v6280_v61 = vld [vmem:[#allocation2 + $0x1e7] sm:$0xff] }
 0x2d5   : > { %v13680_v22 = vpop.f32.mrf.mxu1  ;;  %v13736_v38 = vpop.f32.mrf.mxu0 }
 0x2d6   : > { %14015 = vmatmul.mubr.msk.f32.gmra.mxu1 %vm279_vm2, %v6271_v1  ;;  %14071 = vmatmul.mubr.msk.f32.gmra.mxu0 %vm279_vm2, %v6661_v11  ;;  %v17365_v39 = vadd.f32 %v13736_v38, %v13680_v22  ;;  %v6670_v1 = vld [vmem:[#allocation2 + $0x1e8] sm:$0xff] }
 0x2d7   : > { %14017 = vmatprep.mubr.msk.f32.mxu1 %vm279_vm2, %v6272_v40  ;;  %14073 = vmatprep.mubr.msk.f32.mxu0 %vm279_vm2, %v6662_v7  ;;  %v17369_v8 = vpop.f32.mrf.mxu1  ;;  %v17371_v18 = vpop.f32.mrf.mxu0  ;;  %v6281_v40 = vld [vmem:[#allocation2 + $0x1ef] sm:$0xff] }
 0x2d8   : > { %v6671_v7 = vld [vmem:[#allocation2 + $0x1f0] sm:$0xff] }
 0x2d9   : > { %v13683_v3 = vpop.f32.mrf.mxu1  ;;  %v13739_v12 = vpop.f32.mrf.mxu0 }
 0x2da   : > { %14018 = vmatmul.mubr.msk.f32.gmra.mxu1 %vm279_vm2, %v6273_v49  ;;  %14074 = vmatmul.mubr.msk.f32.gmra.mxu0 %vm279_vm2, %v6663_v60  ;;  %v17375_v56 = vadd.f32 %v13739_v12, %v13683_v3 }
 0x2db   : > { %14020 = vmatprep.mubr.msk.f32.mxu1 %vm279_vm2, %v6274_v20  ;;  %14076 = vmatprep.mubr.msk.f32.mxu0 %vm279_vm2, %v6664_v52  ;;  %v17379_v37 = vpop.f32.mrf.mxu1  ;;  %v17381_v33 = vpop.f32.mrf.mxu0  ;;  %v6284_v52 = vld [vmem:[#allocation2 + $0x227] sm:$0xff] }
 0x2dd   : > { %v13686_v25 = vpop.f32.mrf.mxu1  ;;  %v13742_v5 = vpop.f32.mrf.mxu0 }
 0x2de   : > { %14021 = vmatmul.mubr.msk.f32.gmra.mxu1 %vm279_vm2, %v6275_v14  ;;  %14077 = vmatmul.mubr.msk.f32.gmra.mxu0 %vm279_vm2, %v6665_v19  ;;  %v17385_v41 = vadd.f32 %v13742_v5, %v13686_v25  ;;  %v6674_v14 = vld [vmem:[#allocation2 + $0x228] sm:$0xff] }
 0x2df   : > { %14023 = vmatprep.mubr.msk.f32.mxu1 %vm279_vm2, %v6276_v30  ;;  %14079 = vmatprep.mubr.msk.f32.mxu0 %vm279_vm2, %v6666_v6  ;;  %v17389_v50 = vpop.f32.mrf.mxu1  ;;  %v17391_v42 = vpop.f32.mrf.mxu0 }
 0x2e1   : > { %v13689_v46 = vpop.f32.mrf.mxu1  ;;  %v13745_v26 = vpop.f32.mrf.mxu0 }
 0x2e2   : > { %14024 = vmatmul.mubr.msk.f32.gmra.mxu1 %vm279_vm2, %v6277_v57  ;;  %14080 = vmatmul.mubr.msk.f32.gmra.mxu0 %vm279_vm2, %v6667_v17  ;;  %v17395_v34 = vadd.f32 %v13745_v26, %v13689_v46 }
 0x2e3   : > { %14026 = vmatprep.mubr.msk.f32.mxu1 %vm279_vm2, %v6278_v16  ;;  %14082 = vmatprep.mubr.msk.f32.mxu0 %vm279_vm2, %v6668_v2  ;;  %v17399_v9 = vpop.f32.mrf.mxu1  ;;  %v17401_v62 = vpop.f32.mrf.mxu0  ;;  %v7035_v16 = vld [vmem:[#allocation2 + $0x51] sm:$0xff] }
 0x2e5   : > { %v13692_v63 = vpop.f32.mrf.mxu1 }
 0x2e6   : > { %v13748_v43 = vpop.f32.mrf.mxu0  ;;  %14027 = vmatmul.mubr.msk.f32.gmra.mxu1 %vm279_vm2, %v6279_v53  ;;  %14083 = vmatmul.mubr.msk.f32.gmra.mxu0 %vm279_vm2, %v6669_v4  ;;  %v7036_v4 = vld [vmem:[#allocation2 + $0x69] sm:$0xff] }
 0x2e7   : > { %v17405_v11 = vadd.f32 %v13748_v43, %v13692_v63  ;;  %14029 = vmatprep.mubr.msk.f32.mxu1 %vm279_vm2, %v6280_v61  ;;  %14085 = vmatprep.mubr.msk.f32.mxu0 %vm279_vm2, %v6670_v1  ;;  %v17409_v22 = vpop.f32.mrf.mxu1 }
 0x2e8   : > { %19917 = vst [vmem:[#allocation16_spill] sm:$0xff] %v17409_v22  ;;  %v17411_v38 = vpop.f32.mrf.mxu0 }
 0x2e9   : > { %19918 = vst [vmem:[#allocation28_spill] sm:$0xff] %v17411_v38  ;;  %v13695_v49 = vpop.f32.mrf.mxu1 }
 0x2ea   : > { %v13751_v60 = vpop.f32.mrf.mxu0  ;;  %14030 = vmatmul.mubr.msk.f32.gmra.mxu1 %vm279_vm2, %v6281_v40  ;;  %14086 = vmatmul.mubr.msk.f32.gmra.mxu0 %vm279_vm2, %v6671_v7  ;;  %v7037_v40 = vld [vmem:[#allocation2 + $0x71] sm:$0xff] }
 0x2eb   : > { %v17415_v3 = vadd.f32 %v13751_v60, %v13695_v49  ;;  %14032 = vmatprep.mubr.msk.f32.mxu1 %vm279_vm2, %v17111_v36  ;;  %14088 = vmatprep.mubr.msk.f32.mxu0 %vm279_vm2, %v17271_v35  ;;  %v17421_v12 = vpop.f32.mrf.mxu1  ;;  %v6285_v36 = vld [vmem:[#allocation2 + $0x22f] sm:$0xff] }
 0x2ec   : > { %19919 = vst [vmem:[#allocation50_spill] sm:$0xff] %v17421_v12  ;;  %v17423_v20 = vpop.f32.mrf.mxu0  ;;  %v6675_v35 = vld [vmem:[#allocation2 + $0x230] sm:$0xff] }
 0x2ed   : > { %19920 = vst [vmem:[#allocation27_spill] sm:$0xff] %v17423_v20  ;;  %v13698_v19 = vpop.f32.mrf.mxu1  ;;  %v7038_v60 = vld [vmem:[#allocation2 + $0x89] sm:$0xff] }
 0x2ee   : > { %v13754_v25 = vpop.f32.mrf.mxu0  ;;  %14033 = vmatmul.mubr.msk.f32.gmra.mxu1 %vm279_vm2, %v17119_v29  ;;  %14089 = vmatmul.mubr.msk.f32.gmra.mxu0 %vm279_vm2, %v17279_v48  ;;  %v7034_v29 = vld [vmem:[#allocation2 + $0x49] sm:$0xff] }
 0x2ef   : > { %v17429_v5 = vadd.f32 %v13754_v25, %v13698_v19  ;;  %14035 = vmatprep.mubr.msk.f32.mxu1 %vm279_vm2, %v6284_v52  ;;  %14091 = vmatprep.mubr.msk.f32.mxu0 %vm279_vm2, %v6674_v14  ;;  %v17433_v30 = vpop.f32.mrf.mxu1 }
 0x2f0   : > { %19921 = vst [vmem:[#allocation53_spill] sm:$0xff] %v17433_v30  ;;  %v17435_v6 = vpop.f32.mrf.mxu0  ;;  %v7565_v30 = vld [vmem:[#allocation3 + $0x10] sm:$0xff] }
 0x2f1   : > { %19922 = vst [vmem:[#allocation8_spill] sm:$0xff] %v17435_v6  ;;  %v13701_v57 = vpop.f32.mrf.mxu1 }
 0x2f2   : > { %v13757_v17 = vpop.f32.mrf.mxu0  ;;  %14036 = vmatmul.mubr.msk.f32.gmra.mxu1 %vm279_vm2, %v6285_v36  ;;  %14092 = vmatmul.mubr.msk.f32.gmra.mxu0 %vm279_vm2, %v6675_v35  ;;  %v7039_v36 = vld [vmem:[#allocation2 + $0x91] sm:$0xff] }
 0x2f3   : > { %v17439_v48 = vadd.f32 %v13757_v17, %v13701_v57  ;;  %14102 = vmatprep.mubr.msk.f32.mxu1 %vm279_vm2, %v7034_v29  ;;  %v17442_v46 = vpop.f32.mrf.mxu1  ;;  %v7040_v17 = vld [vmem:[#allocation2 + $0xa9] sm:$0xff] }
 0x2f4   : > { %19923 = vst [vmem:[#allocation18_spill] sm:$0xff] %v17442_v46  ;;  %v17444_v26 = vpop.f32.mrf.mxu0  ;;  %v7528_v46 = vld [vmem:[#allocation3 + $0x7] sm:$0xff] }
 0x2f5   : > { %19924 = vst [vmem:[#allocation52_spill] sm:$0xff] %v17444_v26  ;;  %v13768_v2 = vpop.f32.mrf.mxu1 }
 0x2f6   : > { %v13824_v53 = vpop.f32.mrf.mxu0  ;;  %14103 = vmatmul.mubr.msk.f32.vlgmr.msra.gmra.mxu1 %vm279_vm2, %v7035_v16  ;;  %v5052_v63 = vadd.f32 %v13768_v2, %v16910_v27 }
 0x2f7   : > { %14105 = vmatprep.mubr.msk.f32.mxu1 %vm279_vm2, %v7036_v4  ;;  %v17449_v43 = vpop.f32.mrf.mxu1 }
 0x2f8   : > { %v17451_v61 = vpop.f32.mrf.mxu0  ;;  %v17453_v1 = vadd.f32 %v13824_v53, %v5052_v63 }
 0x2fa   : > { %v13771_v7 = vpop.f32.mrf.mxu1  ;;  %v13827_v49 = vpop.f32.mrf.mxu0  ;;  %14106 = vmatmul.mubr.msk.f32.gmra.mxu1 %vm279_vm2, %v7037_v40  ;;  %v7042_v40 = vld [vmem:[#allocation2 + $0xc9] sm:$0xff] }
 0x2fb   : > { %v5054_v52 = vadd.f32 %v13771_v7, %v17306_v54  ;;  %14108 = vmatprep.mubr.msk.f32.mxu1 %vm279_vm2, %v7038_v60 }
 0x2fc   : > { %v4902_v14 = vpop.f32.mrf.mxu1  ;;  %v17458_v27 = vpop.f32.mrf.mxu0 }
 0x2fd   : > { %v17460_v19 = vadd.f32 %v13827_v49, %v5054_v52  ;;  %v17463_v25 = vadd.f32 %v4902_v14, %v17310_v24  ;;  %v7041_v24 = vld [vmem:[#allocation2 + $0xb1] sm:$0xff] }
 0x2fe   : > { %v13774_v35 = vpop.f32.mrf.mxu1  ;;  %v13830_v57 = vpop.f32.mrf.mxu0  ;;  %14109 = vmatmul.mubr.msk.f32.gmra.mxu1 %vm279_vm2, %v7039_v36  ;;  %v11930_v14 = vld [vmem:[%s19589_s5 + $0x38] sm:$0xff] }
 0x2ff   : > { %v5056_v29 = vadd.f32 %v13774_v35, %v17317_v23  ;;  %14111 = vmatprep.mubr.msk.f32.mxu1 %vm279_vm2, %v7040_v17  ;;  %14150 = vmatprep.subr.mxu0 %v11930_v14 }
 0x300   : > { %v4912_v54 = vpop.f32.mrf.mxu1  ;;  %v17468_v16 = vpop.f32.mrf.mxu0  ;;  %14151 = vmatpush3.msra.mxu0 %v11930_v14 }
 0x301   : > { %v17470_v2 = vadd.f32 %v13830_v57, %v5056_v29  ;;  %v17473_v53 = vadd.f32 %v4912_v54, %v17321_v21  ;;  %v7043_v21 = vld [vmem:[#allocation2 + $0xd1] sm:$0xff] }
 0x302   : > { %v13777_v4 = vpop.f32.mrf.mxu1  ;;  %v13833_v63 = vpop.f32.mrf.mxu0  ;;  %14112 = vmatmul.mubr.msk.f32.gmra.mxu1 %vm279_vm2, %v7041_v24  ;;  %v7045_v24 = vld [vmem:[#allocation2 + $0xf1] sm:$0xff] }
 0x303   : > { %v5058_v7 = vadd.f32 %v13777_v4, %v17325_v0  ;;  %14114 = vmatprep.mubr.msk.f32.mxu1 %vm279_vm2, %v7042_v40  ;;  %v7044_v0 = vld [vmem:[#allocation2 + $0xe9] sm:$0xff] }
 0x304   : > { %v4922_v23 = vpop.f32.mrf.mxu1  ;;  %v17478_v49 = vpop.f32.mrf.mxu0  ;;  %v7046_v40 = vld [vmem:[#allocation2 + $0x109] sm:$0xff] }
 0x305   : > { %v17480_v60 = vadd.f32 %v13833_v63, %v5058_v7  ;;  %v17483_v52 = vadd.f32 %v4922_v23, %v17329_v44 }
 0x306   : > { %v13780_v36 = vpop.f32.mrf.mxu1  ;;  %v13836_v35 = vpop.f32.mrf.mxu0  ;;  %14115 = vmatmul.mubr.msk.f32.gmra.mxu1 %vm279_vm2, %v7043_v21 }
 0x307   : > { %v5060_v57 = vadd.f32 %v13780_v36, %v17333_v58  ;;  %14117 = vmatprep.mubr.msk.f32.mxu1 %vm279_vm2, %v7044_v0  ;;  %v7048_v0 = vld [vmem:[#allocation2 + $0x129] sm:$0xff] }
 0x308   : > { %v4932_v17 = vpop.f32.mrf.mxu1  ;;  %v17491_v29 = vpop.f32.mrf.mxu0 }
 0x309   : > { %v17493_v44 = vadd.f32 %v13836_v35, %v5060_v57  ;;  %v17496_v54 = vadd.f32 %v4932_v17, %v17337_v47  ;;  %v7047_v47 = vld [vmem:[#allocation2 + $0x111] sm:$0xff] }
 0x30a   : > { %v13783_v4 = vpop.f32.mrf.mxu1  ;;  %v13839_v63 = vpop.f32.mrf.mxu0  ;;  %14118 = vmatmul.mubr.msk.f32.gmra.mxu1 %vm279_vm2, %v7045_v24 }
 0x30b   : > { %v5062_v7 = vadd.f32 %v13783_v4, %v17341_v51  ;;  %14120 = vmatprep.mubr.msk.f32.mxu1 %vm279_vm2, %v7046_v40 }
 0x30c   : > { %v4942_v58 = vpop.f32.mrf.mxu1  ;;  %v17501_v23 = vpop.f32.mrf.mxu0 }
 0x30d   : > { %v17503_v21 = vadd.f32 %v13839_v63, %v5062_v7  ;;  %v17506_v14 = vadd.f32 %v4942_v58, %v17345_v15  ;;  %v7049_v15 = vld [vmem:[#allocation2 + $0x131] sm:$0xff]  ;;  %v7050_v7 = vld [vmem:[#allocation2 + $0x149] sm:$0xff] }
 0x30e   : > { %v13786_v36 = vpop.f32.mrf.mxu1  ;;  %v13842_v35 = vpop.f32.mrf.mxu0  ;;  %14121 = vmatmul.mubr.msk.f32.gmra.mxu1 %vm279_vm2, %v7047_v47 }
 0x30f   : > { %v5064_v57 = vadd.f32 %v13786_v36, %v17349_v13  ;;  %14123 = vmatprep.mubr.msk.f32.mxu1 %vm279_vm2, %v7048_v0  ;;  %v11929_v0 = vld [vmem:[%s19589_s5 + $0x30] sm:$0xff] }
 0x310   : > { %v4952_v51 = vpop.f32.mrf.mxu1  ;;  %v17511_v17 = vpop.f32.mrf.mxu0  ;;  %14152 = vmatprep.subr.mxu0 %v11929_v0 }
 0x311   : > { %19925 = vst [vmem:[#allocation55_spill] sm:$0xff] %v17511_v17  ;;  %v17513_v24 = vadd.f32 %v13842_v35, %v5064_v57  ;;  %v17516_v4 = vadd.f32 %v4952_v51, %v17353_v28  ;;  %v7051_v28 = vld [vmem:[#allocation2 + $0x151] sm:$0xff]  ;;  %14153 = vmatpush3.msra.mxu0 %v11929_v0 }
 0x312   : > { %v13789_v63 = vpop.f32.mrf.mxu1  ;;  %v13845_v40 = vpop.f32.mrf.mxu0  ;;  %14124 = vmatmul.mubr.msk.f32.gmra.mxu1 %vm279_vm2, %v7049_v15  ;;  %v4615_v15 = vadd.f32 %v17371_v18, %v17369_v8 }
 0x313   : > { %19926 = vst [vmem:[#allocation29_spill] sm:$0xff] %v17516_v4  ;;  %v5066_v58 = vadd.f32 %v13789_v63, %v17357_v32  ;;  %14126 = vmatprep.mubr.msk.f32.mxu1 %vm279_vm2, %v7050_v7  ;;  %v7052_v32 = vld [vmem:[#allocation2 + $0x169] sm:$0xff] }
 0x314   : > { %v4962_v13 = vpop.f32.mrf.mxu1  ;;  %v17521_v47 = vpop.f32.mrf.mxu0 }
 0x315   : > { %19927 = vst [vmem:[#allocation17_spill] sm:$0xff] %v17521_v47  ;;  %v17523_v36 = vadd.f32 %v13845_v40, %v5066_v58  ;;  %v17526_v35 = vadd.f32 %v4962_v13, %v17361_v45  ;;  %v7053_v13 = vld [vmem:[#allocation2 + $0x171] sm:$0xff] }
 0x316   : > { %v13792_v57 = vpop.f32.mrf.mxu1  ;;  %v13848_v51 = vpop.f32.mrf.mxu0  ;;  %14127 = vmatmul.mubr.msk.f32.gmra.mxu1 %vm279_vm2, %v7051_v28 }
 0x317   : > { %19928 = vst [vmem:[#allocation31_spill] sm:$0xff] %v17526_v35  ;;  %v5068_v63 = vadd.f32 %v13792_v57, %v17365_v39  ;;  %14129 = vmatprep.mubr.msk.f32.mxu1 %vm279_vm2, %v7052_v32  ;;  %v7054_v35 = vld [vmem:[#allocation2 + $0x189] sm:$0xff]  ;;  %v7055_v57 = vld [vmem:[#allocation2 + $0x191] sm:$0xff] }
 0x318   : > { %v4972_v45 = vpop.f32.mrf.mxu1  ;;  %v17536_v40 = vpop.f32.mrf.mxu0 }
 0x319   : > { %19929 = vst [vmem:[#allocation54_spill] sm:$0xff] %v17536_v40  ;;  %v17538_v7 = vadd.f32 %v13848_v51, %v5068_v63  ;;  %v17540_v58 = vadd.f32 %v4972_v45, %v4615_v15  ;;  %v7056_v15 = vld [vmem:[#allocation2 + $0x1a9] sm:$0xff] }
 0x31a   : > { %v13795_v47 = vpop.f32.mrf.mxu1  ;;  %v13851_v28 = vpop.f32.mrf.mxu0  ;;  %14130 = vmatmul.mubr.msk.f32.gmra.mxu1 %vm279_vm2, %v7053_v13  ;;  %v7561_v40 = vld [vmem:[%s19589_s5 + $0x8] sm:$0xff] }
 0x31b   : > { %19930 = vst [vmem:[#allocation30_spill] sm:$0xff] %v17540_v58  ;;  %v5070_v8 = vadd.f32 %v13795_v47, %v17375_v56  ;;  %14132 = vmatprep.mubr.msk.f32.mxu1 %vm279_vm2, %v7054_v35  ;;  %v7057_v35 = vld [vmem:[#allocation2 + $0x1b1] sm:$0xff] }
 0x31c   : > { %v17545_v39 = vpop.f32.mrf.mxu1  ;;  %v17547_v18 = vpop.f32.mrf.mxu0 }
 0x31d   : > { %19931 = vst [vmem:[#allocation57_spill] sm:$0xff] %v17545_v39  ;;  %19932 = vst [vmem:[#allocation19_spill] sm:$0xff] %v17547_v18  ;;  %v17549_v0 = vadd.f32 %v13851_v28, %v5070_v8  ;;  %v7058_v8 = vld [vmem:[#allocation2 + $0x1c9] sm:$0xff] }
 0x31e   : > { %v13798_v51 = vpop.f32.mrf.mxu1  ;;  %v13854_v32 = vpop.f32.mrf.mxu0  ;;  %14133 = vmatmul.mubr.msk.f32.gmra.mxu1 %vm279_vm2, %v7055_v57 }
 0x31f   : > { %v5072_v63 = vadd.f32 %v13798_v51, %v17385_v41  ;;  %14135 = vmatprep.mubr.msk.f32.mxu1 %vm279_vm2, %v7056_v15  ;;  %v7059_v15 = vld [vmem:[#allocation2 + $0x1d1] sm:$0xff] }
 0x320   : > { %v17554_v45 = vpop.f32.mrf.mxu1  ;;  %v17556_v56 = vpop.f32.mrf.mxu0 }
 0x321   : > { %19933 = vst [vmem:[#allocation56_spill] sm:$0xff] %v17554_v45  ;;  %19934 = vst [vmem:[#allocation59_spill] sm:$0xff] %v17556_v56  ;;  %v17558_v47 = vadd.f32 %v13854_v32, %v5072_v63  ;;  %v11928_v32 = vld [vmem:[%s19589_s5 + $0x28] sm:$0xff] }
 0x322   : > { %v13801_v13 = vpop.f32.mrf.mxu1  ;;  %v13857_v28 = vpop.f32.mrf.mxu0  ;;  %14136 = vmatmul.mubr.msk.f32.gmra.mxu1 %vm279_vm2, %v7057_v35  ;;  %v7060_v35 = vld [vmem:[#allocation2 + $0x1e9] sm:$0xff]  ;;  %14154 = vmatprep.subr.mxu0 %v11928_v32 }
 0x323   : > { %v5074_v18 = vadd.f32 %v13801_v13, %v17395_v34  ;;  %14138 = vmatprep.mubr.msk.f32.mxu1 %vm279_vm2, %v7058_v8  ;;  %14155 = vmatpush3.msra.mxu0 %v11928_v32  ;;  %v7061_v8 = vld [vmem:[#allocation2 + $0x1f1] sm:$0xff]  ;;  %v7064_v32 = vld [vmem:[#allocation2 + $0x229] sm:$0xff] }
 0x324   : > { %v17563_v57 = vpop.f32.mrf.mxu1  ;;  %v17565_v41 = vpop.f32.mrf.mxu0 }
 0x325   : > { %19935 = vst [vmem:[#allocation32_spill] sm:$0xff] %v17563_v57  ;;  %19936 = vst [vmem:[#allocation34_spill] sm:$0xff] %v17565_v41  ;;  %v17567_v51 = vadd.f32 %v13857_v28, %v5074_v18 }
 0x326   : > { %v13804_v63 = vpop.f32.mrf.mxu1  ;;  %v13860_v56 = vpop.f32.mrf.mxu0  ;;  %14139 = vmatmul.mubr.msk.f32.gmra.mxu1 %vm279_vm2, %v7059_v15 }
 0x327   : > { %v5076_v34 = vadd.f32 %v13804_v63, %v17405_v11  ;;  %14141 = vmatprep.mubr.msk.f32.mxu1 %vm279_vm2, %v7060_v35 }
 0x328   : > { %v17575_v13 = vpop.f32.mrf.mxu1  ;;  %v17577_v18 = vpop.f32.mrf.mxu0 }
 0x329   : > { %19937 = vst [vmem:[#allocation58_spill] sm:$0xff] %v17575_v13  ;;  %19938 = vst [vmem:[#allocation33_spill] sm:$0xff] %v17577_v18  ;;  %v17579_v28 = vadd.f32 %v13860_v56, %v5076_v34  ;;  %v7563_v13 = vld [vmem:[%s19589_s5 + $0x18] sm:$0xff] }
 0x32a   : > { %v13807_v41 = vpop.f32.mrf.mxu1  ;;  %v13863_v57 = vpop.f32.mrf.mxu0  ;;  %14142 = vmatmul.mubr.msk.f32.gmra.mxu1 %vm279_vm2, %v7061_v8  ;;  %14206 = vmatprep.subr.mxu1 %v7563_v13 }
 0x32b   : > { %v5078_v15 = vadd.f32 %v13807_v41, %v17415_v3  ;;  %14144 = vmatprep.mubr.msk.f32.mxu1 %vm279_vm2, %v17273_v55  ;;  %v7065_v3 = vld [vmem:[#allocation2 + $0x231] sm:$0xff]  ;;  %14207 = vmatpush3.msra.mxu1 %v7563_v13  ;;  %v7560_v13 = vld [vmem:[%s19589_s5] sm:$0xff] }
 0x32c   : > { %v17585_v11 = vpop.f32.mrf.mxu1  ;;  %v17587_v63 = vpop.f32.mrf.mxu0 }
 0x32d   : > { %19939 = vst [vmem:[#allocation61_spill] sm:$0xff] %v17585_v11  ;;  %19940 = vst [vmem:[#allocation9_spill] sm:$0xff] %v17587_v63  ;;  %v17589_v35 = vadd.f32 %v13863_v57, %v5078_v15 }
 0x32e   : > { %v13810_v18 = vpop.f32.mrf.mxu1  ;;  %v13866_v56 = vpop.f32.mrf.mxu0  ;;  %14145 = vmatmul.mubr.msk.f32.gmra.mxu1 %vm279_vm2, %v17281_v31  ;;  %v11927_v31 = vld [vmem:[%s19589_s5 + $0x20] sm:$0xff] }
 0x32f   : > { %v5080_v34 = vadd.f32 %v13810_v18, %v17429_v5  ;;  %14147 = vmatprep.mubr.msk.f32.mxu1 %vm279_vm2, %v7064_v32  ;;  %14156 = vmatprep.subr.mxu0 %v11927_v31 }
 0x330   : > { %v17595_v41 = vpop.f32.mrf.mxu1  ;;  %v17597_v55 = vpop.f32.mrf.mxu0  ;;  %14157 = vmatpush3.msra.mxu0 %v11927_v31 }
 0x331   : > { %19941 = vst [vmem:[#allocation20_spill] sm:$0xff] %v17595_v41  ;;  %19942 = vst [vmem:[#allocation60_spill] sm:$0xff] %v17597_v55  ;;  %v17599_v8 = vadd.f32 %v13866_v56, %v5080_v34 }
 0x332   : > { %v13813_v63 = vpop.f32.mrf.mxu1  ;;  %v13869_v11 = vpop.f32.mrf.mxu0  ;;  %14148 = vmatmul.mubr.msk.f32.gmra.mxu1 %vm279_vm2, %v7065_v3 }
 0x333   : > { %v5082_v57 = vadd.f32 %v13813_v63, %v17439_v48  ;;  %14214 = vmatprep.mubr.msk.f32.mxu1 %vm279_vm2, %v7528_v46 }
 0x334   : > { %v17606_v5 = vpop.f32.mrf.mxu1  ;;  %v17608_v18 = vpop.f32.mrf.mxu0 }
 0x335   : > { %19943 = vst [vmem:[#allocation63_spill] sm:$0xff] %v17606_v5  ;;  %19944 = vst [vmem:[#allocation10_spill] sm:$0xff] %v17608_v18  ;;  %v17610_v15 = vadd.f32 %v13869_v11, %v5082_v57 }
 0x336   : > { %v13880_v32 = vpop.f32.mrf.mxu1  ;;  %v17612_v56 = vpop.f32.mrf.mxu0 }
 0x337   : > { %v17615_v34 = vadd.f32 %v13880_v32, %v17453_v1 }
 0x338   : > { %v17617_v3 = vpop.f32.mrf.mxu1  ;;  %v17619_v48 = vpop.f32.mrf.mxu0 }
 0x33a   : > { %v13883_v63 = vpop.f32.mrf.mxu1  ;;  %v17621_v55 = vpop.f32.mrf.mxu0 }
 0x33b   : > { %v17624_v5 = vadd.f32 %v13883_v63, %v17460_v19 }
 0x33c   : > { %v17626_v18 = vpop.f32.mrf.mxu1  ;;  %v17628_v11 = vpop.f32.mrf.mxu0 }
 0x33e   : > { %v13886_v57 = vpop.f32.mrf.mxu1  ;;  %v17630_v31 = vpop.f32.mrf.mxu0 }
 0x33f   : > { %v17633_v1 = vadd.f32 %v13886_v57, %v17470_v2  ;;  %v7562_v2 = vld [vmem:[%s19589_s5 + $0x10] sm:$0xff] }
 0x340   : > { %v17635_v32 = vpop.f32.mrf.mxu1  ;;  %v17637_v41 = vpop.f32.mrf.mxu0  ;;  %14208 = vmatprep.subr.mxu1 %v7562_v2 }
 0x341   : > { %14209 = vmatpush3.msra.mxu1 %v7562_v2 }
 0x342   : > { %v13889_v19 = vpop.f32.mrf.mxu1  ;;  %v17642_v63 = vpop.f32.mrf.mxu0  ;;  %14210 = vmatprep.subr.mxu1 %v7561_v40 }
 0x343   : > { %v17645_v45 = vadd.f32 %v13889_v19, %v17480_v60  ;;  %14211 = vmatpush3.msra.mxu1 %v7561_v40  ;;  %v7564_v19 = vld [vmem:[#allocation3 + $0x8] sm:$0xff]  ;;  %v11998_v40 = vld [vmem:[%s19589_s5 + $0x58] sm:$0xff] }
 0x344   : > { %v17650_v57 = vpop.f32.mrf.mxu1  ;;  %v17652_v39 = vpop.f32.mrf.mxu0  ;;  %14212 = vmatprep.subr.mxu1 %v7560_v13  ;;  %14158 = vmatprep.mubr.msk.f32.mxu0 %vm279_vm2, %v7564_v19 }
 0x345   : > { %14213 = vmatpush3.msra.mxu1 %v7560_v13  ;;  %14159 = vmatmul.mubr.msk.f32.vlgmr.msra.gmra.mxu0 %vm279_vm2, %v7565_v30 }
 0x346   : > { %v13892_v58 = vpop.f32.mrf.mxu1  ;;  %v17657_v26 = vpop.f32.mrf.mxu0  ;;  %14262 = vmatprep.subr.mxu0 %v11998_v40 }
 0x347   : > { %v17660_v60 = vadd.f32 %v13892_v58, %v17493_v44  ;;  %v7529_v44 = vld [vmem:[#allocation3 + $0xf] sm:$0xff]  ;;  %14263 = vmatpush3.msra.mxu0 %v11998_v40 }
 0x348   : > { %v17665_v6 = vpop.f32.mrf.mxu1  ;;  %v17667_v2 = vpop.f32.mrf.mxu0  ;;  %14215 = vmatmul.mubr.msk.f32.vlgmr.msra.gmra.mxu1 %vm279_vm2, %v7529_v44 }
 0x349   : > { %19945 = vst [vmem:[#allocation12_spill] sm:$0xff] %v17667_v2 }
 0x34a   : > { %v13895_v58 = vpop.f32.mrf.mxu1  ;;  %v17674_v17 = vpop.f32.mrf.mxu0 }
 0x34b   : > { %19946 = vst [vmem:[#allocation62_spill] sm:$0xff] %v17674_v17  ;;  %v17679_v4 = vadd.f32 %v13895_v58, %v17503_v21 }
 0x34c   : > { %v17681_v13 = vpop.f32.mrf.mxu1  ;;  %v17683_v46 = vpop.f32.mrf.mxu0 }
 0x34d   : > { %19947 = vst [vmem:[#allocation4_spill] sm:$0xff] %v17679_v4  ;;  %19948 = vst [vmem:[#allocation65_spill] sm:$0xff] %v17681_v13 }
 0x34e   : > { %19949 = vst [vmem:[#allocation21_spill] sm:$0xff] %v17683_v46  ;;  %v13898_v19 = vpop.f32.mrf.mxu1  ;;  %v17685_v20 = vpop.f32.mrf.mxu0 }
 0x34f   : > { %19950 = vst [vmem:[#allocation64_spill] sm:$0xff] %v17685_v20  ;;  %v17688_v12 = vadd.f32 %v13898_v19, %v17513_v24 }
 0x350   : > { %v17690_v17 = vpop.f32.mrf.mxu1  ;;  %v17692_v30 = vpop.f32.mrf.mxu0 }
 0x351   : > { %19951 = vst [vmem:[#allocation67_spill] sm:$0xff] %v17688_v12  ;;  %19952 = vst [vmem:[#allocation11_spill] sm:$0xff] %v17690_v17 }
 0x352   : > { %19953 = vst [vmem:[#allocation35_spill] sm:$0xff] %v17692_v30  ;;  %v13901_v44 = vpop.f32.mrf.mxu1  ;;  %v17694_v2 = vpop.f32.mrf.mxu0 }
 0x353   : > { %19954 = vst [vmem:[#allocation66_spill] sm:$0xff] %v17694_v2  ;;  %v17697_v21 = vadd.f32 %v13901_v44, %v17523_v36  ;;  %v11997_v2 = vld [vmem:[%s19589_s5 + $0x50] sm:$0xff] }
 0x354   : > { %v17699_v58 = vpop.f32.mrf.mxu1  ;;  %v17701_v46 = vpop.f32.mrf.mxu0  ;;  %14264 = vmatprep.subr.mxu0 %v11997_v2 }
 0x355   : > { %19955 = vst [vmem:[#allocation14_spill] sm:$0xff] %v17697_v21  ;;  %19956 = vst [vmem:[#allocation69_spill] sm:$0xff] %v17699_v58  ;;  %14265 = vmatpush3.msra.mxu0 %v11997_v2 }
 0x356   : > { %19957 = vst [vmem:[#allocation13_spill] sm:$0xff] %v17701_v46  ;;  %v13904_v40 = vpop.f32.mrf.mxu1  ;;  %v17703_v4 = vpop.f32.mrf.mxu0 }
 0x357   : > { %19958 = vst [vmem:[#allocation22_spill] sm:$0xff] %v17703_v4  ;;  %v17706_v24 = vadd.f32 %v13904_v40, %v17538_v7 }
 0x358   : > { %v17708_v19 = vpop.f32.mrf.mxu1  ;;  %v17710_v20 = vpop.f32.mrf.mxu0 }
 0x359   : > { %19959 = vst [vmem:[#allocation68_spill] sm:$0xff] %v17706_v24  ;;  %19960 = vst [vmem:[#allocation71_spill] sm:$0xff] %v17708_v19 }
 0x35a   : > { %19961 = vst [vmem:[#allocation36_spill] sm:$0xff] %v17710_v20  ;;  %v13907_v36 = vpop.f32.mrf.mxu1  ;;  %v17715_v44 = vpop.f32.mrf.mxu0 }
 0x35b   : > { %19962 = vst [vmem:[#allocation38_spill] sm:$0xff] %v17715_v44  ;;  %v17718_v46 = vadd.f32 %v13907_v36, %v17549_v0 }
 0x35c   : > { %v17720_v4 = vpop.f32.mrf.mxu1  ;;  %v17722_v7 = vpop.f32.mrf.mxu0 }
 0x35d   : > { %19963 = vst [vmem:[#allocation70_spill] sm:$0xff] %v17718_v46  ;;  %19964 = vst [vmem:[#allocation37_spill] sm:$0xff] %v17720_v4 }
 0x35e   : > { %19965 = vst [vmem:[#allocation73_spill] sm:$0xff] %v17722_v7  ;;  %v13910_v40 = vpop.f32.mrf.mxu1  ;;  %v17724_v24 = vpop.f32.mrf.mxu0 }
 0x35f   : > { %19966 = vst [vmem:[#allocation23_spill] sm:$0xff] %v17724_v24  ;;  %v17727_v20 = vadd.f32 %v13910_v40, %v17558_v47 }
 0x360   : > { %v17729_v19 = vpop.f32.mrf.mxu1  ;;  %v17731_v21 = vpop.f32.mrf.mxu0 }
 0x361   : > { %19967 = vst [vmem:[#allocation72_spill] sm:$0xff] %v17727_v20  ;;  %19968 = vst [vmem:[#allocation39_spill] sm:$0xff] %v17729_v19 }
 0x362   : > { %19969 = vst [vmem:[#allocation41_spill] sm:$0xff] %v17731_v21  ;;  %v13913_v44 = vpop.f32.mrf.mxu1  ;;  %v17733_v58 = vpop.f32.mrf.mxu0 }
 0x363   : > { %19970 = vst [vmem:[#allocation74_spill] sm:$0xff] %v17733_v58  ;;  %v17736_v0 = vadd.f32 %v13913_v44, %v17567_v51  ;;  %v11996_v58 = vld [vmem:[%s19589_s5 + $0x48] sm:$0xff] }
 0x364   : > { %v17738_v2 = vpop.f32.mrf.mxu1  ;;  %v17740_v36 = vpop.f32.mrf.mxu0  ;;  %14266 = vmatprep.subr.mxu0 %v11996_v58 }
 0x365   : > { %19971 = vst [vmem:[#allocation40_spill] sm:$0xff] %v17736_v0  ;;  %19972 = vst [vmem:[#allocation76_spill] sm:$0xff] %v17738_v2  ;;  %14267 = vmatpush3.msra.mxu0 %v11996_v58 }
 0x366   : > { %19973 = vst [vmem:[#allocation15_spill] sm:$0xff] %v17740_v36  ;;  %v13916_v7 = vpop.f32.mrf.mxu1  ;;  %v17742_v46 = vpop.f32.mrf.mxu0 }
 0x367   : > { %19974 = vst [vmem:[#allocation24_spill] sm:$0xff] %v17742_v46  ;;  %v17745_v47 = vadd.f32 %v13916_v7, %v17579_v28 }
 0x368   : > { %v17747_v40 = vpop.f32.mrf.mxu1  ;;  %v17749_v24 = vpop.f32.mrf.mxu0 }
 0x369   : > { %19975 = vst [vmem:[#allocation75_spill] sm:$0xff] %v17745_v47  ;;  %19976 = vst [vmem:[#allocation78_spill] sm:$0xff] %v17747_v40 }
 0x36a   : > { %19977 = vst [vmem:[#allocation42_spill] sm:$0xff] %v17749_v24  ;;  %v13919_v51 = vpop.f32.mrf.mxu1  ;;  %v17754_v44 = vpop.f32.mrf.mxu0 }
 0x36b   : > { %19978 = vst [vmem:[#allocation44_spill] sm:$0xff] %v17754_v44  ;;  %v17757_v36 = vadd.f32 %v13919_v51, %v17589_v35 }
 0x36c   : > { %v17759_v46 = vpop.f32.mrf.mxu1  ;;  %v17761_v28 = vpop.f32.mrf.mxu0 }
 0x36d   : > { %19979 = vst [vmem:[#allocation77_spill] sm:$0xff] %v17757_v36  ;;  %19980 = vst [vmem:[#allocation43_spill] sm:$0xff] %v17759_v46  ;;  %v17817_v36 = vld [vmem:[%s19589_s5 + $0x98] sm:$0xff] }
 0x36e   : > { %19981 = vst [vmem:[#allocation80_spill] sm:$0xff] %v17761_v28  ;;  %v13922_v7 = vpop.f32.mrf.mxu1  ;;  %v17763_v47 = vpop.f32.mrf.mxu0  ;;  %19990 = vst [vmem:[#allocation48_spill] sm:$0xff] %v17817_v36 }
 0x36f   : > { %19982 = vst [vmem:[#allocation25_spill] sm:$0xff] %v17763_v47  ;;  %v17766_v24 = vadd.f32 %v13922_v7, %v17599_v8  ;;  %v11995_v7 = vld [vmem:[%s19589_s5 + $0x40] sm:$0xff] }
 0x370   : > { %v17768_v40 = vpop.f32.mrf.mxu1  ;;  %v17770_v0 = vpop.f32.mrf.mxu0  ;;  %14268 = vmatprep.subr.mxu0 %v11995_v7 }
 0x371   : > { %19983 = vst [vmem:[#allocation79_spill] sm:$0xff] %v17766_v24  ;;  %19984 = vst [vmem:[#allocation82_spill] sm:$0xff] %v17768_v40  ;;  %14269 = vmatpush3.msra.mxu0 %v11995_v7  ;;  %v12032_v7 = vld [vmem:[%s19589_s5 + $0x68] sm:$0xff]  ;;  %v12031_v40 = vld [vmem:[%s19589_s5 + $0x60] sm:$0xff] }
 0x372   : > { %19985 = vst [vmem:[#allocation45_spill] sm:$0xff] %v17770_v0  ;;  %v13925_v44 = vpop.f32.mrf.mxu1  ;;  %v17772_v2 = vpop.f32.mrf.mxu0  ;;  %14374 = vmatprep.subr.mxu0 %v17817_v36 }
 0x373   : > { %19986 = vst [vmem:[#allocation47_spill] sm:$0xff] %v17772_v2  ;;  %v17775_v35 = vadd.f32 %v13925_v44, %v17610_v15  ;;  %v12034_v44 = vld [vmem:[%s19589_s5 + $0x78] sm:$0xff] }
 0x374   : > { %v17777_v58 = vpop.f32.mrf.mxu1  ;;  %v17779_v51 = vpop.f32.mrf.mxu0  ;;  %14318 = vmatprep.subr.mxu1 %v12034_v44 }
 0x375   : > { %19987 = vst [vmem:[#allocation81_spill] sm:$0xff] %v17775_v35  ;;  %19988 = vst [vmem:[#allocation46_spill] sm:$0xff] %v17777_v58  ;;  %14319 = vmatpush3.msra.mxu1 %v12034_v44 }
 0x376   : > { %19989 = vst [vmem:[#allocation83_spill] sm:$0xff] %v17779_v51  ;;  %v17781_v28 = vpop.f32.mrf.mxu1  ;;  %v17783_v47 = vpop.f32.mrf.mxu0  ;;  %v12033_v51 = vld [vmem:[%s19589_s5 + $0x70] sm:$0xff] }
 0x377   : > { %14320 = vmatprep.subr.mxu1 %v12033_v51 }
 0x378   : > { %v17785_v8 = vpop.f32.mrf.mxu1  ;;  %v17790_v0 = vpop.f32.mrf.mxu0  ;;  %14321 = vmatpush3.msra.mxu1 %v12033_v51 }
 0x379   : > { %14322 = vmatprep.subr.mxu1 %v12032_v7 }
 0x37a   : > { %v17792_v2 = vpop.f32.mrf.mxu1  ;;  %v17802_v35 = vpop.f32.mrf.mxu0  ;;  %14323 = vmatpush3.msra.mxu1 %v12032_v7 }
 0x37b   : > { %14324 = vmatprep.subr.mxu1 %v12031_v40 }
 0x37c   : > { %v17794_v15 = vpop.f32.mrf.mxu1  ;;  %v17819_v46 = vpop.f32.mrf.mxu0  ;;  %14325 = vmatpush3.msra.mxu1 %v12031_v40 }
 0x37e   : > { %v17804_v58 = vpop.f32.mrf.mxu1  ;;  %v17826_v21 = vpop.f32.mrf.mxu0 }
 0x380   : > { %v17806_v24 = vpop.f32.mrf.mxu1  ;;  %v17832_v4 = vpop.f32.mrf.mxu0 }
 0x382   : > { %v17821_v44 = vpop.f32.mrf.mxu1  ;;  %v17838_v17 = vpop.f32.mrf.mxu0 }
 0x383   : > { %19995 = vst [vmem:[#allocation6_spill] sm:$0xff] %v17838_v17 }
 0x384   : > { %v17824_v51 = vpop.f32.mrf.mxu1  ;;  %v17844_v13 = vpop.f32.mrf.mxu0 }
 0x385   : > { %19998 = vst [vmem:[#allocation26_spill] sm:$0xff] %v17844_v13 }
 0x386   : > { %v17828_v20 = vpop.f32.mrf.mxu1 }
 0x387   : > { %19991 = vst [vmem:[#allocation84_spill] sm:$0xff] %v17828_v20  ;;  %v17850_v20 = vpop.f32.mrf.mxu0 }
 0x388   : > { %v17830_v19 = vpop.f32.mrf.mxu1  ;;  %20001 = vst [vmem:[#allocation88_spill] sm:$0xff] %v17850_v20 }
 0x389   : > { %19992 = vst [vmem:[#allocation49_spill] sm:$0xff] %v17830_v19 }
 0x38a   : > { %v17834_v30 = vpop.f32.mrf.mxu1 }
 0x38b   : > { %19993 = vst [vmem:[#allocation85_spill] sm:$0xff] %v17834_v30  ;;  %v17856_v30 = vpop.f32.mrf.mxu0 }
 0x38c   : > { %v17836_v12 = vpop.f32.mrf.mxu1  ;;  %20004 = vst [vmem:[#allocation91_spill] sm:$0xff] %v17856_v30 }
 0x38d   : > { %19994 = vst [vmem:[#allocation5_spill] sm:$0xff] %v17836_v12 }
 0x38e   : > { %v17840_v7 = vpop.f32.mrf.mxu1 }
 0x38f   : > { %19996 = vst [vmem:[#allocation7_spill] sm:$0xff] %v17840_v7  ;;  %v17862_v7 = vpop.f32.mrf.mxu0 }
 0x390   : > { %v17842_v36 = vpop.f32.mrf.mxu1  ;;  %20007 = vst [vmem:[#allocation94_spill] sm:$0xff] %v17862_v7 }
 0x391   : > { %19997 = vst [vmem:[#allocation51_spill] sm:$0xff] %v17842_v36 }
 0x392   : > { %v17846_v40 = vpop.f32.mrf.mxu1 }
 0x393   : > { %19999 = vst [vmem:[#allocation86_spill] sm:$0xff] %v17846_v40  ;;  %v17868_v40 = vpop.f32.mrf.mxu0 }
 0x394   : > { %v17848_v38 = vpop.f32.mrf.mxu1  ;;  %20010 = vst [vmem:[#allocation97_spill] sm:$0xff] %v17868_v40 }
 0x395   : > { %20000 = vst [vmem:[#allocation87_spill] sm:$0xff] %v17848_v38 }
 0x396   : > { %v17852_v19 = vpop.f32.mrf.mxu1 }
 0x397   : > { %20002 = vst [vmem:[#allocation89_spill] sm:$0xff] %v17852_v19  ;;  %v17876_v19 = vpop.f32.mrf.mxu0 }
 0x398   : > { %v17854_v22 = vpop.f32.mrf.mxu1 }
 0x399   : > { %20003 = vst [vmem:[#allocation90_spill] sm:$0xff] %v17854_v22  ;;  %v4535_v22 = vadd.f32 %v17298_v59, %v17296_v10  ;;  %v5443_v59 = vadd.f32 %v17458_v27, %v17463_v25  ;;  %v6224_v27 = vadd.f32 %v17621_v55, %v17624_v5  ;;  %v17928_v5 = vld [vmem:[%s19588_s4] ss:$0 sm:$0xff] }
 0x39a   : > { %v17858_v12 = vpop.f32.mrf.mxu1 }
 0x39b   : > { %20005 = vst [vmem:[#allocation92_spill] sm:$0xff] %v17858_v12 }
 0x39c   : > { %v17860_v17 = vpop.f32.mrf.mxu1 }
 0x39d   : > { %20006 = vst [vmem:[#allocation93_spill] sm:$0xff] %v17860_v17  ;;  %v5051_v17 = vadd.f32 %v17449_v43, %v4535_v22  ;;  %v6222_v22 = vadd.f32 %v17612_v56, %v17615_v34 }
 0x39e   : > { %v17864_v36 = vpop.f32.mrf.mxu1 }
 0x39f   : > { %20008 = vst [vmem:[#allocation95_spill] sm:$0xff] %v17864_v36  ;;  %v17883_v36 = vpop.f32.mrf.mxu0  ;;  %v5441_v40 = vadd.f32 %v17451_v61, %v5051_v17  ;;  %v5833_v61 = vadd.f32 %v17626_v18, %v5443_v59  ;;  %v6613_v17 = vadd.f32 %v17781_v28, %v6222_v22  ;;  %v17939_v59 = vadd.f32 %v17381_v33, %v17379_v37 }
 0x3a0   : > { %v17866_v13 = vpop.f32.mrf.mxu1  ;;  %v17952_v37 = vadd.f32 %v17391_v42, %v17389_v50 }
 0x3a1   : > { %20009 = vst [vmem:[#allocation96_spill] sm:$0xff] %v17866_v13  ;;  %v17891_v30 = vpop.f32.mrf.mxu0  ;;  %v7003_v18 = vadd.f32 %v17783_v47, %v6613_v17 }
 0x3a2   : > { %v17870_v38 = vpop.f32.mrf.mxu1 }
 0x3a3   : > { %20011 = vst [vmem:[#allocation98_spill] sm:$0xff] %v17870_v38 }
 0x3a4   : > { %v17872_v20 = vpop.f32.mrf.mxu1 }
 0x3a5   : > { %20012 = vst [vmem:[#allocation99_spill] sm:$0xff] %v17872_v20  ;;  %v5831_v20 = vadd.f32 %v17617_v3, %v5441_v40  ;;  %v5445_v3 = vadd.f32 %v17468_v16, %v17473_v53  ;;  %v17906_v40 = vpop.f32.mrf.mxu0  ;;  %v5447_v16 = vadd.f32 %v17478_v49, %v17483_v52  ;;  %v6226_v53 = vadd.f32 %v17630_v31, %v17633_v1 }
 0x3a6   : > { %v17878_v12 = vpop.f32.mrf.mxu1 }
 0x3a7   : > { %v5835_v56 = vadd.f32 %v17635_v32, %v5445_v3  ;;  %v17923_v28 = vpop.f32.mrf.mxu0  ;;  %v5837_v49 = vadd.f32 %v17650_v57, %v5447_v16  ;;  %v6617_v52 = vadd.f32 %v17804_v58, %v6226_v53 }
 0x3a8   : > { %v17881_v7 = vpop.f32.mrf.mxu1 }
 0x3a9   : > { %v6227_v33 = vadd.f32 %v17652_v39, %v5837_v49  ;;  %v5451_v39 = vadd.f32 %v17501_v23, %v17506_v14  ;;  %v20017_v23 = vld [vmem:[#allocation12_spill] sm:$0xff]  ;;  %v20022_v49 = vld [vmem:[#allocation27_spill] sm:$0xff] }
 0x3aa   : > { %v17885_v13 = vpop.f32.mrf.mxu1 }
 0x3ab   : > { %20013 = vst [vmem:[#allocation100_spill] sm:$0xff] %v17885_v13  ;;  %v6221_v13 = vadd.f32 %v17619_v48, %v5831_v20  ;;  %v6223_v20 = vadd.f32 %v17628_v11, %v5833_v61  ;;  %v6615_v48 = vadd.f32 %v17792_v2, %v6224_v27  ;;  %v6225_v2 = vadd.f32 %v17637_v41, %v5835_v56 }
 0x3ac   : > { %v17888_v38 = vpop.f32.mrf.mxu1  ;;  %v6228_v41 = vadd.f32 %v17642_v63, %v17645_v45  ;;  %v17960_v63 = vld [vmem:[%s19589_s5 + $0xb8] sm:$0xff] }
 0x3ad   : > { %v6612_v25 = vadd.f32 %v17785_v8, %v6221_v13  ;;  %v6614_v32 = vadd.f32 %v17794_v15, %v6223_v20  ;;  %v7005_v1 = vadd.f32 %v17802_v35, %v6615_v48  ;;  %v6616_v57 = vadd.f32 %v17806_v24, %v6225_v2  ;;  %v17946_v15 = vpop.f32.mrf.mxu0  ;;  %14430 = vmatprep.subr.mxu1 %v17960_v63  ;;  %v20021_v2 = vld [vmem:[#allocation50_spill] sm:$0xff] }
 0x3ae   : > { %v17893_v10 = vpop.f32.mrf.mxu1 }
 0x3af   : > { %20014 = vst [vmem:[#allocation101_spill] sm:$0xff] %v17893_v10  ;;  %v7002_v11 = vadd.f32 %v17790_v0, %v6612_v25  ;;  %v5449_v0 = vadd.f32 %v17491_v29, %v17496_v54  ;;  %v7004_v35 = vadd.f32 %v17819_v46, %v6614_v32  ;;  %v7007_v54 = vadd.f32 %v17826_v21, %v6617_v52  ;;  %v17975_v3 = vpop.f32.mrf.mxu0 }
 0x3b0   : > { %v17899_v43 = vpop.f32.mrf.mxu1  ;;  %v6619_v46 = vadd.f32 %v17821_v44, %v6228_v41  ;;  %v6230_v21 = vadd.f32 %v17657_v26, %v17660_v60  ;;  %v7006_v44 = vadd.f32 %v17832_v4, %v6616_v57  ;;  %v6618_v25 = vadd.f32 %v17824_v51, %v6227_v33  ;;  %v20018_v26 = vld [vmem:[#allocation65_spill] sm:$0xff]  ;;  %v20019_v4 = vld [vmem:[#allocation84_spill] sm:$0xff] }
 0x3b1   : > { %v5839_v29 = vadd.f32 %v17665_v6, %v5449_v0  ;;  %v17968_v6 = vadd.f32 %v17401_v62, %v17399_v9  ;;  %v20015_v62 = vld [vmem:[#allocation16_spill] sm:$0xff]  ;;  %v5841_v60 = vadd.f32 %v20018_v26, %v5451_v39  ;;  %v17992_v52 = vadd.f32 %v20022_v49, %v20021_v2  ;;  %v20026_v0 = vld [vmem:[#allocation62_spill] sm:$0xff]  ;;  %v20027_v57 = vld [vmem:[#allocation49_spill] sm:$0xff] }
 0x3b2   : > { %v17908_v10 = vpop.f32.mrf.mxu1  ;;  %v6621_v16 = vadd.f32 %v20019_v4, %v6230_v21  ;;  %v20032_v39 = vld [vmem:[#allocation11_spill] sm:$0xff] }
 0x3b3   : > { %v6229_v14 = vadd.f32 %v20017_v23, %v5839_v29  ;;  %v20035_v23 = vld [vmem:[#allocation18_spill] sm:$0xff]  ;;  %v20037_v4 = vld [vmem:[#allocation31_spill] sm:$0xff] }
 0x3b4   : > { %v17914_v34 = vpop.f32.mrf.mxu1 }
 0x3b6   : > { %v14104_v55 = vpop.f32.mrf.mxu1 }
 0x3b7   : > { %v7393_v13 = vadd.f32 %v14104_v55, %v7003_v18  ;;  %v20016_v18 = vld [vmem:[#allocation28_spill] sm:$0xff]  ;;  %v20020_v55 = vld [vmem:[#allocation6_spill] sm:$0xff] }
 0x3b8   : > { %v7233_v31 = vpop.f32.mrf.mxu1  ;;  %v17982_v48 = vadd.f32 %v20016_v18, %v20015_v62 }
 0x3b9   : > { %v7432_v47 = vadd.f32 %v17928_v5, %v7393_v13  ;;  %v7392_v8 = vadd.f32 %v7233_v31, %v7002_v11  ;;  %v7009_v11 = vadd.f32 %v20020_v55, %v6619_v46  ;;  %v20023_v31 = vld [vmem:[#allocation29_spill] sm:$0xff]  ;;  %v20030_v46 = vld [vmem:[#allocation8_spill] sm:$0xff]  ;;  %v20039_v55 = vld [vmem:[#allocation67_spill] sm:$0xff] }
 0x3ba   : > { %v14107_v58 = vpop.f32.mrf.mxu1 }
 0x3bb   : > { %v7464_v22 = vmax.f32 %v7432_v47, 0.0  ;;  %v7431_v61 = vadd.f32 %v17928_v5, %v7392_v8  ;;  %v7395_v17 = vadd.f32 %v14107_v58, %v7005_v1  ;;  %v20024_v1 = vld [vmem:[#allocation55_spill] sm:$0xff]  ;;  %v20025_v8 = vld [vmem:[#allocation4_spill] sm:$0xff]  ;;  %v6620_v58 = vadd.f32 %v20027_v57, %v6229_v14 }
 0x3bc   : > { %v7243_v45 = vpop.f32.mrf.mxu1  ;;  %v5453_v47 = vadd.f32 %v20024_v1, %v20023_v31  ;;  %v6232_v41 = vadd.f32 %v20026_v0, %v20025_v8  ;;  %v20036_v14 = vld [vmem:[#allocation52_spill] sm:$0xff] }
 0x3bd   : > { %7497 = vst.msk [vmem:[#allocation3 + $0x30] sm:$0xff] %vm279_vm2, %v7464_v22  ;;  %v7463_v24 = vmax.f32 %v7431_v61, 0.0  ;;  %v7434_v50 = vadd.f32 %v17928_v5, %v7395_v17  ;;  %v7394_v42 = vadd.f32 %v7243_v45, %v7004_v35  ;;  %v17999_v35 = vpop.f32.mrf.mxu0  ;;  %v20028_v61 = vld [vmem:[#allocation26_spill] sm:$0xff]  ;;  %v20029_v45 = vld [vmem:[#allocation53_spill] sm:$0xff]  ;;  %v18016_v26 = vadd.f32 %v20036_v14, %v20035_v23  ;;  %v20052_v14 = vld [vmem:[#allocation51_spill] sm:$0xff] }
 0x3be   : > { %v14110_v27 = vpop.f32.mrf.mxu1  ;;  %v7008_v17 = vadd.f32 %v20028_v61, %v6618_v25  ;;  %v5843_v21 = vadd.f32 %v20032_v39, %v5453_v47  ;;  %v20042_v47 = vld [vmem:[#allocation5_spill] sm:$0xff] }
 0x3bf   : > { %7496 = vst.msk [vmem:[#allocation3 + $0x28] sm:$0xff] %vm279_vm2, %v7463_v24  ;;  %v7466_v56 = vmax.f32 %v7434_v50, 0.0  ;;  %v7433_v20 = vadd.f32 %v17928_v5, %v7394_v42  ;;  %v7397_v9 = vadd.f32 %v14110_v27, %v7007_v54  ;;  %v18006_v24 = vadd.f32 %v20030_v46, %v20029_v45  ;;  %v20031_v50 = vld [vmem:[#allocation21_spill] sm:$0xff]  ;;  %v20046_v46 = vld [vmem:[#allocation94_spill] sm:$0xff] }
 0x3c0   : > { %v7253_v53 = vpop.f32.mrf.mxu1  ;;  %v6231_v42 = vadd.f32 %v20031_v50, %v5841_v60 }
 0x3c1   : > { %7499 = vst.msk [vmem:[#allocation3 + $0x50] sm:$0xff] %vm279_vm2, %v7466_v56  ;;  %v7465_v51 = vmax.f32 %v7433_v20, 0.0  ;;  %v7436_v32 = vadd.f32 %v17928_v5, %v7397_v9  ;;  %v7396_v13 = vadd.f32 %v7253_v53, %v7006_v44  ;;  %v20033_v44 = vld [vmem:[#allocation88_spill] sm:$0xff]  ;;  %v20034_v20 = vld [vmem:[#allocation85_spill] sm:$0xff] }
 0x3c2   : > { %v14113_v22 = vpop.f32.mrf.mxu1  ;;  %v7011_v27 = vadd.f32 %v20033_v44, %v6621_v16  ;;  %v6623_v9 = vadd.f32 %v20034_v20, %v6232_v41  ;;  %v20038_v53 = vld [vmem:[#allocation17_spill] sm:$0xff]  ;;  %v20041_v16 = vld [vmem:[#allocation91_spill] sm:$0xff]  ;;  %v6622_v8 = vadd.f32 %v20042_v47, %v6231_v42 }
 0x3c3   : > { %7498 = vst.msk [vmem:[#allocation3 + $0x48] sm:$0xff] %vm279_vm2, %v7465_v51  ;;  %v7468_v33 = vmax.f32 %v7436_v32, 0.0  ;;  %v7435_v29 = vadd.f32 %v17928_v5, %v7396_v13  ;;  %v7399_v54 = vadd.f32 %v14113_v22, %v7009_v11  ;;  %v5455_v60 = vadd.f32 %v20038_v53, %v20037_v4  ;;  %v20040_v11 = vld [vmem:[#allocation64_spill] sm:$0xff]  ;;  %v18023_v13 = vpop.f32.mrf.mxu0  ;;  %v20043_v22 = vld [vmem:[#allocation35_spill] sm:$0xff]  ;;  %v20049_v20 = vld [vmem:[#allocation57_spill] sm:$0xff] }
 0x3c4   : > { %v7263_v56 = vpop.f32.mrf.mxu1  ;;  %v6234_v51 = vadd.f32 %v20040_v11, %v20039_v55  ;;  %v7010_v32 = vadd.f32 %v20041_v16, %v6620_v58  ;;  %v18038_v58 = vld [vmem:[#allocation3 + $0x30] sm:$0xff]  ;;  %v6233_v61 = vadd.f32 %v20043_v22, %v5843_v21  ;;  %v7013_v50 = vadd.f32 %v20046_v46, %v6623_v9 }
 0x3c5   : > { %7501 = vst.msk [vmem:[#allocation3 + $0x70] sm:$0xff] %vm279_vm2, %v7468_v33  ;;  %v7467_v25 = vmax.f32 %v7435_v29, 0.0  ;;  %v7438_v62 = vadd.f32 %v17928_v5, %v7399_v54  ;;  %v7398_v18 = vadd.f32 %v7263_v56, %v7008_v17  ;;  %v20044_v17 = vld [vmem:[#allocation69_spill] sm:$0xff]  ;;  %v20045_v29 = vld [vmem:[#allocation7_spill] sm:$0xff]  ;;  %v20047_v21 = vld [vmem:[#allocation30_spill] sm:$0xff]  ;;  %v18057_v53 = vpop.f32.mrf.mxu0 }
 0x3c6   : > { %v14116_v2 = vpop.f32.mrf.mxu1  ;;  %v18025_v49 = vld [vmem:[#allocation3 + $0x28] sm:$0xff]  ;;  %v5845_v33 = vadd.f32 %v20044_v17, %v5455_v60  ;;  %v6625_v54 = vadd.f32 %v20045_v29, %v6234_v51  ;;  %v6624_v4 = vadd.f32 %v20052_v14, %v6233_v61  ;;  %v20056_v17 = vld [vmem:[#allocation86_spill] sm:$0xff]  ;;  %v20061_v14 = vld [vmem:[#allocation87_spill] sm:$0xff] }
 0x3c7   : > { %v18027_v31 = vld [vmem:[#allocation3 + $0x27] sm:$0xff]  ;;  %v18029_v1 = vld [vmem:[#allocation3 + $0x2f] sm:$0xff]  ;;  %7500 = vst.msk [vmem:[#allocation3 + $0x68] sm:$0xff] %vm279_vm2, %v7467_v25  ;;  %v7470_v0 = vmax.f32 %v7438_v62, 0.0  ;;  %v7437_v41 = vadd.f32 %v17928_v5, %v7398_v18  ;;  %v7401_v57 = vadd.f32 %v14116_v2, %v7011_v27  ;;  %14161 = vmatprep.mubr.msk.f32.mxu0 %vm279_vm2, %v18025_v49  ;;  %v5069_v25 = vadd.f32 %v20049_v20, %v17939_v59 }
 0x3c8   : > { %14217 = vmatprep.mubr.msk.f32.mxu1 %vm279_vm2, %v18027_v31  ;;  %v7273_v45 = vpop.f32.mrf.mxu1  ;;  %14162 = vmatmul.mubr.msk.f32.gmra.mxu0 %vm279_vm2, %v18038_v58  ;;  %v20048_v27 = vld [vmem:[#allocation54_spill] sm:$0xff]  ;;  %v20053_v51 = vld [vmem:[#allocation97_spill] sm:$0xff] }
 0x3c9   : > { %14218 = vmatmul.mubr.msk.f32.gmra.mxu1 %vm279_vm2, %v18029_v1  ;;  %7503 = vst.msk [vmem:[#allocation3 + $0x90] sm:$0xff] %vm279_vm2, %v7470_v0  ;;  %v7469_v42 = vmax.f32 %v7437_v41, 0.0  ;;  %v7440_v39 = vadd.f32 %v17928_v5, %v7401_v57  ;;  %v7400_v44 = vadd.f32 %v7273_v45, %v7010_v32  ;;  %v5457_v56 = vadd.f32 %v20048_v27, %v20047_v21  ;;  %v20050_v62 = vld [vmem:[#allocation14_spill] sm:$0xff]  ;;  %v20054_v0 = vld [vmem:[#allocation13_spill] sm:$0xff]  ;;  %v20055_v57 = vld [vmem:[#allocation71_spill] sm:$0xff] }
 0x3ca   : > { %v20051_v18 = vld [vmem:[#allocation66_spill] sm:$0xff]  ;;  %v14119_v9 = vpop.f32.mrf.mxu1  ;;  %v18059_v60 = vld [vmem:[#allocation3 + $0x48] sm:$0xff]  ;;  %v7012_v16 = vadd.f32 %v20053_v51, %v6622_v8  ;;  %v6235_v41 = vadd.f32 %v20054_v0, %v5845_v33  ;;  %v7015_v8 = vadd.f32 %v17876_v19, %v6625_v54  ;;  %v20057_v33 = vld [vmem:[#allocation19_spill] sm:$0xff]  ;;  %v7014_v27 = vadd.f32 %v17883_v36, %v6624_v4 }
 0x3cb   : > { %v6236_v23 = vadd.f32 %v20051_v18, %v20050_v62  ;;  %v18061_v55 = vld [vmem:[#allocation3 + $0x47] sm:$0xff]  ;;  %v18063_v11 = vld [vmem:[#allocation3 + $0x4f] sm:$0xff]  ;;  %7502 = vst.msk [vmem:[#allocation3 + $0x88] sm:$0xff] %vm279_vm2, %v7469_v42  ;;  %v7472_v32 = vmax.f32 %v7440_v39, 0.0  ;;  %v7439_v59 = vadd.f32 %v17928_v5, %v7400_v44  ;;  %v7403_v2 = vadd.f32 %v14119_v9, %v7013_v50  ;;  %14164 = vmatprep.mubr.msk.f32.mxu0 %vm279_vm2, %v18059_v60 }
 0x3cc   : > { %14220 = vmatprep.mubr.msk.f32.mxu1 %vm279_vm2, %v18061_v55  ;;  %v18072_v47 = vld [vmem:[#allocation3 + $0x50] sm:$0xff]  ;;  %v5847_v22 = vadd.f32 %v20055_v57, %v5457_v56  ;;  %v7283_v61 = vpop.f32.mrf.mxu1  ;;  %v5459_v42 = vadd.f32 %v20057_v33, %v5069_v25  ;;  %v20058_v39 = vld [vmem:[#allocation56_spill] sm:$0xff]  ;;  %v18090_v56 = vpop.f32.mrf.mxu0  ;;  %v6626_v9 = vadd.f32 %v20061_v14, %v6235_v41 }
 0x3cd   : > { %14165 = vmatmul.mubr.msk.f32.gmra.mxu0 %vm279_vm2, %v18072_v47  ;;  %14221 = vmatmul.mubr.msk.f32.gmra.mxu1 %vm279_vm2, %v18063_v11  ;;  %v6627_v29 = vadd.f32 %v20056_v17, %v6236_v23  ;;  %7505 = vst.msk [vmem:[#allocation3 + $0xb0] sm:$0xff] %vm279_vm2, %v7472_v32  ;;  %v7471_v45 = vmax.f32 %v7439_v59, 0.0  ;;  %v7442_v46 = vadd.f32 %v17928_v5, %v7403_v2  ;;  %v20059_v54 = vld [vmem:[#allocation68_spill] sm:$0xff]  ;;  %v20060_v44 = vld [vmem:[#allocation22_spill] sm:$0xff]  ;;  %v20063_v32 = vld [vmem:[#allocation37_spill] sm:$0xff] }
 0x3ce   : > { %v7402_v50 = vadd.f32 %v7283_v61, %v7012_v16  ;;  %v5071_v19 = vadd.f32 %v20058_v39, %v17952_v37  ;;  %v6238_v21 = vadd.f32 %v20060_v44, %v20059_v54  ;;  %v14122_v20 = vpop.f32.mrf.mxu1  ;;  %v18092_v62 = vld [vmem:[#allocation3 + $0x68] sm:$0xff]  ;;  %v18105_v36 = vld [vmem:[#allocation3 + $0x70] sm:$0xff]  ;;  %v20062_v4 = vld [vmem:[#allocation36_spill] sm:$0xff]  ;;  %v5849_v59 = vadd.f32 %v20063_v32, %v5459_v42 }
 0x3cf   : > { %v18094_v18 = vld [vmem:[#allocation3 + $0x67] sm:$0xff]  ;;  %v18096_v23 = vld [vmem:[#allocation3 + $0x6f] sm:$0xff]  ;;  %7504 = vst.msk [vmem:[#allocation3 + $0xa8] sm:$0xff] %vm279_vm2, %v7471_v45  ;;  %v7474_v25 = vmax.f32 %v7442_v46, 0.0  ;;  %v7405_v51 = vadd.f32 %v14122_v20, %v7015_v8  ;;  %14167 = vmatprep.mubr.msk.f32.mxu0 %vm279_vm2, %v18092_v62  ;;  %v6237_v16 = vadd.f32 %v20062_v4, %v5847_v22  ;;  %v7017_v57 = vadd.f32 %v17891_v30, %v6627_v29  ;;  %v20065_v22 = vld [vmem:[#allocation59_spill] sm:$0xff] }
 0x3d0   : > { %v7441_v37 = vadd.f32 %v17928_v5, %v7402_v50  ;;  %14223 = vmatprep.mubr.msk.f32.mxu1 %vm279_vm2, %v18094_v18  ;;  %v20064_v2 = vld [vmem:[#allocation89_spill] sm:$0xff]  ;;  %v7293_v41 = vpop.f32.mrf.mxu1  ;;  %v5461_v45 = vadd.f32 %v20065_v22, %v5071_v19  ;;  %v20066_v46 = vld [vmem:[#allocation32_spill] sm:$0xff]  ;;  %v20067_v33 = vld [vmem:[#allocation70_spill] sm:$0xff] }
 0x3d1   : > { %v6629_v0 = vadd.f32 %v20064_v2, %v6238_v21  ;;  %14168 = vmatmul.mubr.msk.f32.gmra.mxu0 %vm279_vm2, %v18105_v36  ;;  %14224 = vmatmul.mubr.msk.f32.gmra.mxu1 %vm279_vm2, %v18096_v23  ;;  %7507 = vst.msk [vmem:[#allocation3 + $0xd0] sm:$0xff] %vm279_vm2, %v7474_v25  ;;  %v7444_v61 = vadd.f32 %v17928_v5, %v7405_v51  ;;  %v20068_v42 = vld [vmem:[#allocation38_spill] sm:$0xff]  ;;  %v18123_v21 = vpop.f32.mrf.mxu0  ;;  %v20070_v51 = vld [vmem:[#allocation73_spill] sm:$0xff]  ;;  %v20072_v2 = vld [vmem:[#allocation92_spill] sm:$0xff] }
 0x3d2   : > { %v7473_v8 = vmax.f32 %v7441_v37, 0.0  ;;  %v7404_v17 = vadd.f32 %v7293_v41, %v7014_v27  ;;  %v5073_v50 = vadd.f32 %v20066_v46, %v17968_v6  ;;  %v6240_v39 = vadd.f32 %v20068_v42, %v20067_v33  ;;  %v20069_v54 = vld [vmem:[#allocation90_spill] sm:$0xff]  ;;  %v14125_v20 = vpop.f32.mrf.mxu1  ;;  %v18125_v30 = vld [vmem:[#allocation3 + $0x88] sm:$0xff] }
 0x3d3   : > { %v6628_v44 = vadd.f32 %v20069_v54, %v6237_v16  ;;  %v18127_v29 = vld [vmem:[#allocation3 + $0x87] sm:$0xff]  ;;  %v18129_v14 = vld [vmem:[#allocation3 + $0x8f] sm:$0xff]  ;;  %v7016_v27 = vadd.f32 %v17906_v40, %v6626_v9  ;;  %v7476_v19 = vmax.f32 %v7444_v61, 0.0  ;;  %v7407_v25 = vadd.f32 %v14125_v20, %v7017_v57  ;;  %14170 = vmatprep.mubr.msk.f32.mxu0 %vm279_vm2, %v18125_v30  ;;  %v20071_v16 = vld [vmem:[#allocation39_spill] sm:$0xff]  ;;  %v18156_v42 = vpop.f32.mrf.mxu0 }
 0x3d4   : > { %7506 = vst.msk [vmem:[#allocation3 + $0xc8] sm:$0xff] %vm279_vm2, %v7473_v8  ;;  %v7443_v6 = vadd.f32 %v17928_v5, %v7404_v17  ;;  %14226 = vmatprep.mubr.msk.f32.mxu1 %vm279_vm2, %v18127_v29  ;;  %v18138_v37 = vld [vmem:[#allocation3 + $0x90] sm:$0xff]  ;;  %v6239_v4 = vadd.f32 %v20070_v51, %v5849_v59  ;;  %v5851_v32 = vadd.f32 %v20071_v16, %v5461_v45  ;;  %v7303_v9 = vpop.f32.mrf.mxu1  ;;  %v20076_v45 = vld [vmem:[#allocation23_spill] sm:$0xff]  ;;  %v20079_v16 = vld [vmem:[#allocation76_spill] sm:$0xff] }
 0x3d5   : > { %v7019_v40 = vadd.f32 %v17923_v28, %v6629_v0  ;;  %14171 = vmatmul.mubr.msk.f32.gmra.mxu0 %vm279_vm2, %v18138_v37  ;;  %14227 = vmatmul.mubr.msk.f32.gmra.mxu1 %vm279_vm2, %v18129_v14  ;;  %v6631_v41 = vadd.f32 %v20072_v2, %v6240_v39  ;;  %7509 = vst.msk [vmem:[#allocation3 + $0xf0] sm:$0xff] %vm279_vm2, %v7476_v19  ;;  %v20073_v59 = vld [vmem:[#allocation34_spill] sm:$0xff]  ;;  %v20075_v0 = vld [vmem:[#allocation72_spill] sm:$0xff]  ;;  %v20080_v2 = vld [vmem:[#allocation95_spill] sm:$0xff] }
 0x3d6   : > { %v7475_v57 = vmax.f32 %v7443_v6, 0.0  ;;  %v7446_v8 = vadd.f32 %v17928_v5, %v7407_v25  ;;  %v7406_v61 = vadd.f32 %v7303_v9, %v7016_v27  ;;  %v5463_v17 = vadd.f32 %v20073_v59, %v5073_v50  ;;  %v20074_v22 = vld [vmem:[#allocation58_spill] sm:$0xff]  ;;  %v14128_v54 = vpop.f32.mrf.mxu1  ;;  %v18158_v39 = vld [vmem:[#allocation3 + $0xa8] sm:$0xff] }
 0x3d7   : > { %v5075_v28 = vadd.f32 %v20074_v22, %v17982_v48  ;;  %v6242_v46 = vadd.f32 %v20076_v45, %v20075_v0  ;;  %v7018_v33 = vadd.f32 %v17946_v15, %v6628_v44  ;;  %v18160_v20 = vld [vmem:[#allocation3 + $0xa7] sm:$0xff]  ;;  %v18162_v19 = vld [vmem:[#allocation3 + $0xaf] sm:$0xff]  ;;  %v7409_v25 = vadd.f32 %v14128_v54, %v7019_v40  ;;  %14173 = vmatprep.mubr.msk.f32.mxu0 %vm279_vm2, %v18158_v39 }
 0x3d8   : > { %v20077_v27 = vld [vmem:[#allocation93_spill] sm:$0xff]  ;;  %7508 = vst.msk [vmem:[#allocation3 + $0xe8] sm:$0xff] %vm279_vm2, %v7475_v57  ;;  %v7478_v50 = vmax.f32 %v7446_v8, 0.0  ;;  %v7445_v48 = vadd.f32 %v17928_v5, %v7406_v61  ;;  %14229 = vmatprep.mubr.msk.f32.mxu1 %vm279_vm2, %v18160_v20  ;;  %v18171_v15 = vld [vmem:[#allocation3 + $0xb0] sm:$0xff]  ;;  %v5853_v9 = vadd.f32 %v20079_v16, %v5463_v17  ;;  %v7313_v59 = vpop.f32.mrf.mxu1  ;;  %v7021_v40 = vadd.f32 %v17975_v3, %v6631_v41  ;;  %v20083_v45 = vld [vmem:[#allocation40_spill] sm:$0xff]  ;;  %v18189_v16 = vpop.f32.mrf.mxu0 }
 0x3d9   : > { %v6630_v6 = vadd.f32 %v20077_v27, %v6239_v4  ;;  %v20078_v44 = vld [vmem:[#allocation41_spill] sm:$0xff]  ;;  %v6633_v4 = vadd.f32 %v20080_v2, %v6242_v46  ;;  %14174 = vmatmul.mubr.msk.f32.gmra.mxu0 %vm279_vm2, %v18171_v15  ;;  %14230 = vmatmul.mubr.msk.f32.gmra.mxu1 %vm279_vm2, %v18162_v19  ;;  %v7448_v8 = vadd.f32 %v17928_v5, %v7409_v25  ;;  %v20084_v46 = vld [vmem:[#allocation74_spill] sm:$0xff]  ;;  %v20085_v27 = vld [vmem:[#allocation96_spill] sm:$0xff] }
 0x3da   : > { %v6241_v51 = vadd.f32 %v20078_v44, %v5851_v32  ;;  %7511 = vst.msk [vmem:[#allocation3 + $0x110] sm:$0xff] %vm279_vm2, %v7478_v50  ;;  %v7477_v57 = vmax.f32 %v7445_v48, 0.0  ;;  %v7408_v61 = vadd.f32 %v7313_v59, %v7018_v33  ;;  %v20081_v32 = vld [vmem:[#allocation33_spill] sm:$0xff]  ;;  %v6244_v54 = vadd.f32 %v20084_v46, %v20083_v45  ;;  %v14131_v2 = vpop.f32.mrf.mxu1  ;;  %v18204_v25 = vld [vmem:[#allocation3 + $0xd0] sm:$0xff] }
 0x3db   : > { %v5465_v22 = vadd.f32 %v20081_v32, %v5075_v28  ;;  %v20082_v17 = vld [vmem:[#allocation61_spill] sm:$0xff]  ;;  %v7020_v33 = vadd.f32 %v17999_v35, %v6630_v6  ;;  %v7480_v28 = vmax.f32 %v7448_v8, 0.0  ;;  %v7411_v48 = vadd.f32 %v14131_v2, %v7021_v40  ;;  %20086 = vst [vmem:[#allocation16_spill] sm:$0xff] %v18204_v25  ;;  %v20088_v32 = vld [vmem:[#allocation78_spill] sm:$0xff] }
 0x3dc   : > { %v5077_v0 = vadd.f32 %v20082_v17, %v17992_v52  ;;  %v6632_v44 = vadd.f32 %v20085_v27, %v6241_v51  ;;  %v18191_v3 = vld [vmem:[#allocation3 + $0xc8] sm:$0xff]  ;;  %7510 = vst.msk [vmem:[#allocation3 + $0x108] sm:$0xff] %vm279_vm2, %v7477_v57  ;;  %v7447_v52 = vadd.f32 %v17928_v5, %v7408_v61  ;;  %v20087_v51 = vld [vmem:[#allocation15_spill] sm:$0xff]  ;;  %v7023_v35 = vadd.f32 %v18023_v13, %v6633_v4  ;;  %v7323_v6 = vpop.f32.mrf.mxu1  ;;  %v20089_v40 = vld [vmem:[#allocation98_spill] sm:$0xff] }
 0x3dd   : > { %v18193_v41 = vld [vmem:[#allocation3 + $0xc7] sm:$0xff]  ;;  %v18195_v50 = vld [vmem:[#allocation3 + $0xcf] sm:$0xff]  ;;  %14176 = vmatprep.mubr.msk.f32.mxu0 %vm279_vm2, %v18191_v3  ;;  %v6243_v59 = vadd.f32 %v20087_v51, %v5853_v9  ;;  %v5855_v17 = vadd.f32 %v20088_v32, %v5465_v22  ;;  %v6635_v57 = vadd.f32 %v20089_v40, %v6244_v54  ;;  %7513 = vst.msk [vmem:[#allocation3 + $0x130] sm:$0xff] %vm279_vm2, %v7480_v28  ;;  %v20092_v4 = vld [vmem:[#allocation75_spill] sm:$0xff]  ;;  %v18222_v32 = vpop.f32.mrf.mxu0 }
 0x3de   : > { %14232 = vmatprep.mubr.msk.f32.mxu1 %vm279_vm2, %v18193_v41  ;;  %14177 = vmatmul.mubr.msk.f32.gmra.mxu0 %vm279_vm2, %v18204_v25  ;;  %v7479_v8 = vmax.f32 %v7447_v52, 0.0  ;;  %v7450_v61 = vadd.f32 %v17928_v5, %v7411_v48  ;;  %v7410_v45 = vadd.f32 %v7323_v6, %v7020_v33  ;;  %v20090_v9 = vld [vmem:[#allocation9_spill] sm:$0xff]  ;;  %v20091_v22 = vld [vmem:[#allocation20_spill] sm:$0xff]  ;;  %v7022_v51 = vadd.f32 %v18057_v53, %v6632_v44  ;;  %v14134_v25 = vpop.f32.mrf.mxu1  ;;  %v20095_v33 = vld [vmem:[#allocation99_spill] sm:$0xff] }
 0x3df   : > { %14233 = vmatmul.mubr.msk.f32.gmra.mxu1 %vm279_vm2, %v18195_v50  ;;  %v5467_v46 = vadd.f32 %v20090_v9, %v5077_v0  ;;  %v5079_v13 = vadd.f32 %v20091_v22, %v18006_v24  ;;  %v20093_v27 = vld [vmem:[#allocation24_spill] sm:$0xff]  ;;  %v18224_v54 = vld [vmem:[#allocation3 + $0xe8] sm:$0xff]  ;;  %v6634_v48 = vadd.f32 %v20095_v33, %v6243_v59  ;;  %v7413_v6 = vadd.f32 %v14134_v25, %v7023_v35  ;;  %v18237_v53 = vld [vmem:[#allocation3 + $0xf0] sm:$0xff] }
 0x3e0   : > { %v6246_v2 = vadd.f32 %v20093_v27, %v20092_v4  ;;  %20094 = vst [vmem:[#allocation28_spill] sm:$0xff] %v18224_v54  ;;  %v18226_v28 = vld [vmem:[#allocation3 + $0xe7] sm:$0xff]  ;;  %v18228_v52 = vld [vmem:[#allocation3 + $0xef] sm:$0xff]  ;;  %7512 = vst.msk [vmem:[#allocation3 + $0x128] sm:$0xff] %vm279_vm2, %v7479_v8  ;;  %v7482_v0 = vmax.f32 %v7450_v61, 0.0  ;;  %v7449_v24 = vadd.f32 %v17928_v5, %v7410_v45  ;;  %14179 = vmatprep.mubr.msk.f32.mxu0 %vm279_vm2, %v18224_v54  ;;  %v7333_v4 = vpop.f32.mrf.mxu1 }
 0x3e1   : > { %14235 = vmatprep.mubr.msk.f32.mxu1 %vm279_vm2, %v18226_v28  ;;  %20096 = vst [vmem:[#allocation12_spill] sm:$0xff] %v18237_v53  ;;  %v20097_v44 = vld [vmem:[#allocation42_spill] sm:$0xff]  ;;  %v20098_v9 = vld [vmem:[#allocation43_spill] sm:$0xff]  ;;  %v7025_v25 = vadd.f32 %v18090_v56, %v6635_v57  ;;  %v7452_v8 = vadd.f32 %v17928_v5, %v7413_v6  ;;  %v7412_v61 = vadd.f32 %v7333_v4, %v7022_v51  ;;  %v20101_v27 = vld [vmem:[#allocation77_spill] sm:$0xff] }
 0x3e2   : > { %v6245_v40 = vadd.f32 %v20097_v44, %v5855_v17  ;;  %v5857_v22 = vadd.f32 %v20098_v9, %v5467_v46  ;;  %v6637_v59 = vadd.f32 %v17878_v12, %v6246_v2  ;;  %14180 = vmatmul.mubr.msk.f32.gmra.mxu0 %vm279_vm2, %v18237_v53  ;;  %7515 = vst.msk [vmem:[#allocation3 + $0x150] sm:$0xff] %vm279_vm2, %v7482_v0  ;;  %v7481_v35 = vmax.f32 %v7449_v24, 0.0  ;;  %v20099_v17 = vld [vmem:[#allocation60_spill] sm:$0xff]  ;;  %v20100_v46 = vld [vmem:[#allocation63_spill] sm:$0xff]  ;;  %v6973_v9 = vpop.f32.mrf.mxu0  ;;  %v14137_v53 = vpop.f32.mrf.mxu1 }
 0x3e3   : > { %14236 = vmatmul.mubr.msk.f32.gmra.mxu1 %vm279_vm2, %v18228_v52  ;;  %v5469_v45 = vadd.f32 %v20099_v17, %v5079_v13  ;;  %v5081_v12 = vadd.f32 %v20100_v46, %v18016_v26  ;;  %v20102_v2 = vld [vmem:[#allocation44_spill] sm:$0xff]  ;;  %v18255_v54 = vld [vmem:[#allocation3 + $0x108] sm:$0xff]  ;;  %v7024_v51 = vadd.f32 %v18123_v21, %v6634_v48  ;;  %v7484_v13 = vmax.f32 %v7452_v8, 0.0 }
 0x3e4   : > { %v6248_v33 = vadd.f32 %v20102_v2, %v20101_v27  ;;  %v6636_v44 = vadd.f32 %v17881_v7, %v6245_v40  ;;  %v18257_v56 = vld [vmem:[#allocation3 + $0x107] sm:$0xff]  ;;  %v18259_v57 = vld [vmem:[#allocation3 + $0x10f] sm:$0xff]  ;;  %7514 = vst.msk [vmem:[#allocation3 + $0x148] sm:$0xff] %vm279_vm2, %v7481_v35  ;;  %v7451_v26 = vadd.f32 %v17928_v5, %v7412_v61  ;;  %v7415_v0 = vadd.f32 %v14137_v53, %v7025_v25  ;;  %v7343_v48 = vpop.f32.mrf.mxu1  ;;  %v14090_v27 = vpop.f32.mrf.mxu0 }
 0x3e5   : > { %14182 = vmatprep.mubr.msk.f32.mxu0 %vm279_vm2, %v18255_v54  ;;  %14238 = vmatprep.mubr.msk.f32.mxu1 %vm279_vm2, %v18257_v56  ;;  %v18268_v7 = vld [vmem:[#allocation3 + $0x110] sm:$0xff]  ;;  %v20103_v24 = vld [vmem:[#allocation80_spill] sm:$0xff]  ;;  %v7027_v21 = vadd.f32 %v18156_v42, %v6637_v59  ;;  %7517 = vst.msk [vmem:[#allocation3 + $0x170] sm:$0xff] %vm279_vm2, %v7484_v13  ;;  %v7414_v61 = vadd.f32 %v7343_v48, %v7024_v51  ;;  %v20108_v46 = vld [vmem:[#allocation25_spill] sm:$0xff] }
 0x3e6   : > { %v6247_v6 = vadd.f32 %v20103_v24, %v5857_v22  ;;  %v20104_v40 = vld [vmem:[#allocation82_spill] sm:$0xff]  ;;  %14183 = vmatmul.mubr.msk.f32.gmra.mxu0 %vm279_vm2, %v18268_v7  ;;  %v20105_v53 = vld [vmem:[#allocation100_spill] sm:$0xff]  ;;  %v7483_v35 = vmax.f32 %v7451_v26, 0.0  ;;  %v7454_v8 = vadd.f32 %v17928_v5, %v7415_v0  ;;  %v7026_v59 = vadd.f32 %v18189_v16, %v6636_v44  ;;  %v14140_v2 = vpop.f32.mrf.mxu1  ;;  %v20109_v44 = vld [vmem:[#allocation45_spill] sm:$0xff] }
 0x3e7   : > { %v5859_v4 = vadd.f32 %v20104_v40, %v5469_v45  ;;  %14239 = vmatmul.mubr.msk.f32.gmra.mxu1 %vm279_vm2, %v18259_v57  ;;  %v6639_v25 = vadd.f32 %v20105_v53, %v6248_v33  ;;  %v20106_v22 = vld [vmem:[#allocation10_spill] sm:$0xff]  ;;  %v20107_v45 = vld [vmem:[#allocation79_spill] sm:$0xff]  ;;  %v18284_v24 = vld [vmem:[#allocation3 + $0x128] sm:$0xff]  ;;  %v7417_v26 = vadd.f32 %v14140_v2, %v7027_v21 }
 0x3e8   : > { %v5471_v17 = vadd.f32 %v20106_v22, %v5081_v12  ;;  %v6250_v42 = vadd.f32 %v20108_v46, %v20107_v45  ;;  %v18286_v40 = vld [vmem:[#allocation3 + $0x127] sm:$0xff]  ;;  %v18288_v33 = vld [vmem:[#allocation3 + $0x12f] sm:$0xff]  ;;  %v6638_v13 = vadd.f32 %v17888_v38, %v6247_v6  ;;  %7516 = vst.msk [vmem:[#allocation3 + $0x168] sm:$0xff] %vm279_vm2, %v7483_v35  ;;  %v7486_v51 = vmax.f32 %v7454_v8, 0.0  ;;  %14185 = vmatprep.mubr.msk.f32.mxu0 %vm279_vm2, %v18284_v24  ;;  %v7353_v6 = vpop.f32.mrf.mxu1  ;;  %v20113_v45 = vld [vmem:[#allocation47_spill] sm:$0xff] }
 0x3e9   : > { %v7453_v12 = vadd.f32 %v17928_v5, %v7414_v61  ;;  %14241 = vmatprep.mubr.msk.f32.mxu1 %vm279_vm2, %v18286_v40  ;;  %v18297_v16 = vld [vmem:[#allocation3 + $0x130] sm:$0xff]  ;;  %v6249_v0 = vadd.f32 %v20109_v44, %v5859_v4  ;;  %v20111_v22 = vld [vmem:[#allocation101_spill] sm:$0xff]  ;;  %v7029_v21 = vadd.f32 %v18222_v32, %v6639_v25  ;;  %v7456_v8 = vadd.f32 %v17928_v5, %v7417_v26 }
 0x3ea   : > { %v20110_v48 = vld [vmem:[#allocation46_spill] sm:$0xff]  ;;  %v6641_v38 = vadd.f32 %v20111_v22, %v6250_v42  ;;  %14186 = vmatmul.mubr.msk.f32.gmra.mxu0 %vm279_vm2, %v18297_v16  ;;  %7519 = vst.msk [vmem:[#allocation3 + $0x190] sm:$0xff] %vm279_vm2, %v7486_v51  ;;  %v7416_v61 = vadd.f32 %v7353_v6, %v7026_v59  ;;  %v20112_v4 = vld [vmem:[#allocation81_spill] sm:$0xff]  ;;  %v6983_v42 = vpop.f32.mrf.mxu0  ;;  %v14143_v2 = vpop.f32.mrf.mxu1  ;;  %v7028_v32 = vadd.f32 %v6973_v9, %v6638_v13 }
 0x3eb   : > { %v5861_v53 = vadd.f32 %v20110_v48, %v5471_v17  ;;  %14242 = vmatmul.mubr.msk.f32.gmra.mxu1 %vm279_vm2, %v18288_v33  ;;  %v7485_v35 = vmax.f32 %v7453_v12, 0.0  ;;  %v6252_v17 = vadd.f32 %v20113_v45, %v20112_v4  ;;  %v6640_v46 = vadd.f32 %v17899_v43, %v6249_v0  ;;  %v18312_v44 = vld [vmem:[#allocation3 + $0x148] sm:$0xff]  ;;  %v18324_v43 = vld [vmem:[#allocation3 + $0x150] sm:$0xff]  ;;  %v20116_v12 = vld [vmem:[#allocation83_spill] sm:$0xff] }
 0x3ec   : > { %v18314_v48 = vld [vmem:[#allocation3 + $0x147] sm:$0xff]  ;;  %v18316_v22 = vld [vmem:[#allocation3 + $0x14f] sm:$0xff]  ;;  %v7488_v25 = vmax.f32 %v7456_v8, 0.0  ;;  %v7455_v51 = vadd.f32 %v17928_v5, %v7416_v61  ;;  %v7419_v59 = vadd.f32 %v14143_v2, %v7029_v21  ;;  %14188 = vmatprep.mubr.msk.f32.mxu0 %vm279_vm2, %v18312_v44  ;;  %v7031_v0 = vadd.f32 %v14090_v27, %v6641_v38  ;;  %v14093_v6 = vpop.f32.mrf.mxu0  ;;  %v7363_v4 = vpop.f32.mrf.mxu1 }
 0x3ed   : > { %20114 = vst [vmem:[#allocation65_spill] sm:$0xff] %v18314_v48  ;;  %20115 = vst [vmem:[#allocation84_spill] sm:$0xff] %v18316_v22  ;;  %14244 = vmatprep.mubr.msk.f32.mxu1 %vm279_vm2, %v18314_v48  ;;  %v6251_v26 = vadd.f32 %v20116_v12, %v5861_v53  ;;  %v6643_v9 = vadd.f32 %v17908_v10, %v6252_v17  ;;  %v7030_v8 = vadd.f32 %v6983_v42, %v6640_v46  ;;  %v18347_v46 = vld [vmem:[#allocation3 + $0x170] sm:$0xff] }
 0x3ee   : > { %7518 = vst.msk [vmem:[#allocation3 + $0x188] sm:$0xff] %vm279_vm2, %v7485_v35  ;;  %14189 = vmatmul.mubr.msk.f32.gmra.mxu0 %vm279_vm2, %v18324_v43  ;;  %7521 = vst.msk [vmem:[#allocation3 + $0x1b0] sm:$0xff] %vm279_vm2, %v7488_v25  ;;  %v7487_v13 = vmax.f32 %v7455_v51, 0.0  ;;  %v7458_v21 = vadd.f32 %v17928_v5, %v7419_v59  ;;  %v7418_v35 = vadd.f32 %v7363_v4, %v7028_v32  ;;  %v14146_v61 = vpop.f32.mrf.mxu1  ;;  %v6993_v42 = vpop.f32.mrf.mxu0 }
 0x3ef   : > { %14245 = vmatmul.mubr.msk.f32.gmra.mxu1 %vm279_vm2, %v18316_v22  ;;  %v18334_v53 = vld [vmem:[#allocation3 + $0x168] sm:$0xff]  ;;  %v6642_v45 = vadd.f32 %v17914_v34, %v6251_v26  ;;  %v7421_v17 = vadd.f32 %v14146_v61, %v7031_v0  ;;  %v7033_v34 = vadd.f32 %v14093_v6, %v6643_v9 }
 0x3f0   : > { %v18336_v27 = vld [vmem:[#allocation3 + $0x167] sm:$0xff]  ;;  %v18338_v38 = vld [vmem:[#allocation3 + $0x16f] sm:$0xff]  ;;  %7520 = vst.msk [vmem:[#allocation3 + $0x1a8] sm:$0xff] %vm279_vm2, %v7487_v13  ;;  %v7490_v2 = vmax.f32 %v7458_v21, 0.0  ;;  %v7457_v10 = vadd.f32 %v17928_v5, %v7418_v35  ;;  %14191 = vmatprep.mubr.msk.f32.mxu0 %vm279_vm2, %v18334_v53  ;;  %v7373_v32 = vpop.f32.mrf.mxu1 }
 0x3f1   : > { %20117 = vst [vmem:[#allocation6_spill] sm:$0xff] %v18336_v27  ;;  %20118 = vst [vmem:[#allocation50_spill] sm:$0xff] %v18338_v38  ;;  %14247 = vmatprep.mubr.msk.f32.mxu1 %vm279_vm2, %v18336_v27  ;;  %v7460_v51 = vadd.f32 %v17928_v5, %v7421_v17  ;;  %v7420_v59 = vadd.f32 %v7373_v32, %v7030_v8  ;;  %v7032_v13 = vadd.f32 %v6993_v42, %v6642_v45  ;;  %v18367_v9 = vld [vmem:[#allocation3 + $0x190] sm:$0xff] }
 0x3f2   : > { %14192 = vmatmul.mubr.msk.f32.gmra.mxu0 %vm279_vm2, %v18347_v46  ;;  %7523 = vst.msk [vmem:[#allocation3 + $0x1d0] sm:$0xff] %vm279_vm2, %v7490_v2  ;;  %v7489_v25 = vmax.f32 %v7457_v10, 0.0  ;;  %v14149_v12 = vpop.f32.mrf.mxu1 }
 0x3f3   : > { %14248 = vmatmul.mubr.msk.f32.gmra.mxu1 %vm279_vm2, %v18338_v38  ;;  %v7492_v21 = vmax.f32 %v7460_v51, 0.0  ;;  %v7459_v35 = vadd.f32 %v17928_v5, %v7420_v59  ;;  %v7423_v6 = vadd.f32 %v14149_v12, %v7033_v34 }
 0x3f4   : > { %7522 = vst.msk [vmem:[#allocation3 + $0x1c8] sm:$0xff] %vm279_vm2, %v7489_v25  ;;  %v7383_v8 = vpop.f32.mrf.mxu1 }
 0x3f5   : > { %v18355_v26 = vld [vmem:[#allocation3 + $0x188] sm:$0xff]  ;;  %7525 = vst.msk [vmem:[#allocation3 + $0x1f0] sm:$0xff] %vm279_vm2, %v7492_v21  ;;  %v7491_v61 = vmax.f32 %v7459_v35, 0.0  ;;  %v7462_v45 = vadd.f32 %v17928_v5, %v7423_v6  ;;  %v7422_v2 = vadd.f32 %v7383_v8, %v7032_v13  ;;  %v18387_v25 = vld [vmem:[#allocation3 + $0x1b0] sm:$0xff] }
 0x3f6   : > { %v18357_v0 = vld [vmem:[#allocation3 + $0x187] sm:$0xff]  ;;  %v18359_v4 = vld [vmem:[#allocation3 + $0x18f] sm:$0xff]  ;;  %14194 = vmatprep.mubr.msk.f32.mxu0 %vm279_vm2, %v18355_v26 }
 0x3f7   : > { %20119 = vst [vmem:[#allocation27_spill] sm:$0xff] %v18357_v0  ;;  %20120 = vst [vmem:[#allocation29_spill] sm:$0xff] %v18359_v4  ;;  %14250 = vmatprep.mubr.msk.f32.mxu1 %vm279_vm2, %v18357_v0  ;;  %14195 = vmatmul.mubr.msk.f32.gmra.mxu0 %vm279_vm2, %v18367_v9  ;;  %v18375_v10 = vld [vmem:[#allocation3 + $0x1a8] sm:$0xff]  ;;  %v7494_v32 = vmax.f32 %v7462_v45, 0.0  ;;  %v7461_v34 = vadd.f32 %v17928_v5, %v7422_v2  ;;  %v8244_v45 = vld [vmem:[#allocation3 + $0x11] sm:$0xff] }
 0x3f8   : > { %14251 = vmatmul.mubr.msk.f32.gmra.mxu1 %vm279_vm2, %v18359_v4  ;;  %v18377_v17 = vld [vmem:[#allocation3 + $0x1a7] sm:$0xff]  ;;  %v18379_v42 = vld [vmem:[#allocation3 + $0x1af] sm:$0xff]  ;;  %7524 = vst.msk [vmem:[#allocation3 + $0x1e8] sm:$0xff] %vm279_vm2, %v7491_v61  ;;  %14197 = vmatprep.mubr.msk.f32.mxu0 %vm279_vm2, %v18375_v10 }
 0x3f9   : > { %20121 = vst [vmem:[#allocation55_spill] sm:$0xff] %v18377_v17  ;;  %20122 = vst [vmem:[#allocation4_spill] sm:$0xff] %v18379_v42  ;;  %14253 = vmatprep.mubr.msk.f32.mxu1 %vm279_vm2, %v18377_v17  ;;  %v7493_v51 = vmax.f32 %v7461_v34, 0.0  ;;  %v18405_v13 = vld [vmem:[#allocation3 + $0x1d0] sm:$0xff]  ;;  %v20126_v34 = vld [vmem:[#allocation48_spill] sm:$0xff] }
 0x3fa   : > { %7527 = vst.msk [vmem:[#allocation3 + $0x210] sm:$0xff] %vm279_vm2, %v7494_v32  ;;  %v8243_v21 = vld [vmem:[#allocation3 + $0x9] sm:$0xff] }
 0x3fb   : > { %14198 = vmatmul.mubr.msk.f32.gmra.mxu0 %vm279_vm2, %v18387_v25  ;;  %v18394_v59 = vld [vmem:[#allocation3 + $0x1c8] sm:$0xff]  ;;  %7526 = vst.msk [vmem:[#allocation3 + $0x208] sm:$0xff] %vm279_vm2, %v7493_v51  ;;  %v12069_v2 = vld [vmem:[%s19589_s5 + $0x90] sm:$0xff] }
 0x3fc   : > { %14254 = vmatmul.mubr.msk.f32.gmra.mxu1 %vm279_vm2, %v18379_v42  ;;  %v18396_v5 = vld [vmem:[#allocation3 + $0x1c7] sm:$0xff]  ;;  %v18398_v12 = vld [vmem:[#allocation3 + $0x1cf] sm:$0xff]  ;;  %14200 = vmatprep.mubr.msk.f32.mxu0 %vm279_vm2, %v18394_v59 }
 0x3fd   : > { %20123 = vst [vmem:[#allocation62_spill] sm:$0xff] %v18396_v5  ;;  %20124 = vst [vmem:[#allocation49_spill] sm:$0xff] %v18398_v12  ;;  %14256 = vmatprep.mubr.msk.f32.mxu1 %vm279_vm2, %v18396_v5  ;;  %v18421_v61 = vld [vmem:[#allocation3 + $0x1f0] sm:$0xff]  ;;  %v12068_v51 = vld [vmem:[%s19589_s5 + $0x88] sm:$0xff] }
 0x3fe   : > { %v18436_v32 = vld [vmem:[#allocation3 + $0x29] sm:$0xff] }
 0x3ff   : > { %14201 = vmatmul.mubr.msk.f32.gmra.mxu0 %vm279_vm2, %v18405_v13  ;;  %v18411_v35 = vld [vmem:[#allocation3 + $0x1e8] sm:$0xff] }
 0x400   : > { %14257 = vmatmul.mubr.msk.f32.gmra.mxu1 %vm279_vm2, %v18398_v12  ;;  %v18413_v6 = vld [vmem:[#allocation3 + $0x1e7] sm:$0xff]  ;;  %v18415_v8 = vld [vmem:[#allocation3 + $0x1ef] sm:$0xff]  ;;  %14203 = vmatprep.mubr.msk.f32.mxu0 %vm279_vm2, %v18411_v35 }
 0x401   : > { %20125 = vst [vmem:[#allocation26_spill] sm:$0xff] %v18413_v6  ;;  %14259 = vmatprep.mubr.msk.f32.mxu1 %vm279_vm2, %v18413_v6 }
 0x403   : > { %14204 = vmatmul.mubr.msk.f32.gmra.mxu0 %vm279_vm2, %v18421_v61 }
 0x404   : > { %14260 = vmatmul.mubr.msk.f32.gmra.mxu1 %vm279_vm2, %v18415_v8  ;;  %14270 = vmatprep.mubr.msk.f32.mxu0 %vm279_vm2, %v8243_v21 }
 0x405   : > { %14326 = vmatprep.mubr.msk.f32.mxu1 %vm279_vm2, %v18027_v31  ;;  %v18443_v31 = vld [vmem:[#allocation3 + $0x31] sm:$0xff] }
 0x407   : > { %14271 = vmatmul.mubr.msk.f32.vlgmr.msra.gmra.mxu0 %vm279_vm2, %v8244_v45  ;;  %v18462_v45 = vld [vmem:[#allocation3 + $0x51] sm:$0xff] }
 0x408   : > { %14327 = vmatmul.mubr.msk.f32.vlgmr.msra.gmra.mxu1 %vm279_vm2, %v18029_v1  ;;  %14375 = vmatpush3.msra.mxu0 %v20126_v34  ;;  %v12105_v1 = vld [vmem:[%s19589_s5 + $0xb0] sm:$0xff]  ;;  %v14216_v21 = vpop.f32.mrf.mxu1 }
 0x409   : > { %14273 = vmatprep.mubr.msk.f32.mxu0 %vm279_vm2, %v18436_v32  ;;  %14329 = vmatprep.mubr.msk.f32.mxu1 %vm279_vm2, %v18061_v55  ;;  %v18456_v55 = vld [vmem:[#allocation3 + $0x49] sm:$0xff] }
 0x40a   : > { %14376 = vmatprep.subr.mxu0 %v12069_v2  ;;  %14431 = vmatpush3.msra.mxu1 %v17960_v63  ;;  %v14160_v63 = vpop.f32.mrf.mxu0 }
 0x40b   : > { %14377 = vmatpush3.msra.mxu0 %v12069_v2  ;;  %14432 = vmatprep.subr.mxu1 %v12105_v1  ;;  %v12067_v2 = vld [vmem:[%s19589_s5 + $0x80] sm:$0xff]  ;;  %v18470_v34 = vadd.f32 %v14216_v21, %v14160_v63  ;;  %v18503_v63 = vld [vmem:[#allocation3 + $0x91] sm:$0xff] }
 0x40c   : > { %14274 = vmatmul.mubr.msk.f32.gmra.mxu0 %vm279_vm2, %v18443_v31  ;;  %14330 = vmatmul.mubr.msk.f32.gmra.mxu1 %vm279_vm2, %v18063_v11  ;;  %v12104_v11 = vld [vmem:[%s19589_s5 + $0xa8] sm:$0xff]  ;;  %v18508_v21 = vld [vmem:[%s19589_s5 + $0xf8] sm:$0xff] }
 0x40d   : > { %14276 = vmatprep.mubr.msk.f32.mxu0 %vm279_vm2, %v18456_v55  ;;  %14332 = vmatprep.mubr.msk.f32.mxu1 %vm279_vm2, %v18094_v18  ;;  %20127 = vst [vmem:[#allocation53_spill] sm:$0xff] %v18470_v34  ;;  %v18476_v18 = vld [vmem:[#allocation3 + $0x69] sm:$0xff] }
 0x40e   : > { %14378 = vmatprep.subr.mxu0 %v12068_v51  ;;  %14433 = vmatpush3.msra.mxu1 %v12105_v1  ;;  %v12103_v1 = vld [vmem:[%s19589_s5 + $0xa0] sm:$0xff]  ;;  %v18587_v34 = vld [vmem:[#allocation3 + $0x169] sm:$0xff] }
 0x40f   : > { %14379 = vmatpush3.msra.mxu0 %v12068_v51  ;;  %14434 = vmatprep.subr.mxu1 %v12104_v11  ;;  %v18482_v51 = vld [vmem:[#allocation3 + $0x71] sm:$0xff] }
 0x410   : > { %14277 = vmatmul.mubr.msk.f32.gmra.mxu0 %vm279_vm2, %v18462_v45  ;;  %14333 = vmatmul.mubr.msk.f32.gmra.mxu1 %vm279_vm2, %v18096_v23  ;;  %v18490_v23 = vld [vmem:[%s19589_s5 + $0xd8] sm:$0xff] }
 0x411   : > { %14279 = vmatprep.mubr.msk.f32.mxu0 %vm279_vm2, %v18476_v18  ;;  %14335 = vmatprep.mubr.msk.f32.mxu1 %vm279_vm2, %v18127_v29  ;;  %v18496_v29 = vld [vmem:[#allocation3 + $0x89] sm:$0xff] }
 0x412   : > { %14380 = vmatprep.subr.mxu0 %v12067_v2  ;;  %14435 = vmatpush3.msra.mxu1 %v12104_v11  ;;  %v18575_v11 = vld [vmem:[#allocation3 + $0x149] sm:$0xff] }
 0x413   : > { %14381 = vmatpush3.msra.mxu0 %v12067_v2  ;;  %14436 = vmatprep.subr.mxu1 %v12103_v1  ;;  %v18527_v2 = vld [vmem:[#allocation3 + $0xc9] sm:$0xff] }
 0x414   : > { %14280 = vmatmul.mubr.msk.f32.gmra.mxu0 %vm279_vm2, %v18482_v51  ;;  %14336 = vmatmul.mubr.msk.f32.gmra.mxu1 %vm279_vm2, %v18129_v14  ;;  %v18514_v14 = vld [vmem:[#allocation3 + $0xa9] sm:$0xff] }
 0x415   : > { %14282 = vmatprep.mubr.msk.f32.mxu0 %vm279_vm2, %v18496_v29  ;;  %14338 = vmatprep.mubr.msk.f32.mxu1 %vm279_vm2, %v18160_v20  ;;  %v18521_v20 = vld [vmem:[#allocation3 + $0xb1] sm:$0xff] }
 0x416   : > { %14486 = vmatprep.subr.mxu0 %v18490_v23  ;;  %14437 = vmatpush3.msra.mxu1 %v12103_v1  ;;  %v18581_v1 = vld [vmem:[#allocation3 + $0x151] sm:$0xff] }
 0x417   : > { %14542 = vmatprep.subr.mxu1 %v18508_v21 }
 0x418   : > { %14283 = vmatmul.mubr.msk.f32.gmra.mxu0 %vm279_vm2, %v18503_v63  ;;  %14339 = vmatmul.mubr.msk.f32.gmra.mxu1 %vm279_vm2, %v18162_v19  ;;  %v18533_v19 = vld [vmem:[#allocation3 + $0xd1] sm:$0xff] }
 0x419   : > { %14285 = vmatprep.mubr.msk.f32.mxu0 %vm279_vm2, %v18514_v14  ;;  %14341 = vmatprep.mubr.msk.f32.mxu1 %vm279_vm2, %v18193_v41  ;;  %v18539_v41 = vld [vmem:[#allocation3 + $0xe9] sm:$0xff] }
 0x41c   : > { %14286 = vmatmul.mubr.msk.f32.gmra.mxu0 %vm279_vm2, %v18521_v20  ;;  %14342 = vmatmul.mubr.msk.f32.gmra.mxu1 %vm279_vm2, %v18195_v50  ;;  %v18545_v50 = vld [vmem:[#allocation3 + $0xf1] sm:$0xff] }
 0x41d   : > { %14288 = vmatprep.mubr.msk.f32.mxu0 %vm279_vm2, %v18527_v2  ;;  %14344 = vmatprep.mubr.msk.f32.mxu1 %vm279_vm2, %v18226_v28  ;;  %v18551_v28 = vld [vmem:[#allocation3 + $0x109] sm:$0xff] }
 0x420   : > { %14289 = vmatmul.mubr.msk.f32.gmra.mxu0 %vm279_vm2, %v18533_v19  ;;  %14345 = vmatmul.mubr.msk.f32.gmra.mxu1 %vm279_vm2, %v18228_v52  ;;  %v18557_v52 = vld [vmem:[#allocation3 + $0x111] sm:$0xff] }
 0x421   : > { %14291 = vmatprep.mubr.msk.f32.mxu0 %vm279_vm2, %v18539_v41  ;;  %14347 = vmatprep.mubr.msk.f32.mxu1 %vm279_vm2, %v18257_v56  ;;  %v18563_v56 = vld [vmem:[#allocation3 + $0x129] sm:$0xff] }
 0x424   : > { %14292 = vmatmul.mubr.msk.f32.gmra.mxu0 %vm279_vm2, %v18545_v50  ;;  %14348 = vmatmul.mubr.msk.f32.gmra.mxu1 %vm279_vm2, %v18259_v57  ;;  %v18569_v57 = vld [vmem:[#allocation3 + $0x131] sm:$0xff] }
 0x425   : > { %14294 = vmatprep.mubr.msk.f32.mxu0 %vm279_vm2, %v18551_v28  ;;  %14350 = vmatprep.mubr.msk.f32.mxu1 %vm279_vm2, %v18286_v40 }
 0x428   : > { %14295 = vmatmul.mubr.msk.f32.gmra.mxu0 %vm279_vm2, %v18557_v52  ;;  %14351 = vmatmul.mubr.msk.f32.gmra.mxu1 %vm279_vm2, %v18288_v33 }
 0x429   : > { %14297 = vmatprep.mubr.msk.f32.mxu0 %vm279_vm2, %v18563_v56  ;;  %14353 = vmatprep.mubr.msk.f32.mxu1 %vm279_vm2, %v18314_v48  ;;  %v18637_v48 = vld [vmem:[#allocation3 + $0x207] sm:$0xff] }
 0x42c   : > { %14298 = vmatmul.mubr.msk.f32.gmra.mxu0 %vm279_vm2, %v18569_v57  ;;  %14354 = vmatmul.mubr.msk.f32.gmra.mxu1 %vm279_vm2, %v18316_v22  ;;  %v18593_v22 = vld [vmem:[#allocation3 + $0x171] sm:$0xff] }
 0x42d   : > { %14300 = vmatprep.mubr.msk.f32.mxu0 %vm279_vm2, %v18575_v11  ;;  %14356 = vmatprep.mubr.msk.f32.mxu1 %vm279_vm2, %v18336_v27  ;;  %v18599_v27 = vld [vmem:[#allocation3 + $0x189] sm:$0xff] }
 0x430   : > { %14301 = vmatmul.mubr.msk.f32.gmra.mxu0 %vm279_vm2, %v18581_v1  ;;  %14357 = vmatmul.mubr.msk.f32.gmra.mxu1 %vm279_vm2, %v18338_v38  ;;  %v18605_v38 = vld [vmem:[#allocation3 + $0x191] sm:$0xff] }
 0x431   : > { %14303 = vmatprep.mubr.msk.f32.mxu0 %vm279_vm2, %v18587_v34  ;;  %14359 = vmatprep.mubr.msk.f32.mxu1 %vm279_vm2, %v18357_v0  ;;  %v18611_v0 = vld [vmem:[#allocation3 + $0x1a9] sm:$0xff] }
 0x434   : > { %14304 = vmatmul.mubr.msk.f32.gmra.mxu0 %vm279_vm2, %v18593_v22  ;;  %14360 = vmatmul.mubr.msk.f32.gmra.mxu1 %vm279_vm2, %v18359_v4  ;;  %v18617_v4 = vld [vmem:[#allocation3 + $0x1b1] sm:$0xff] }
 0x435   : > { %14306 = vmatprep.mubr.msk.f32.mxu0 %vm279_vm2, %v18599_v27  ;;  %14362 = vmatprep.mubr.msk.f32.mxu1 %vm279_vm2, %v18377_v17  ;;  %v18623_v17 = vld [vmem:[#allocation3 + $0x1c9] sm:$0xff] }
 0x438   : > { %14307 = vmatmul.mubr.msk.f32.gmra.mxu0 %vm279_vm2, %v18605_v38  ;;  %14363 = vmatmul.mubr.msk.f32.gmra.mxu1 %vm279_vm2, %v18379_v42  ;;  %v18629_v42 = vld [vmem:[#allocation3 + $0x1d1] sm:$0xff] }
 0x439   : > { %14309 = vmatprep.mubr.msk.f32.mxu0 %vm279_vm2, %v18611_v0  ;;  %14365 = vmatprep.mubr.msk.f32.mxu1 %vm279_vm2, %v18396_v5  ;;  %v18635_v5 = vld [vmem:[#allocation3 + $0x1e9] sm:$0xff] }
 0x43c   : > { %14310 = vmatmul.mubr.msk.f32.gmra.mxu0 %vm279_vm2, %v18617_v4  ;;  %14366 = vmatmul.mubr.msk.f32.gmra.mxu1 %vm279_vm2, %v18398_v12  ;;  %v18643_v12 = vld [vmem:[#allocation3 + $0x1f1] sm:$0xff] }
 0x43d   : > { %14312 = vmatprep.mubr.msk.f32.mxu0 %vm279_vm2, %v18623_v17  ;;  %14368 = vmatprep.mubr.msk.f32.mxu1 %vm279_vm2, %v18413_v6  ;;  %v18645_v6 = vld [vmem:[#allocation3 + $0x20f] sm:$0xff] }
 0x440   : > { %14313 = vmatmul.mubr.msk.f32.gmra.mxu0 %vm279_vm2, %v18629_v42  ;;  %14369 = vmatmul.mubr.msk.f32.gmra.mxu1 %vm279_vm2, %v18415_v8  ;;  %v12141_v8 = vld [vmem:[%s19589_s5 + $0xd0] sm:$0xff] }
 0x441   : > { %14315 = vmatprep.mubr.msk.f32.mxu0 %vm279_vm2, %v18635_v5  ;;  %14371 = vmatprep.mubr.msk.f32.mxu1 %vm279_vm2, %v18637_v48 }
 0x444   : > { %14316 = vmatmul.mubr.msk.f32.gmra.mxu0 %vm279_vm2, %v18643_v12  ;;  %14372 = vmatmul.mubr.msk.f32.gmra.mxu1 %vm279_vm2, %v18645_v6 }
 0x445   : > { %14382 = vmatprep.mubr.msk.f32.mxu0 %vm279_vm2, %v18025_v49  ;;  %14438 = vmatprep.mubr.msk.f32.mxu1 %vm279_vm2, %v18436_v32  ;;  %v12140_v49 = vld [vmem:[%s19589_s5 + $0xc8] sm:$0xff] }
 0x448   : > { %14383 = vmatmul.mubr.msk.f32.vlgmr.msra.gmra.mxu0 %vm279_vm2, %v18038_v58  ;;  %14439 = vmatmul.mubr.msk.f32.vlgmr.msra.gmra.mxu1 %vm279_vm2, %v18443_v31  ;;  %v12177_v58 = vld [vmem:[%s19589_s5 + $0xf0] sm:$0xff]  ;;  %v9808_v31 = vld [vmem:[#allocation3 + $0x87] sm:$0xff] }
 0x449   : > { %14487 = vmatpush3.msra.mxu0 %v18490_v23  ;;  %14385 = vmatprep.mubr.msk.f32.mxu0 %vm279_vm2, %v18059_v60  ;;  %v12139_v60 = vld [vmem:[%s19589_s5 + $0xc0] sm:$0xff]  ;;  %v9809_v23 = vld [vmem:[#allocation3 + $0x8f] sm:$0xff] }
 0x44a   : > { %14441 = vmatprep.mubr.msk.f32.mxu1 %vm279_vm2, %v18456_v55  ;;  %14488 = vmatprep.subr.mxu0 %v12141_v8  ;;  %v10198_v55 = vld [vmem:[#allocation3 + $0x88] sm:$0xff] }
 0x44b   : > { %14489 = vmatpush3.msra.mxu0 %v12141_v8  ;;  %14543 = vmatpush3.msra.mxu1 %v18508_v21  ;;  %v10202_v8 = vld [vmem:[#allocation3 + $0xc8] sm:$0xff] }
 0x44c   : > { %14386 = vmatmul.mubr.msk.f32.gmra.mxu0 %vm279_vm2, %v18072_v47  ;;  %14442 = vmatmul.mubr.msk.f32.gmra.mxu1 %vm279_vm2, %v18462_v45  ;;  %v12176_v47 = vld [vmem:[%s19589_s5 + $0xe8] sm:$0xff] }
 0x44d   : > { %14388 = vmatprep.mubr.msk.f32.mxu0 %vm279_vm2, %v18092_v62  ;;  %14444 = vmatprep.mubr.msk.f32.mxu1 %vm279_vm2, %v18476_v18  ;;  %v12175_v62 = vld [vmem:[%s19589_s5 + $0xe0] sm:$0xff] }
 0x44e   : > { %14490 = vmatprep.subr.mxu0 %v12140_v49  ;;  %14544 = vmatprep.subr.mxu1 %v12177_v58 }
 0x44f   : > { %14491 = vmatpush3.msra.mxu0 %v12140_v49  ;;  %14545 = vmatpush3.msra.mxu1 %v12177_v58 }
 0x450   : > { %14389 = vmatmul.mubr.msk.f32.gmra.mxu0 %vm279_vm2, %v18105_v36  ;;  %14445 = vmatmul.mubr.msk.f32.gmra.mxu1 %vm279_vm2, %v18482_v51  ;;  %v18702_v36 = vld [vmem:[%s19589_s5 + $0x118] sm:$0xff] }
 0x451   : > { %14391 = vmatprep.mubr.msk.f32.mxu0 %vm279_vm2, %v18125_v30  ;;  %14447 = vmatprep.mubr.msk.f32.mxu1 %vm279_vm2, %v18496_v29  ;;  %v20128_v30 = vld [vmem:[#allocation16_spill] sm:$0xff]  ;;  %v10199_v29 = vld [vmem:[#allocation3 + $0x90] sm:$0xff] }
 0x452   : > { %14492 = vmatprep.subr.mxu0 %v12139_v60  ;;  %14546 = vmatprep.subr.mxu1 %v12176_v47 }
 0x453   : > { %14493 = vmatpush3.msra.mxu0 %v12139_v60  ;;  %14547 = vmatpush3.msra.mxu1 %v12176_v47 }
 0x454   : > { %14392 = vmatmul.mubr.msk.f32.gmra.mxu0 %vm279_vm2, %v18138_v37  ;;  %14448 = vmatmul.mubr.msk.f32.gmra.mxu1 %vm279_vm2, %v18503_v63  ;;  %v20129_v37 = vld [vmem:[#allocation28_spill] sm:$0xff] }
 0x455   : > { %14394 = vmatprep.mubr.msk.f32.mxu0 %vm279_vm2, %v18158_v39  ;;  %14450 = vmatprep.mubr.msk.f32.mxu1 %vm279_vm2, %v18514_v14  ;;  %v20130_v39 = vld [vmem:[#allocation12_spill] sm:$0xff] }
 0x456   : > { %14548 = vmatprep.subr.mxu1 %v12175_v62  ;;  %14598 = vmatprep.subr.mxu0 %v18702_v36  ;;  %v12211_v63 = vld [vmem:[%s19589_s5 + $0x100] sm:$0xff] }
 0x457   : > { %14549 = vmatpush3.msra.mxu1 %v12175_v62  ;;  %v9813_v62 = vld [vmem:[#allocation3 + $0xcf] sm:$0xff] }
 0x458   : > { %14395 = vmatmul.mubr.msk.f32.gmra.mxu0 %vm279_vm2, %v18171_v15  ;;  %14451 = vmatmul.mubr.msk.f32.gmra.mxu1 %vm279_vm2, %v18521_v20  ;;  %v18797_v15 = vld [vmem:[#allocation3 + $0x208] sm:$0xff] }
 0x459   : > { %14397 = vmatprep.mubr.msk.f32.mxu0 %vm279_vm2, %v18191_v3  ;;  %14453 = vmatprep.mubr.msk.f32.mxu1 %vm279_vm2, %v18527_v2  ;;  %v18799_v3 = vld [vmem:[#allocation3 + $0x209] sm:$0xff] }
 0x45a   : > { %v9810_v20 = vld [vmem:[#allocation3 + $0xa7] sm:$0xff] }
 0x45b   : > { %v10200_v2 = vld [vmem:[#allocation3 + $0xa8] sm:$0xff] }
 0x45c   : > { %14398 = vmatmul.mubr.msk.f32.gmra.mxu0 %vm279_vm2, %v20128_v30  ;;  %14454 = vmatmul.mubr.msk.f32.gmra.mxu1 %vm279_vm2, %v18533_v19 }
 0x45d   : > { %14400 = vmatprep.mubr.msk.f32.mxu0 %vm279_vm2, %v20129_v37  ;;  %14456 = vmatprep.mubr.msk.f32.mxu1 %vm279_vm2, %v18539_v41 }
 0x460   : > { %14401 = vmatmul.mubr.msk.f32.gmra.mxu0 %vm279_vm2, %v20130_v39  ;;  %14457 = vmatmul.mubr.msk.f32.gmra.mxu1 %vm279_vm2, %v18545_v50  ;;  %v9814_v39 = vld [vmem:[#allocation3 + $0xe7] sm:$0xff] }
 0x461   : > { %14403 = vmatprep.mubr.msk.f32.mxu0 %vm279_vm2, %v18255_v54  ;;  %14459 = vmatprep.mubr.msk.f32.mxu1 %vm279_vm2, %v18551_v28  ;;  %v18805_v54 = vld [vmem:[#allocation3 + $0x210] sm:$0xff] }
 0x464   : > { %14404 = vmatmul.mubr.msk.f32.gmra.mxu0 %vm279_vm2, %v18268_v7  ;;  %14460 = vmatmul.mubr.msk.f32.gmra.mxu1 %vm279_vm2, %v18557_v52  ;;  %v18807_v7 = vld [vmem:[#allocation3 + $0x211] sm:$0xff] }
 0x465   : > { %14406 = vmatprep.mubr.msk.f32.mxu0 %vm279_vm2, %v18284_v24  ;;  %14462 = vmatprep.mubr.msk.f32.mxu1 %vm279_vm2, %v18563_v56  ;;  %v9804_v24 = vld [vmem:[#allocation3 + $0x47] sm:$0xff]  ;;  %v9811_v52 = vld [vmem:[#allocation3 + $0xaf] sm:$0xff] }
 0x466   : > { %v10201_v56 = vld [vmem:[#allocation3 + $0xb0] sm:$0xff] }
 0x468   : > { %14407 = vmatmul.mubr.msk.f32.gmra.mxu0 %vm279_vm2, %v18297_v16  ;;  %14463 = vmatmul.mubr.msk.f32.gmra.mxu1 %vm279_vm2, %v18569_v57  ;;  %v10194_v16 = vld [vmem:[#allocation3 + $0x48] sm:$0xff] }
 0x469   : > { %14409 = vmatprep.mubr.msk.f32.mxu0 %vm279_vm2, %v18312_v44  ;;  %14465 = vmatprep.mubr.msk.f32.mxu1 %vm279_vm2, %v18575_v11 }
 0x46c   : > { %14410 = vmatmul.mubr.msk.f32.gmra.mxu0 %vm279_vm2, %v18324_v43  ;;  %14466 = vmatmul.mubr.msk.f32.gmra.mxu1 %vm279_vm2, %v18581_v1  ;;  %v9812_v1 = vld [vmem:[#allocation3 + $0xc7] sm:$0xff] }
 0x46d   : > { %14412 = vmatprep.mubr.msk.f32.mxu0 %vm279_vm2, %v18334_v53  ;;  %14468 = vmatprep.mubr.msk.f32.mxu1 %vm279_vm2, %v18587_v34 }
 0x470   : > { %14413 = vmatmul.mubr.msk.f32.gmra.mxu0 %vm279_vm2, %v18347_v46  ;;  %14469 = vmatmul.mubr.msk.f32.gmra.mxu1 %vm279_vm2, %v18593_v22  ;;  %v9805_v22 = vld [vmem:[#allocation3 + $0x4f] sm:$0xff] }
 0x471   : > { %14415 = vmatprep.mubr.msk.f32.mxu0 %vm279_vm2, %v18355_v26  ;;  %14471 = vmatprep.mubr.msk.f32.mxu1 %vm279_vm2, %v18599_v27  ;;  %v10195_v27 = vld [vmem:[#allocation3 + $0x50] sm:$0xff] }
 0x474   : > { %14416 = vmatmul.mubr.msk.f32.gmra.mxu0 %vm279_vm2, %v18367_v9  ;;  %14472 = vmatmul.mubr.msk.f32.gmra.mxu1 %vm279_vm2, %v18605_v38  ;;  %v12213_v38 = vld [vmem:[%s19589_s5 + $0x110] sm:$0xff] }
 0x475   : > { %14418 = vmatprep.mubr.msk.f32.mxu0 %vm279_vm2, %v18375_v10  ;;  %14474 = vmatprep.mubr.msk.f32.mxu1 %vm279_vm2, %v18611_v0  ;;  %v9806_v0 = vld [vmem:[#allocation3 + $0x67] sm:$0xff] }
 0x478   : > { %14419 = vmatmul.mubr.msk.f32.gmra.mxu0 %vm279_vm2, %v18387_v25  ;;  %14475 = vmatmul.mubr.msk.f32.gmra.mxu1 %vm279_vm2, %v18617_v4  ;;  %v10196_v4 = vld [vmem:[#allocation3 + $0x68] sm:$0xff] }
 0x479   : > { %14421 = vmatprep.mubr.msk.f32.mxu0 %vm279_vm2, %v18394_v59  ;;  %14477 = vmatprep.mubr.msk.f32.mxu1 %vm279_vm2, %v18623_v17  ;;  %v18822_v17 = vpop.f32.mrf.mxu0 }
 0x47c   : > { %14422 = vmatmul.mubr.msk.f32.gmra.mxu0 %vm279_vm2, %v18405_v13  ;;  %14478 = vmatmul.mubr.msk.f32.gmra.mxu1 %vm279_vm2, %v18629_v42  ;;  %v18824_v42 = vpop.f32.mrf.mxu1  ;;  %v12212_v13 = vld [vmem:[%s19589_s5 + $0x108] sm:$0xff] }
 0x47d   : > { %14424 = vmatprep.mubr.msk.f32.mxu0 %vm279_vm2, %v18411_v35  ;;  %14480 = vmatprep.mubr.msk.f32.mxu1 %vm279_vm2, %v18635_v5  ;;  %v9807_v5 = vld [vmem:[#allocation3 + $0x6f] sm:$0xff] }
 0x480   : > { %14425 = vmatmul.mubr.msk.f32.gmra.mxu0 %vm279_vm2, %v18421_v61  ;;  %14481 = vmatmul.mubr.msk.f32.gmra.mxu1 %vm279_vm2, %v18643_v12  ;;  %v10197_v12 = vld [vmem:[#allocation3 + $0x70] sm:$0xff] }
 0x481   : > { %14427 = vmatprep.mubr.msk.f32.mxu0 %vm279_vm2, %v18797_v15  ;;  %14483 = vmatprep.mubr.msk.f32.mxu1 %vm279_vm2, %v18799_v3 }
 0x484   : > { %14428 = vmatmul.mubr.msk.f32.gmra.mxu0 %vm279_vm2, %v18805_v54  ;;  %14484 = vmatmul.mubr.msk.f32.gmra.mxu1 %vm279_vm2, %v18807_v7 }
 0x485   : > { %14494 = vmatprep.mubr.msk.f32.mxu0 %vm279_vm2, %v9804_v24  ;;  %14550 = vmatprep.mubr.msk.f32.mxu1 %vm279_vm2, %v10194_v16  ;;  %v10204_v24 = vld [vmem:[#allocation3 + $0xe8] sm:$0xff] }
 0x488   : > { %14495 = vmatmul.mubr.msk.f32.vlgmr.msra.gmra.mxu0 %vm279_vm2, %v9805_v22  ;;  %14551 = vmatmul.mubr.msk.f32.vlgmr.msra.gmra.mxu1 %vm279_vm2, %v10195_v27  ;;  %v14163_v61 = vpop.f32.mrf.mxu0 }
 0x489   : > { %14599 = vmatpush3.msra.mxu0 %v18702_v36  ;;  %14497 = vmatprep.mubr.msk.f32.mxu0 %vm279_vm2, %v9806_v0  ;;  %v14219_v32 = vpop.f32.mrf.mxu1  ;;  %v10203_v36 = vld [vmem:[#allocation3 + $0xd0] sm:$0xff] }
 0x48a   : > { %14553 = vmatprep.mubr.msk.f32.mxu1 %vm279_vm2, %v10196_v4  ;;  %14600 = vmatprep.subr.mxu0 %v12213_v38  ;;  %v18832_v45 = vadd.f32 %v14219_v32, %v14163_v61  ;;  %v7773_v34 = vpop.f32.mrf.mxu0  ;;  %v9815_v0 = vld [vmem:[#allocation3 + $0xef] sm:$0xff] }
 0x48b   : > { %14601 = vmatpush3.msra.mxu0 %v12213_v38  ;;  %v8094_v18 = vpop.f32.mrf.mxu1  ;;  %v10205_v4 = vld [vmem:[#allocation3 + $0xf0] sm:$0xff]  ;;  %v10206_v61 = vld [vmem:[#allocation3 + $0x108] sm:$0xff] }
 0x48c   : > { %14498 = vmatmul.mubr.msk.f32.gmra.mxu0 %vm279_vm2, %v9807_v5  ;;  %14554 = vmatmul.mubr.msk.f32.gmra.mxu1 %vm279_vm2, %v10197_v12  ;;  %v18836_v51 = vadd.f32 %v8094_v18, %v7773_v34  ;;  %v9817_v18 = vld [vmem:[#allocation3 + $0x10f] sm:$0xff] }
 0x48d   : > { %14500 = vmatprep.mubr.msk.f32.mxu0 %vm279_vm2, %v9808_v31  ;;  %14556 = vmatprep.mubr.msk.f32.mxu1 %vm279_vm2, %v10198_v55  ;;  %v14166_v21 = vpop.f32.mrf.mxu0  ;;  %v14222_v14 = vpop.f32.mrf.mxu1 }
 0x48e   : > { %14602 = vmatprep.subr.mxu0 %v12212_v13  ;;  %v18843_v19 = vadd.f32 %v14222_v14, %v14166_v21  ;;  %v10208_v21 = vld [vmem:[#allocation3 + $0x128] sm:$0xff] }
 0x48f   : > { %14603 = vmatpush3.msra.mxu0 %v12212_v13  ;;  %v7783_v41 = vpop.f32.mrf.mxu0  ;;  %v8104_v50 = vpop.f32.mrf.mxu1  ;;  %v9816_v13 = vld [vmem:[#allocation3 + $0x107] sm:$0xff] }
 0x490   : > { %14501 = vmatmul.mubr.msk.f32.gmra.mxu0 %vm279_vm2, %v9809_v23  ;;  %14557 = vmatmul.mubr.msk.f32.gmra.mxu1 %vm279_vm2, %v10199_v29  ;;  %v18847_v28 = vadd.f32 %v8104_v50, %v7783_v41  ;;  %v10207_v23 = vld [vmem:[#allocation3 + $0x110] sm:$0xff] }
 0x491   : > { %14503 = vmatprep.mubr.msk.f32.mxu0 %vm279_vm2, %v9810_v20  ;;  %14559 = vmatprep.mubr.msk.f32.mxu1 %vm279_vm2, %v10200_v2  ;;  %v14169_v57 = vpop.f32.mrf.mxu0  ;;  %v14225_v11 = vpop.f32.mrf.mxu1  ;;  %v10209_v50 = vld [vmem:[#allocation3 + $0x130] sm:$0xff] }
 0x492   : > { %14604 = vmatprep.subr.mxu0 %v12211_v63  ;;  %v18851_v49 = vadd.f32 %v14225_v11, %v14169_v57  ;;  %v20131_v11 = vld [vmem:[#allocation65_spill] sm:$0xff] }
 0x493   : > { %14605 = vmatpush3.msra.mxu0 %v12211_v63  ;;  %v7793_v58 = vpop.f32.mrf.mxu0  ;;  %v8114_v60 = vpop.f32.mrf.mxu1 }
 0x494   : > { %14504 = vmatmul.mubr.msk.f32.gmra.mxu0 %vm279_vm2, %v9811_v52  ;;  %14560 = vmatmul.mubr.msk.f32.gmra.mxu1 %vm279_vm2, %v10201_v56  ;;  %v18855_v47 = vadd.f32 %v8114_v60, %v7793_v58 }
 0x495   : > { %14506 = vmatprep.mubr.msk.f32.mxu0 %vm279_vm2, %v9812_v1  ;;  %14562 = vmatprep.mubr.msk.f32.mxu1 %vm279_vm2, %v10202_v8  ;;  %v14172_v30 = vpop.f32.mrf.mxu0  ;;  %v14228_v37 = vpop.f32.mrf.mxu1 }
 0x496   : > { %v18859_v16 = vadd.f32 %v14228_v37, %v14172_v30 }
 0x497   : > { %v7803_v22 = vpop.f32.mrf.mxu0  ;;  %v8124_v27 = vpop.f32.mrf.mxu1 }
 0x498   : > { %14507 = vmatmul.mubr.msk.f32.gmra.mxu0 %vm279_vm2, %v9813_v62  ;;  %14563 = vmatmul.mubr.msk.f32.gmra.mxu1 %vm279_vm2, %v10203_v36  ;;  %v18863_v38 = vadd.f32 %v8124_v27, %v7803_v22  ;;  %v20132_v62 = vld [vmem:[#allocation84_spill] sm:$0xff]  ;;  %v20133_v36 = vld [vmem:[#allocation6_spill] sm:$0xff]  ;;  %v20135_v27 = vld [vmem:[#allocation27_spill] sm:$0xff] }
 0x499   : > { %14509 = vmatprep.mubr.msk.f32.mxu0 %vm279_vm2, %v9814_v39  ;;  %14565 = vmatprep.mubr.msk.f32.mxu1 %vm279_vm2, %v10204_v24  ;;  %v14175_v5 = vpop.f32.mrf.mxu0  ;;  %v14231_v12 = vpop.f32.mrf.mxu1  ;;  %v20134_v22 = vld [vmem:[#allocation50_spill] sm:$0xff] }
 0x49a   : > { %v18867_v32 = vadd.f32 %v14231_v12, %v14175_v5 }
 0x49b   : > { %v7813_v31 = vpop.f32.mrf.mxu0  ;;  %v8134_v55 = vpop.f32.mrf.mxu1 }
 0x49c   : > { %14510 = vmatmul.mubr.msk.f32.gmra.mxu0 %vm279_vm2, %v9815_v0  ;;  %14566 = vmatmul.mubr.msk.f32.gmra.mxu1 %vm279_vm2, %v10205_v4  ;;  %v18871_v34 = vadd.f32 %v8134_v55, %v7813_v31 }
 0x49d   : > { %14512 = vmatprep.mubr.msk.f32.mxu0 %vm279_vm2, %v9816_v13  ;;  %14568 = vmatprep.mubr.msk.f32.mxu1 %vm279_vm2, %v10206_v61  ;;  %v20136_v13 = vld [vmem:[#allocation29_spill] sm:$0xff]  ;;  %v20137_v61 = vld [vmem:[#allocation55_spill] sm:$0xff] }
 0x49e   : > { %v14178_v29 = vpop.f32.mrf.mxu0 }
 0x49f   : > { %v14234_v63 = vpop.f32.mrf.mxu1 }
 0x4a0   : > { %14513 = vmatmul.mubr.msk.f32.gmra.mxu0 %vm279_vm2, %v9817_v18  ;;  %14569 = vmatmul.mubr.msk.f32.gmra.mxu1 %vm279_vm2, %v10207_v23  ;;  %v18875_v14 = vadd.f32 %v14234_v63, %v14178_v29  ;;  %v7823_v20 = vpop.f32.mrf.mxu0  ;;  %v20138_v29 = vld [vmem:[#allocation4_spill] sm:$0xff]  ;;  %v20139_v63 = vld [vmem:[#allocation62_spill] sm:$0xff] }
 0x4a1   : > { %14515 = vmatprep.mubr.msk.f32.mxu0 %vm279_vm2, %v18286_v40  ;;  %14571 = vmatprep.mubr.msk.f32.mxu1 %vm279_vm2, %v10208_v21  ;;  %v8144_v2 = vpop.f32.mrf.mxu1 }
 0x4a2   : > { %v18880_v41 = vadd.f32 %v8144_v2, %v7823_v20  ;;  %v14181_v52 = vpop.f32.mrf.mxu0  ;;  %v10219_v2 = vld [vmem:[#allocation3 + $0x1d0] sm:$0xff] }
 0x4a3   : > { %v14237_v56 = vpop.f32.mrf.mxu1 }
 0x4a4   : > { %14516 = vmatmul.mubr.msk.f32.gmra.mxu0 %vm279_vm2, %v18288_v33  ;;  %14572 = vmatmul.mubr.msk.f32.gmra.mxu1 %vm279_vm2, %v10209_v50  ;;  %v18885_v57 = vadd.f32 %v14237_v56, %v14181_v52  ;;  %v7833_v40 = vpop.f32.mrf.mxu0  ;;  %v20140_v56 = vld [vmem:[#allocation49_spill] sm:$0xff] }
 0x4a5   : > { %14518 = vmatprep.mubr.msk.f32.mxu0 %vm279_vm2, %v20131_v11  ;;  %14574 = vmatprep.mubr.msk.f32.mxu1 %vm279_vm2, %v18312_v44  ;;  %v8154_v1 = vpop.f32.mrf.mxu1  ;;  %v20141_v11 = vld [vmem:[#allocation26_spill] sm:$0xff] }
 0x4a6   : > { %v18891_v8 = vadd.f32 %v8154_v1, %v7833_v40  ;;  %v14184_v58 = vpop.f32.mrf.mxu0 }
 0x4a7   : > { %v14240_v60 = vpop.f32.mrf.mxu1 }
 0x4a8   : > { %14519 = vmatmul.mubr.msk.f32.gmra.mxu0 %vm279_vm2, %v20132_v62  ;;  %14575 = vmatmul.mubr.msk.f32.gmra.mxu1 %vm279_vm2, %v18324_v43  ;;  %v18897_v33 = vadd.f32 %v14240_v60, %v14184_v58  ;;  %v7843_v44 = vpop.f32.mrf.mxu0  ;;  %v9831_v58 = vld [vmem:[#allocation3 + $0x1ef] sm:$0xff] }
 0x4a9   : > { %14521 = vmatprep.mubr.msk.f32.mxu0 %vm279_vm2, %v20133_v36  ;;  %14577 = vmatprep.mubr.msk.f32.mxu1 %vm279_vm2, %v18334_v53  ;;  %v8164_v30 = vpop.f32.mrf.mxu1  ;;  %v10221_v60 = vld [vmem:[#allocation3 + $0x1f0] sm:$0xff] }
 0x4aa   : > { %v18903_v37 = vadd.f32 %v8164_v30, %v7843_v44  ;;  %v14187_v39 = vpop.f32.mrf.mxu0 }
 0x4ab   : > { %v14243_v24 = vpop.f32.mrf.mxu1 }
 0x4ac   : > { %14522 = vmatmul.mubr.msk.f32.gmra.mxu0 %vm279_vm2, %v20134_v22  ;;  %14578 = vmatmul.mubr.msk.f32.gmra.mxu1 %vm279_vm2, %v18347_v46  ;;  %v18909_v43 = vadd.f32 %v14243_v24, %v14187_v39  ;;  %v7853_v53 = vpop.f32.mrf.mxu0  ;;  %v9834_v39 = vld [vmem:[#allocation3 + $0x227] sm:$0xff] }
 0x4ad   : > { %14524 = vmatprep.mubr.msk.f32.mxu0 %vm279_vm2, %v20135_v27  ;;  %14580 = vmatprep.mubr.msk.f32.mxu1 %vm279_vm2, %v18355_v26  ;;  %v8174_v0 = vpop.f32.mrf.mxu1  ;;  %v10224_v24 = vld [vmem:[#allocation3 + $0x228] sm:$0xff] }
 0x4ae   : > { %v18915_v4 = vadd.f32 %v8174_v0, %v7853_v53  ;;  %v14190_v5 = vpop.f32.mrf.mxu0 }
 0x4af   : > { %v14246_v12 = vpop.f32.mrf.mxu1 }
 0x4b0   : > { %14525 = vmatmul.mubr.msk.f32.gmra.mxu0 %vm279_vm2, %v20136_v13  ;;  %14581 = vmatmul.mubr.msk.f32.gmra.mxu1 %vm279_vm2, %v18367_v9  ;;  %v18921_v46 = vadd.f32 %v14246_v12, %v14190_v5  ;;  %v7863_v26 = vpop.f32.mrf.mxu0 }
 0x4b1   : > { %14527 = vmatprep.mubr.msk.f32.mxu0 %vm279_vm2, %v20137_v61  ;;  %14583 = vmatprep.mubr.msk.f32.mxu1 %vm279_vm2, %v18375_v10  ;;  %v8184_v31 = vpop.f32.mrf.mxu1 }
 0x4b2   : > { %v18927_v55 = vadd.f32 %v8184_v31, %v7863_v26  ;;  %v14193_v18 = vpop.f32.mrf.mxu0 }
 0x4b3   : > { %v14249_v23 = vpop.f32.mrf.mxu1 }
 0x4b4   : > { %14528 = vmatmul.mubr.msk.f32.gmra.mxu0 %vm279_vm2, %v20138_v29  ;;  %14584 = vmatmul.mubr.msk.f32.gmra.mxu1 %vm279_vm2, %v18387_v25  ;;  %v18933_v9 = vadd.f32 %v14249_v23, %v14193_v18  ;;  %v7873_v10 = vpop.f32.mrf.mxu0  ;;  %v10585_v29 = vld [vmem:[#allocation3 + $0x51] sm:$0xff] }
 0x4b5   : > { %14530 = vmatprep.mubr.msk.f32.mxu0 %vm279_vm2, %v20139_v63  ;;  %14586 = vmatprep.mubr.msk.f32.mxu1 %vm279_vm2, %v18394_v59  ;;  %v8194_v21 = vpop.f32.mrf.mxu1 }
 0x4b6   : > { %v18939_v20 = vadd.f32 %v8194_v21, %v7873_v10  ;;  %v10586_v21 = vld [vmem:[#allocation3 + $0x69] sm:$0xff] }
 0x4b7   : > { %v14196_v50 = vpop.f32.mrf.mxu0 }
 0x4b8   : > { %v14252_v52 = vpop.f32.mrf.mxu1  ;;  %14531 = vmatmul.mubr.msk.f32.gmra.mxu0 %vm279_vm2, %v20140_v56  ;;  %14587 = vmatmul.mubr.msk.f32.gmra.mxu1 %vm279_vm2, %v10219_v2  ;;  %v8085_v2 = vadd.f32 %v18824_v42, %v18822_v17 }
 0x4b9   : > { %v18944_v25 = vadd.f32 %v14252_v52, %v14196_v50  ;;  %14533 = vmatprep.mubr.msk.f32.mxu0 %vm279_vm2, %v20141_v11  ;;  %14589 = vmatprep.mubr.msk.f32.mxu1 %vm279_vm2, %v18411_v35  ;;  %v7883_v59 = vpop.f32.mrf.mxu0  ;;  %v20142_v50 = vld [vmem:[#allocation53_spill] sm:$0xff] }
 0x4ba   : > { %v8204_v40 = vpop.f32.mrf.mxu1 }
 0x4bb   : > { %v18950_v1 = vadd.f32 %v8204_v40, %v7883_v59  ;;  %v14199_v62 = vpop.f32.mrf.mxu0 }
 0x4bc   : > { %v14255_v36 = vpop.f32.mrf.mxu1  ;;  %14534 = vmatmul.mubr.msk.f32.gmra.mxu0 %vm279_vm2, %v9831_v58  ;;  %14590 = vmatmul.mubr.msk.f32.gmra.mxu1 %vm279_vm2, %v10221_v60  ;;  %v10587_v58 = vld [vmem:[#allocation3 + $0x71] sm:$0xff] }
 0x4bd   : > { %v18954_v44 = vadd.f32 %v14255_v36, %v14199_v62  ;;  %14536 = vmatprep.mubr.msk.f32.mxu0 %vm279_vm2, %v18637_v48  ;;  %14592 = vmatprep.mubr.msk.f32.mxu1 %vm279_vm2, %v18797_v15  ;;  %v7893_v35 = vpop.f32.mrf.mxu0  ;;  %v9835_v48 = vld [vmem:[#allocation3 + $0x22f] sm:$0xff] }
 0x4be   : > { %v8214_v30 = vpop.f32.mrf.mxu1  ;;  %v10225_v15 = vld [vmem:[#allocation3 + $0x230] sm:$0xff] }
 0x4bf   : > { %v18960_v22 = vadd.f32 %v8214_v30, %v7893_v35  ;;  %v14202_v27 = vpop.f32.mrf.mxu0  ;;  %v10588_v36 = vld [vmem:[#allocation3 + $0x89] sm:$0xff] }
 0x4c0   : > { %v14258_v53 = vpop.f32.mrf.mxu1  ;;  %14537 = vmatmul.mubr.msk.f32.gmra.mxu0 %vm279_vm2, %v18645_v6  ;;  %14593 = vmatmul.mubr.msk.f32.gmra.mxu1 %vm279_vm2, %v18805_v54  ;;  %v10584_v6 = vld [vmem:[#allocation3 + $0x49] sm:$0xff] }
 0x4c1   : > { %v18966_v0 = vadd.f32 %v14258_v53, %v14202_v27  ;;  %14539 = vmatprep.mubr.msk.f32.mxu0 %vm279_vm2, %v9834_v39  ;;  %14595 = vmatprep.mubr.msk.f32.mxu1 %vm279_vm2, %v10224_v24  ;;  %v7903_v5 = vpop.f32.mrf.mxu0  ;;  %v10589_v27 = vld [vmem:[#allocation3 + $0x91] sm:$0xff] }
 0x4c2   : > { %v8224_v12 = vpop.f32.mrf.mxu1 }
 0x4c3   : > { %v18970_v13 = vadd.f32 %v8224_v12, %v7903_v5  ;;  %v14205_v61 = vpop.f32.mrf.mxu0 }
 0x4c4   : > { %v14261_v26 = vpop.f32.mrf.mxu1  ;;  %14540 = vmatmul.mubr.msk.f32.gmra.mxu0 %vm279_vm2, %v9835_v48  ;;  %14596 = vmatmul.mubr.msk.f32.gmra.mxu1 %vm279_vm2, %v10225_v15  ;;  %v10590_v15 = vld [vmem:[#allocation3 + $0xa9] sm:$0xff] }
 0x4c5   : > { %v18974_v54 = vadd.f32 %v14261_v26, %v14205_v61  ;;  %14606 = vmatprep.mubr.msk.f32.mxu0 %vm279_vm2, %v10584_v6  ;;  %v7913_v31 = vpop.f32.mrf.mxu0 }
 0x4c6   : > { %v8234_v18 = vpop.f32.mrf.mxu1 }
 0x4c7   : > { %v18977_v23 = vadd.f32 %v8234_v18, %v7913_v31  ;;  %v14272_v63 = vpop.f32.mrf.mxu0  ;;  %v10591_v31 = vld [vmem:[#allocation3 + $0xb1] sm:$0xff] }
 0x4c8   : > { %v14328_v10 = vpop.f32.mrf.mxu1  ;;  %14607 = vmatmul.mubr.msk.f32.vlgmr.msra.gmra.mxu0 %vm279_vm2, %v10585_v29  ;;  %v8602_v52 = vadd.f32 %v14272_v63, %v20142_v50  ;;  %v10592_v29 = vld [vmem:[#allocation3 + $0xc9] sm:$0xff] }
 0x4c9   : > { %14609 = vmatprep.mubr.msk.f32.mxu0 %vm279_vm2, %v10586_v21  ;;  %v8442_v56 = vpop.f32.mrf.mxu0 }
 0x4ca   : > { %v8832_v11 = vpop.f32.mrf.mxu1  ;;  %v18984_v59 = vadd.f32 %v14328_v10, %v8602_v52  ;;  %v8601_v40 = vadd.f32 %v8442_v56, %v8085_v2  ;;  %v10593_v52 = vld [vmem:[#allocation3 + $0xd1] sm:$0xff] }
 0x4cc   : > { %v14275_v60 = vpop.f32.mrf.mxu0  ;;  %v14331_v62 = vpop.f32.mrf.mxu1  ;;  %14610 = vmatmul.mubr.msk.f32.gmra.mxu0 %vm279_vm2, %v10587_v58  ;;  %v18987_v35 = vadd.f32 %v8832_v11, %v8601_v40  ;;  %v10594_v11 = vld [vmem:[#allocation3 + $0xe9] sm:$0xff] }
 0x4cd   : > { %v8604_v30 = vadd.f32 %v14275_v60, %v18832_v45  ;;  %14612 = vmatprep.mubr.msk.f32.mxu0 %vm279_vm2, %v10588_v36 }
 0x4ce   : > { %v8452_v17 = vpop.f32.mrf.mxu0  ;;  %v8842_v42 = vpop.f32.mrf.mxu1 }
 0x4cf   : > { %v18991_v39 = vadd.f32 %v14331_v62, %v8604_v30  ;;  %v8603_v24 = vadd.f32 %v8452_v17, %v18836_v51  ;;  %v10595_v30 = vld [vmem:[#allocation3 + $0xf1] sm:$0xff] }
 0x4d0   : > { %v14278_v53 = vpop.f32.mrf.mxu0  ;;  %v14334_v48 = vpop.f32.mrf.mxu1  ;;  %14613 = vmatmul.mubr.msk.f32.gmra.mxu0 %vm279_vm2, %v10589_v27 }
 0x4d1   : > { %v18995_v5 = vadd.f32 %v8842_v42, %v8603_v24  ;;  %v8606_v12 = vadd.f32 %v14278_v53, %v18843_v19  ;;  %14615 = vmatprep.mubr.msk.f32.mxu0 %vm279_vm2, %v10590_v15  ;;  %v10596_v42 = vld [vmem:[#allocation3 + $0x109] sm:$0xff] }
 0x4d2   : > { %v8462_v45 = vpop.f32.mrf.mxu0  ;;  %v8852_v61 = vpop.f32.mrf.mxu1 }
 0x4d3   : > { %v18999_v26 = vadd.f32 %v14334_v48, %v8606_v12  ;;  %v8605_v6 = vadd.f32 %v8462_v45, %v18847_v28  ;;  %v10597_v12 = vld [vmem:[#allocation3 + $0x111] sm:$0xff] }
 0x4d4   : > { %v14281_v51 = vpop.f32.mrf.mxu0  ;;  %v14337_v18 = vpop.f32.mrf.mxu1  ;;  %14616 = vmatmul.mubr.msk.f32.gmra.mxu0 %vm279_vm2, %v10591_v31 }
 0x4d5   : > { %v19003_v63 = vadd.f32 %v8852_v61, %v8605_v6  ;;  %v8608_v10 = vadd.f32 %v14281_v51, %v18851_v49  ;;  %14618 = vmatprep.mubr.msk.f32.mxu0 %vm279_vm2, %v10592_v29  ;;  %v10598_v61 = vld [vmem:[#allocation3 + $0x129] sm:$0xff] }
 0x4d6   : > { %v8472_v19 = vpop.f32.mrf.mxu0  ;;  %v8862_v21 = vpop.f32.mrf.mxu1 }
 0x4d7   : > { %v19007_v2 = vadd.f32 %v14337_v18, %v8608_v10  ;;  %v8607_v50 = vadd.f32 %v8472_v19, %v18855_v47  ;;  %v10599_v10 = vld [vmem:[#allocation3 + $0x131] sm:$0xff] }
 0x4d8   : > { %v14284_v28 = vpop.f32.mrf.mxu0  ;;  %v14340_v56 = vpop.f32.mrf.mxu1  ;;  %14619 = vmatmul.mubr.msk.f32.gmra.mxu0 %vm279_vm2, %v10593_v52 }
 0x4d9   : > { %v19011_v40 = vadd.f32 %v8862_v21, %v8607_v50  ;;  %v8610_v58 = vadd.f32 %v14284_v28, %v18859_v16  ;;  %14621 = vmatprep.mubr.msk.f32.mxu0 %vm279_vm2, %v10594_v11  ;;  %v10600_v21 = vld [vmem:[#allocation3 + $0x149] sm:$0xff] }
 0x4da   : > { %v8482_v49 = vpop.f32.mrf.mxu0  ;;  %v8872_v60 = vpop.f32.mrf.mxu1 }
 0x4db   : > { %v19015_v62 = vadd.f32 %v14340_v56, %v8610_v58  ;;  %v8609_v36 = vadd.f32 %v8482_v49, %v18863_v38  ;;  %v10601_v58 = vld [vmem:[#allocation3 + $0x151] sm:$0xff] }
 0x4dc   : > { %v14287_v47 = vpop.f32.mrf.mxu0  ;;  %v14343_v17 = vpop.f32.mrf.mxu1  ;;  %14622 = vmatmul.mubr.msk.f32.gmra.mxu0 %vm279_vm2, %v10595_v30 }
 0x4dd   : > { %v19019_v24 = vadd.f32 %v8872_v60, %v8609_v36  ;;  %v8612_v27 = vadd.f32 %v14287_v47, %v18867_v32  ;;  %14624 = vmatprep.mubr.msk.f32.mxu0 %vm279_vm2, %v10596_v42  ;;  %v10602_v60 = vld [vmem:[#allocation3 + $0x169] sm:$0xff] }
 0x4de   : > { %v8492_v16 = vpop.f32.mrf.mxu0  ;;  %v8882_v53 = vpop.f32.mrf.mxu1 }
 0x4df   : > { %v19023_v48 = vadd.f32 %v14343_v17, %v8612_v27  ;;  %v8611_v15 = vadd.f32 %v8492_v16, %v18871_v34  ;;  %v10603_v27 = vld [vmem:[#allocation3 + $0x171] sm:$0xff] }
 0x4e0   : > { %v14290_v38 = vpop.f32.mrf.mxu0  ;;  %v14346_v45 = vpop.f32.mrf.mxu1  ;;  %14625 = vmatmul.mubr.msk.f32.gmra.mxu0 %vm279_vm2, %v10597_v12 }
 0x4e1   : > { %v19027_v6 = vadd.f32 %v8882_v53, %v8611_v15  ;;  %v8614_v31 = vadd.f32 %v14290_v38, %v18875_v14  ;;  %14627 = vmatprep.mubr.msk.f32.mxu0 %vm279_vm2, %v10598_v61  ;;  %v10604_v53 = vld [vmem:[#allocation3 + $0x189] sm:$0xff] }
 0x4e2   : > { %v8502_v32 = vpop.f32.mrf.mxu0  ;;  %v8892_v51 = vpop.f32.mrf.mxu1 }
 0x4e3   : > { %v19031_v18 = vadd.f32 %v14346_v45, %v8614_v31  ;;  %v8613_v29 = vadd.f32 %v8502_v32, %v18880_v41  ;;  %v10605_v31 = vld [vmem:[#allocation3 + $0x191] sm:$0xff] }
 0x4e4   : > { %v14293_v34 = vpop.f32.mrf.mxu0  ;;  %v14349_v19 = vpop.f32.mrf.mxu1  ;;  %14628 = vmatmul.mubr.msk.f32.gmra.mxu0 %vm279_vm2, %v10599_v10 }
 0x4e5   : > { %v19035_v50 = vadd.f32 %v8892_v51, %v8613_v29  ;;  %v8616_v52 = vadd.f32 %v14293_v34, %v18885_v57  ;;  %14630 = vmatprep.mubr.msk.f32.mxu0 %vm279_vm2, %v10600_v21  ;;  %v10606_v51 = vld [vmem:[#allocation3 + $0x1a9] sm:$0xff] }
 0x4e6   : > { %v8512_v14 = vpop.f32.mrf.mxu0  ;;  %v8902_v28 = vpop.f32.mrf.mxu1 }
 0x4e7   : > { %v19039_v56 = vadd.f32 %v14349_v19, %v8616_v52  ;;  %v8615_v11 = vadd.f32 %v8512_v14, %v18891_v8  ;;  %v10607_v52 = vld [vmem:[#allocation3 + $0x1b1] sm:$0xff] }
 0x4e8   : > { %v14296_v41 = vpop.f32.mrf.mxu0  ;;  %v14352_v49 = vpop.f32.mrf.mxu1  ;;  %14631 = vmatmul.mubr.msk.f32.gmra.mxu0 %vm279_vm2, %v10601_v58 }
 0x4e9   : > { %v19043_v36 = vadd.f32 %v8902_v28, %v8615_v11  ;;  %v8618_v30 = vadd.f32 %v14296_v41, %v18897_v33  ;;  %14633 = vmatprep.mubr.msk.f32.mxu0 %vm279_vm2, %v10602_v60  ;;  %v10608_v28 = vld [vmem:[#allocation3 + $0x1c9] sm:$0xff] }
 0x4ea   : > { %v8522_v57 = vpop.f32.mrf.mxu0  ;;  %v8912_v47 = vpop.f32.mrf.mxu1 }
 0x4eb   : > { %v19047_v17 = vadd.f32 %v14352_v49, %v8618_v30  ;;  %v8617_v42 = vadd.f32 %v8522_v57, %v18903_v37  ;;  %v10609_v30 = vld [vmem:[#allocation3 + $0x1d1] sm:$0xff] }
 0x4ec   : > { %v14299_v8 = vpop.f32.mrf.mxu0  ;;  %v14355_v16 = vpop.f32.mrf.mxu1  ;;  %14634 = vmatmul.mubr.msk.f32.gmra.mxu0 %vm279_vm2, %v10603_v27 }
 0x4ed   : > { %v19051_v15 = vadd.f32 %v8912_v47, %v8617_v42  ;;  %v8620_v12 = vadd.f32 %v14299_v8, %v18909_v43  ;;  %14636 = vmatprep.mubr.msk.f32.mxu0 %vm279_vm2, %v10604_v53  ;;  %v10610_v47 = vld [vmem:[#allocation3 + $0x1e9] sm:$0xff] }
 0x4ee   : > { %v8532_v33 = vpop.f32.mrf.mxu0  ;;  %v8922_v38 = vpop.f32.mrf.mxu1 }
 0x4ef   : > { %v19055_v45 = vadd.f32 %v14355_v16, %v8620_v12  ;;  %v8619_v61 = vadd.f32 %v8532_v33, %v18915_v4  ;;  %v10611_v12 = vld [vmem:[#allocation3 + $0x1f1] sm:$0xff] }
 0x4f0   : > { %v14302_v37 = vpop.f32.mrf.mxu0  ;;  %v14358_v32 = vpop.f32.mrf.mxu1  ;;  %14637 = vmatmul.mubr.msk.f32.gmra.mxu0 %vm279_vm2, %v10605_v31 }
 0x4f1   : > { %v19059_v29 = vadd.f32 %v8922_v38, %v8619_v61  ;;  %v8622_v10 = vadd.f32 %v14302_v37, %v18921_v46  ;;  %14639 = vmatprep.mubr.msk.f32.mxu0 %vm279_vm2, %v10606_v51  ;;  %v10614_v37 = vld [vmem:[#allocation3 + $0x229] sm:$0xff] }
 0x4f2   : > { %v8542_v43 = vpop.f32.mrf.mxu0  ;;  %v8932_v34 = vpop.f32.mrf.mxu1 }
 0x4f3   : > { %v19063_v19 = vadd.f32 %v14358_v32, %v8622_v10  ;;  %v8621_v21 = vadd.f32 %v8542_v43, %v18927_v55 }
 0x4f4   : > { %v14305_v4 = vpop.f32.mrf.mxu0  ;;  %v14361_v14 = vpop.f32.mrf.mxu1  ;;  %14640 = vmatmul.mubr.msk.f32.gmra.mxu0 %vm279_vm2, %v10607_v52 }
 0x4f5   : > { %v19067_v11 = vadd.f32 %v8932_v34, %v8621_v21  ;;  %v8624_v58 = vadd.f32 %v14305_v4, %v18933_v9  ;;  %14642 = vmatprep.mubr.msk.f32.mxu0 %vm279_vm2, %v10608_v28 }
 0x4f6   : > { %v8552_v46 = vpop.f32.mrf.mxu0  ;;  %v8942_v41 = vpop.f32.mrf.mxu1 }
 0x4f7   : > { %v19071_v49 = vadd.f32 %v14361_v14, %v8624_v58  ;;  %v8623_v60 = vadd.f32 %v8552_v46, %v18939_v20 }
 0x4f8   : > { %v14308_v55 = vpop.f32.mrf.mxu0  ;;  %v14364_v57 = vpop.f32.mrf.mxu1  ;;  %14643 = vmatmul.mubr.msk.f32.gmra.mxu0 %vm279_vm2, %v10609_v30 }
 0x4f9   : > { %v19075_v42 = vadd.f32 %v8942_v41, %v8623_v60  ;;  %v8626_v27 = vadd.f32 %v14308_v55, %v18944_v25  ;;  %14645 = vmatprep.mubr.msk.f32.mxu0 %vm279_vm2, %v10610_v47 }
 0x4fa   : > { %v8562_v9 = vpop.f32.mrf.mxu0  ;;  %v8952_v8 = vpop.f32.mrf.mxu1 }
 0x4fb   : > { %v19079_v16 = vadd.f32 %v14364_v57, %v8626_v27  ;;  %v8625_v53 = vadd.f32 %v8562_v9, %v18950_v1 }
 0x4fc   : > { %v14311_v20 = vpop.f32.mrf.mxu0  ;;  %v14367_v33 = vpop.f32.mrf.mxu1  ;;  %14646 = vmatmul.mubr.msk.f32.gmra.mxu0 %vm279_vm2, %v10611_v12 }
 0x4fd   : > { %v19083_v38 = vadd.f32 %v8952_v8, %v8625_v53  ;;  %v8628_v61 = vadd.f32 %v14311_v20, %v18954_v44  ;;  %14648 = vmatprep.mubr.msk.f32.mxu0 %vm279_vm2, %v18799_v3  ;;  %v10615_v44 = vld [vmem:[#allocation3 + $0x231] sm:$0xff] }
 0x4fe   : > { %v8572_v25 = vpop.f32.mrf.mxu0  ;;  %v8962_v31 = vpop.f32.mrf.mxu1 }
 0x4ff   : > { %v19088_v32 = vadd.f32 %v14367_v33, %v8628_v61  ;;  %v8627_v51 = vadd.f32 %v8572_v25, %v18960_v22 }
 0x500   : > { %v14314_v1 = vpop.f32.mrf.mxu0  ;;  %v14370_v10 = vpop.f32.mrf.mxu1  ;;  %14649 = vmatmul.mubr.msk.f32.gmra.mxu0 %vm279_vm2, %v18807_v7 }
 0x501   : > { %v19093_v43 = vadd.f32 %v8962_v31, %v8627_v51  ;;  %v8630_v34 = vadd.f32 %v14314_v1, %v18966_v0  ;;  %14651 = vmatprep.mubr.msk.f32.mxu0 %vm279_vm2, %v10614_v37 }
 0x502   : > { %v8582_v3 = vpop.f32.mrf.mxu0  ;;  %v8972_v21 = vpop.f32.mrf.mxu1 }
 0x503   : > { %v19097_v52 = vadd.f32 %v14370_v10, %v8630_v34  ;;  %v8629_v4 = vadd.f32 %v8582_v3, %v18970_v13 }
 0x504   : > { %v14317_v14 = vpop.f32.mrf.mxu0  ;;  %v14373_v22 = vpop.f32.mrf.mxu1  ;;  %14652 = vmatmul.mubr.msk.f32.gmra.mxu0 %vm279_vm2, %v10615_v44 }
 0x505   : > { %v19101_v28 = vadd.f32 %v8972_v21, %v8629_v4  ;;  %v8632_v7 = vadd.f32 %v14317_v14, %v18974_v54 }
 0x506   : > { %v8592_v58 = vpop.f32.mrf.mxu0  ;;  %v8982_v46 = vpop.f32.mrf.mxu1 }
 0x507   : > { %v19104_v0 = vadd.f32 %v14373_v22, %v8632_v7  ;;  %v8631_v41 = vadd.f32 %v8592_v58, %v18977_v23 }
 0x508   : > { %v14384_v60 = vpop.f32.mrf.mxu0  ;;  %v19107_v30 = vpop.f32.mrf.mxu1 }
 0x509   : > { %v19109_v55 = vadd.f32 %v8982_v46, %v8631_v41  ;;  %v19112_v13 = vadd.f32 %v14384_v60, %v18984_v59 }
 0x50a   : > { %v9222_v57 = vpop.f32.mrf.mxu0  ;;  %v19114_v47 = vpop.f32.mrf.mxu1 }
 0x50b   : > { %v19117_v27 = vadd.f32 %v9222_v57, %v18987_v35 }
 0x50c   : > { %v14387_v54 = vpop.f32.mrf.mxu0  ;;  %v19119_v9 = vpop.f32.mrf.mxu1 }
 0x50d   : > { %v19122_v8 = vadd.f32 %v14387_v54, %v18991_v39 }
 0x50e   : > { %v9232_v23 = vpop.f32.mrf.mxu0  ;;  %v19124_v53 = vpop.f32.mrf.mxu1 }
 0x50f   : > { %v19127_v12 = vadd.f32 %v9232_v23, %v18995_v5 }
 0x510   : > { %v14390_v59 = vpop.f32.mrf.mxu0  ;;  %v19129_v20 = vpop.f32.mrf.mxu1 }
 0x511   : > { %v19132_v33 = vadd.f32 %v14390_v59, %v18999_v26 }
 0x512   : > { %v9242_v35 = vpop.f32.mrf.mxu0  ;;  %v19134_v61 = vpop.f32.mrf.mxu1 }
 0x513   : > { %v19137_v25 = vadd.f32 %v9242_v35, %v19003_v63 }
 0x514   : > { %v14393_v39 = vpop.f32.mrf.mxu0  ;;  %v19139_v31 = vpop.f32.mrf.mxu1 }
 0x515   : > { %v19142_v37 = vadd.f32 %v14393_v39, %v19007_v2 }
 0x516   : > { %v9252_v5 = vpop.f32.mrf.mxu0  ;;  %v19144_v51 = vpop.f32.mrf.mxu1 }
 0x517   : > { %v19147_v1 = vadd.f32 %v9252_v5, %v19011_v40 }
 0x518   : > { %v14396_v26 = vpop.f32.mrf.mxu0  ;;  %v19149_v10 = vpop.f32.mrf.mxu1 }
 0x519   : > { %v19152_v34 = vadd.f32 %v14396_v26, %v19015_v62 }
 0x51a   : > { %v9262_v63 = vpop.f32.mrf.mxu0  ;;  %v19154_v44 = vpop.f32.mrf.mxu1 }
 0x51b   : > { %v19157_v3 = vadd.f32 %v9262_v63, %v19019_v24 }
 0x51c   : > { %v14399_v2 = vpop.f32.mrf.mxu0  ;;  %v19159_v21 = vpop.f32.mrf.mxu1 }
 0x51d   : > { %v19162_v4 = vadd.f32 %v14399_v2, %v19023_v48 }
 0x51e   : > { %v9272_v40 = vpop.f32.mrf.mxu0  ;;  %v19164_v14 = vpop.f32.mrf.mxu1 }
 0x51f   : > { %v19167_v22 = vadd.f32 %v9272_v40, %v19027_v6 }
 0x520   : > { %v14402_v62 = vpop.f32.mrf.mxu0  ;;  %v19169_v7 = vpop.f32.mrf.mxu1 }
 0x521   : > { %v19172_v58 = vadd.f32 %v14402_v62, %v19031_v18 }
 0x522   : > { %v9282_v24 = vpop.f32.mrf.mxu0  ;;  %v19174_v46 = vpop.f32.mrf.mxu1 }
 0x523   : > { %v19177_v41 = vadd.f32 %v9282_v24, %v19035_v50 }
 0x524   : > { %v14405_v48 = vpop.f32.mrf.mxu0  ;;  %v19179_v60 = vpop.f32.mrf.mxu1 }
 0x525   : > { %v19182_v57 = vadd.f32 %v14405_v48, %v19039_v56 }
 0x526   : > { %v9292_v6 = vpop.f32.mrf.mxu0  ;;  %v19184_v54 = vpop.f32.mrf.mxu1 }
 0x527   : > { %20143 = vst [vmem:[#allocation8_spill] sm:$0xff] %v19184_v54  ;;  %v19187_v23 = vadd.f32 %v9292_v6, %v19043_v36 }
 0x528   : > { %v14408_v18 = vpop.f32.mrf.mxu0  ;;  %v19189_v59 = vpop.f32.mrf.mxu1 }
 0x529   : > { %20144 = vst [vmem:[#allocation21_spill] sm:$0xff] %v19187_v23  ;;  %20145 = vst [vmem:[#allocation11_spill] sm:$0xff] %v19189_v59  ;;  %v19192_v35 = vadd.f32 %v14408_v18, %v19047_v17 }
 0x52a   : > { %v9302_v50 = vpop.f32.mrf.mxu0  ;;  %v19194_v39 = vpop.f32.mrf.mxu1 }
 0x52b   : > { %20146 = vst [vmem:[#allocation88_spill] sm:$0xff] %v19192_v35  ;;  %20147 = vst [vmem:[#allocation85_spill] sm:$0xff] %v19194_v39  ;;  %v19197_v5 = vadd.f32 %v9302_v50, %v19051_v15 }
 0x52c   : > { %v14411_v56 = vpop.f32.mrf.mxu0  ;;  %v19199_v26 = vpop.f32.mrf.mxu1 }
 0x52d   : > { %20148 = vst [vmem:[#allocation18_spill] sm:$0xff] %v19197_v5  ;;  %20149 = vst [vmem:[#allocation52_spill] sm:$0xff] %v19199_v26  ;;  %v19202_v63 = vadd.f32 %v14411_v56, %v19055_v45 }
 0x52e   : > { %v9312_v36 = vpop.f32.mrf.mxu0  ;;  %v19204_v2 = vpop.f32.mrf.mxu1 }
 0x52f   : > { %20150 = vst [vmem:[#allocation31_spill] sm:$0xff] %v19202_v63  ;;  %20151 = vst [vmem:[#allocation17_spill] sm:$0xff] %v19204_v2  ;;  %v19207_v40 = vadd.f32 %v9312_v36, %v19059_v29 }
 0x530   : > { %v14414_v17 = vpop.f32.mrf.mxu0  ;;  %v19209_v62 = vpop.f32.mrf.mxu1 }
 0x531   : > { %20152 = vst [vmem:[#allocation67_spill] sm:$0xff] %v19207_v40  ;;  %20153 = vst [vmem:[#allocation64_spill] sm:$0xff] %v19209_v62  ;;  %v19212_v24 = vadd.f32 %v14414_v17, %v19063_v19 }
 0x532   : > { %v9322_v15 = vpop.f32.mrf.mxu0  ;;  %v19214_v48 = vpop.f32.mrf.mxu1 }
 0x533   : > { %20154 = vst [vmem:[#allocation91_spill] sm:$0xff] %v19212_v24  ;;  %20155 = vst [vmem:[#allocation5_spill] sm:$0xff] %v19214_v48  ;;  %v19217_v6 = vadd.f32 %v9322_v15, %v19067_v11 }
 0x534   : > { %v14417_v45 = vpop.f32.mrf.mxu0  ;;  %v19219_v18 = vpop.f32.mrf.mxu1 }
 0x535   : > { %20156 = vst [vmem:[#allocation35_spill] sm:$0xff] %v19217_v6  ;;  %20157 = vst [vmem:[#allocation69_spill] sm:$0xff] %v19219_v18  ;;  %v19222_v50 = vadd.f32 %v14417_v45, %v19071_v49 }
 0x536   : > { %v9332_v29 = vpop.f32.mrf.mxu0  ;;  %v19224_v56 = vpop.f32.mrf.mxu1 }
 0x537   : > { %20158 = vst [vmem:[#allocation7_spill] sm:$0xff] %v19222_v50  ;;  %20159 = vst [vmem:[#allocation94_spill] sm:$0xff] %v19224_v56  ;;  %v19227_v36 = vadd.f32 %v9332_v29, %v19075_v42 }
 0x538   : > { %v14420_v19 = vpop.f32.mrf.mxu0  ;;  %v19229_v17 = vpop.f32.mrf.mxu1 }
 0x539   : > { %20160 = vst [vmem:[#allocation30_spill] sm:$0xff] %v19227_v36  ;;  %20161 = vst [vmem:[#allocation54_spill] sm:$0xff] %v19229_v17  ;;  %v19232_v48 = vadd.f32 %v14420_v19, %v19079_v16 }
 0x53a   : > { %v9342_v11 = vpop.f32.mrf.mxu0  ;;  %v19234_v15 = vpop.f32.mrf.mxu1 }
 0x53b   : > { %20162 = vst [vmem:[#allocation57_spill] sm:$0xff] %v19232_v48  ;;  %20163 = vst [vmem:[#allocation14_spill] sm:$0xff] %v19234_v15  ;;  %v19237_v18 = vadd.f32 %v9342_v11, %v19083_v38 }
 0x53c   : > { %v14423_v49 = vpop.f32.mrf.mxu0  ;;  %v19239_v45 = vpop.f32.mrf.mxu1 }
 0x53d   : > { %20164 = vst [vmem:[#allocation66_spill] sm:$0xff] %v19237_v18  ;;  %20165 = vst [vmem:[#allocation51_spill] sm:$0xff] %v19239_v45  ;;  %v19242_v56 = vadd.f32 %v14423_v49, %v19088_v32 }
 0x53e   : > { %v9352_v42 = vpop.f32.mrf.mxu0  ;;  %v19244_v29 = vpop.f32.mrf.mxu1 }
 0x53f   : > { %20166 = vst [vmem:[#allocation97_spill] sm:$0xff] %v19242_v56  ;;  %20167 = vst [vmem:[#allocation13_spill] sm:$0xff] %v19244_v29  ;;  %v19247_v17 = vadd.f32 %v9352_v42, %v19093_v43 }
 0x540   : > { %v14426_v16 = vpop.f32.mrf.mxu0  ;;  %v19249_v19 = vpop.f32.mrf.mxu1 }
 0x541   : > { %20168 = vst [vmem:[#allocation71_spill] sm:$0xff] %v19247_v17  ;;  %20169 = vst [vmem:[#allocation86_spill] sm:$0xff] %v19249_v19  ;;  %v19252_v15 = vadd.f32 %v14426_v16, %v19097_v52 }
 0x542   : > { %v9362_v38 = vpop.f32.mrf.mxu0  ;;  %v19254_v11 = vpop.f32.mrf.mxu1 }
 0x543   : > { %20170 = vst [vmem:[#allocation19_spill] sm:$0xff] %v19252_v15  ;;  %20171 = vst [vmem:[#allocation56_spill] sm:$0xff] %v19254_v11  ;;  %v19257_v45 = vadd.f32 %v9362_v38, %v19101_v28 }
 0x544   : > { %v14429_v32 = vpop.f32.mrf.mxu0  ;;  %v19259_v49 = vpop.f32.mrf.mxu1 }
 0x545   : > { %20172 = vst [vmem:[#allocation68_spill] sm:$0xff] %v19257_v45  ;;  %20173 = vst [vmem:[#allocation22_spill] sm:$0xff] %v19259_v49  ;;  %v19262_v29 = vadd.f32 %v14429_v32, %v19104_v0 }
 0x546   : > { %v9372_v43 = vpop.f32.mrf.mxu0  ;;  %v19264_v42 = vpop.f32.mrf.mxu1 }
 0x547   : > { %20174 = vst [vmem:[#allocation87_spill] sm:$0xff] %v19262_v29  ;;  %20175 = vst [vmem:[#allocation36_spill] sm:$0xff] %v19264_v42  ;;  %v19267_v19 = vadd.f32 %v9372_v43, %v19109_v55 }
 0x548   : > { %v14496_v52 = vpop.f32.mrf.mxu0  ;;  %v14552_v16 = vpop.f32.mrf.mxu1 }
 0x549   : > { %20176 = vst [vmem:[#allocation37_spill] sm:$0xff] %v19267_v19 }
 0x54a   : > { %v10003_v15 = vpop.f32.mrf.mxu0  ;;  %v10393_v17 = vpop.f32.mrf.mxu1 }
 0x54c   : > { %v14499_v11 = vpop.f32.mrf.mxu0  ;;  %v14555_v28 = vpop.f32.mrf.mxu1 }
 0x54e   : > { %v10013_v56 = vpop.f32.mrf.mxu0  ;;  %v19271_v49 = vpop.f32.mrf.mxu1 }
 0x550   : > { %v14502_v38 = vpop.f32.mrf.mxu0  ;;  %v19277_v42 = vpop.f32.mrf.mxu1 }
 0x552   : > { %v19269_v45 = vpop.f32.mrf.mxu0  ;;  %v19283_v19 = vpop.f32.mrf.mxu1 }
 0x554   : > { %v19273_v0 = vpop.f32.mrf.mxu0  ;;  %v19289_v48 = vpop.f32.mrf.mxu1 }
 0x556   : > { %v19275_v32 = vpop.f32.mrf.mxu0  ;;  %v19295_v6 = vpop.f32.mrf.mxu1 }
 0x558   : > { %v19279_v55 = vpop.f32.mrf.mxu0  ;;  %v19301_v2 = vpop.f32.mrf.mxu1 }
 0x55a   : > { %v19281_v43 = vpop.f32.mrf.mxu0  ;;  %v19307_v63 = vpop.f32.mrf.mxu1 }
 0x55c   : > { %v19285_v29 = vpop.f32.mrf.mxu0  ;;  %v19313_v59 = vpop.f32.mrf.mxu1 }
 0x55e   : > { %v19287_v18 = vpop.f32.mrf.mxu0 }
 0x560   : > { %v19291_v36 = vpop.f32.mrf.mxu0 }
 0x562   : > { %v19293_v50 = vpop.f32.mrf.mxu0 }
 0x563   : > { %20177 = vst [vmem:[#allocation89_spill] sm:$0xff] %v19293_v50 }
 0x564   : > { %v19297_v62 = vpop.f32.mrf.mxu0 }
 0x565   : > { %20178 = vst [vmem:[#allocation59_spill] sm:$0xff] %v19297_v62  ;;  %v19319_v62 = vpop.f32.mrf.mxu1 }
 0x566   : > { %v19299_v24 = vpop.f32.mrf.mxu0  ;;  %20186 = vst [vmem:[#allocation34_spill] sm:$0xff] %v19319_v62 }
 0x567   : > { %20179 = vst [vmem:[#allocation32_spill] sm:$0xff] %v19299_v24 }
 0x568   : > { %v19303_v40 = vpop.f32.mrf.mxu0 }
 0x569   : > { %20180 = vst [vmem:[#allocation70_spill] sm:$0xff] %v19303_v40  ;;  %v19325_v40 = vpop.f32.mrf.mxu1 }
 0x56a   : > { %v19305_v26 = vpop.f32.mrf.mxu0  ;;  %20189 = vst [vmem:[#allocation23_spill] sm:$0xff] %v19325_v40 }
 0x56b   : > { %20181 = vst [vmem:[#allocation38_spill] sm:$0xff] %v19305_v26 }
 0x56c   : > { %v19309_v39 = vpop.f32.mrf.mxu0 }
 0x56d   : > { %20182 = vst [vmem:[#allocation90_spill] sm:$0xff] %v19309_v39  ;;  %v19331_v39 = vpop.f32.mrf.mxu1 }
 0x56e   : > { %v19311_v5 = vpop.f32.mrf.mxu0  ;;  %20192 = vst [vmem:[#allocation76_spill] sm:$0xff] %v19331_v39 }
 0x56f   : > { %20183 = vst [vmem:[#allocation73_spill] sm:$0xff] %v19311_v5 }
 0x570   : > { %v19315_v35 = vpop.f32.mrf.mxu0 }
 0x571   : > { %20184 = vst [vmem:[#allocation39_spill] sm:$0xff] %v19315_v35 }
 0x572   : > { %v19317_v54 = vpop.f32.mrf.mxu0 }
 0x573   : > { %20185 = vst [vmem:[#allocation92_spill] sm:$0xff] %v19317_v54  ;;  %v19337_v54 = vpop.f32.mrf.mxu1 }
 0x574   : > { %v19321_v24 = vpop.f32.mrf.mxu0  ;;  %20195 = vst [vmem:[#allocation61_spill] sm:$0xff] %v19337_v54 }
 0x575   : > { %20187 = vst [vmem:[#allocation58_spill] sm:$0xff] %v19321_v24  ;;  %v19347_v40 = vpop.f32.mrf.mxu1 }
 0x576   : > { %v19323_v23 = vpop.f32.mrf.mxu0 }
 0x577   : > { %20188 = vst [vmem:[#allocation72_spill] sm:$0xff] %v19323_v23  ;;  %v9772_v23 = vadd.f32 %v19107_v30, %v19112_v13 }
 0x578   : > { %v19327_v26 = vpop.f32.mrf.mxu0 }
 0x579   : > { %20190 = vst [vmem:[#allocation93_spill] sm:$0xff] %v19327_v26  ;;  %v9771_v26 = vadd.f32 %v19114_v47, %v19117_v27  ;;  %v19363_v27 = vld [vmem:[%s19590_s6] ss:$0 sm:$0xff] }
 0x57a   : > { %v19329_v50 = vpop.f32.mrf.mxu0 }
 0x57b   : > { %20191 = vst [vmem:[#allocation41_spill] sm:$0xff] %v19329_v50  ;;  %v10163_v50 = vadd.f32 %v14496_v52, %v9772_v23 }
 0x57c   : > { %v19333_v5 = vpop.f32.mrf.mxu0 }
 0x57d   : > { %20193 = vst [vmem:[#allocation95_spill] sm:$0xff] %v19333_v5  ;;  %v10162_v5 = vadd.f32 %v10003_v15, %v9771_v26  ;;  %v10553_v30 = vadd.f32 %v14552_v16, %v10163_v50 }
 0x57e   : > { %v19335_v35 = vpop.f32.mrf.mxu0 }
 0x57f   : > { %20194 = vst [vmem:[#allocation33_spill] sm:$0xff] %v19335_v35  ;;  %v9774_v35 = vadd.f32 %v19119_v9, %v19122_v8  ;;  %v9776_v9 = vadd.f32 %v19129_v20, %v19132_v33  ;;  %v10552_v8 = vadd.f32 %v10393_v17, %v10162_v5  ;;  %v9778_v20 = vadd.f32 %v19139_v31, %v19142_v37 }
 0x580   : > { %v19339_v62 = vpop.f32.mrf.mxu0  ;;  %v9777_v17 = vadd.f32 %v19144_v51, %v19147_v1 }
 0x581   : > { %20196 = vst [vmem:[#allocation40_spill] sm:$0xff] %v19339_v62  ;;  %v9773_v62 = vadd.f32 %v19124_v53, %v19127_v12  ;;  %v10165_v13 = vadd.f32 %v14499_v11, %v9774_v35  ;;  %v9775_v53 = vadd.f32 %v19134_v61, %v19137_v25  ;;  %v10167_v50 = vadd.f32 %v14502_v38, %v9776_v9 }
 0x582   : > { %v19343_v24 = vpop.f32.mrf.mxu0  ;;  %v10169_v31 = vadd.f32 %v19273_v0, %v9778_v20  ;;  %v10168_v51 = vadd.f32 %v19275_v32, %v9777_v17  ;;  %v9779_v0 = vadd.f32 %v19154_v44, %v19157_v3  ;;  %v9782_v32 = vadd.f32 %v19159_v21, %v19162_v4 }
 0x583   : > { %20197 = vst [vmem:[#allocation74_spill] sm:$0xff] %v19343_v24  ;;  %v19358_v24 = vpop.f32.mrf.mxu1  ;;  %v10164_v23 = vadd.f32 %v10013_v56, %v9773_v62  ;;  %v10555_v35 = vadd.f32 %v14555_v28, %v10165_v13  ;;  %v10166_v25 = vadd.f32 %v19269_v45, %v9775_v53  ;;  %v10557_v16 = vadd.f32 %v19277_v42, %v10167_v50 }
 0x584   : > { %v19349_v39 = vpop.f32.mrf.mxu0  ;;  %v10170_v44 = vadd.f32 %v19281_v43, %v9779_v0  ;;  %v10173_v21 = vadd.f32 %v19285_v29, %v9782_v32  ;;  %v9784_v43 = vadd.f32 %v19169_v7, %v19172_v58  ;;  %v9783_v29 = vadd.f32 %v19174_v46, %v19177_v41  ;;  %v20199_v46 = vld [vmem:[#allocation89_spill] sm:$0xff] }
 0x585   : > { %v19377_v33 = vpop.f32.mrf.mxu1  ;;  %v10554_v61 = vadd.f32 %v19271_v49, %v10164_v23  ;;  %v9780_v49 = vadd.f32 %v19149_v10, %v19152_v34  ;;  %v10558_v23 = vadd.f32 %v19295_v6, %v10168_v51  ;;  %v20209_v32 = vld [vmem:[#allocation85_spill] sm:$0xff] }
 0x586   : > { %v19353_v54 = vpop.f32.mrf.mxu0  ;;  %v10560_v50 = vadd.f32 %v19307_v63, %v10170_v44  ;;  %v10175_v7 = vadd.f32 %v19291_v36, %v9784_v43  ;;  %v10174_v41 = vadd.f32 %v20199_v46, %v9783_v29  ;;  %v20210_v44 = vld [vmem:[#allocation61_spill] sm:$0xff]  ;;  %v20219_v46 = vld [vmem:[#allocation64_spill] sm:$0xff] }
 0x587   : > { %v19393_v28 = vpop.f32.mrf.mxu1  ;;  %v10171_v10 = vadd.f32 %v19279_v55, %v9780_v49  ;;  %v9781_v55 = vadd.f32 %v19164_v14, %v19167_v22  ;;  %v20204_v49 = vld [vmem:[#allocation88_spill] sm:$0xff] }
 0x588   : > { %v14608_v47 = vpop.f32.mrf.mxu0 }
 0x589   : > { %v10943_v26 = vadd.f32 %v14608_v47, %v10553_v30  ;;  %v10556_v30 = vadd.f32 %v19283_v19, %v10166_v25  ;;  %v10559_v47 = vadd.f32 %v19289_v48, %v10169_v31  ;;  %v19409_v9 = vpop.f32.mrf.mxu1  ;;  %v10561_v53 = vadd.f32 %v19301_v2, %v10171_v10 }
 0x58a   : > { %v10783_v12 = vpop.f32.mrf.mxu0  ;;  %v10172_v14 = vadd.f32 %v19287_v18, %v9781_v55  ;;  %v9786_v18 = vadd.f32 %v19179_v60, %v19182_v57  ;;  %v20203_v60 = vld [vmem:[#allocation59_spill] sm:$0xff] }
 0x58b   : > { %v10982_v15 = vadd.f32 %v19363_v27, %v10943_v26  ;;  %v10942_v11 = vadd.f32 %v10783_v12, %v10552_v8  ;;  %v19425_v12 = vpop.f32.mrf.mxu1 }
 0x58c   : > { %v14611_v5 = vpop.f32.mrf.mxu0  ;;  %v10177_v57 = vadd.f32 %v20203_v60, %v9786_v18  ;;  %v20217_v18 = vld [vmem:[#allocation90_spill] sm:$0xff] }
 0x58d   : > { %11014 = vst.msk [vmem:[%s19372_s25 + $0x8] sm:$0xff] %vm279_vm2, %v10982_v15  ;;  %v10981_v62 = vadd.f32 %v19363_v27, %v10942_v11  ;;  %v10945_v56 = vadd.f32 %v14611_v5, %v10555_v35  ;;  %v10563_v11 = vadd.f32 %v19313_v59, %v10173_v21  ;;  %v19441_v20 = vpop.f32.mrf.mxu1  ;;  %v20212_v21 = vld [vmem:[#allocation31_spill] sm:$0xff] }
 0x58e   : > { %v10793_v52 = vpop.f32.mrf.mxu0 }
 0x58f   : > { %11013 = vst.msk [vmem:[%s19372_s25] sm:$0xff] %vm279_vm2, %v10981_v62  ;;  %v10984_v37 = vadd.f32 %v19363_v27, %v10945_v56  ;;  %v10944_v45 = vadd.f32 %v10793_v52, %v10554_v61  ;;  %v20198_v61 = vld [vmem:[#allocation34_spill] sm:$0xff]  ;;  %v20200_v62 = vld [vmem:[#allocation21_spill] sm:$0xff]  ;;  %v20201_v56 = vld [vmem:[#allocation8_spill] sm:$0xff]  ;;  %v19457_v51 = vpop.f32.mrf.mxu1 }
 0x590   : > { %v14614_v38 = vpop.f32.mrf.mxu0  ;;  %v10562_v25 = vadd.f32 %v20198_v61, %v10172_v14  ;;  %v9785_v17 = vadd.f32 %v20201_v56, %v20200_v62  ;;  %v20214_v14 = vld [vmem:[#allocation38_spill] sm:$0xff]  ;;  %v20220_v56 = vld [vmem:[#allocation73_spill] sm:$0xff] }
 0x591   : > { %11016 = vst.msk [vmem:[%s19372_s25 + $0x18] sm:$0xff] %vm279_vm2, %v10984_v37  ;;  %v10983_v1 = vadd.f32 %v19363_v27, %v10944_v45  ;;  %v10947_v42 = vadd.f32 %v14614_v38, %v10557_v16  ;;  %v20202_v16 = vld [vmem:[#allocation23_spill] sm:$0xff]  ;;  %v10503_v43 = vpop.f32.mrf.mxu1 }
 0x592   : > { %v10803_v13 = vpop.f32.mrf.mxu0  ;;  %v10565_v31 = vadd.f32 %v20202_v16, %v10175_v7  ;;  %v20205_v38 = vld [vmem:[#allocation11_spill] sm:$0xff] }
 0x593   : > { %11015 = vst.msk [vmem:[%s19372_s25 + $0x10] sm:$0xff] %vm279_vm2, %v10983_v1  ;;  %v10986_v34 = vadd.f32 %v19363_v27, %v10947_v42  ;;  %v10946_v19 = vadd.f32 %v10803_v13, %v10556_v30  ;;  %v9788_v30 = vadd.f32 %v20205_v38, %v20204_v49  ;;  %v20206_v42 = vld [vmem:[#allocation76_spill] sm:$0xff]  ;;  %v20221_v16 = vld [vmem:[#allocation35_spill] sm:$0xff] }
 0x594   : > { %v14617_v8 = vpop.f32.mrf.mxu0  ;;  %v10564_v0 = vadd.f32 %v20206_v42, %v10174_v41  ;;  %v20207_v13 = vld [vmem:[#allocation32_spill] sm:$0xff] }
 0x595   : > { %11018 = vst.msk [vmem:[%s19372_s25 + $0x28] sm:$0xff] %vm279_vm2, %v10986_v34  ;;  %v10985_v3 = vadd.f32 %v19363_v27, %v10946_v19  ;;  %v10949_v48 = vadd.f32 %v14617_v8, %v10559_v47  ;;  %v10176_v47 = vadd.f32 %v20207_v13, %v9785_v17  ;;  %v20208_v19 = vld [vmem:[#allocation18_spill] sm:$0xff] }
 0x596   : > { %v10813_v26 = vpop.f32.mrf.mxu0  ;;  %v9787_v8 = vadd.f32 %v20209_v32, %v20208_v19  ;;  %v20227_v32 = vld [vmem:[#allocation30_spill] sm:$0xff] }
 0x597   : > { %11017 = vst.msk [vmem:[%s19372_s25 + $0x20] sm:$0xff] %vm279_vm2, %v10985_v3  ;;  %v10988_v4 = vadd.f32 %v19363_v27, %v10949_v48  ;;  %v10948_v6 = vadd.f32 %v10813_v26, %v10558_v23  ;;  %v10567_v3 = vadd.f32 %v20210_v44, %v10177_v57  ;;  %v20211_v48 = vld [vmem:[#allocation70_spill] sm:$0xff] }
 0x598   : > { %v14620_v35 = vpop.f32.mrf.mxu0  ;;  %v10179_v55 = vadd.f32 %v20211_v48, %v9788_v30  ;;  %v20224_v30 = vld [vmem:[#allocation7_spill] sm:$0xff]  ;;  %v20229_v48 = vld [vmem:[#allocation58_spill] sm:$0xff] }
 0x599   : > { %11020 = vst.msk [vmem:[%s19372_s25 + $0x38] sm:$0xff] %vm279_vm2, %v10988_v4  ;;  %v10987_v22 = vadd.f32 %v19363_v27, %v10948_v6  ;;  %v10951_v2 = vadd.f32 %v14620_v35, %v10561_v53  ;;  %v20213_v4 = vld [vmem:[#allocation52_spill] sm:$0xff] }
 0x59a   : > { %v10823_v15 = vpop.f32.mrf.mxu0  ;;  %v9790_v6 = vadd.f32 %v20213_v4, %v20212_v21  ;;  %v20231_v21 = vld [vmem:[#allocation54_spill] sm:$0xff] }
 0x59b   : > { %11019 = vst.msk [vmem:[%s19372_s25 + $0x30] sm:$0xff] %vm279_vm2, %v10987_v22  ;;  %v10990_v58 = vadd.f32 %v19363_v27, %v10951_v2  ;;  %v10950_v63 = vadd.f32 %v10823_v15, %v10560_v50  ;;  %v10566_v50 = vadd.f32 %v19347_v40, %v10176_v47  ;;  %v10178_v22 = vadd.f32 %v20214_v14, %v9787_v8  ;;  %v20215_v15 = vld [vmem:[#allocation67_spill] sm:$0xff]  ;;  %v20228_v8 = vld [vmem:[#allocation94_spill] sm:$0xff]  ;;  %v20232_v14 = vld [vmem:[#allocation72_spill] sm:$0xff] }
 0x59c   : > { %v14623_v5 = vpop.f32.mrf.mxu0 }
 0x59d   : > { %11022 = vst.msk [vmem:[%s19372_s25 + $0x48] sm:$0xff] %vm279_vm2, %v10990_v58  ;;  %v10989_v59 = vadd.f32 %v19363_v27, %v10950_v63  ;;  %v10953_v36 = vadd.f32 %v14623_v5, %v10563_v11  ;;  %v20216_v11 = vld [vmem:[#allocation17_spill] sm:$0xff]  ;;  %v10569_v63 = vadd.f32 %v19358_v24, %v10179_v55  ;;  %v10181_v5 = vadd.f32 %v20217_v18, %v9790_v6 }
 0x59e   : > { %v10833_v52 = vpop.f32.mrf.mxu0  ;;  %v9789_v7 = vadd.f32 %v20216_v11, %v20215_v15  ;;  %v10568_v62 = vadd.f32 %v19377_v33, %v10178_v22  ;;  %v20234_v15 = vld [vmem:[#allocation14_spill] sm:$0xff] }
 0x59f   : > { %11021 = vst.msk [vmem:[%s19372_s25 + $0x40] sm:$0xff] %vm279_vm2, %v10989_v59  ;;  %v10992_v37 = vadd.f32 %v19363_v27, %v10953_v36  ;;  %v10952_v45 = vadd.f32 %v10833_v52, %v10562_v25  ;;  %v20218_v25 = vld [vmem:[#allocation91_spill] sm:$0xff]  ;;  %v14588_v59 = vpop.f32.mrf.mxu1 }
 0x5a0   : > { %v14626_v1 = vpop.f32.mrf.mxu0  ;;  %v9792_v41 = vadd.f32 %v20219_v46, %v20218_v25  ;;  %v10180_v17 = vadd.f32 %v20220_v56, %v9789_v7 }
 0x5a1   : > { %11024 = vst.msk [vmem:[%s19372_s25 + $0x58] sm:$0xff] %vm279_vm2, %v10992_v37  ;;  %v10991_v10 = vadd.f32 %v19363_v27, %v10952_v45  ;;  %v10955_v34 = vadd.f32 %v14626_v1, %v10565_v31  ;;  %v20222_v31 = vld [vmem:[#allocation5_spill] sm:$0xff]  ;;  %v10571_v37 = vadd.f32 %v19393_v28, %v10181_v5  ;;  %v20223_v45 = vld [vmem:[#allocation39_spill] sm:$0xff] }
 0x5a2   : > { %v10843_v23 = vpop.f32.mrf.mxu0  ;;  %v9791_v60 = vadd.f32 %v20222_v31, %v20221_v16  ;;  %v10183_v49 = vadd.f32 %v20223_v45, %v9792_v41  ;;  %v20225_v1 = vld [vmem:[#allocation69_spill] sm:$0xff]  ;;  %v10570_v47 = vadd.f32 %v19409_v9, %v10180_v17 }
 0x5a3   : > { %11023 = vst.msk [vmem:[%s19372_s25 + $0x50] sm:$0xff] %vm279_vm2, %v10991_v10  ;;  %v10994_v26 = vadd.f32 %v19363_v27, %v10955_v34  ;;  %v10954_v53 = vadd.f32 %v10843_v23, %v10564_v0  ;;  %v9794_v42 = vadd.f32 %v20225_v1, %v20224_v30  ;;  %v10513_v0 = vpop.f32.mrf.mxu1  ;;  %v20226_v10 = vld [vmem:[#allocation92_spill] sm:$0xff]  ;;  %v9793_v23 = vadd.f32 %v20228_v8, %v20227_v32 }
 0x5a4   : > { %v14629_v35 = vpop.f32.mrf.mxu0  ;;  %v10182_v34 = vadd.f32 %v20226_v10, %v9791_v60 }
 0x5a5   : > { %11026 = vst.msk [vmem:[%s19372_s25 + $0x68] sm:$0xff] %vm279_vm2, %v10994_v26  ;;  %v10993_v2 = vadd.f32 %v19363_v27, %v10954_v53  ;;  %v10957_v29 = vadd.f32 %v14629_v35, %v10567_v3  ;;  %v10573_v3 = vadd.f32 %v19425_v12, %v10183_v49  ;;  %v10185_v55 = vadd.f32 %v20229_v48, %v9794_v42  ;;  %v20230_v53 = vld [vmem:[#allocation57_spill] sm:$0xff]  ;;  %v14591_v6 = vpop.f32.mrf.mxu1  ;;  %v20242_v49 = vld [vmem:[#allocation19_spill] sm:$0xff] }
 0x5a6   : > { %v10853_v58 = vpop.f32.mrf.mxu0  ;;  %v9796_v4 = vadd.f32 %v20231_v21, %v20230_v53  ;;  %v10184_v22 = vadd.f32 %v20232_v14, %v9793_v23  ;;  %v20247_v23 = vld [vmem:[#allocation40_spill] sm:$0xff]  ;;  %v20248_v48 = vld [vmem:[#allocation87_spill] sm:$0xff]  ;;  %v20251_v14 = vld [vmem:[#allocation37_spill] sm:$0xff] }
 0x5a7   : > { %11025 = vst.msk [vmem:[%s19372_s25 + $0x60] sm:$0xff] %vm279_vm2, %v10993_v2  ;;  %v10996_v40 = vadd.f32 %v19363_v27, %v10957_v29  ;;  %v10956_v61 = vadd.f32 %v10853_v58, %v10566_v50  ;;  %v10572_v50 = vadd.f32 %v19441_v20, %v10182_v34  ;;  %v20233_v29 = vld [vmem:[#allocation66_spill] sm:$0xff]  ;;  %v10575_v58 = vadd.f32 %v19457_v51, %v10185_v55  ;;  %v10523_v46 = vpop.f32.mrf.mxu1  ;;  %v20245_v34 = vld [vmem:[#allocation68_spill] sm:$0xff] }
 0x5a8   : > { %v14632_v36 = vpop.f32.mrf.mxu0  ;;  %v9795_v11 = vadd.f32 %v20234_v15, %v20233_v29  ;;  %v20249_v55 = vld [vmem:[#allocation22_spill] sm:$0xff] }
 0x5a9   : > { %11028 = vst.msk [vmem:[%s19372_s25 + $0x78] sm:$0xff] %vm279_vm2, %v10996_v40  ;;  %v10995_v24 = vadd.f32 %v19363_v27, %v10956_v61  ;;  %v10959_v52 = vadd.f32 %v14632_v36, %v10569_v63  ;;  %v20235_v63 = vld [vmem:[#allocation93_spill] sm:$0xff]  ;;  %v20237_v61 = vld [vmem:[#allocation51_spill] sm:$0xff]  ;;  %v10574_v36 = vadd.f32 %v10503_v43, %v10184_v22  ;;  %v14594_v30 = vpop.f32.mrf.mxu1  ;;  %v20252_v22 = vld [vmem:[#allocation36_spill] sm:$0xff] }
 0x5aa   : > { %v10863_v57 = vpop.f32.mrf.mxu0  ;;  %v10187_v18 = vadd.f32 %v20235_v63, %v9796_v4  ;;  %v20236_v40 = vld [vmem:[#allocation97_spill] sm:$0xff]  ;;  %v20250_v4 = vld [vmem:[#allocation74_spill] sm:$0xff] }
 0x5ab   : > { %11027 = vst.msk [vmem:[%s19372_s25 + $0x70] sm:$0xff] %vm279_vm2, %v10995_v24  ;;  %v10998_v33 = vadd.f32 %v19363_v27, %v10959_v52  ;;  %v10958_v38 = vadd.f32 %v10863_v57, %v10568_v62  ;;  %v9798_v25 = vadd.f32 %v20237_v61, %v20236_v40  ;;  %v20238_v62 = vld [vmem:[#allocation41_spill] sm:$0xff]  ;;  %v20239_v24 = vld [vmem:[#allocation71_spill] sm:$0xff] }
 0x5ac   : > { %v14635_v13 = vpop.f32.mrf.mxu0  ;;  %v10186_v56 = vadd.f32 %v20238_v62, %v9795_v11  ;;  %v20240_v52 = vld [vmem:[#allocation13_spill] sm:$0xff]  ;;  %v10577_v60 = vadd.f32 %v14588_v59, %v10187_v18  ;;  %v20241_v57 = vld [vmem:[#allocation95_spill] sm:$0xff] }
 0x5ad   : > { %11030 = vst.msk [vmem:[%s19372_s25 + $0x88] sm:$0xff] %vm279_vm2, %v10998_v33  ;;  %v10997_v28 = vadd.f32 %v19363_v27, %v10958_v38  ;;  %v10961_v19 = vadd.f32 %v14635_v13, %v10571_v37  ;;  %v9797_v16 = vadd.f32 %v20240_v52, %v20239_v24  ;;  %v10189_v37 = vadd.f32 %v20241_v57, %v9798_v25  ;;  %v20243_v33 = vld [vmem:[#allocation86_spill] sm:$0xff]  ;;  %v20244_v13 = vld [vmem:[#allocation33_spill] sm:$0xff] }
 0x5ae   : > { %v10873_v44 = vpop.f32.mrf.mxu0  ;;  %v9800_v38 = vadd.f32 %v20243_v33, %v20242_v49  ;;  %v10576_v42 = vadd.f32 %v10513_v0, %v10186_v56 }
 0x5af   : > { %11029 = vst.msk [vmem:[%s19372_s25 + $0x80] sm:$0xff] %vm279_vm2, %v10997_v28  ;;  %v11000_v9 = vadd.f32 %v19363_v27, %v10961_v19  ;;  %v10960_v26 = vadd.f32 %v10873_v44, %v10570_v47  ;;  %v10188_v47 = vadd.f32 %v20244_v13, %v9797_v16  ;;  %v20246_v28 = vld [vmem:[#allocation56_spill] sm:$0xff]  ;;  %v10579_v8 = vadd.f32 %v14591_v6, %v10189_v37 }
 0x5b0   : > { %v14638_v35 = vpop.f32.mrf.mxu0  ;;  %v9799_v19 = vadd.f32 %v20246_v28, %v20245_v34  ;;  %v10191_v44 = vadd.f32 %v20247_v23, %v9800_v38 }
 0x5b1   : > { %11032 = vst.msk [vmem:[%s19372_s25 + $0x98] sm:$0xff] %vm279_vm2, %v11000_v9  ;;  %v10999_v12 = vadd.f32 %v19363_v27, %v10960_v26  ;;  %v10963_v2 = vadd.f32 %v14638_v35, %v10573_v3  ;;  %v9802_v9 = vadd.f32 %v20249_v55, %v20248_v48  ;;  %v10533_v26 = vpop.f32.mrf.mxu1  ;;  %v10578_v21 = vadd.f32 %v10523_v46, %v10188_v47 }
 0x5b2   : > { %v10883_v7 = vpop.f32.mrf.mxu0  ;;  %v10190_v35 = vadd.f32 %v20250_v4, %v9799_v19  ;;  %v10581_v15 = vadd.f32 %v14594_v30, %v10191_v44 }
 0x5b3   : > { %11031 = vst.msk [vmem:[%s19372_s25 + $0x90] sm:$0xff] %vm279_vm2, %v10999_v12  ;;  %v11002_v20 = vadd.f32 %v19363_v27, %v10963_v2  ;;  %v10962_v5 = vadd.f32 %v10883_v7, %v10572_v50  ;;  %v9801_v12 = vadd.f32 %v20252_v22, %v20251_v14  ;;  %v14597_v2 = vpop.f32.mrf.mxu1  ;;  %v10193_v11 = vadd.f32 %v19349_v39, %v9802_v9 }
 0x5b4   : > { %v14641_v41 = vpop.f32.mrf.mxu0  ;;  %v10580_v18 = vadd.f32 %v10533_v26, %v10190_v35 }
 0x5b5   : > { %11034 = vst.msk [vmem:[%s19372_s25 + $0xa8] sm:$0xff] %vm279_vm2, %v11002_v20  ;;  %v11001_v51 = vadd.f32 %v19363_v27, %v10962_v5  ;;  %v10965_v17 = vadd.f32 %v14641_v41, %v10575_v58  ;;  %v10192_v20 = vadd.f32 %v19353_v54, %v9801_v12  ;;  %v10543_v61 = vpop.f32.mrf.mxu1  ;;  %v10583_v39 = vadd.f32 %v14597_v2, %v10193_v11 }
 0x5b6   : > { %v10893_v31 = vpop.f32.mrf.mxu0 }
 0x5b7   : > { %11033 = vst.msk [vmem:[%s19372_s25 + $0xa0] sm:$0xff] %vm279_vm2, %v11001_v51  ;;  %v11004_v43 = vadd.f32 %v19363_v27, %v10965_v17  ;;  %v10964_v45 = vadd.f32 %v10893_v31, %v10574_v36  ;;  %v10582_v62 = vadd.f32 %v10543_v61, %v10192_v20 }
 0x5b8   : > { %v14644_v1 = vpop.f32.mrf.mxu0 }
 0x5b9   : > { %11036 = vst.msk [vmem:[%s19372_s25 + $0xb8] sm:$0xff] %vm279_vm2, %v11004_v43  ;;  %v11003_v59 = vadd.f32 %v19363_v27, %v10964_v45  ;;  %v10967_v10 = vadd.f32 %v14644_v1, %v10577_v60 }
 0x5ba   : > { %v10903_v32 = vpop.f32.mrf.mxu0 }
 0x5bb   : > { %11035 = vst.msk [vmem:[%s19372_s25 + $0xb0] sm:$0xff] %vm279_vm2, %v11003_v59  ;;  %v11006_v0 = vadd.f32 %v19363_v27, %v10967_v10  ;;  %v10966_v3 = vadd.f32 %v10903_v32, %v10576_v42 }
 0x5bc   : > { %v14647_v53 = vpop.f32.mrf.mxu0 }
 0x5bd   : > { %11038 = vst.msk [vmem:[%s19372_s25 + $0xc8] sm:$0xff] %vm279_vm2, %v11006_v0  ;;  %v11005_v6 = vadd.f32 %v19363_v27, %v10966_v3  ;;  %v10969_v50 = vadd.f32 %v14647_v53, %v10579_v8 }
 0x5be   : > { %v10913_v29 = vpop.f32.mrf.mxu0 }
 0x5bf   : > { %11037 = vst.msk [vmem:[%s19372_s25 + $0xc0] sm:$0xff] %vm279_vm2, %v11005_v6  ;;  %v11008_v7 = vadd.f32 %v19363_v27, %v10969_v50  ;;  %v10968_v58 = vadd.f32 %v10913_v29, %v10578_v21 }
 0x5c0   : > { %v14650_v63 = vpop.f32.mrf.mxu0 }
 0x5c1   : > { %11040 = vst.msk [vmem:[%s19372_s25 + $0xd8] sm:$0xff] %vm279_vm2, %v11008_v7  ;;  %v11007_v5 = vadd.f32 %v19363_v27, %v10968_v58  ;;  %v10971_v40 = vadd.f32 %v14650_v63, %v10581_v15 }
 0x5c2   : > { %v10923_v25 = vpop.f32.mrf.mxu0 }
 0x5c3   : > { %11039 = vst.msk [vmem:[%s19372_s25 + $0xd0] sm:$0xff] %vm279_vm2, %v11007_v5  ;;  %v11010_v46 = vadd.f32 %v19363_v27, %v10971_v40  ;;  %v10970_v41 = vadd.f32 %v10923_v25, %v10580_v18 }
 0x5c4   : > { %v14653_v36 = vpop.f32.mrf.mxu0 }
 0x5c5   : > { %11042 = vst.msk [vmem:[%s19372_s25 + $0xe8] sm:$0xff] %vm279_vm2, %v11010_v46  ;;  %v11009_v54 = vadd.f32 %v19363_v27, %v10970_v41  ;;  %v10973_v56 = vadd.f32 %v14653_v36, %v10583_v39 }
 0x5c6   : > { %v10933_v51 = vpop.f32.mrf.mxu0 }
 0x5c7   : > { %11041 = vst.msk [vmem:[%s19372_s25 + $0xe0] sm:$0xff] %vm279_vm2, %v11009_v54  ;;  %v11012_v17 = vadd.f32 %v19363_v27, %v10973_v56  ;;  %v10972_v24 = vadd.f32 %v10933_v51, %v10582_v62 }
 0x5c9   : > { %11044 = vst.msk [vmem:[%s19372_s25 + $0xf8] sm:$0xff] %vm279_vm2, %v11012_v17  ;;  %v11011_v52 = vadd.f32 %v19363_v27, %v10972_v24 }
 0x5cb   : > { %11043 = vst.msk [vmem:[%s19372_s25 + $0xf0] sm:$0xff] %vm279_vm2, %v11011_v52 }
 0x5cc PF: > { %s17_s24 = sadd.s32 1, %s14673_s24  }
 0x5cd   : > { %p14_p4 = scmp.ge.s32.totalorder %s17_s24, 4  }
 0x5cf   :  { %16 = sbr.rel (!%p14_p4) target bundleno = 1 (0x1), region = 108 }

</bundles_post_ra>
